<compile_context>
chip_gen: v7x
topology: tpu7x:2x2x1
jax: 0.10.0
libtpu: 0.0.40
codegen_flags: <defaults>
</compile_context>

<pallas_src>
import functools

import jax
import jax.numpy as jnp
from jax.experimental import pallas as pl
from jax.experimental.pallas import tpu as pltpu

# ---------------------------------------------------------------------------
# Static model geometry (LeNet on 32x32x3).
# ---------------------------------------------------------------------------
H0 = W0 = 32
C0 = 3                      # real input channels
KH = KW = 5                 # conv kernel
C1, C2 = 6, 16              # real conv output channels
CP = 128                    # lane-padded channel width (one vreg lane row)
CK1 = 16                    # conv1 packed K: KW*C0 = 15 -> padded to 16
NF1, NF2, NF3 = 120, 84, 10

HO1, WO1 = H0 - KH + 1, W0 - KW + 1        # 28, 28
HP1, WP1 = HO1 // 2, WO1 // 2              # 14, 14
HO2, WO2 = HP1 - KH + 1, WP1 - KW + 1      # 10, 10
HP2, WP2 = HO2 // 2, WO2 // 2              # 5, 5

# conv1 emits rows p = h*W0 + w for p < MC1P (full image width); rows with
# w >= WO1 are don't-care (pool1's compaction never reads them).
MC1P = (HO1 - 1) * W0 + W0                 # 896, multiple of 8
CHUNK1 = 128                               # conv1 matmul M-chunk
N_CHUNK1 = MC1P // CHUNK1                  # 7

# conv2 emits rows p = ho*WP1 + wo for p < MC2; rows with wo >= WO2 are
# don't-care.  a2 is allocated with MC2R rows; rows [MC2, MC2R) are zeroed so
# pool2's full-width slab loads never read uninitialized VMEM.
MC2 = (HO2 - 1) * WP1 + WO2                # 136
MC2R = 144                                 # a2 scratch rows (multiple of 8)
CONV2_CHUNKS = ((0, 72), (72, 64))         # aligned conv2 M-chunks

P1R = 224                                  # p1 scratch rows (>= 14*14 = 196)
P2S = 32                                   # per-image row stride in p2 scratch
IMG_MAX = 8                                # max images per grid step

# conv2 tap offsets (i-major, j-minor) in pool1 row-flattened coordinates,
# plus one duplicated tap so taps can be consumed in K=256 pairs (the extra
# tap's weights are zero).
OFF2 = tuple(i * WP1 + j for i in range(KH) for j in range(KW))
OFF2P = OFF2 + (OFF2[-1],)
N_PAIR2 = len(OFF2P) // 2                  # 13

MACS_PER_IMAGE = (HO1 * WO1 * KH * KW * C0 * C1
                  + HO2 * WO2 * KH * KW * C1 * C2
                  + NF1 * C2 * HP2 * WP2 + NF2 * NF1 + NF3 * NF2)

# Geometry invariants the kernel relies on.
assert MC1P % CHUNK1 == 0
assert (MC1P - 1) + (KH - 1) * W0 == H0 * W0 - 1          # conv1 reads in-image
assert 2 * (HP1 - 1) * W0 + 2 * W0 <= MC1P                # pool1 slab reads
assert sum(c[1] for c in CONV2_CHUNKS) == MC2
assert all(c[0] % 8 == 0 for c in CONV2_CHUNKS)
assert (MC2 - 1) + max(OFF2) <= HP1 * WP1 - 1             # conv2 reads in p1
assert HP1 * WP1 <= P1R
assert 2 * (HP2 - 1) * WP1 + 2 * WP1 <= MC2R              # pool2 slab reads
assert HP2 * WP2 <= P2S


# ---------------------------------------------------------------------------
# The fused kernel body (one grid step = `img` images).
# ---------------------------------------------------------------------------
def _convnet_kernel_body(img, x_ref, w1_ref, b1_ref, w2_ref, b2_ref,
                         f1w_ref, f1b_ref, f2w_ref, f2b_ref, f3w_ref, f3b_ref,
                         o_ref, a1_ref, p1_ref, a2_ref, p2_ref, stg_ref):
    """x_ref:(img,1024,16)bf16  w1:(5,16,128)  w2:(13,256,128)
    f1w:(25,16,128)  f2w/f3w:(128,128)  biases:(1,128)f32
    o_ref:(img,1,128)f32  scratch: a1/a2/p2/stg f32, p1 bf16."""
    f32 = jnp.float32
    bf16 = jnp.bfloat16

    b1 = b1_ref[...]
    b2 = b2_ref[...]

    # Keep the a2 tail rows (read by pool2's full-width slabs, never pooled
    # into the result) at a defined value.
    a2_ref[MC2:MC2R, :] = jnp.zeros((MC2R - MC2, CP), f32)

    for k in range(img):
        # ---- conv1 + bias + ReLU.  The KW horizontal taps are pre-packed
        #      into channels by the wrapper, so only KH vertical taps remain:
        #      5 shifted matmuls with K=16 per 128-row chunk. ----
        for ci in range(N_CHUNK1):
            m0 = ci * CHUNK1
            acc = None
            for i in range(KH):
                lhs = x_ref[k, m0 + i * W0:m0 + i * W0 + CHUNK1, :]
                d = jnp.dot(lhs, w1_ref[i], preferred_element_type=f32)
                acc = d if acc is None else acc + d
            a1_ref[m0:m0 + CHUNK1, :] = jnp.maximum(acc + b1, 0.0)

        # ---- 2x2/2 max-pool #1 -> p1 (bf16).  Vertical max over two full-
        #      width row slabs, then one even/odd stride-2 compaction. ----
        for hp in range(HP1):
            r0 = 2 * hp * W0
            v = jnp.maximum(a1_ref[r0:r0 + W0, :],
                            a1_ref[r0 + W0:r0 + 2 * W0, :])
            stg_ref[0:W0, :] = v
            ev = stg_ref[pl.ds(0, WP1, stride=2), :]
            od = stg_ref[pl.ds(1, WP1, stride=2), :]
            p1_ref[hp * WP1:(hp + 1) * WP1, :] = (
                jnp.maximum(ev, od).astype(bf16))

        # ---- conv2 + bias + ReLU.  Taps consumed in K=256 pairs (13 dots
        #      per chunk); the LHS pair is a free lane-concat of two aligned
        #      128-wide bf16 tiles. ----
        for c0, cm in CONV2_CHUNKS:
            acc = None
            for t in range(N_PAIR2):
                oa = OFF2P[2 * t]
                ob = OFF2P[2 * t + 1]
                lhs = jnp.concatenate(
                    [p1_ref[c0 + oa:c0 + oa + cm, :],
                     p1_ref[c0 + ob:c0 + ob + cm, :]], axis=1)
                d = jnp.dot(lhs, w2_ref[t], preferred_element_type=f32)
                acc = d if acc is None else acc + d
            a2_ref[c0:c0 + cm, :] = jnp.maximum(acc + b2, 0.0)

        # ---- 2x2/2 max-pool #2 -> p2 rows for image k (f32). ----
        for hp in range(HP2):
            r0 = 2 * hp * WP1
            v = jnp.maximum(a2_ref[r0:r0 + WP1, :],
                            a2_ref[r0 + WP1:r0 + 2 * WP1, :])
            stg_ref[0:WP1, :] = v
            ev = stg_ref[pl.ds(0, WP2, stride=2), :]
            od = stg_ref[pl.ds(1, WP2, stride=2), :]
            d0 = k * P2S + hp * WP2
            p2_ref[d0:d0 + WP2, :] = jnp.maximum(ev, od)

    # ---- fused fc1 + ReLU + fc2 + ReLU + fc3 over all img images.  fc1 is a
    #      sum of 25 tiny dots whose LHS gathers row r from every image's p2
    #      block (stride P2S), so no explicit 400-wide flatten is needed. ----
    h = None
    for r in range(HP2 * WP2):
        lhs = p2_ref[pl.ds(r, img, stride=P2S), 0:C2].astype(bf16)
        d = jnp.dot(lhs, f1w_ref[r], preferred_element_type=f32)
        h = d if h is None else h + d
    h = jnp.maximum(h + f1b_ref[...], 0.0).astype(bf16)
    h = jnp.dot(h, f2w_ref[...], preferred_element_type=f32)
    h = jnp.maximum(h + f2b_ref[...], 0.0).astype(bf16)
    h = jnp.dot(h, f3w_ref[...], preferred_element_type=f32)
    o_ref[:, 0, :] = h + f3b_ref[...]


def _pick_img_per_step(batch):
    """Largest divisor of batch <= min(IMG_MAX, batch//2) (>=2 grid steps for
    the v7x megacore whenever batch >= 2)."""
    cap = min(IMG_MAX, max(1, batch // 2))
    for cand in range(cap, 0, -1):
        if batch % cand == 0:
            return cand
    return 1


def _run_fused(xp, prep, img):
    batch = xp.shape[0]
    grid = batch // img
    args = (xp, prep["w1p"], prep["b1p"], prep["w2p"], prep["b2p"],
            prep["fc1wp"], prep["fc1bp"], prep["fc2wp"], prep["fc2bp"],
            prep["fc3wp"], prep["fc3bp"])
    const2 = lambda s: (0, 0)
    const3 = lambda s: (0, 0, 0)
    in_specs = [
        pl.BlockSpec((img, H0 * W0, CK1), lambda s: (s, 0, 0)),
        pl.BlockSpec((KH, CK1, CP), const3),
        pl.BlockSpec((1, CP), const2),
        pl.BlockSpec((N_PAIR2, 2 * CP, CP), const3),
        pl.BlockSpec((1, CP), const2),
        pl.BlockSpec((HP2 * WP2, C2, CP), const3),
        pl.BlockSpec((1, CP), const2),
        pl.BlockSpec((CP, CP), const2),
        pl.BlockSpec((1, CP), const2),
        pl.BlockSpec((CP, CP), const2),
        pl.BlockSpec((1, CP), const2),
    ]
    bytes_accessed = (sum(int(a.size) * a.dtype.itemsize for a in args)
                      + batch * CP * 4)
    return pl.pallas_call(
        functools.partial(_convnet_kernel_body, img),
        out_shape=jax.ShapeDtypeStruct((batch, 1, CP), jnp.float32),
        grid_spec=pltpu.PrefetchScalarGridSpec(
            num_scalar_prefetch=0,
            grid=(grid,),
            in_specs=in_specs,
            out_specs=pl.BlockSpec((img, 1, CP), lambda s: (s, 0, 0)),
            scratch_shapes=[
                pltpu.VMEM((MC1P, CP), jnp.float32),        # a1: conv1 out
                pltpu.VMEM((P1R, CP), jnp.bfloat16),        # p1: pool1 out
                pltpu.VMEM((MC2R, CP), jnp.float32),        # a2: conv2 out
                pltpu.VMEM((img * P2S, CP), jnp.float32),   # p2: pool2 out
                pltpu.VMEM((W0, CP), jnp.float32),          # pooling staging
            ],
        ),
        compiler_params=pltpu.CompilerParams(
            dimension_semantics=("parallel",),
            vmem_limit_bytes=32 * 1024 * 1024,
        ),
        cost_estimate=pl.CostEstimate(
            flops=int(2 * MACS_PER_IMAGE * batch),
            transcendentals=0,
            bytes_accessed=int(bytes_accessed)),
    )(*args)


# ---------------------------------------------------------------------------
# Parameters: PyTorch layout + one-time kernel-layout repack.
# ---------------------------------------------------------------------------
def init_params(key):
    ks = jax.random.split(key, 10)

    def u(k, shape, fan_in):
        bound = 1.0 / jnp.sqrt(fan_in)
        return jax.random.uniform(k, shape, jnp.float32, -bound, bound)

    nfeat = C2 * HP2 * WP2
    return {
        "conv1_w": u(ks[0], (C1, C0, KH, KW), C0 * KH * KW),
        "conv1_b": u(ks[1], (C1,), C0 * KH * KW),
        "conv2_w": u(ks[2], (C2, C1, KH, KW), C1 * KH * KW),
        "conv2_b": u(ks[3], (C2,), C1 * KH * KW),
        "fc1_w": u(ks[4], (NF1, nfeat), nfeat),
        "fc1_b": u(ks[5], (NF1,), nfeat),
        "fc2_w": u(ks[6], (NF2, NF1), NF1),
        "fc2_b": u(ks[7], (NF2,), NF1),
        "fc3_w": u(ks[8], (NF3, NF2), NF2),
        "fc3_b": u(ks[9], (NF3,), NF2),
    }


def prepare_params(p):
    """One-time repack (outside the jitted forward):
      * conv1: (KH, KW*C0 -> 16, 128) bf16, horizontal taps packed along K;
      * conv2: per-tap (128,128) weights paired along K -> (13, 256, 128) bf16
        (26th tap is all-zero padding);
      * fc1: (25 rows, 16 channels, 128 out) bf16 in the kernel's (h,w,c)
        feature order; fc2/fc3 pre-transposed and lane-padded to 128."""
    f32, bf16 = jnp.float32, jnp.bfloat16

    t1 = jnp.transpose(p["conv1_w"], (2, 3, 1, 0)).reshape(KH, KW * C0, C1)
    w1p = jnp.zeros((KH, CK1, CP), f32).at[:, :KW * C0, :C1].set(t1)
    b1p = jnp.zeros((1, CP), f32).at[0, :C1].set(p["conv1_b"])

    t2 = jnp.transpose(p["conv2_w"], (2, 3, 1, 0)).reshape(KH * KW, C1, C2)
    w2tap = jnp.zeros((KH * KW + 1, CP, CP), f32).at[:KH * KW, :C1, :C2].set(t2)
    w2p = w2tap.reshape(N_PAIR2, 2 * CP, CP)
    b2p = jnp.zeros((1, CP), f32).at[0, :C2].set(p["conv2_b"])

    # PyTorch flattens (c, h, w); the kernel's p2 rows are (h, w) with c on
    # lanes, so permute once here.
    f1 = p["fc1_w"].reshape(NF1, C2, HP2 * WP2).transpose(2, 1, 0)  # (25,16,120)
    fc1wp = jnp.zeros((HP2 * WP2, C2, CP), f32).at[:, :, :NF1].set(f1)
    fc1bp = jnp.zeros((1, CP), f32).at[0, :NF1].set(p["fc1_b"])
    fc2wp = jnp.zeros((CP, CP), f32).at[:NF1, :NF2].set(p["fc2_w"].T)
    fc2bp = jnp.zeros((1, CP), f32).at[0, :NF2].set(p["fc2_b"])
    fc3wp = jnp.zeros((CP, CP), f32).at[:NF2, :NF3].set(p["fc3_w"].T)
    fc3bp = jnp.zeros((1, CP), f32).at[0, :NF3].set(p["fc3_b"])

    return {
        "w1p": w1p.astype(bf16), "b1p": b1p,
        "w2p": w2p.astype(bf16), "b2p": b2p,
        "fc1wp": fc1wp.astype(bf16), "fc1bp": fc1bp,
        "fc2wp": fc2wp.astype(bf16), "fc2bp": fc2bp,
        "fc3wp": fc3wp.astype(bf16), "fc3bp": fc3bp,
    }


# ---------------------------------------------------------------------------
# Forward pass.
# ---------------------------------------------------------------------------
def _pack_conv1_input(x):
    """NCHW f32 -> row-flattened NHWC with conv1's KW horizontal taps packed
    into channels: xp[b, h*32+w, j*3+c] = x[b, c, h, w+j] (0 past the edge)."""
    batch = x.shape[0]
    xn = jnp.transpose(x, (0, 2, 3, 1)).astype(jnp.float32)        # (B,32,32,3)
    xw = jnp.pad(xn, ((0, 0), (0, 0), (0, KW - 1), (0, 0)))        # (B,32,36,3)
    taps = [xw[:, :, j:j + W0, :] for j in range(KW)]
    xp = jnp.concatenate(taps, axis=-1)                            # (B,32,32,15)
    xp = jnp.pad(xp, ((0, 0), (0, 0), (0, 0), (0, CK1 - KW * C0)))
    return xp.reshape(batch, H0 * W0, CK1).astype(jnp.bfloat16)


@jax.jit
def convnet_forward(prep, x):
    """x: (B, 3, 32, 32) float32 NCHW (PyTorch layout) -> (B, 10) logits."""
    batch = x.shape[0]
    img = _pick_img_per_step(batch)
    xp = _pack_conv1_input(x)
    out = _run_fused(xp, prep, img)                                # (B,1,128)
    return out.reshape(batch, CP)[:, :NF3]


# ---------------------------------------------------------------------------
# Pure-JAX reference (numerical sanity check only).
# ---------------------------------------------------------------------------
def _reference_forward(params, x):
    dn = ("NCHW", "OIHW", "NCHW")
    y = jax.lax.conv_general_dilated(x, params["conv1_w"], (1, 1), "VALID",
                                     dimension_numbers=dn)
    y = jax.nn.relu(y + params["conv1_b"][None, :, None, None])
    y = jax.lax.reduce_window(y, -jnp.inf, jax.lax.max,
                              (1, 1, 2, 2), (1, 1, 2, 2), "VALID")
    y = jax.lax.conv_general_dilated(y, params["conv2_w"], (1, 1), "VALID",
                                     dimension_numbers=dn)
    y = jax.nn.relu(y + params["conv2_b"][None, :, None, None])
    y = jax.lax.reduce_window(y, -jnp.inf, jax.lax.max,
                              (1, 1, 2, 2), (1, 1, 2, 2), "VALID")
    y = y.reshape(y.shape[0], -1)
    y = jax.nn.relu(y @ params["fc1_w"].T + params["fc1_b"])
    y = jax.nn.relu(y @ params["fc2_w"].T + params["fc2_b"])
    return y @ params["fc3_w"].T + params["fc3_b"]


if __name__ == "__main__":
    key = jax.random.PRNGKey(0)
    pkey, xkey = jax.random.split(key)
    params = init_params(pkey)
    prep = prepare_params(params)

    # CIFAR-10-sized input (32x32 is fixed by fc1's 16*5*5 input dim).
    x = jax.random.normal(xkey, (2, 3, 32, 32), jnp.float32)

    out = convnet_forward(prep, x)
    out = jax.block_until_ready(out)
    assert out.shape == (2, NF3), out.shape

    # Tolerance is set by the bf16 matmul operands (f32 accumulation).
    ref = _reference_forward(params, x)
    err = float(jnp.max(jnp.abs(out - ref)))
    assert err < 4e-2, f"numerical mismatch vs reference: max|diff|={err}"

    print("KERNEL_OK")
</pallas_src>

<mosaic_0001>
module attributes {stable_mosaic.version = 11 : i64} {
  func.func @_convnet_kernel_body(%arg0: i32, %arg1: memref<1x1024x16xbf16, #tpu.memory_space<vmem>>, %arg2: memref<5x16x128xbf16, #tpu.memory_space<vmem>>, %arg3: memref<1x128xf32, #tpu.memory_space<vmem>>, %arg4: memref<13x256x128xbf16, #tpu.memory_space<vmem>>, %arg5: memref<1x128xf32, #tpu.memory_space<vmem>>, %arg6: memref<25x16x128xbf16, #tpu.memory_space<vmem>>, %arg7: memref<1x128xf32, #tpu.memory_space<vmem>>, %arg8: memref<128x128xbf16, #tpu.memory_space<vmem>>, %arg9: memref<1x128xf32, #tpu.memory_space<vmem>>, %arg10: memref<128x128xbf16, #tpu.memory_space<vmem>>, %arg11: memref<1x128xf32, #tpu.memory_space<vmem>>, %arg12: memref<1x1x128xf32, #tpu.memory_space<vmem>>, %arg13: memref<896x128xf32, #tpu.memory_space<vmem>>, %arg14: memref<224x128xbf16, #tpu.memory_space<vmem>>, %arg15: memref<144x128xf32, #tpu.memory_space<vmem>>, %arg16: memref<32x128xf32, #tpu.memory_space<vmem>>, %arg17: memref<32x128xf32, #tpu.memory_space<vmem>>) attributes {dimension_semantics = [#tpu.dimension_semantics<parallel>], iteration_bounds = array<i64: 2>, scalar_prefetch = 0 : i64, scratch_operands = 5 : i64, tpu.core_type = #tpu.core_type<tc>, window_params = [{transform_indices = @transform_0, window_bounds = array<i64: 1, 1024, 16>}, {pipeline_mode = #tpu.pipeline_mode<synchronous>, transform_indices = @transform_1, window_bounds = array<i64: 5, 16, 128>}, {pipeline_mode = #tpu.pipeline_mode<synchronous>, transform_indices = @transform_2, window_bounds = array<i64: 1, 128>}, {pipeline_mode = #tpu.pipeline_mode<synchronous>, transform_indices = @transform_3, window_bounds = array<i64: 13, 256, 128>}, {pipeline_mode = #tpu.pipeline_mode<synchronous>, transform_indices = @transform_4, window_bounds = array<i64: 1, 128>}, {pipeline_mode = #tpu.pipeline_mode<synchronous>, transform_indices = @transform_5, window_bounds = array<i64: 25, 16, 128>}, {pipeline_mode = #tpu.pipeline_mode<synchronous>, transform_indices = @transform_6, window_bounds = array<i64: 1, 128>}, {pipeline_mode = #tpu.pipeline_mode<synchronous>, transform_indices = @transform_7, window_bounds = array<i64: 128, 128>}, {pipeline_mode = #tpu.pipeline_mode<synchronous>, transform_indices = @transform_8, window_bounds = array<i64: 1, 128>}, {pipeline_mode = #tpu.pipeline_mode<synchronous>, transform_indices = @transform_9, window_bounds = array<i64: 128, 128>}, {pipeline_mode = #tpu.pipeline_mode<synchronous>, transform_indices = @transform_10, window_bounds = array<i64: 1, 128>}, {transform_indices = @transform_11, window_bounds = array<i64: 1, 1, 128>}]} {
    %c0 = arith.constant 0 : index
    %c0_0 = arith.constant 0 : index
    %0 = vector.load %arg3[%c0, %c0_0] : memref<1x128xf32, #tpu.memory_space<vmem>>, vector<1x128xf32>
    %c0_1 = arith.constant 0 : index
    %c0_2 = arith.constant 0 : index
    %1 = vector.load %arg5[%c0_1, %c0_2] : memref<1x128xf32, #tpu.memory_space<vmem>>, vector<1x128xf32>
    %cst = arith.constant 0.000000e+00 : f32
    %2 = vector.broadcast %cst : f32 to vector<8x128xf32>
    %c136 = arith.constant 136 : index
    %c0_3 = arith.constant 0 : index
    %3 = vector.load %arg15[%c136, %c0_3] : memref<144x128xf32, #tpu.memory_space<vmem>>, vector<8x128xf32>
    tpu.vector_store %arg15[%c136, %c0_3], %2 {strides = array<i32>} : memref<144x128xf32, #tpu.memory_space<vmem>>, vector<8x128xf32>,
    %c0_4 = arith.constant 0 : index
    %c0_5 = arith.constant 0 : index
    %c0_6 = arith.constant 0 : index
    %4 = vector.load %arg1[%c0_4, %c0_5, %c0_6] : memref<1x1024x16xbf16, #tpu.memory_space<vmem>>, vector<1x128x16xbf16>
    %5 = vector.shape_cast %4 : vector<1x128x16xbf16> to vector<128x16xbf16>
    %c0_7 = arith.constant 0 : index
    %c0_8 = arith.constant 0 : index
    %c0_9 = arith.constant 0 : index
    %6 = vector.load %arg2[%c0_7, %c0_8, %c0_9] : memref<5x16x128xbf16, #tpu.memory_space<vmem>>, vector<1x16x128xbf16>
    %7 = vector.shape_cast %6 : vector<1x16x128xbf16> to vector<16x128xbf16>
    %cst_10 = arith.constant dense<0.000000e+00> : vector<128x128xf32>
    %8 = tpu.matmul %5, %7, %cst_10 {dimension_numbers = #tpu.dot_dimension_numbers<[1], [0], [0], [1], [0, 0, 1, 1], [], []>} : vector<128x16xbf16>, vector<16x128xbf16>, vector<128x128xf32> -> vector<128x128xf32>
    %c0_11 = arith.constant 0 : index
    %c32 = arith.constant 32 : index
    %c0_12 = arith.constant 0 : index
    %9 = vector.load %arg1[%c0_11, %c32, %c0_12] : memref<1x1024x16xbf16, #tpu.memory_space<vmem>>, vector<1x128x16xbf16>
    %10 = vector.shape_cast %9 : vector<1x128x16xbf16> to vector<128x16xbf16>
    %c1 = arith.constant 1 : index
    %c0_13 = arith.constant 0 : index
    %c0_14 = arith.constant 0 : index
    %11 = vector.load %arg2[%c1, %c0_13, %c0_14] : memref<5x16x128xbf16, #tpu.memory_space<vmem>>, vector<1x16x128xbf16>
    %12 = vector.shape_cast %11 : vector<1x16x128xbf16> to vector<16x128xbf16>
    %cst_15 = arith.constant dense<0.000000e+00> : vector<128x128xf32>
    %13 = tpu.matmul %10, %12, %cst_15 {dimension_numbers = #tpu.dot_dimension_numbers<[1], [0], [0], [1], [0, 0, 1, 1], [], []>} : vector<128x16xbf16>, vector<16x128xbf16>, vector<128x128xf32> -> vector<128x128xf32>
    %14 = arith.addf %8, %13 : vector<128x128xf32>
    %c0_16 = arith.constant 0 : index
    %c64 = arith.constant 64 : index
    %c0_17 = arith.constant 0 : index
    %15 = vector.load %arg1[%c0_16, %c64, %c0_17] : memref<1x1024x16xbf16, #tpu.memory_space<vmem>>, vector<1x128x16xbf16>
    %16 = vector.shape_cast %15 : vector<1x128x16xbf16> to vector<128x16xbf16>
    %c2 = arith.constant 2 : index
    %c0_18 = arith.constant 0 : index
    %c0_19 = arith.constant 0 : index
    %17 = vector.load %arg2[%c2, %c0_18, %c0_19] : memref<5x16x128xbf16, #tpu.memory_space<vmem>>, vector<1x16x128xbf16>
    %18 = vector.shape_cast %17 : vector<1x16x128xbf16> to vector<16x128xbf16>
    %cst_20 = arith.constant dense<0.000000e+00> : vector<128x128xf32>
    %19 = tpu.matmul %16, %18, %cst_20 {dimension_numbers = #tpu.dot_dimension_numbers<[1], [0], [0], [1], [0, 0, 1, 1], [], []>} : vector<128x16xbf16>, vector<16x128xbf16>, vector<128x128xf32> -> vector<128x128xf32>
    %20 = arith.addf %14, %19 : vector<128x128xf32>
    %c0_21 = arith.constant 0 : index
    %c96 = arith.constant 96 : index
    %c0_22 = arith.constant 0 : index
    %21 = vector.load %arg1[%c0_21, %c96, %c0_22] : memref<1x1024x16xbf16, #tpu.memory_space<vmem>>, vector<1x128x16xbf16>
    %22 = vector.shape_cast %21 : vector<1x128x16xbf16> to vector<128x16xbf16>
    %c3 = arith.constant 3 : index
    %c0_23 = arith.constant 0 : index
    %c0_24 = arith.constant 0 : index
    %23 = vector.load %arg2[%c3, %c0_23, %c0_24] : memref<5x16x128xbf16, #tpu.memory_space<vmem>>, vector<1x16x128xbf16>
    %24 = vector.shape_cast %23 : vector<1x16x128xbf16> to vector<16x128xbf16>
    %cst_25 = arith.constant dense<0.000000e+00> : vector<128x128xf32>
    %25 = tpu.matmul %22, %24, %cst_25 {dimension_numbers = #tpu.dot_dimension_numbers<[1], [0], [0], [1], [0, 0, 1, 1], [], []>} : vector<128x16xbf16>, vector<16x128xbf16>, vector<128x128xf32> -> vector<128x128xf32>
    %26 = arith.addf %20, %25 : vector<128x128xf32>
    %c0_26 = arith.constant 0 : index
    %c128 = arith.constant 128 : index
    %c0_27 = arith.constant 0 : index
    %27 = vector.load %arg1[%c0_26, %c128, %c0_27] : memref<1x1024x16xbf16, #tpu.memory_space<vmem>>, vector<1x128x16xbf16>
    %28 = vector.shape_cast %27 : vector<1x128x16xbf16> to vector<128x16xbf16>
    %c4 = arith.constant 4 : index
    %c0_28 = arith.constant 0 : index
    %c0_29 = arith.constant 0 : index
    %29 = vector.load %arg2[%c4, %c0_28, %c0_29] : memref<5x16x128xbf16, #tpu.memory_space<vmem>>, vector<1x16x128xbf16>
    %30 = vector.shape_cast %29 : vector<1x16x128xbf16> to vector<16x128xbf16>
    %cst_30 = arith.constant dense<0.000000e+00> : vector<128x128xf32>
    %31 = tpu.matmul %28, %30, %cst_30 {dimension_numbers = #tpu.dot_dimension_numbers<[1], [0], [0], [1], [0, 0, 1, 1], [], []>} : vector<128x16xbf16>, vector<16x128xbf16>, vector<128x128xf32> -> vector<128x128xf32>
    %32 = arith.addf %26, %31 : vector<128x128xf32>
    %33 = vector.broadcast %0 : vector<1x128xf32> to vector<128x128xf32>
    %34 = arith.addf %32, %33 : vector<128x128xf32>
    %cst_31 = arith.constant 0.000000e+00 : f32
    %35 = vector.broadcast %cst_31 : f32 to vector<128x128xf32>
    %36 = arith.maximumf %34, %35 : vector<128x128xf32>
    %c0_32 = arith.constant 0 : index
    %c0_33 = arith.constant 0 : index
    %37 = vector.load %arg13[%c0_32, %c0_33] : memref<896x128xf32, #tpu.memory_space<vmem>>, vector<128x128xf32>
    tpu.vector_store %arg13[%c0_32, %c0_33], %36 {strides = array<i32>} : memref<896x128xf32, #tpu.memory_space<vmem>>, vector<128x128xf32>,
    %c0_34 = arith.constant 0 : index
    %c128_35 = arith.constant 128 : index
    %c0_36 = arith.constant 0 : index
    %38 = vector.load %arg1[%c0_34, %c128_35, %c0_36] : memref<1x1024x16xbf16, #tpu.memory_space<vmem>>, vector<1x128x16xbf16>
    %39 = vector.shape_cast %38 : vector<1x128x16xbf16> to vector<128x16xbf16>
    %c0_37 = arith.constant 0 : index
    %c0_38 = arith.constant 0 : index
    %c0_39 = arith.constant 0 : index
    %40 = vector.load %arg2[%c0_37, %c0_38, %c0_39] : memref<5x16x128xbf16, #tpu.memory_space<vmem>>, vector<1x16x128xbf16>
    %41 = vector.shape_cast %40 : vector<1x16x128xbf16> to vector<16x128xbf16>
    %cst_40 = arith.constant dense<0.000000e+00> : vector<128x128xf32>
    %42 = tpu.matmul %39, %41, %cst_40 {dimension_numbers = #tpu.dot_dimension_numbers<[1], [0], [0], [1], [0, 0, 1, 1], [], []>} : vector<128x16xbf16>, vector<16x128xbf16>, vector<128x128xf32> -> vector<128x128xf32>
    %c0_41 = arith.constant 0 : index
    %c160 = arith.constant 160 : index
    %c0_42 = arith.constant 0 : index
    %43 = vector.load %arg1[%c0_41, %c160, %c0_42] : memref<1x1024x16xbf16, #tpu.memory_space<vmem>>, vector<1x128x16xbf16>
    %44 = vector.shape_cast %43 : vector<1x128x16xbf16> to vector<128x16xbf16>
    %c1_43 = arith.constant 1 : index
    %c0_44 = arith.constant 0 : index
    %c0_45 = arith.constant 0 : index
    %45 = vector.load %arg2[%c1_43, %c0_44, %c0_45] : memref<5x16x128xbf16, #tpu.memory_space<vmem>>, vector<1x16x128xbf16>
    %46 = vector.shape_cast %45 : vector<1x16x128xbf16> to vector<16x128xbf16>
    %cst_46 = arith.constant dense<0.000000e+00> : vector<128x128xf32>
    %47 = tpu.matmul %44, %46, %cst_46 {dimension_numbers = #tpu.dot_dimension_numbers<[1], [0], [0], [1], [0, 0, 1, 1], [], []>} : vector<128x16xbf16>, vector<16x128xbf16>, vector<128x128xf32> -> vector<128x128xf32>
    %48 = arith.addf %42, %47 : vector<128x128xf32>
    %c0_47 = arith.constant 0 : index
    %c192 = arith.constant 192 : index
    %c0_48 = arith.constant 0 : index
    %49 = vector.load %arg1[%c0_47, %c192, %c0_48] : memref<1x1024x16xbf16, #tpu.memory_space<vmem>>, vector<1x128x16xbf16>
    %50 = vector.shape_cast %49 : vector<1x128x16xbf16> to vector<128x16xbf16>
    %c2_49 = arith.constant 2 : index
    %c0_50 = arith.constant 0 : index
    %c0_51 = arith.constant 0 : index
    %51 = vector.load %arg2[%c2_49, %c0_50, %c0_51] : memref<5x16x128xbf16, #tpu.memory_space<vmem>>, vector<1x16x128xbf16>
    %52 = vector.shape_cast %51 : vector<1x16x128xbf16> to vector<16x128xbf16>
    %cst_52 = arith.constant dense<0.000000e+00> : vector<128x128xf32>
    %53 = tpu.matmul %50, %52, %cst_52 {dimension_numbers = #tpu.dot_dimension_numbers<[1], [0], [0], [1], [0, 0, 1, 1], [], []>} : vector<128x16xbf16>, vector<16x128xbf16>, vector<128x128xf32> -> vector<128x128xf32>
    %54 = arith.addf %48, %53 : vector<128x128xf32>
    %c0_53 = arith.constant 0 : index
    %c224 = arith.constant 224 : index
    %c0_54 = arith.constant 0 : index
    %55 = vector.load %arg1[%c0_53, %c224, %c0_54] : memref<1x1024x16xbf16, #tpu.memory_space<vmem>>, vector<1x128x16xbf16>
    %56 = vector.shape_cast %55 : vector<1x128x16xbf16> to vector<128x16xbf16>
    %c3_55 = arith.constant 3 : index
    %c0_56 = arith.constant 0 : index
    %c0_57 = arith.constant 0 : index
    %57 = vector.load %arg2[%c3_55, %c0_56, %c0_57] : memref<5x16x128xbf16, #tpu.memory_space<vmem>>, vector<1x16x128xbf16>
    %58 = vector.shape_cast %57 : vector<1x16x128xbf16> to vector<16x128xbf16>
    %cst_58 = arith.constant dense<0.000000e+00> : vector<128x128xf32>
    %59 = tpu.matmul %56, %58, %cst_58 {dimension_numbers = #tpu.dot_dimension_numbers<[1], [0], [0], [1], [0, 0, 1, 1], [], []>} : vector<128x16xbf16>, vector<16x128xbf16>, vector<128x128xf32> -> vector<128x128xf32>
    %60 = arith.addf %54, %59 : vector<128x128xf32>
    %c0_59 = arith.constant 0 : index
    %c256 = arith.constant 256 : index
    %c0_60 = arith.constant 0 : index
    %61 = vector.load %arg1[%c0_59, %c256, %c0_60] : memref<1x1024x16xbf16, #tpu.memory_space<vmem>>, vector<1x128x16xbf16>
    %62 = vector.shape_cast %61 : vector<1x128x16xbf16> to vector<128x16xbf16>
    %c4_61 = arith.constant 4 : index
    %c0_62 = arith.constant 0 : index
    %c0_63 = arith.constant 0 : index
    %63 = vector.load %arg2[%c4_61, %c0_62, %c0_63] : memref<5x16x128xbf16, #tpu.memory_space<vmem>>, vector<1x16x128xbf16>
    %64 = vector.shape_cast %63 : vector<1x16x128xbf16> to vector<16x128xbf16>
    %cst_64 = arith.constant dense<0.000000e+00> : vector<128x128xf32>
    %65 = tpu.matmul %62, %64, %cst_64 {dimension_numbers = #tpu.dot_dimension_numbers<[1], [0], [0], [1], [0, 0, 1, 1], [], []>} : vector<128x16xbf16>, vector<16x128xbf16>, vector<128x128xf32> -> vector<128x128xf32>
    %66 = arith.addf %60, %65 : vector<128x128xf32>
    %67 = vector.broadcast %0 : vector<1x128xf32> to vector<128x128xf32>
    %68 = arith.addf %66, %67 : vector<128x128xf32>
    %cst_65 = arith.constant 0.000000e+00 : f32
    %69 = vector.broadcast %cst_65 : f32 to vector<128x128xf32>
    %70 = arith.maximumf %68, %69 : vector<128x128xf32>
    %c128_66 = arith.constant 128 : index
    %c0_67 = arith.constant 0 : index
    %71 = vector.load %arg13[%c128_66, %c0_67] : memref<896x128xf32, #tpu.memory_space<vmem>>, vector<128x128xf32>
    tpu.vector_store %arg13[%c128_66, %c0_67], %70 {strides = array<i32>} : memref<896x128xf32, #tpu.memory_space<vmem>>, vector<128x128xf32>,
    %c0_68 = arith.constant 0 : index
    %c256_69 = arith.constant 256 : index
    %c0_70 = arith.constant 0 : index
    %72 = vector.load %arg1[%c0_68, %c256_69, %c0_70] : memref<1x1024x16xbf16, #tpu.memory_space<vmem>>, vector<1x128x16xbf16>
    %73 = vector.shape_cast %72 : vector<1x128x16xbf16> to vector<128x16xbf16>
    %c0_71 = arith.constant 0 : index
    %c0_72 = arith.constant 0 : index
    %c0_73 = arith.constant 0 : index
    %74 = vector.load %arg2[%c0_71, %c0_72, %c0_73] : memref<5x16x128xbf16, #tpu.memory_space<vmem>>, vector<1x16x128xbf16>
    %75 = vector.shape_cast %74 : vector<1x16x128xbf16> to vector<16x128xbf16>
    %cst_74 = arith.constant dense<0.000000e+00> : vector<128x128xf32>
    %76 = tpu.matmul %73, %75, %cst_74 {dimension_numbers = #tpu.dot_dimension_numbers<[1], [0], [0], [1], [0, 0, 1, 1], [], []>} : vector<128x16xbf16>, vector<16x128xbf16>, vector<128x128xf32> -> vector<128x128xf32>
    %c0_75 = arith.constant 0 : index
    %c288 = arith.constant 288 : index
    %c0_76 = arith.constant 0 : index
    %77 = vector.load %arg1[%c0_75, %c288, %c0_76] : memref<1x1024x16xbf16, #tpu.memory_space<vmem>>, vector<1x128x16xbf16>
    %78 = vector.shape_cast %77 : vector<1x128x16xbf16> to vector<128x16xbf16>
    %c1_77 = arith.constant 1 : index
    %c0_78 = arith.constant 0 : index
    %c0_79 = arith.constant 0 : index
    %79 = vector.load %arg2[%c1_77, %c0_78, %c0_79] : memref<5x16x128xbf16, #tpu.memory_space<vmem>>, vector<1x16x128xbf16>
    %80 = vector.shape_cast %79 : vector<1x16x128xbf16> to vector<16x128xbf16>
    %cst_80 = arith.constant dense<0.000000e+00> : vector<128x128xf32>
    %81 = tpu.matmul %78, %80, %cst_80 {dimension_numbers = #tpu.dot_dimension_numbers<[1], [0], [0], [1], [0, 0, 1, 1], [], []>} : vector<128x16xbf16>, vector<16x128xbf16>, vector<128x128xf32> -> vector<128x128xf32>
    %82 = arith.addf %76, %81 : vector<128x128xf32>
    %c0_81 = arith.constant 0 : index
    %c320 = arith.constant 320 : index
    %c0_82 = arith.constant 0 : index
    %83 = vector.load %arg1[%c0_81, %c320, %c0_82] : memref<1x1024x16xbf16, #tpu.memory_space<vmem>>, vector<1x128x16xbf16>
    %84 = vector.shape_cast %83 : vector<1x128x16xbf16> to vector<128x16xbf16>
    %c2_83 = arith.constant 2 : index
    %c0_84 = arith.constant 0 : index
    %c0_85 = arith.constant 0 : index
    %85 = vector.load %arg2[%c2_83, %c0_84, %c0_85] : memref<5x16x128xbf16, #tpu.memory_space<vmem>>, vector<1x16x128xbf16>
    %86 = vector.shape_cast %85 : vector<1x16x128xbf16> to vector<16x128xbf16>
    %cst_86 = arith.constant dense<0.000000e+00> : vector<128x128xf32>
    %87 = tpu.matmul %84, %86, %cst_86 {dimension_numbers = #tpu.dot_dimension_numbers<[1], [0], [0], [1], [0, 0, 1, 1], [], []>} : vector<128x16xbf16>, vector<16x128xbf16>, vector<128x128xf32> -> vector<128x128xf32>
    %88 = arith.addf %82, %87 : vector<128x128xf32>
    %c0_87 = arith.constant 0 : index
    %c352 = arith.constant 352 : index
    %c0_88 = arith.constant 0 : index
    %89 = vector.load %arg1[%c0_87, %c352, %c0_88] : memref<1x1024x16xbf16, #tpu.memory_space<vmem>>, vector<1x128x16xbf16>
    %90 = vector.shape_cast %89 : vector<1x128x16xbf16> to vector<128x16xbf16>
    %c3_89 = arith.constant 3 : index
    %c0_90 = arith.constant 0 : index
    %c0_91 = arith.constant 0 : index
    %91 = vector.load %arg2[%c3_89, %c0_90, %c0_91] : memref<5x16x128xbf16, #tpu.memory_space<vmem>>, vector<1x16x128xbf16>
    %92 = vector.shape_cast %91 : vector<1x16x128xbf16> to vector<16x128xbf16>
    %cst_92 = arith.constant dense<0.000000e+00> : vector<128x128xf32>
    %93 = tpu.matmul %90, %92, %cst_92 {dimension_numbers = #tpu.dot_dimension_numbers<[1], [0], [0], [1], [0, 0, 1, 1], [], []>} : vector<128x16xbf16>, vector<16x128xbf16>, vector<128x128xf32> -> vector<128x128xf32>
    %94 = arith.addf %88, %93 : vector<128x128xf32>
    %c0_93 = arith.constant 0 : index
    %c384 = arith.constant 384 : index
    %c0_94 = arith.constant 0 : index
    %95 = vector.load %arg1[%c0_93, %c384, %c0_94] : memref<1x1024x16xbf16, #tpu.memory_space<vmem>>, vector<1x128x16xbf16>
    %96 = vector.shape_cast %95 : vector<1x128x16xbf16> to vector<128x16xbf16>
    %c4_95 = arith.constant 4 : index
    %c0_96 = arith.constant 0 : index
    %c0_97 = arith.constant 0 : index
    %97 = vector.load %arg2[%c4_95, %c0_96, %c0_97] : memref<5x16x128xbf16, #tpu.memory_space<vmem>>, vector<1x16x128xbf16>
    %98 = vector.shape_cast %97 : vector<1x16x128xbf16> to vector<16x128xbf16>
    %cst_98 = arith.constant dense<0.000000e+00> : vector<128x128xf32>
    %99 = tpu.matmul %96, %98, %cst_98 {dimension_numbers = #tpu.dot_dimension_numbers<[1], [0], [0], [1], [0, 0, 1, 1], [], []>} : vector<128x16xbf16>, vector<16x128xbf16>, vector<128x128xf32> -> vector<128x128xf32>
    %100 = arith.addf %94, %99 : vector<128x128xf32>
    %101 = vector.broadcast %0 : vector<1x128xf32> to vector<128x128xf32>
    %102 = arith.addf %100, %101 : vector<128x128xf32>
    %cst_99 = arith.constant 0.000000e+00 : f32
    %103 = vector.broadcast %cst_99 : f32 to vector<128x128xf32>
    %104 = arith.maximumf %102, %103 : vector<128x128xf32>
    %c256_100 = arith.constant 256 : index
    %c0_101 = arith.constant 0 : index
    %105 = vector.load %arg13[%c256_100, %c0_101] : memref<896x128xf32, #tpu.memory_space<vmem>>, vector<128x128xf32>
    tpu.vector_store %arg13[%c256_100, %c0_101], %104 {strides = array<i32>} : memref<896x128xf32, #tpu.memory_space<vmem>>, vector<128x128xf32>,
    %c0_102 = arith.constant 0 : index
    %c384_103 = arith.constant 384 : index
    %c0_104 = arith.constant 0 : index
    %106 = vector.load %arg1[%c0_102, %c384_103, %c0_104] : memref<1x1024x16xbf16, #tpu.memory_space<vmem>>, vector<1x128x16xbf16>
    %107 = vector.shape_cast %106 : vector<1x128x16xbf16> to vector<128x16xbf16>
    %c0_105 = arith.constant 0 : index
    %c0_106 = arith.constant 0 : index
    %c0_107 = arith.constant 0 : index
    %108 = vector.load %arg2[%c0_105, %c0_106, %c0_107] : memref<5x16x128xbf16, #tpu.memory_space<vmem>>, vector<1x16x128xbf16>
    %109 = vector.shape_cast %108 : vector<1x16x128xbf16> to vector<16x128xbf16>
    %cst_108 = arith.constant dense<0.000000e+00> : vector<128x128xf32>
    %110 = tpu.matmul %107, %109, %cst_108 {dimension_numbers = #tpu.dot_dimension_numbers<[1], [0], [0], [1], [0, 0, 1, 1], [], []>} : vector<128x16xbf16>, vector<16x128xbf16>, vector<128x128xf32> -> vector<128x128xf32>
    %c0_109 = arith.constant 0 : index
    %c416 = arith.constant 416 : index
    %c0_110 = arith.constant 0 : index
    %111 = vector.load %arg1[%c0_109, %c416, %c0_110] : memref<1x1024x16xbf16, #tpu.memory_space<vmem>>, vector<1x128x16xbf16>
    %112 = vector.shape_cast %111 : vector<1x128x16xbf16> to vector<128x16xbf16>
    %c1_111 = arith.constant 1 : index
    %c0_112 = arith.constant 0 : index
    %c0_113 = arith.constant 0 : index
    %113 = vector.load %arg2[%c1_111, %c0_112, %c0_113] : memref<5x16x128xbf16, #tpu.memory_space<vmem>>, vector<1x16x128xbf16>
    %114 = vector.shape_cast %113 : vector<1x16x128xbf16> to vector<16x128xbf16>
    %cst_114 = arith.constant dense<0.000000e+00> : vector<128x128xf32>
    %115 = tpu.matmul %112, %114, %cst_114 {dimension_numbers = #tpu.dot_dimension_numbers<[1], [0], [0], [1], [0, 0, 1, 1], [], []>} : vector<128x16xbf16>, vector<16x128xbf16>, vector<128x128xf32> -> vector<128x128xf32>
    %116 = arith.addf %110, %115 : vector<128x128xf32>
    %c0_115 = arith.constant 0 : index
    %c448 = arith.constant 448 : index
    %c0_116 = arith.constant 0 : index
    %117 = vector.load %arg1[%c0_115, %c448, %c0_116] : memref<1x1024x16xbf16, #tpu.memory_space<vmem>>, vector<1x128x16xbf16>
    %118 = vector.shape_cast %117 : vector<1x128x16xbf16> to vector<128x16xbf16>
    %c2_117 = arith.constant 2 : index
    %c0_118 = arith.constant 0 : index
    %c0_119 = arith.constant 0 : index
    %119 = vector.load %arg2[%c2_117, %c0_118, %c0_119] : memref<5x16x128xbf16, #tpu.memory_space<vmem>>, vector<1x16x128xbf16>
    %120 = vector.shape_cast %119 : vector<1x16x128xbf16> to vector<16x128xbf16>
    %cst_120 = arith.constant dense<0.000000e+00> : vector<128x128xf32>
    %121 = tpu.matmul %118, %120, %cst_120 {dimension_numbers = #tpu.dot_dimension_numbers<[1], [0], [0], [1], [0, 0, 1, 1], [], []>} : vector<128x16xbf16>, vector<16x128xbf16>, vector<128x128xf32> -> vector<128x128xf32>
    %122 = arith.addf %116, %121 : vector<128x128xf32>
    %c0_121 = arith.constant 0 : index
    %c480 = arith.constant 480 : index
    %c0_122 = arith.constant 0 : index
    %123 = vector.load %arg1[%c0_121, %c480, %c0_122] : memref<1x1024x16xbf16, #tpu.memory_space<vmem>>, vector<1x128x16xbf16>
    %124 = vector.shape_cast %123 : vector<1x128x16xbf16> to vector<128x16xbf16>
    %c3_123 = arith.constant 3 : index
    %c0_124 = arith.constant 0 : index
    %c0_125 = arith.constant 0 : index
    %125 = vector.load %arg2[%c3_123, %c0_124, %c0_125] : memref<5x16x128xbf16, #tpu.memory_space<vmem>>, vector<1x16x128xbf16>
    %126 = vector.shape_cast %125 : vector<1x16x128xbf16> to vector<16x128xbf16>
    %cst_126 = arith.constant dense<0.000000e+00> : vector<128x128xf32>
    %127 = tpu.matmul %124, %126, %cst_126 {dimension_numbers = #tpu.dot_dimension_numbers<[1], [0], [0], [1], [0, 0, 1, 1], [], []>} : vector<128x16xbf16>, vector<16x128xbf16>, vector<128x128xf32> -> vector<128x128xf32>
    %128 = arith.addf %122, %127 : vector<128x128xf32>
    %c0_127 = arith.constant 0 : index
    %c512 = arith.constant 512 : index
    %c0_128 = arith.constant 0 : index
    %129 = vector.load %arg1[%c0_127, %c512, %c0_128] : memref<1x1024x16xbf16, #tpu.memory_space<vmem>>, vector<1x128x16xbf16>
    %130 = vector.shape_cast %129 : vector<1x128x16xbf16> to vector<128x16xbf16>
    %c4_129 = arith.constant 4 : index
    %c0_130 = arith.constant 0 : index
    %c0_131 = arith.constant 0 : index
    %131 = vector.load %arg2[%c4_129, %c0_130, %c0_131] : memref<5x16x128xbf16, #tpu.memory_space<vmem>>, vector<1x16x128xbf16>
    %132 = vector.shape_cast %131 : vector<1x16x128xbf16> to vector<16x128xbf16>
    %cst_132 = arith.constant dense<0.000000e+00> : vector<128x128xf32>
    %133 = tpu.matmul %130, %132, %cst_132 {dimension_numbers = #tpu.dot_dimension_numbers<[1], [0], [0], [1], [0, 0, 1, 1], [], []>} : vector<128x16xbf16>, vector<16x128xbf16>, vector<128x128xf32> -> vector<128x128xf32>
    %134 = arith.addf %128, %133 : vector<128x128xf32>
    %135 = vector.broadcast %0 : vector<1x128xf32> to vector<128x128xf32>
    %136 = arith.addf %134, %135 : vector<128x128xf32>
    %cst_133 = arith.constant 0.000000e+00 : f32
    %137 = vector.broadcast %cst_133 : f32 to vector<128x128xf32>
    %138 = arith.maximumf %136, %137 : vector<128x128xf32>
    %c384_134 = arith.constant 384 : index
    %c0_135 = arith.constant 0 : index
    %139 = vector.load %arg13[%c384_134, %c0_135] : memref<896x128xf32, #tpu.memory_space<vmem>>, vector<128x128xf32>
    tpu.vector_store %arg13[%c384_134, %c0_135], %138 {strides = array<i32>} : memref<896x128xf32, #tpu.memory_space<vmem>>, vector<128x128xf32>,
    %c0_136 = arith.constant 0 : index
    %c512_137 = arith.constant 512 : index
    %c0_138 = arith.constant 0 : index
    %140 = vector.load %arg1[%c0_136, %c512_137, %c0_138] : memref<1x1024x16xbf16, #tpu.memory_space<vmem>>, vector<1x128x16xbf16>
    %141 = vector.shape_cast %140 : vector<1x128x16xbf16> to vector<128x16xbf16>
    %c0_139 = arith.constant 0 : index
    %c0_140 = arith.constant 0 : index
    %c0_141 = arith.constant 0 : index
    %142 = vector.load %arg2[%c0_139, %c0_140, %c0_141] : memref<5x16x128xbf16, #tpu.memory_space<vmem>>, vector<1x16x128xbf16>
    %143 = vector.shape_cast %142 : vector<1x16x128xbf16> to vector<16x128xbf16>
    %cst_142 = arith.constant dense<0.000000e+00> : vector<128x128xf32>
    %144 = tpu.matmul %141, %143, %cst_142 {dimension_numbers = #tpu.dot_dimension_numbers<[1], [0], [0], [1], [0, 0, 1, 1], [], []>} : vector<128x16xbf16>, vector<16x128xbf16>, vector<128x128xf32> -> vector<128x128xf32>
    %c0_143 = arith.constant 0 : index
    %c544 = arith.constant 544 : index
    %c0_144 = arith.constant 0 : index
    %145 = vector.load %arg1[%c0_143, %c544, %c0_144] : memref<1x1024x16xbf16, #tpu.memory_space<vmem>>, vector<1x128x16xbf16>
    %146 = vector.shape_cast %145 : vector<1x128x16xbf16> to vector<128x16xbf16>
    %c1_145 = arith.constant 1 : index
    %c0_146 = arith.constant 0 : index
    %c0_147 = arith.constant 0 : index
    %147 = vector.load %arg2[%c1_145, %c0_146, %c0_147] : memref<5x16x128xbf16, #tpu.memory_space<vmem>>, vector<1x16x128xbf16>
    %148 = vector.shape_cast %147 : vector<1x16x128xbf16> to vector<16x128xbf16>
    %cst_148 = arith.constant dense<0.000000e+00> : vector<128x128xf32>
    %149 = tpu.matmul %146, %148, %cst_148 {dimension_numbers = #tpu.dot_dimension_numbers<[1], [0], [0], [1], [0, 0, 1, 1], [], []>} : vector<128x16xbf16>, vector<16x128xbf16>, vector<128x128xf32> -> vector<128x128xf32>
    %150 = arith.addf %144, %149 : vector<128x128xf32>
    %c0_149 = arith.constant 0 : index
    %c576 = arith.constant 576 : index
    %c0_150 = arith.constant 0 : index
    %151 = vector.load %arg1[%c0_149, %c576, %c0_150] : memref<1x1024x16xbf16, #tpu.memory_space<vmem>>, vector<1x128x16xbf16>
    %152 = vector.shape_cast %151 : vector<1x128x16xbf16> to vector<128x16xbf16>
    %c2_151 = arith.constant 2 : index
    %c0_152 = arith.constant 0 : index
    %c0_153 = arith.constant 0 : index
    %153 = vector.load %arg2[%c2_151, %c0_152, %c0_153] : memref<5x16x128xbf16, #tpu.memory_space<vmem>>, vector<1x16x128xbf16>
    %154 = vector.shape_cast %153 : vector<1x16x128xbf16> to vector<16x128xbf16>
    %cst_154 = arith.constant dense<0.000000e+00> : vector<128x128xf32>
    %155 = tpu.matmul %152, %154, %cst_154 {dimension_numbers = #tpu.dot_dimension_numbers<[1], [0], [0], [1], [0, 0, 1, 1], [], []>} : vector<128x16xbf16>, vector<16x128xbf16>, vector<128x128xf32> -> vector<128x128xf32>
    %156 = arith.addf %150, %155 : vector<128x128xf32>
    %c0_155 = arith.constant 0 : index
    %c608 = arith.constant 608 : index
    %c0_156 = arith.constant 0 : index
    %157 = vector.load %arg1[%c0_155, %c608, %c0_156] : memref<1x1024x16xbf16, #tpu.memory_space<vmem>>, vector<1x128x16xbf16>
    %158 = vector.shape_cast %157 : vector<1x128x16xbf16> to vector<128x16xbf16>
    %c3_157 = arith.constant 3 : index
    %c0_158 = arith.constant 0 : index
    %c0_159 = arith.constant 0 : index
    %159 = vector.load %arg2[%c3_157, %c0_158, %c0_159] : memref<5x16x128xbf16, #tpu.memory_space<vmem>>, vector<1x16x128xbf16>
    %160 = vector.shape_cast %159 : vector<1x16x128xbf16> to vector<16x128xbf16>
    %cst_160 = arith.constant dense<0.000000e+00> : vector<128x128xf32>
    %161 = tpu.matmul %158, %160, %cst_160 {dimension_numbers = #tpu.dot_dimension_numbers<[1], [0], [0], [1], [0, 0, 1, 1], [], []>} : vector<128x16xbf16>, vector<16x128xbf16>, vector<128x128xf32> -> vector<128x128xf32>
    %162 = arith.addf %156, %161 : vector<128x128xf32>
    %c0_161 = arith.constant 0 : index
    %c640 = arith.constant 640 : index
    %c0_162 = arith.constant 0 : index
    %163 = vector.load %arg1[%c0_161, %c640, %c0_162] : memref<1x1024x16xbf16, #tpu.memory_space<vmem>>, vector<1x128x16xbf16>
    %164 = vector.shape_cast %163 : vector<1x128x16xbf16> to vector<128x16xbf16>
    %c4_163 = arith.constant 4 : index
    %c0_164 = arith.constant 0 : index
    %c0_165 = arith.constant 0 : index
    %165 = vector.load %arg2[%c4_163, %c0_164, %c0_165] : memref<5x16x128xbf16, #tpu.memory_space<vmem>>, vector<1x16x128xbf16>
    %166 = vector.shape_cast %165 : vector<1x16x128xbf16> to vector<16x128xbf16>
    %cst_166 = arith.constant dense<0.000000e+00> : vector<128x128xf32>
    %167 = tpu.matmul %164, %166, %cst_166 {dimension_numbers = #tpu.dot_dimension_numbers<[1], [0], [0], [1], [0, 0, 1, 1], [], []>} : vector<128x16xbf16>, vector<16x128xbf16>, vector<128x128xf32> -> vector<128x128xf32>
    %168 = arith.addf %162, %167 : vector<128x128xf32>
    %169 = vector.broadcast %0 : vector<1x128xf32> to vector<128x128xf32>
    %170 = arith.addf %168, %169 : vector<128x128xf32>
    %cst_167 = arith.constant 0.000000e+00 : f32
    %171 = vector.broadcast %cst_167 : f32 to vector<128x128xf32>
    %172 = arith.maximumf %170, %171 : vector<128x128xf32>
    %c512_168 = arith.constant 512 : index
    %c0_169 = arith.constant 0 : index
    %173 = vector.load %arg13[%c512_168, %c0_169] : memref<896x128xf32, #tpu.memory_space<vmem>>, vector<128x128xf32>
    tpu.vector_store %arg13[%c512_168, %c0_169], %172 {strides = array<i32>} : memref<896x128xf32, #tpu.memory_space<vmem>>, vector<128x128xf32>,
    %c0_170 = arith.constant 0 : index
    %c640_171 = arith.constant 640 : index
    %c0_172 = arith.constant 0 : index
    %174 = vector.load %arg1[%c0_170, %c640_171, %c0_172] : memref<1x1024x16xbf16, #tpu.memory_space<vmem>>, vector<1x128x16xbf16>
    %175 = vector.shape_cast %174 : vector<1x128x16xbf16> to vector<128x16xbf16>
    %c0_173 = arith.constant 0 : index
    %c0_174 = arith.constant 0 : index
    %c0_175 = arith.constant 0 : index
    %176 = vector.load %arg2[%c0_173, %c0_174, %c0_175] : memref<5x16x128xbf16, #tpu.memory_space<vmem>>, vector<1x16x128xbf16>
    %177 = vector.shape_cast %176 : vector<1x16x128xbf16> to vector<16x128xbf16>
    %cst_176 = arith.constant dense<0.000000e+00> : vector<128x128xf32>
    %178 = tpu.matmul %175, %177, %cst_176 {dimension_numbers = #tpu.dot_dimension_numbers<[1], [0], [0], [1], [0, 0, 1, 1], [], []>} : vector<128x16xbf16>, vector<16x128xbf16>, vector<128x128xf32> -> vector<128x128xf32>
    %c0_177 = arith.constant 0 : index
    %c672 = arith.constant 672 : index
    %c0_178 = arith.constant 0 : index
    %179 = vector.load %arg1[%c0_177, %c672, %c0_178] : memref<1x1024x16xbf16, #tpu.memory_space<vmem>>, vector<1x128x16xbf16>
    %180 = vector.shape_cast %179 : vector<1x128x16xbf16> to vector<128x16xbf16>
    %c1_179 = arith.constant 1 : index
    %c0_180 = arith.constant 0 : index
    %c0_181 = arith.constant 0 : index
    %181 = vector.load %arg2[%c1_179, %c0_180, %c0_181] : memref<5x16x128xbf16, #tpu.memory_space<vmem>>, vector<1x16x128xbf16>
    %182 = vector.shape_cast %181 : vector<1x16x128xbf16> to vector<16x128xbf16>
    %cst_182 = arith.constant dense<0.000000e+00> : vector<128x128xf32>
    %183 = tpu.matmul %180, %182, %cst_182 {dimension_numbers = #tpu.dot_dimension_numbers<[1], [0], [0], [1], [0, 0, 1, 1], [], []>} : vector<128x16xbf16>, vector<16x128xbf16>, vector<128x128xf32> -> vector<128x128xf32>
    %184 = arith.addf %178, %183 : vector<128x128xf32>
    %c0_183 = arith.constant 0 : index
    %c704 = arith.constant 704 : index
    %c0_184 = arith.constant 0 : index
    %185 = vector.load %arg1[%c0_183, %c704, %c0_184] : memref<1x1024x16xbf16, #tpu.memory_space<vmem>>, vector<1x128x16xbf16>
    %186 = vector.shape_cast %185 : vector<1x128x16xbf16> to vector<128x16xbf16>
    %c2_185 = arith.constant 2 : index
    %c0_186 = arith.constant 0 : index
    %c0_187 = arith.constant 0 : index
    %187 = vector.load %arg2[%c2_185, %c0_186, %c0_187] : memref<5x16x128xbf16, #tpu.memory_space<vmem>>, vector<1x16x128xbf16>
    %188 = vector.shape_cast %187 : vector<1x16x128xbf16> to vector<16x128xbf16>
    %cst_188 = arith.constant dense<0.000000e+00> : vector<128x128xf32>
    %189 = tpu.matmul %186, %188, %cst_188 {dimension_numbers = #tpu.dot_dimension_numbers<[1], [0], [0], [1], [0, 0, 1, 1], [], []>} : vector<128x16xbf16>, vector<16x128xbf16>, vector<128x128xf32> -> vector<128x128xf32>
    %190 = arith.addf %184, %189 : vector<128x128xf32>
    %c0_189 = arith.constant 0 : index
    %c736 = arith.constant 736 : index
    %c0_190 = arith.constant 0 : index
    %191 = vector.load %arg1[%c0_189, %c736, %c0_190] : memref<1x1024x16xbf16, #tpu.memory_space<vmem>>, vector<1x128x16xbf16>
    %192 = vector.shape_cast %191 : vector<1x128x16xbf16> to vector<128x16xbf16>
    %c3_191 = arith.constant 3 : index
    %c0_192 = arith.constant 0 : index
    %c0_193 = arith.constant 0 : index
    %193 = vector.load %arg2[%c3_191, %c0_192, %c0_193] : memref<5x16x128xbf16, #tpu.memory_space<vmem>>, vector<1x16x128xbf16>
    %194 = vector.shape_cast %193 : vector<1x16x128xbf16> to vector<16x128xbf16>
    %cst_194 = arith.constant dense<0.000000e+00> : vector<128x128xf32>
    %195 = tpu.matmul %192, %194, %cst_194 {dimension_numbers = #tpu.dot_dimension_numbers<[1], [0], [0], [1], [0, 0, 1, 1], [], []>} : vector<128x16xbf16>, vector<16x128xbf16>, vector<128x128xf32> -> vector<128x128xf32>
    %196 = arith.addf %190, %195 : vector<128x128xf32>
    %c0_195 = arith.constant 0 : index
    %c768 = arith.constant 768 : index
    %c0_196 = arith.constant 0 : index
    %197 = vector.load %arg1[%c0_195, %c768, %c0_196] : memref<1x1024x16xbf16, #tpu.memory_space<vmem>>, vector<1x128x16xbf16>
    %198 = vector.shape_cast %197 : vector<1x128x16xbf16> to vector<128x16xbf16>
    %c4_197 = arith.constant 4 : index
    %c0_198 = arith.constant 0 : index
    %c0_199 = arith.constant 0 : index
    %199 = vector.load %arg2[%c4_197, %c0_198, %c0_199] : memref<5x16x128xbf16, #tpu.memory_space<vmem>>, vector<1x16x128xbf16>
    %200 = vector.shape_cast %199 : vector<1x16x128xbf16> to vector<16x128xbf16>
    %cst_200 = arith.constant dense<0.000000e+00> : vector<128x128xf32>
    %201 = tpu.matmul %198, %200, %cst_200 {dimension_numbers = #tpu.dot_dimension_numbers<[1], [0], [0], [1], [0, 0, 1, 1], [], []>} : vector<128x16xbf16>, vector<16x128xbf16>, vector<128x128xf32> -> vector<128x128xf32>
    %202 = arith.addf %196, %201 : vector<128x128xf32>
    %203 = vector.broadcast %0 : vector<1x128xf32> to vector<128x128xf32>
    %204 = arith.addf %202, %203 : vector<128x128xf32>
    %cst_201 = arith.constant 0.000000e+00 : f32
    %205 = vector.broadcast %cst_201 : f32 to vector<128x128xf32>
    %206 = arith.maximumf %204, %205 : vector<128x128xf32>
    %c640_202 = arith.constant 640 : index
    %c0_203 = arith.constant 0 : index
    %207 = vector.load %arg13[%c640_202, %c0_203] : memref<896x128xf32, #tpu.memory_space<vmem>>, vector<128x128xf32>
    tpu.vector_store %arg13[%c640_202, %c0_203], %206 {strides = array<i32>} : memref<896x128xf32, #tpu.memory_space<vmem>>, vector<128x128xf32>,
    %c0_204 = arith.constant 0 : index
    %c768_205 = arith.constant 768 : index
    %c0_206 = arith.constant 0 : index
    %208 = vector.load %arg1[%c0_204, %c768_205, %c0_206] : memref<1x1024x16xbf16, #tpu.memory_space<vmem>>, vector<1x128x16xbf16>
    %209 = vector.shape_cast %208 : vector<1x128x16xbf16> to vector<128x16xbf16>
    %c0_207 = arith.constant 0 : index
    %c0_208 = arith.constant 0 : index
    %c0_209 = arith.constant 0 : index
    %210 = vector.load %arg2[%c0_207, %c0_208, %c0_209] : memref<5x16x128xbf16, #tpu.memory_space<vmem>>, vector<1x16x128xbf16>
    %211 = vector.shape_cast %210 : vector<1x16x128xbf16> to vector<16x128xbf16>
    %cst_210 = arith.constant dense<0.000000e+00> : vector<128x128xf32>
    %212 = tpu.matmul %209, %211, %cst_210 {dimension_numbers = #tpu.dot_dimension_numbers<[1], [0], [0], [1], [0, 0, 1, 1], [], []>} : vector<128x16xbf16>, vector<16x128xbf16>, vector<128x128xf32> -> vector<128x128xf32>
    %c0_211 = arith.constant 0 : index
    %c800 = arith.constant 800 : index
    %c0_212 = arith.constant 0 : index
    %213 = vector.load %arg1[%c0_211, %c800, %c0_212] : memref<1x1024x16xbf16, #tpu.memory_space<vmem>>, vector<1x128x16xbf16>
    %214 = vector.shape_cast %213 : vector<1x128x16xbf16> to vector<128x16xbf16>
    %c1_213 = arith.constant 1 : index
    %c0_214 = arith.constant 0 : index
    %c0_215 = arith.constant 0 : index
    %215 = vector.load %arg2[%c1_213, %c0_214, %c0_215] : memref<5x16x128xbf16, #tpu.memory_space<vmem>>, vector<1x16x128xbf16>
    %216 = vector.shape_cast %215 : vector<1x16x128xbf16> to vector<16x128xbf16>
    %cst_216 = arith.constant dense<0.000000e+00> : vector<128x128xf32>
    %217 = tpu.matmul %214, %216, %cst_216 {dimension_numbers = #tpu.dot_dimension_numbers<[1], [0], [0], [1], [0, 0, 1, 1], [], []>} : vector<128x16xbf16>, vector<16x128xbf16>, vector<128x128xf32> -> vector<128x128xf32>
    %218 = arith.addf %212, %217 : vector<128x128xf32>
    %c0_217 = arith.constant 0 : index
    %c832 = arith.constant 832 : index
    %c0_218 = arith.constant 0 : index
    %219 = vector.load %arg1[%c0_217, %c832, %c0_218] : memref<1x1024x16xbf16, #tpu.memory_space<vmem>>, vector<1x128x16xbf16>
    %220 = vector.shape_cast %219 : vector<1x128x16xbf16> to vector<128x16xbf16>
    %c2_219 = arith.constant 2 : index
    %c0_220 = arith.constant 0 : index
    %c0_221 = arith.constant 0 : index
    %221 = vector.load %arg2[%c2_219, %c0_220, %c0_221] : memref<5x16x128xbf16, #tpu.memory_space<vmem>>, vector<1x16x128xbf16>
    %222 = vector.shape_cast %221 : vector<1x16x128xbf16> to vector<16x128xbf16>
    %cst_222 = arith.constant dense<0.000000e+00> : vector<128x128xf32>
    %223 = tpu.matmul %220, %222, %cst_222 {dimension_numbers = #tpu.dot_dimension_numbers<[1], [0], [0], [1], [0, 0, 1, 1], [], []>} : vector<128x16xbf16>, vector<16x128xbf16>, vector<128x128xf32> -> vector<128x128xf32>
    %224 = arith.addf %218, %223 : vector<128x128xf32>
    %c0_223 = arith.constant 0 : index
    %c864 = arith.constant 864 : index
    %c0_224 = arith.constant 0 : index
    %225 = vector.load %arg1[%c0_223, %c864, %c0_224] : memref<1x1024x16xbf16, #tpu.memory_space<vmem>>, vector<1x128x16xbf16>
    %226 = vector.shape_cast %225 : vector<1x128x16xbf16> to vector<128x16xbf16>
    %c3_225 = arith.constant 3 : index
    %c0_226 = arith.constant 0 : index
    %c0_227 = arith.constant 0 : index
    %227 = vector.load %arg2[%c3_225, %c0_226, %c0_227] : memref<5x16x128xbf16, #tpu.memory_space<vmem>>, vector<1x16x128xbf16>
    %228 = vector.shape_cast %227 : vector<1x16x128xbf16> to vector<16x128xbf16>
    %cst_228 = arith.constant dense<0.000000e+00> : vector<128x128xf32>
    %229 = tpu.matmul %226, %228, %cst_228 {dimension_numbers = #tpu.dot_dimension_numbers<[1], [0], [0], [1], [0, 0, 1, 1], [], []>} : vector<128x16xbf16>, vector<16x128xbf16>, vector<128x128xf32> -> vector<128x128xf32>
    %230 = arith.addf %224, %229 : vector<128x128xf32>
    %c0_229 = arith.constant 0 : index
    %c896 = arith.constant 896 : index
    %c0_230 = arith.constant 0 : index
    %231 = vector.load %arg1[%c0_229, %c896, %c0_230] : memref<1x1024x16xbf16, #tpu.memory_space<vmem>>, vector<1x128x16xbf16>
    %232 = vector.shape_cast %231 : vector<1x128x16xbf16> to vector<128x16xbf16>
    %c4_231 = arith.constant 4 : index
    %c0_232 = arith.constant 0 : index
    %c0_233 = arith.constant 0 : index
    %233 = vector.load %arg2[%c4_231, %c0_232, %c0_233] : memref<5x16x128xbf16, #tpu.memory_space<vmem>>, vector<1x16x128xbf16>
    %234 = vector.shape_cast %233 : vector<1x16x128xbf16> to vector<16x128xbf16>
    %cst_234 = arith.constant dense<0.000000e+00> : vector<128x128xf32>
    %235 = tpu.matmul %232, %234, %cst_234 {dimension_numbers = #tpu.dot_dimension_numbers<[1], [0], [0], [1], [0, 0, 1, 1], [], []>} : vector<128x16xbf16>, vector<16x128xbf16>, vector<128x128xf32> -> vector<128x128xf32>
    %236 = arith.addf %230, %235 : vector<128x128xf32>
    %237 = vector.broadcast %0 : vector<1x128xf32> to vector<128x128xf32>
    %238 = arith.addf %236, %237 : vector<128x128xf32>
    %cst_235 = arith.constant 0.000000e+00 : f32
    %239 = vector.broadcast %cst_235 : f32 to vector<128x128xf32>
    %240 = arith.maximumf %238, %239 : vector<128x128xf32>
    %c768_236 = arith.constant 768 : index
    %c0_237 = arith.constant 0 : index
    %241 = vector.load %arg13[%c768_236, %c0_237] : memref<896x128xf32, #tpu.memory_space<vmem>>, vector<128x128xf32>
    tpu.vector_store %arg13[%c768_236, %c0_237], %240 {strides = array<i32>} : memref<896x128xf32, #tpu.memory_space<vmem>>, vector<128x128xf32>,
    %c0_238 = arith.constant 0 : index
    %c0_239 = arith.constant 0 : index
    %242 = vector.load %arg13[%c0_238, %c0_239] : memref<896x128xf32, #tpu.memory_space<vmem>>, vector<32x128xf32>
    %c32_240 = arith.constant 32 : index
    %c0_241 = arith.constant 0 : index
    %243 = vector.load %arg13[%c32_240, %c0_241] : memref<896x128xf32, #tpu.memory_space<vmem>>, vector<32x128xf32>
    %244 = arith.maximumf %242, %243 : vector<32x128xf32>
    %c0_242 = arith.constant 0 : index
    %c0_243 = arith.constant 0 : index
    %245 = vector.load %arg17[%c0_242, %c0_243] : memref<32x128xf32, #tpu.memory_space<vmem>>, vector<32x128xf32>
    tpu.vector_store %arg17[%c0_242, %c0_243], %244 {strides = array<i32>} : memref<32x128xf32, #tpu.memory_space<vmem>>, vector<32x128xf32>,
    %c0_244 = arith.constant 0 : index
    %c0_245 = arith.constant 0 : index
    %246 = tpu.strided_load %arg17[%c0_244, %c0_245] {strides = array<i32: 2, 1>} : memref<32x128xf32, #tpu.memory_space<vmem>>, vector<14x128xf32>
    %c1_246 = arith.constant 1 : index
    %c0_247 = arith.constant 0 : index
    %247 = tpu.strided_load %arg17[%c1_246, %c0_247] {strides = array<i32: 2, 1>} : memref<32x128xf32, #tpu.memory_space<vmem>>, vector<14x128xf32>
    %248 = arith.maximumf %246, %247 : vector<14x128xf32>
    %249 = arith.truncf %248 : vector<14x128xf32> to vector<14x128xbf16>
    %c0_248 = arith.constant 0 : index
    %c0_249 = arith.constant 0 : index
    %250 = vector.load %arg14[%c0_248, %c0_249] : memref<224x128xbf16, #tpu.memory_space<vmem>>, vector<14x128xbf16>
    tpu.vector_store %arg14[%c0_248, %c0_249], %249 {strides = array<i32>} : memref<224x128xbf16, #tpu.memory_space<vmem>>, vector<14x128xbf16>,
    %c64_250 = arith.constant 64 : index
    %c0_251 = arith.constant 0 : index
    %251 = vector.load %arg13[%c64_250, %c0_251] : memref<896x128xf32, #tpu.memory_space<vmem>>, vector<32x128xf32>
    %c96_252 = arith.constant 96 : index
    %c0_253 = arith.constant 0 : index
    %252 = vector.load %arg13[%c96_252, %c0_253] : memref<896x128xf32, #tpu.memory_space<vmem>>, vector<32x128xf32>
    %253 = arith.maximumf %251, %252 : vector<32x128xf32>
    %c0_254 = arith.constant 0 : index
    %c0_255 = arith.constant 0 : index
    %254 = vector.load %arg17[%c0_254, %c0_255] : memref<32x128xf32, #tpu.memory_space<vmem>>, vector<32x128xf32>
    tpu.vector_store %arg17[%c0_254, %c0_255], %253 {strides = array<i32>} : memref<32x128xf32, #tpu.memory_space<vmem>>, vector<32x128xf32>,
    %c0_256 = arith.constant 0 : index
    %c0_257 = arith.constant 0 : index
    %255 = tpu.strided_load %arg17[%c0_256, %c0_257] {strides = array<i32: 2, 1>} : memref<32x128xf32, #tpu.memory_space<vmem>>, vector<14x128xf32>
    %c1_258 = arith.constant 1 : index
    %c0_259 = arith.constant 0 : index
    %256 = tpu.strided_load %arg17[%c1_258, %c0_259] {strides = array<i32: 2, 1>} : memref<32x128xf32, #tpu.memory_space<vmem>>, vector<14x128xf32>
    %257 = arith.maximumf %255, %256 : vector<14x128xf32>
    %258 = arith.truncf %257 : vector<14x128xf32> to vector<14x128xbf16>
    %c14 = arith.constant 14 : index
    %c0_260 = arith.constant 0 : index
    %259 = vector.load %arg14[%c14, %c0_260] : memref<224x128xbf16, #tpu.memory_space<vmem>>, vector<14x128xbf16>
    tpu.vector_store %arg14[%c14, %c0_260], %258 {strides = array<i32>} : memref<224x128xbf16, #tpu.memory_space<vmem>>, vector<14x128xbf16>,
    %c128_261 = arith.constant 128 : index
    %c0_262 = arith.constant 0 : index
    %260 = vector.load %arg13[%c128_261, %c0_262] : memref<896x128xf32, #tpu.memory_space<vmem>>, vector<32x128xf32>
    %c160_263 = arith.constant 160 : index
    %c0_264 = arith.constant 0 : index
    %261 = vector.load %arg13[%c160_263, %c0_264] : memref<896x128xf32, #tpu.memory_space<vmem>>, vector<32x128xf32>
    %262 = arith.maximumf %260, %261 : vector<32x128xf32>
    %c0_265 = arith.constant 0 : index
    %c0_266 = arith.constant 0 : index
    %263 = vector.load %arg17[%c0_265, %c0_266] : memref<32x128xf32, #tpu.memory_space<vmem>>, vector<32x128xf32>
    tpu.vector_store %arg17[%c0_265, %c0_266], %262 {strides = array<i32>} : memref<32x128xf32, #tpu.memory_space<vmem>>, vector<32x128xf32>,
    %c0_267 = arith.constant 0 : index
    %c0_268 = arith.constant 0 : index
    %264 = tpu.strided_load %arg17[%c0_267, %c0_268] {strides = array<i32: 2, 1>} : memref<32x128xf32, #tpu.memory_space<vmem>>, vector<14x128xf32>
    %c1_269 = arith.constant 1 : index
    %c0_270 = arith.constant 0 : index
    %265 = tpu.strided_load %arg17[%c1_269, %c0_270] {strides = array<i32: 2, 1>} : memref<32x128xf32, #tpu.memory_space<vmem>>, vector<14x128xf32>
    %266 = arith.maximumf %264, %265 : vector<14x128xf32>
    %267 = arith.truncf %266 : vector<14x128xf32> to vector<14x128xbf16>
    %c28 = arith.constant 28 : index
    %c0_271 = arith.constant 0 : index
    %268 = vector.load %arg14[%c28, %c0_271] : memref<224x128xbf16, #tpu.memory_space<vmem>>, vector<14x128xbf16>
    tpu.vector_store %arg14[%c28, %c0_271], %267 {strides = array<i32>} : memref<224x128xbf16, #tpu.memory_space<vmem>>, vector<14x128xbf16>,
    %c192_272 = arith.constant 192 : index
    %c0_273 = arith.constant 0 : index
    %269 = vector.load %arg13[%c192_272, %c0_273] : memref<896x128xf32, #tpu.memory_space<vmem>>, vector<32x128xf32>
    %c224_274 = arith.constant 224 : index
    %c0_275 = arith.constant 0 : index
    %270 = vector.load %arg13[%c224_274, %c0_275] : memref<896x128xf32, #tpu.memory_space<vmem>>, vector<32x128xf32>
    %271 = arith.maximumf %269, %270 : vector<32x128xf32>
    %c0_276 = arith.constant 0 : index
    %c0_277 = arith.constant 0 : index
    %272 = vector.load %arg17[%c0_276, %c0_277] : memref<32x128xf32, #tpu.memory_space<vmem>>, vector<32x128xf32>
    tpu.vector_store %arg17[%c0_276, %c0_277], %271 {strides = array<i32>} : memref<32x128xf32, #tpu.memory_space<vmem>>, vector<32x128xf32>,
    %c0_278 = arith.constant 0 : index
    %c0_279 = arith.constant 0 : index
    %273 = tpu.strided_load %arg17[%c0_278, %c0_279] {strides = array<i32: 2, 1>} : memref<32x128xf32, #tpu.memory_space<vmem>>, vector<14x128xf32>
    %c1_280 = arith.constant 1 : index
    %c0_281 = arith.constant 0 : index
    %274 = tpu.strided_load %arg17[%c1_280, %c0_281] {strides = array<i32: 2, 1>} : memref<32x128xf32, #tpu.memory_space<vmem>>, vector<14x128xf32>
    %275 = arith.maximumf %273, %274 : vector<14x128xf32>
    %276 = arith.truncf %275 : vector<14x128xf32> to vector<14x128xbf16>
    %c42 = arith.constant 42 : index
    %c0_282 = arith.constant 0 : index
    %277 = vector.load %arg14[%c42, %c0_282] : memref<224x128xbf16, #tpu.memory_space<vmem>>, vector<14x128xbf16>
    tpu.vector_store %arg14[%c42, %c0_282], %276 {strides = array<i32>} : memref<224x128xbf16, #tpu.memory_space<vmem>>, vector<14x128xbf16>,
    %c256_283 = arith.constant 256 : index
    %c0_284 = arith.constant 0 : index
    %278 = vector.load %arg13[%c256_283, %c0_284] : memref<896x128xf32, #tpu.memory_space<vmem>>, vector<32x128xf32>
    %c288_285 = arith.constant 288 : index
    %c0_286 = arith.constant 0 : index
    %279 = vector.load %arg13[%c288_285, %c0_286] : memref<896x128xf32, #tpu.memory_space<vmem>>, vector<32x128xf32>
    %280 = arith.maximumf %278, %279 : vector<32x128xf32>
    %c0_287 = arith.constant 0 : index
    %c0_288 = arith.constant 0 : index
    %281 = vector.load %arg17[%c0_287, %c0_288] : memref<32x128xf32, #tpu.memory_space<vmem>>, vector<32x128xf32>
    tpu.vector_store %arg17[%c0_287, %c0_288], %280 {strides = array<i32>} : memref<32x128xf32, #tpu.memory_space<vmem>>, vector<32x128xf32>,
    %c0_289 = arith.constant 0 : index
    %c0_290 = arith.constant 0 : index
    %282 = tpu.strided_load %arg17[%c0_289, %c0_290] {strides = array<i32: 2, 1>} : memref<32x128xf32, #tpu.memory_space<vmem>>, vector<14x128xf32>
    %c1_291 = arith.constant 1 : index
    %c0_292 = arith.constant 0 : index
    %283 = tpu.strided_load %arg17[%c1_291, %c0_292] {strides = array<i32: 2, 1>} : memref<32x128xf32, #tpu.memory_space<vmem>>, vector<14x128xf32>
    %284 = arith.maximumf %282, %283 : vector<14x128xf32>
    %285 = arith.truncf %284 : vector<14x128xf32> to vector<14x128xbf16>
    %c56 = arith.constant 56 : index
    %c0_293 = arith.constant 0 : index
    %286 = vector.load %arg14[%c56, %c0_293] : memref<224x128xbf16, #tpu.memory_space<vmem>>, vector<14x128xbf16>
    tpu.vector_store %arg14[%c56, %c0_293], %285 {strides = array<i32>} : memref<224x128xbf16, #tpu.memory_space<vmem>>, vector<14x128xbf16>,
    %c320_294 = arith.constant 320 : index
    %c0_295 = arith.constant 0 : index
    %287 = vector.load %arg13[%c320_294, %c0_295] : memref<896x128xf32, #tpu.memory_space<vmem>>, vector<32x128xf32>
    %c352_296 = arith.constant 352 : index
    %c0_297 = arith.constant 0 : index
    %288 = vector.load %arg13[%c352_296, %c0_297] : memref<896x128xf32, #tpu.memory_space<vmem>>, vector<32x128xf32>
    %289 = arith.maximumf %287, %288 : vector<32x128xf32>
    %c0_298 = arith.constant 0 : index
    %c0_299 = arith.constant 0 : index
    %290 = vector.load %arg17[%c0_298, %c0_299] : memref<32x128xf32, #tpu.memory_space<vmem>>, vector<32x128xf32>
    tpu.vector_store %arg17[%c0_298, %c0_299], %289 {strides = array<i32>} : memref<32x128xf32, #tpu.memory_space<vmem>>, vector<32x128xf32>,
    %c0_300 = arith.constant 0 : index
    %c0_301 = arith.constant 0 : index
    %291 = tpu.strided_load %arg17[%c0_300, %c0_301] {strides = array<i32: 2, 1>} : memref<32x128xf32, #tpu.memory_space<vmem>>, vector<14x128xf32>
    %c1_302 = arith.constant 1 : index
    %c0_303 = arith.constant 0 : index
    %292 = tpu.strided_load %arg17[%c1_302, %c0_303] {strides = array<i32: 2, 1>} : memref<32x128xf32, #tpu.memory_space<vmem>>, vector<14x128xf32>
    %293 = arith.maximumf %291, %292 : vector<14x128xf32>
    %294 = arith.truncf %293 : vector<14x128xf32> to vector<14x128xbf16>
    %c70 = arith.constant 70 : index
    %c0_304 = arith.constant 0 : index
    %295 = vector.load %arg14[%c70, %c0_304] : memref<224x128xbf16, #tpu.memory_space<vmem>>, vector<14x128xbf16>
    tpu.vector_store %arg14[%c70, %c0_304], %294 {strides = array<i32>} : memref<224x128xbf16, #tpu.memory_space<vmem>>, vector<14x128xbf16>,
    %c384_305 = arith.constant 384 : index
    %c0_306 = arith.constant 0 : index
    %296 = vector.load %arg13[%c384_305, %c0_306] : memref<896x128xf32, #tpu.memory_space<vmem>>, vector<32x128xf32>
    %c416_307 = arith.constant 416 : index
    %c0_308 = arith.constant 0 : index
    %297 = vector.load %arg13[%c416_307, %c0_308] : memref<896x128xf32, #tpu.memory_space<vmem>>, vector<32x128xf32>
    %298 = arith.maximumf %296, %297 : vector<32x128xf32>
    %c0_309 = arith.constant 0 : index
    %c0_310 = arith.constant 0 : index
    %299 = vector.load %arg17[%c0_309, %c0_310] : memref<32x128xf32, #tpu.memory_space<vmem>>, vector<32x128xf32>
    tpu.vector_store %arg17[%c0_309, %c0_310], %298 {strides = array<i32>} : memref<32x128xf32, #tpu.memory_space<vmem>>, vector<32x128xf32>,
    %c0_311 = arith.constant 0 : index
    %c0_312 = arith.constant 0 : index
    %300 = tpu.strided_load %arg17[%c0_311, %c0_312] {strides = array<i32: 2, 1>} : memref<32x128xf32, #tpu.memory_space<vmem>>, vector<14x128xf32>
    %c1_313 = arith.constant 1 : index
    %c0_314 = arith.constant 0 : index
    %301 = tpu.strided_load %arg17[%c1_313, %c0_314] {strides = array<i32: 2, 1>} : memref<32x128xf32, #tpu.memory_space<vmem>>, vector<14x128xf32>
    %302 = arith.maximumf %300, %301 : vector<14x128xf32>
    %303 = arith.truncf %302 : vector<14x128xf32> to vector<14x128xbf16>
    %c84 = arith.constant 84 : index
    %c0_315 = arith.constant 0 : index
    %304 = vector.load %arg14[%c84, %c0_315] : memref<224x128xbf16, #tpu.memory_space<vmem>>, vector<14x128xbf16>
    tpu.vector_store %arg14[%c84, %c0_315], %303 {strides = array<i32>} : memref<224x128xbf16, #tpu.memory_space<vmem>>, vector<14x128xbf16>,
    %c448_316 = arith.constant 448 : index
    %c0_317 = arith.constant 0 : index
    %305 = vector.load %arg13[%c448_316, %c0_317] : memref<896x128xf32, #tpu.memory_space<vmem>>, vector<32x128xf32>
    %c480_318 = arith.constant 480 : index
    %c0_319 = arith.constant 0 : index
    %306 = vector.load %arg13[%c480_318, %c0_319] : memref<896x128xf32, #tpu.memory_space<vmem>>, vector<32x128xf32>
    %307 = arith.maximumf %305, %306 : vector<32x128xf32>
    %c0_320 = arith.constant 0 : index
    %c0_321 = arith.constant 0 : index
    %308 = vector.load %arg17[%c0_320, %c0_321] : memref<32x128xf32, #tpu.memory_space<vmem>>, vector<32x128xf32>
    tpu.vector_store %arg17[%c0_320, %c0_321], %307 {strides = array<i32>} : memref<32x128xf32, #tpu.memory_space<vmem>>, vector<32x128xf32>,
    %c0_322 = arith.constant 0 : index
    %c0_323 = arith.constant 0 : index
    %309 = tpu.strided_load %arg17[%c0_322, %c0_323] {strides = array<i32: 2, 1>} : memref<32x128xf32, #tpu.memory_space<vmem>>, vector<14x128xf32>
    %c1_324 = arith.constant 1 : index
    %c0_325 = arith.constant 0 : index
    %310 = tpu.strided_load %arg17[%c1_324, %c0_325] {strides = array<i32: 2, 1>} : memref<32x128xf32, #tpu.memory_space<vmem>>, vector<14x128xf32>
    %311 = arith.maximumf %309, %310 : vector<14x128xf32>
    %312 = arith.truncf %311 : vector<14x128xf32> to vector<14x128xbf16>
    %c98 = arith.constant 98 : index
    %c0_326 = arith.constant 0 : index
    %313 = vector.load %arg14[%c98, %c0_326] : memref<224x128xbf16, #tpu.memory_space<vmem>>, vector<14x128xbf16>
    tpu.vector_store %arg14[%c98, %c0_326], %312 {strides = array<i32>} : memref<224x128xbf16, #tpu.memory_space<vmem>>, vector<14x128xbf16>,
    %c512_327 = arith.constant 512 : index
    %c0_328 = arith.constant 0 : index
    %314 = vector.load %arg13[%c512_327, %c0_328] : memref<896x128xf32, #tpu.memory_space<vmem>>, vector<32x128xf32>
    %c544_329 = arith.constant 544 : index
    %c0_330 = arith.constant 0 : index
    %315 = vector.load %arg13[%c544_329, %c0_330] : memref<896x128xf32, #tpu.memory_space<vmem>>, vector<32x128xf32>
    %316 = arith.maximumf %314, %315 : vector<32x128xf32>
    %c0_331 = arith.constant 0 : index
    %c0_332 = arith.constant 0 : index
    %317 = vector.load %arg17[%c0_331, %c0_332] : memref<32x128xf32, #tpu.memory_space<vmem>>, vector<32x128xf32>
    tpu.vector_store %arg17[%c0_331, %c0_332], %316 {strides = array<i32>} : memref<32x128xf32, #tpu.memory_space<vmem>>, vector<32x128xf32>,
    %c0_333 = arith.constant 0 : index
    %c0_334 = arith.constant 0 : index
    %318 = tpu.strided_load %arg17[%c0_333, %c0_334] {strides = array<i32: 2, 1>} : memref<32x128xf32, #tpu.memory_space<vmem>>, vector<14x128xf32>
    %c1_335 = arith.constant 1 : index
    %c0_336 = arith.constant 0 : index
    %319 = tpu.strided_load %arg17[%c1_335, %c0_336] {strides = array<i32: 2, 1>} : memref<32x128xf32, #tpu.memory_space<vmem>>, vector<14x128xf32>
    %320 = arith.maximumf %318, %319 : vector<14x128xf32>
    %321 = arith.truncf %320 : vector<14x128xf32> to vector<14x128xbf16>
    %c112 = arith.constant 112 : index
    %c0_337 = arith.constant 0 : index
    %322 = vector.load %arg14[%c112, %c0_337] : memref<224x128xbf16, #tpu.memory_space<vmem>>, vector<14x128xbf16>
    tpu.vector_store %arg14[%c112, %c0_337], %321 {strides = array<i32>} : memref<224x128xbf16, #tpu.memory_space<vmem>>, vector<14x128xbf16>,
    %c576_338 = arith.constant 576 : index
    %c0_339 = arith.constant 0 : index
    %323 = vector.load %arg13[%c576_338, %c0_339] : memref<896x128xf32, #tpu.memory_space<vmem>>, vector<32x128xf32>
    %c608_340 = arith.constant 608 : index
    %c0_341 = arith.constant 0 : index
    %324 = vector.load %arg13[%c608_340, %c0_341] : memref<896x128xf32, #tpu.memory_space<vmem>>, vector<32x128xf32>
    %325 = arith.maximumf %323, %324 : vector<32x128xf32>
    %c0_342 = arith.constant 0 : index
    %c0_343 = arith.constant 0 : index
    %326 = vector.load %arg17[%c0_342, %c0_343] : memref<32x128xf32, #tpu.memory_space<vmem>>, vector<32x128xf32>
    tpu.vector_store %arg17[%c0_342, %c0_343], %325 {strides = array<i32>} : memref<32x128xf32, #tpu.memory_space<vmem>>, vector<32x128xf32>,
    %c0_344 = arith.constant 0 : index
    %c0_345 = arith.constant 0 : index
    %327 = tpu.strided_load %arg17[%c0_344, %c0_345] {strides = array<i32: 2, 1>} : memref<32x128xf32, #tpu.memory_space<vmem>>, vector<14x128xf32>
    %c1_346 = arith.constant 1 : index
    %c0_347 = arith.constant 0 : index
    %328 = tpu.strided_load %arg17[%c1_346, %c0_347] {strides = array<i32: 2, 1>} : memref<32x128xf32, #tpu.memory_space<vmem>>, vector<14x128xf32>
    %329 = arith.maximumf %327, %328 : vector<14x128xf32>
    %330 = arith.truncf %329 : vector<14x128xf32> to vector<14x128xbf16>
    %c126 = arith.constant 126 : index
    %c0_348 = arith.constant 0 : index
    %331 = vector.load %arg14[%c126, %c0_348] : memref<224x128xbf16, #tpu.memory_space<vmem>>, vector<14x128xbf16>
    tpu.vector_store %arg14[%c126, %c0_348], %330 {strides = array<i32>} : memref<224x128xbf16, #tpu.memory_space<vmem>>, vector<14x128xbf16>,
    %c640_349 = arith.constant 640 : index
    %c0_350 = arith.constant 0 : index
    %332 = vector.load %arg13[%c640_349, %c0_350] : memref<896x128xf32, #tpu.memory_space<vmem>>, vector<32x128xf32>
    %c672_351 = arith.constant 672 : index
    %c0_352 = arith.constant 0 : index
    %333 = vector.load %arg13[%c672_351, %c0_352] : memref<896x128xf32, #tpu.memory_space<vmem>>, vector<32x128xf32>
    %334 = arith.maximumf %332, %333 : vector<32x128xf32>
    %c0_353 = arith.constant 0 : index
    %c0_354 = arith.constant 0 : index
    %335 = vector.load %arg17[%c0_353, %c0_354] : memref<32x128xf32, #tpu.memory_space<vmem>>, vector<32x128xf32>
    tpu.vector_store %arg17[%c0_353, %c0_354], %334 {strides = array<i32>} : memref<32x128xf32, #tpu.memory_space<vmem>>, vector<32x128xf32>,
    %c0_355 = arith.constant 0 : index
    %c0_356 = arith.constant 0 : index
    %336 = tpu.strided_load %arg17[%c0_355, %c0_356] {strides = array<i32: 2, 1>} : memref<32x128xf32, #tpu.memory_space<vmem>>, vector<14x128xf32>
    %c1_357 = arith.constant 1 : index
    %c0_358 = arith.constant 0 : index
    %337 = tpu.strided_load %arg17[%c1_357, %c0_358] {strides = array<i32: 2, 1>} : memref<32x128xf32, #tpu.memory_space<vmem>>, vector<14x128xf32>
    %338 = arith.maximumf %336, %337 : vector<14x128xf32>
    %339 = arith.truncf %338 : vector<14x128xf32> to vector<14x128xbf16>
    %c140 = arith.constant 140 : index
    %c0_359 = arith.constant 0 : index
    %340 = vector.load %arg14[%c140, %c0_359] : memref<224x128xbf16, #tpu.memory_space<vmem>>, vector<14x128xbf16>
    tpu.vector_store %arg14[%c140, %c0_359], %339 {strides = array<i32>} : memref<224x128xbf16, #tpu.memory_space<vmem>>, vector<14x128xbf16>,
    %c704_360 = arith.constant 704 : index
    %c0_361 = arith.constant 0 : index
    %341 = vector.load %arg13[%c704_360, %c0_361] : memref<896x128xf32, #tpu.memory_space<vmem>>, vector<32x128xf32>
    %c736_362 = arith.constant 736 : index
    %c0_363 = arith.constant 0 : index
    %342 = vector.load %arg13[%c736_362, %c0_363] : memref<896x128xf32, #tpu.memory_space<vmem>>, vector<32x128xf32>
    %343 = arith.maximumf %341, %342 : vector<32x128xf32>
    %c0_364 = arith.constant 0 : index
    %c0_365 = arith.constant 0 : index
    %344 = vector.load %arg17[%c0_364, %c0_365] : memref<32x128xf32, #tpu.memory_space<vmem>>, vector<32x128xf32>
    tpu.vector_store %arg17[%c0_364, %c0_365], %343 {strides = array<i32>} : memref<32x128xf32, #tpu.memory_space<vmem>>, vector<32x128xf32>,
    %c0_366 = arith.constant 0 : index
    %c0_367 = arith.constant 0 : index
    %345 = tpu.strided_load %arg17[%c0_366, %c0_367] {strides = array<i32: 2, 1>} : memref<32x128xf32, #tpu.memory_space<vmem>>, vector<14x128xf32>
    %c1_368 = arith.constant 1 : index
    %c0_369 = arith.constant 0 : index
    %346 = tpu.strided_load %arg17[%c1_368, %c0_369] {strides = array<i32: 2, 1>} : memref<32x128xf32, #tpu.memory_space<vmem>>, vector<14x128xf32>
    %347 = arith.maximumf %345, %346 : vector<14x128xf32>
    %348 = arith.truncf %347 : vector<14x128xf32> to vector<14x128xbf16>
    %c154 = arith.constant 154 : index
    %c0_370 = arith.constant 0 : index
    %349 = vector.load %arg14[%c154, %c0_370] : memref<224x128xbf16, #tpu.memory_space<vmem>>, vector<14x128xbf16>
    tpu.vector_store %arg14[%c154, %c0_370], %348 {strides = array<i32>} : memref<224x128xbf16, #tpu.memory_space<vmem>>, vector<14x128xbf16>,
    %c768_371 = arith.constant 768 : index
    %c0_372 = arith.constant 0 : index
    %350 = vector.load %arg13[%c768_371, %c0_372] : memref<896x128xf32, #tpu.memory_space<vmem>>, vector<32x128xf32>
    %c800_373 = arith.constant 800 : index
    %c0_374 = arith.constant 0 : index
    %351 = vector.load %arg13[%c800_373, %c0_374] : memref<896x128xf32, #tpu.memory_space<vmem>>, vector<32x128xf32>
    %352 = arith.maximumf %350, %351 : vector<32x128xf32>
    %c0_375 = arith.constant 0 : index
    %c0_376 = arith.constant 0 : index
    %353 = vector.load %arg17[%c0_375, %c0_376] : memref<32x128xf32, #tpu.memory_space<vmem>>, vector<32x128xf32>
    tpu.vector_store %arg17[%c0_375, %c0_376], %352 {strides = array<i32>} : memref<32x128xf32, #tpu.memory_space<vmem>>, vector<32x128xf32>,
    %c0_377 = arith.constant 0 : index
    %c0_378 = arith.constant 0 : index
    %354 = tpu.strided_load %arg17[%c0_377, %c0_378] {strides = array<i32: 2, 1>} : memref<32x128xf32, #tpu.memory_space<vmem>>, vector<14x128xf32>
    %c1_379 = arith.constant 1 : index
    %c0_380 = arith.constant 0 : index
    %355 = tpu.strided_load %arg17[%c1_379, %c0_380] {strides = array<i32: 2, 1>} : memref<32x128xf32, #tpu.memory_space<vmem>>, vector<14x128xf32>
    %356 = arith.maximumf %354, %355 : vector<14x128xf32>
    %357 = arith.truncf %356 : vector<14x128xf32> to vector<14x128xbf16>
    %c168 = arith.constant 168 : index
    %c0_381 = arith.constant 0 : index
    %358 = vector.load %arg14[%c168, %c0_381] : memref<224x128xbf16, #tpu.memory_space<vmem>>, vector<14x128xbf16>
    tpu.vector_store %arg14[%c168, %c0_381], %357 {strides = array<i32>} : memref<224x128xbf16, #tpu.memory_space<vmem>>, vector<14x128xbf16>,
    %c832_382 = arith.constant 832 : index
    %c0_383 = arith.constant 0 : index
    %359 = vector.load %arg13[%c832_382, %c0_383] : memref<896x128xf32, #tpu.memory_space<vmem>>, vector<32x128xf32>
    %c864_384 = arith.constant 864 : index
    %c0_385 = arith.constant 0 : index
    %360 = vector.load %arg13[%c864_384, %c0_385] : memref<896x128xf32, #tpu.memory_space<vmem>>, vector<32x128xf32>
    %361 = arith.maximumf %359, %360 : vector<32x128xf32>
    %c0_386 = arith.constant 0 : index
    %c0_387 = arith.constant 0 : index
    %362 = vector.load %arg17[%c0_386, %c0_387] : memref<32x128xf32, #tpu.memory_space<vmem>>, vector<32x128xf32>
    tpu.vector_store %arg17[%c0_386, %c0_387], %361 {strides = array<i32>} : memref<32x128xf32, #tpu.memory_space<vmem>>, vector<32x128xf32>,
    %c0_388 = arith.constant 0 : index
    %c0_389 = arith.constant 0 : index
    %363 = tpu.strided_load %arg17[%c0_388, %c0_389] {strides = array<i32: 2, 1>} : memref<32x128xf32, #tpu.memory_space<vmem>>, vector<14x128xf32>
    %c1_390 = arith.constant 1 : index
    %c0_391 = arith.constant 0 : index
    %364 = tpu.strided_load %arg17[%c1_390, %c0_391] {strides = array<i32: 2, 1>} : memref<32x128xf32, #tpu.memory_space<vmem>>, vector<14x128xf32>
    %365 = arith.maximumf %363, %364 : vector<14x128xf32>
    %366 = arith.truncf %365 : vector<14x128xf32> to vector<14x128xbf16>
    %c182 = arith.constant 182 : index
    %c0_392 = arith.constant 0 : index
    %367 = vector.load %arg14[%c182, %c0_392] : memref<224x128xbf16, #tpu.memory_space<vmem>>, vector<14x128xbf16>
    tpu.vector_store %arg14[%c182, %c0_392], %366 {strides = array<i32>} : memref<224x128xbf16, #tpu.memory_space<vmem>>, vector<14x128xbf16>,
    %c0_393 = arith.constant 0 : index
    %c0_394 = arith.constant 0 : index
    %368 = vector.load %arg14[%c0_393, %c0_394] : memref<224x128xbf16, #tpu.memory_space<vmem>>, vector<72x128xbf16>
    %c1_395 = arith.constant 1 : index
    %c0_396 = arith.constant 0 : index
    %369 = vector.load %arg14[%c1_395, %c0_396] : memref<224x128xbf16, #tpu.memory_space<vmem>>, vector<72x128xbf16>
    %370 = tpu.concatenate %368, %369 in 1 : vector<72x128xbf16>, vector<72x128xbf16> -> vector<72x256xbf16>
    %c0_397 = arith.constant 0 : index
    %c0_398 = arith.constant 0 : index
    %c0_399 = arith.constant 0 : index
    %371 = vector.load %arg4[%c0_397, %c0_398, %c0_399] : memref<13x256x128xbf16, #tpu.memory_space<vmem>>, vector<1x256x128xbf16>
    %372 = vector.shape_cast %371 : vector<1x256x128xbf16> to vector<256x128xbf16>
    %cst_400 = arith.constant dense<0.000000e+00> : vector<72x128xf32>
    %373 = tpu.matmul %370, %372, %cst_400 {dimension_numbers = #tpu.dot_dimension_numbers<[1], [0], [0], [1], [0, 0, 1, 1], [], []>} : vector<72x256xbf16>, vector<256x128xbf16>, vector<72x128xf32> -> vector<72x128xf32>
    %c2_401 = arith.constant 2 : index
    %c0_402 = arith.constant 0 : index
    %374 = vector.load %arg14[%c2_401, %c0_402] : memref<224x128xbf16, #tpu.memory_space<vmem>>, vector<72x128xbf16>
    %c3_403 = arith.constant 3 : index
    %c0_404 = arith.constant 0 : index
    %375 = vector.load %arg14[%c3_403, %c0_404] : memref<224x128xbf16, #tpu.memory_space<vmem>>, vector<72x128xbf16>
    %376 = tpu.concatenate %374, %375 in 1 : vector<72x128xbf16>, vector<72x128xbf16> -> vector<72x256xbf16>
    %c1_405 = arith.constant 1 : index
    %c0_406 = arith.constant 0 : index
    %c0_407 = arith.constant 0 : index
    %377 = vector.load %arg4[%c1_405, %c0_406, %c0_407] : memref<13x256x128xbf16, #tpu.memory_space<vmem>>, vector<1x256x128xbf16>
    %378 = vector.shape_cast %377 : vector<1x256x128xbf16> to vector<256x128xbf16>
    %cst_408 = arith.constant dense<0.000000e+00> : vector<72x128xf32>
    %379 = tpu.matmul %376, %378, %cst_408 {dimension_numbers = #tpu.dot_dimension_numbers<[1], [0], [0], [1], [0, 0, 1, 1], [], []>} : vector<72x256xbf16>, vector<256x128xbf16>, vector<72x128xf32> -> vector<72x128xf32>
    %380 = arith.addf %373, %379 : vector<72x128xf32>
    %c4_409 = arith.constant 4 : index
    %c0_410 = arith.constant 0 : index
    %381 = vector.load %arg14[%c4_409, %c0_410] : memref<224x128xbf16, #tpu.memory_space<vmem>>, vector<72x128xbf16>
    %c14_411 = arith.constant 14 : index
    %c0_412 = arith.constant 0 : index
    %382 = vector.load %arg14[%c14_411, %c0_412] : memref<224x128xbf16, #tpu.memory_space<vmem>>, vector<72x128xbf16>
    %383 = tpu.concatenate %381, %382 in 1 : vector<72x128xbf16>, vector<72x128xbf16> -> vector<72x256xbf16>
    %c2_413 = arith.constant 2 : index
    %c0_414 = arith.constant 0 : index
    %c0_415 = arith.constant 0 : index
    %384 = vector.load %arg4[%c2_413, %c0_414, %c0_415] : memref<13x256x128xbf16, #tpu.memory_space<vmem>>, vector<1x256x128xbf16>
    %385 = vector.shape_cast %384 : vector<1x256x128xbf16> to vector<256x128xbf16>
    %cst_416 = arith.constant dense<0.000000e+00> : vector<72x128xf32>
    %386 = tpu.matmul %383, %385, %cst_416 {dimension_numbers = #tpu.dot_dimension_numbers<[1], [0], [0], [1], [0, 0, 1, 1], [], []>} : vector<72x256xbf16>, vector<256x128xbf16>, vector<72x128xf32> -> vector<72x128xf32>
    %387 = arith.addf %380, %386 : vector<72x128xf32>
    %c15 = arith.constant 15 : index
    %c0_417 = arith.constant 0 : index
    %388 = vector.load %arg14[%c15, %c0_417] : memref<224x128xbf16, #tpu.memory_space<vmem>>, vector<72x128xbf16>
    %c16 = arith.constant 16 : index
    %c0_418 = arith.constant 0 : index
    %389 = vector.load %arg14[%c16, %c0_418] : memref<224x128xbf16, #tpu.memory_space<vmem>>, vector<72x128xbf16>
    %390 = tpu.concatenate %388, %389 in 1 : vector<72x128xbf16>, vector<72x128xbf16> -> vector<72x256xbf16>
    %c3_419 = arith.constant 3 : index
    %c0_420 = arith.constant 0 : index
    %c0_421 = arith.constant 0 : index
    %391 = vector.load %arg4[%c3_419, %c0_420, %c0_421] : memref<13x256x128xbf16, #tpu.memory_space<vmem>>, vector<1x256x128xbf16>
    %392 = vector.shape_cast %391 : vector<1x256x128xbf16> to vector<256x128xbf16>
    %cst_422 = arith.constant dense<0.000000e+00> : vector<72x128xf32>
    %393 = tpu.matmul %390, %392, %cst_422 {dimension_numbers = #tpu.dot_dimension_numbers<[1], [0], [0], [1], [0, 0, 1, 1], [], []>} : vector<72x256xbf16>, vector<256x128xbf16>, vector<72x128xf32> -> vector<72x128xf32>
    %394 = arith.addf %387, %393 : vector<72x128xf32>
    %c17 = arith.constant 17 : index
    %c0_423 = arith.constant 0 : index
    %395 = vector.load %arg14[%c17, %c0_423] : memref<224x128xbf16, #tpu.memory_space<vmem>>, vector<72x128xbf16>
    %c18 = arith.constant 18 : index
    %c0_424 = arith.constant 0 : index
    %396 = vector.load %arg14[%c18, %c0_424] : memref<224x128xbf16, #tpu.memory_space<vmem>>, vector<72x128xbf16>
    %397 = tpu.concatenate %395, %396 in 1 : vector<72x128xbf16>, vector<72x128xbf16> -> vector<72x256xbf16>
    %c4_425 = arith.constant 4 : index
    %c0_426 = arith.constant 0 : index
    %c0_427 = arith.constant 0 : index
    %398 = vector.load %arg4[%c4_425, %c0_426, %c0_427] : memref<13x256x128xbf16, #tpu.memory_space<vmem>>, vector<1x256x128xbf16>
    %399 = vector.shape_cast %398 : vector<1x256x128xbf16> to vector<256x128xbf16>
    %cst_428 = arith.constant dense<0.000000e+00> : vector<72x128xf32>
    %400 = tpu.matmul %397, %399, %cst_428 {dimension_numbers = #tpu.dot_dimension_numbers<[1], [0], [0], [1], [0, 0, 1, 1], [], []>} : vector<72x256xbf16>, vector<256x128xbf16>, vector<72x128xf32> -> vector<72x128xf32>
    %401 = arith.addf %394, %400 : vector<72x128xf32>
    %c28_429 = arith.constant 28 : index
    %c0_430 = arith.constant 0 : index
    %402 = vector.load %arg14[%c28_429, %c0_430] : memref<224x128xbf16, #tpu.memory_space<vmem>>, vector<72x128xbf16>
    %c29 = arith.constant 29 : index
    %c0_431 = arith.constant 0 : index
    %403 = vector.load %arg14[%c29, %c0_431] : memref<224x128xbf16, #tpu.memory_space<vmem>>, vector<72x128xbf16>
    %404 = tpu.concatenate %402, %403 in 1 : vector<72x128xbf16>, vector<72x128xbf16> -> vector<72x256xbf16>
    %c5 = arith.constant 5 : index
    %c0_432 = arith.constant 0 : index
    %c0_433 = arith.constant 0 : index
    %405 = vector.load %arg4[%c5, %c0_432, %c0_433] : memref<13x256x128xbf16, #tpu.memory_space<vmem>>, vector<1x256x128xbf16>
    %406 = vector.shape_cast %405 : vector<1x256x128xbf16> to vector<256x128xbf16>
    %cst_434 = arith.constant dense<0.000000e+00> : vector<72x128xf32>
    %407 = tpu.matmul %404, %406, %cst_434 {dimension_numbers = #tpu.dot_dimension_numbers<[1], [0], [0], [1], [0, 0, 1, 1], [], []>} : vector<72x256xbf16>, vector<256x128xbf16>, vector<72x128xf32> -> vector<72x128xf32>
    %408 = arith.addf %401, %407 : vector<72x128xf32>
    %c30 = arith.constant 30 : index
    %c0_435 = arith.constant 0 : index
    %409 = vector.load %arg14[%c30, %c0_435] : memref<224x128xbf16, #tpu.memory_space<vmem>>, vector<72x128xbf16>
    %c31 = arith.constant 31 : index
    %c0_436 = arith.constant 0 : index
    %410 = vector.load %arg14[%c31, %c0_436] : memref<224x128xbf16, #tpu.memory_space<vmem>>, vector<72x128xbf16>
    %411 = tpu.concatenate %409, %410 in 1 : vector<72x128xbf16>, vector<72x128xbf16> -> vector<72x256xbf16>
    %c6 = arith.constant 6 : index
    %c0_437 = arith.constant 0 : index
    %c0_438 = arith.constant 0 : index
    %412 = vector.load %arg4[%c6, %c0_437, %c0_438] : memref<13x256x128xbf16, #tpu.memory_space<vmem>>, vector<1x256x128xbf16>
    %413 = vector.shape_cast %412 : vector<1x256x128xbf16> to vector<256x128xbf16>
    %cst_439 = arith.constant dense<0.000000e+00> : vector<72x128xf32>
    %414 = tpu.matmul %411, %413, %cst_439 {dimension_numbers = #tpu.dot_dimension_numbers<[1], [0], [0], [1], [0, 0, 1, 1], [], []>} : vector<72x256xbf16>, vector<256x128xbf16>, vector<72x128xf32> -> vector<72x128xf32>
    %415 = arith.addf %408, %414 : vector<72x128xf32>
    %c32_440 = arith.constant 32 : index
    %c0_441 = arith.constant 0 : index
    %416 = vector.load %arg14[%c32_440, %c0_441] : memref<224x128xbf16, #tpu.memory_space<vmem>>, vector<72x128xbf16>
    %c42_442 = arith.constant 42 : index
    %c0_443 = arith.constant 0 : index
    %417 = vector.load %arg14[%c42_442, %c0_443] : memref<224x128xbf16, #tpu.memory_space<vmem>>, vector<72x128xbf16>
    %418 = tpu.concatenate %416, %417 in 1 : vector<72x128xbf16>, vector<72x128xbf16> -> vector<72x256xbf16>
    %c7 = arith.constant 7 : index
    %c0_444 = arith.constant 0 : index
    %c0_445 = arith.constant 0 : index
    %419 = vector.load %arg4[%c7, %c0_444, %c0_445] : memref<13x256x128xbf16, #tpu.memory_space<vmem>>, vector<1x256x128xbf16>
    %420 = vector.shape_cast %419 : vector<1x256x128xbf16> to vector<256x128xbf16>
    %cst_446 = arith.constant dense<0.000000e+00> : vector<72x128xf32>
    %421 = tpu.matmul %418, %420, %cst_446 {dimension_numbers = #tpu.dot_dimension_numbers<[1], [0], [0], [1], [0, 0, 1, 1], [], []>} : vector<72x256xbf16>, vector<256x128xbf16>, vector<72x128xf32> -> vector<72x128xf32>
    %422 = arith.addf %415, %421 : vector<72x128xf32>
    %c43 = arith.constant 43 : index
    %c0_447 = arith.constant 0 : index
    %423 = vector.load %arg14[%c43, %c0_447] : memref<224x128xbf16, #tpu.memory_space<vmem>>, vector<72x128xbf16>
    %c44 = arith.constant 44 : index
    %c0_448 = arith.constant 0 : index
    %424 = vector.load %arg14[%c44, %c0_448] : memref<224x128xbf16, #tpu.memory_space<vmem>>, vector<72x128xbf16>
    %425 = tpu.concatenate %423, %424 in 1 : vector<72x128xbf16>, vector<72x128xbf16> -> vector<72x256xbf16>
    %c8 = arith.constant 8 : index
    %c0_449 = arith.constant 0 : index
    %c0_450 = arith.constant 0 : index
    %426 = vector.load %arg4[%c8, %c0_449, %c0_450] : memref<13x256x128xbf16, #tpu.memory_space<vmem>>, vector<1x256x128xbf16>
    %427 = vector.shape_cast %426 : vector<1x256x128xbf16> to vector<256x128xbf16>
    %cst_451 = arith.constant dense<0.000000e+00> : vector<72x128xf32>
    %428 = tpu.matmul %425, %427, %cst_451 {dimension_numbers = #tpu.dot_dimension_numbers<[1], [0], [0], [1], [0, 0, 1, 1], [], []>} : vector<72x256xbf16>, vector<256x128xbf16>, vector<72x128xf32> -> vector<72x128xf32>
    %429 = arith.addf %422, %428 : vector<72x128xf32>
    %c45 = arith.constant 45 : index
    %c0_452 = arith.constant 0 : index
    %430 = vector.load %arg14[%c45, %c0_452] : memref<224x128xbf16, #tpu.memory_space<vmem>>, vector<72x128xbf16>
    %c46 = arith.constant 46 : index
    %c0_453 = arith.constant 0 : index
    %431 = vector.load %arg14[%c46, %c0_453] : memref<224x128xbf16, #tpu.memory_space<vmem>>, vector<72x128xbf16>
    %432 = tpu.concatenate %430, %431 in 1 : vector<72x128xbf16>, vector<72x128xbf16> -> vector<72x256xbf16>
    %c9 = arith.constant 9 : index
    %c0_454 = arith.constant 0 : index
    %c0_455 = arith.constant 0 : index
    %433 = vector.load %arg4[%c9, %c0_454, %c0_455] : memref<13x256x128xbf16, #tpu.memory_space<vmem>>, vector<1x256x128xbf16>
    %434 = vector.shape_cast %433 : vector<1x256x128xbf16> to vector<256x128xbf16>
    %cst_456 = arith.constant dense<0.000000e+00> : vector<72x128xf32>
    %435 = tpu.matmul %432, %434, %cst_456 {dimension_numbers = #tpu.dot_dimension_numbers<[1], [0], [0], [1], [0, 0, 1, 1], [], []>} : vector<72x256xbf16>, vector<256x128xbf16>, vector<72x128xf32> -> vector<72x128xf32>
    %436 = arith.addf %429, %435 : vector<72x128xf32>
    %c56_457 = arith.constant 56 : index
    %c0_458 = arith.constant 0 : index
    %437 = vector.load %arg14[%c56_457, %c0_458] : memref<224x128xbf16, #tpu.memory_space<vmem>>, vector<72x128xbf16>
    %c57 = arith.constant 57 : index
    %c0_459 = arith.constant 0 : index
    %438 = vector.load %arg14[%c57, %c0_459] : memref<224x128xbf16, #tpu.memory_space<vmem>>, vector<72x128xbf16>
    %439 = tpu.concatenate %437, %438 in 1 : vector<72x128xbf16>, vector<72x128xbf16> -> vector<72x256xbf16>
    %c10 = arith.constant 10 : index
    %c0_460 = arith.constant 0 : index
    %c0_461 = arith.constant 0 : index
    %440 = vector.load %arg4[%c10, %c0_460, %c0_461] : memref<13x256x128xbf16, #tpu.memory_space<vmem>>, vector<1x256x128xbf16>
    %441 = vector.shape_cast %440 : vector<1x256x128xbf16> to vector<256x128xbf16>
    %cst_462 = arith.constant dense<0.000000e+00> : vector<72x128xf32>
    %442 = tpu.matmul %439, %441, %cst_462 {dimension_numbers = #tpu.dot_dimension_numbers<[1], [0], [0], [1], [0, 0, 1, 1], [], []>} : vector<72x256xbf16>, vector<256x128xbf16>, vector<72x128xf32> -> vector<72x128xf32>
    %443 = arith.addf %436, %442 : vector<72x128xf32>
    %c58 = arith.constant 58 : index
    %c0_463 = arith.constant 0 : index
    %444 = vector.load %arg14[%c58, %c0_463] : memref<224x128xbf16, #tpu.memory_space<vmem>>, vector<72x128xbf16>
    %c59 = arith.constant 59 : index
    %c0_464 = arith.constant 0 : index
    %445 = vector.load %arg14[%c59, %c0_464] : memref<224x128xbf16, #tpu.memory_space<vmem>>, vector<72x128xbf16>
    %446 = tpu.concatenate %444, %445 in 1 : vector<72x128xbf16>, vector<72x128xbf16> -> vector<72x256xbf16>
    %c11 = arith.constant 11 : index
    %c0_465 = arith.constant 0 : index
    %c0_466 = arith.constant 0 : index
    %447 = vector.load %arg4[%c11, %c0_465, %c0_466] : memref<13x256x128xbf16, #tpu.memory_space<vmem>>, vector<1x256x128xbf16>
    %448 = vector.shape_cast %447 : vector<1x256x128xbf16> to vector<256x128xbf16>
    %cst_467 = arith.constant dense<0.000000e+00> : vector<72x128xf32>
    %449 = tpu.matmul %446, %448, %cst_467 {dimension_numbers = #tpu.dot_dimension_numbers<[1], [0], [0], [1], [0, 0, 1, 1], [], []>} : vector<72x256xbf16>, vector<256x128xbf16>, vector<72x128xf32> -> vector<72x128xf32>
    %450 = arith.addf %443, %449 : vector<72x128xf32>
    %c60 = arith.constant 60 : index
    %c0_468 = arith.constant 0 : index
    %451 = vector.load %arg14[%c60, %c0_468] : memref<224x128xbf16, #tpu.memory_space<vmem>>, vector<72x128xbf16>
    %c60_469 = arith.constant 60 : index
    %c0_470 = arith.constant 0 : index
    %452 = vector.load %arg14[%c60_469, %c0_470] : memref<224x128xbf16, #tpu.memory_space<vmem>>, vector<72x128xbf16>
    %453 = tpu.concatenate %451, %452 in 1 : vector<72x128xbf16>, vector<72x128xbf16> -> vector<72x256xbf16>
    %c12 = arith.constant 12 : index
    %c0_471 = arith.constant 0 : index
    %c0_472 = arith.constant 0 : index
    %454 = vector.load %arg4[%c12, %c0_471, %c0_472] : memref<13x256x128xbf16, #tpu.memory_space<vmem>>, vector<1x256x128xbf16>
    %455 = vector.shape_cast %454 : vector<1x256x128xbf16> to vector<256x128xbf16>
    %cst_473 = arith.constant dense<0.000000e+00> : vector<72x128xf32>
    %456 = tpu.matmul %453, %455, %cst_473 {dimension_numbers = #tpu.dot_dimension_numbers<[1], [0], [0], [1], [0, 0, 1, 1], [], []>} : vector<72x256xbf16>, vector<256x128xbf16>, vector<72x128xf32> -> vector<72x128xf32>
    %457 = arith.addf %450, %456 : vector<72x128xf32>
    %458 = vector.broadcast %1 : vector<1x128xf32> to vector<72x128xf32>
    %459 = arith.addf %457, %458 : vector<72x128xf32>
    %cst_474 = arith.constant 0.000000e+00 : f32
    %460 = vector.broadcast %cst_474 : f32 to vector<72x128xf32>
    %461 = arith.maximumf %459, %460 : vector<72x128xf32>
    %c0_475 = arith.constant 0 : index
    %c0_476 = arith.constant 0 : index
    %462 = vector.load %arg15[%c0_475, %c0_476] : memref<144x128xf32, #tpu.memory_space<vmem>>, vector<72x128xf32>
    tpu.vector_store %arg15[%c0_475, %c0_476], %461 {strides = array<i32>} : memref<144x128xf32, #tpu.memory_space<vmem>>, vector<72x128xf32>,
    %c72 = arith.constant 72 : index
    %c0_477 = arith.constant 0 : index
    %463 = vector.load %arg14[%c72, %c0_477] : memref<224x128xbf16, #tpu.memory_space<vmem>>, vector<64x128xbf16>
    %c73 = arith.constant 73 : index
    %c0_478 = arith.constant 0 : index
    %464 = vector.load %arg14[%c73, %c0_478] : memref<224x128xbf16, #tpu.memory_space<vmem>>, vector<64x128xbf16>
    %465 = tpu.concatenate %463, %464 in 1 : vector<64x128xbf16>, vector<64x128xbf16> -> vector<64x256xbf16>
    %c0_479 = arith.constant 0 : index
    %c0_480 = arith.constant 0 : index
    %c0_481 = arith.constant 0 : index
    %466 = vector.load %arg4[%c0_479, %c0_480, %c0_481] : memref<13x256x128xbf16, #tpu.memory_space<vmem>>, vector<1x256x128xbf16>
    %467 = vector.shape_cast %466 : vector<1x256x128xbf16> to vector<256x128xbf16>
    %cst_482 = arith.constant dense<0.000000e+00> : vector<64x128xf32>
    %468 = tpu.matmul %465, %467, %cst_482 {dimension_numbers = #tpu.dot_dimension_numbers<[1], [0], [0], [1], [0, 0, 1, 1], [], []>} : vector<64x256xbf16>, vector<256x128xbf16>, vector<64x128xf32> -> vector<64x128xf32>
    %c74 = arith.constant 74 : index
    %c0_483 = arith.constant 0 : index
    %469 = vector.load %arg14[%c74, %c0_483] : memref<224x128xbf16, #tpu.memory_space<vmem>>, vector<64x128xbf16>
    %c75 = arith.constant 75 : index
    %c0_484 = arith.constant 0 : index
    %470 = vector.load %arg14[%c75, %c0_484] : memref<224x128xbf16, #tpu.memory_space<vmem>>, vector<64x128xbf16>
    %471 = tpu.concatenate %469, %470 in 1 : vector<64x128xbf16>, vector<64x128xbf16> -> vector<64x256xbf16>
    %c1_485 = arith.constant 1 : index
    %c0_486 = arith.constant 0 : index
    %c0_487 = arith.constant 0 : index
    %472 = vector.load %arg4[%c1_485, %c0_486, %c0_487] : memref<13x256x128xbf16, #tpu.memory_space<vmem>>, vector<1x256x128xbf16>
    %473 = vector.shape_cast %472 : vector<1x256x128xbf16> to vector<256x128xbf16>
    %cst_488 = arith.constant dense<0.000000e+00> : vector<64x128xf32>
    %474 = tpu.matmul %471, %473, %cst_488 {dimension_numbers = #tpu.dot_dimension_numbers<[1], [0], [0], [1], [0, 0, 1, 1], [], []>} : vector<64x256xbf16>, vector<256x128xbf16>, vector<64x128xf32> -> vector<64x128xf32>
    %475 = arith.addf %468, %474 : vector<64x128xf32>
    %c76 = arith.constant 76 : index
    %c0_489 = arith.constant 0 : index
    %476 = vector.load %arg14[%c76, %c0_489] : memref<224x128xbf16, #tpu.memory_space<vmem>>, vector<64x128xbf16>
    %c86 = arith.constant 86 : index
    %c0_490 = arith.constant 0 : index
    %477 = vector.load %arg14[%c86, %c0_490] : memref<224x128xbf16, #tpu.memory_space<vmem>>, vector<64x128xbf16>
    %478 = tpu.concatenate %476, %477 in 1 : vector<64x128xbf16>, vector<64x128xbf16> -> vector<64x256xbf16>
    %c2_491 = arith.constant 2 : index
    %c0_492 = arith.constant 0 : index
    %c0_493 = arith.constant 0 : index
    %479 = vector.load %arg4[%c2_491, %c0_492, %c0_493] : memref<13x256x128xbf16, #tpu.memory_space<vmem>>, vector<1x256x128xbf16>
    %480 = vector.shape_cast %479 : vector<1x256x128xbf16> to vector<256x128xbf16>
    %cst_494 = arith.constant dense<0.000000e+00> : vector<64x128xf32>
    %481 = tpu.matmul %478, %480, %cst_494 {dimension_numbers = #tpu.dot_dimension_numbers<[1], [0], [0], [1], [0, 0, 1, 1], [], []>} : vector<64x256xbf16>, vector<256x128xbf16>, vector<64x128xf32> -> vector<64x128xf32>
    %482 = arith.addf %475, %481 : vector<64x128xf32>
    %c87 = arith.constant 87 : index
    %c0_495 = arith.constant 0 : index
    %483 = vector.load %arg14[%c87, %c0_495] : memref<224x128xbf16, #tpu.memory_space<vmem>>, vector<64x128xbf16>
    %c88 = arith.constant 88 : index
    %c0_496 = arith.constant 0 : index
    %484 = vector.load %arg14[%c88, %c0_496] : memref<224x128xbf16, #tpu.memory_space<vmem>>, vector<64x128xbf16>
    %485 = tpu.concatenate %483, %484 in 1 : vector<64x128xbf16>, vector<64x128xbf16> -> vector<64x256xbf16>
    %c3_497 = arith.constant 3 : index
    %c0_498 = arith.constant 0 : index
    %c0_499 = arith.constant 0 : index
    %486 = vector.load %arg4[%c3_497, %c0_498, %c0_499] : memref<13x256x128xbf16, #tpu.memory_space<vmem>>, vector<1x256x128xbf16>
    %487 = vector.shape_cast %486 : vector<1x256x128xbf16> to vector<256x128xbf16>
    %cst_500 = arith.constant dense<0.000000e+00> : vector<64x128xf32>
    %488 = tpu.matmul %485, %487, %cst_500 {dimension_numbers = #tpu.dot_dimension_numbers<[1], [0], [0], [1], [0, 0, 1, 1], [], []>} : vector<64x256xbf16>, vector<256x128xbf16>, vector<64x128xf32> -> vector<64x128xf32>
    %489 = arith.addf %482, %488 : vector<64x128xf32>
    %c89 = arith.constant 89 : index
    %c0_501 = arith.constant 0 : index
    %490 = vector.load %arg14[%c89, %c0_501] : memref<224x128xbf16, #tpu.memory_space<vmem>>, vector<64x128xbf16>
    %c90 = arith.constant 90 : index
    %c0_502 = arith.constant 0 : index
    %491 = vector.load %arg14[%c90, %c0_502] : memref<224x128xbf16, #tpu.memory_space<vmem>>, vector<64x128xbf16>
    %492 = tpu.concatenate %490, %491 in 1 : vector<64x128xbf16>, vector<64x128xbf16> -> vector<64x256xbf16>
    %c4_503 = arith.constant 4 : index
    %c0_504 = arith.constant 0 : index
    %c0_505 = arith.constant 0 : index
    %493 = vector.load %arg4[%c4_503, %c0_504, %c0_505] : memref<13x256x128xbf16, #tpu.memory_space<vmem>>, vector<1x256x128xbf16>
    %494 = vector.shape_cast %493 : vector<1x256x128xbf16> to vector<256x128xbf16>
    %cst_506 = arith.constant dense<0.000000e+00> : vector<64x128xf32>
    %495 = tpu.matmul %492, %494, %cst_506 {dimension_numbers = #tpu.dot_dimension_numbers<[1], [0], [0], [1], [0, 0, 1, 1], [], []>} : vector<64x256xbf16>, vector<256x128xbf16>, vector<64x128xf32> -> vector<64x128xf32>
    %496 = arith.addf %489, %495 : vector<64x128xf32>
    %c100 = arith.constant 100 : index
    %c0_507 = arith.constant 0 : index
    %497 = vector.load %arg14[%c100, %c0_507] : memref<224x128xbf16, #tpu.memory_space<vmem>>, vector<64x128xbf16>
    %c101 = arith.constant 101 : index
    %c0_508 = arith.constant 0 : index
    %498 = vector.load %arg14[%c101, %c0_508] : memref<224x128xbf16, #tpu.memory_space<vmem>>, vector<64x128xbf16>
    %499 = tpu.concatenate %497, %498 in 1 : vector<64x128xbf16>, vector<64x128xbf16> -> vector<64x256xbf16>
    %c5_509 = arith.constant 5 : index
    %c0_510 = arith.constant 0 : index
    %c0_511 = arith.constant 0 : index
    %500 = vector.load %arg4[%c5_509, %c0_510, %c0_511] : memref<13x256x128xbf16, #tpu.memory_space<vmem>>, vector<1x256x128xbf16>
    %501 = vector.shape_cast %500 : vector<1x256x128xbf16> to vector<256x128xbf16>
    %cst_512 = arith.constant dense<0.000000e+00> : vector<64x128xf32>
    %502 = tpu.matmul %499, %501, %cst_512 {dimension_numbers = #tpu.dot_dimension_numbers<[1], [0], [0], [1], [0, 0, 1, 1], [], []>} : vector<64x256xbf16>, vector<256x128xbf16>, vector<64x128xf32> -> vector<64x128xf32>
    %503 = arith.addf %496, %502 : vector<64x128xf32>
    %c102 = arith.constant 102 : index
    %c0_513 = arith.constant 0 : index
    %504 = vector.load %arg14[%c102, %c0_513] : memref<224x128xbf16, #tpu.memory_space<vmem>>, vector<64x128xbf16>
    %c103 = arith.constant 103 : index
    %c0_514 = arith.constant 0 : index
    %505 = vector.load %arg14[%c103, %c0_514] : memref<224x128xbf16, #tpu.memory_space<vmem>>, vector<64x128xbf16>
    %506 = tpu.concatenate %504, %505 in 1 : vector<64x128xbf16>, vector<64x128xbf16> -> vector<64x256xbf16>
    %c6_515 = arith.constant 6 : index
    %c0_516 = arith.constant 0 : index
    %c0_517 = arith.constant 0 : index
    %507 = vector.load %arg4[%c6_515, %c0_516, %c0_517] : memref<13x256x128xbf16, #tpu.memory_space<vmem>>, vector<1x256x128xbf16>
    %508 = vector.shape_cast %507 : vector<1x256x128xbf16> to vector<256x128xbf16>
    %cst_518 = arith.constant dense<0.000000e+00> : vector<64x128xf32>
    %509 = tpu.matmul %506, %508, %cst_518 {dimension_numbers = #tpu.dot_dimension_numbers<[1], [0], [0], [1], [0, 0, 1, 1], [], []>} : vector<64x256xbf16>, vector<256x128xbf16>, vector<64x128xf32> -> vector<64x128xf32>
    %510 = arith.addf %503, %509 : vector<64x128xf32>
    %c104 = arith.constant 104 : index
    %c0_519 = arith.constant 0 : index
    %511 = vector.load %arg14[%c104, %c0_519] : memref<224x128xbf16, #tpu.memory_space<vmem>>, vector<64x128xbf16>
    %c114 = arith.constant 114 : index
    %c0_520 = arith.constant 0 : index
    %512 = vector.load %arg14[%c114, %c0_520] : memref<224x128xbf16, #tpu.memory_space<vmem>>, vector<64x128xbf16>
    %513 = tpu.concatenate %511, %512 in 1 : vector<64x128xbf16>, vector<64x128xbf16> -> vector<64x256xbf16>
    %c7_521 = arith.constant 7 : index
    %c0_522 = arith.constant 0 : index
    %c0_523 = arith.constant 0 : index
    %514 = vector.load %arg4[%c7_521, %c0_522, %c0_523] : memref<13x256x128xbf16, #tpu.memory_space<vmem>>, vector<1x256x128xbf16>
    %515 = vector.shape_cast %514 : vector<1x256x128xbf16> to vector<256x128xbf16>
    %cst_524 = arith.constant dense<0.000000e+00> : vector<64x128xf32>
    %516 = tpu.matmul %513, %515, %cst_524 {dimension_numbers = #tpu.dot_dimension_numbers<[1], [0], [0], [1], [0, 0, 1, 1], [], []>} : vector<64x256xbf16>, vector<256x128xbf16>, vector<64x128xf32> -> vector<64x128xf32>
    %517 = arith.addf %510, %516 : vector<64x128xf32>
    %c115 = arith.constant 115 : index
    %c0_525 = arith.constant 0 : index
    %518 = vector.load %arg14[%c115, %c0_525] : memref<224x128xbf16, #tpu.memory_space<vmem>>, vector<64x128xbf16>
    %c116 = arith.constant 116 : index
    %c0_526 = arith.constant 0 : index
    %519 = vector.load %arg14[%c116, %c0_526] : memref<224x128xbf16, #tpu.memory_space<vmem>>, vector<64x128xbf16>
    %520 = tpu.concatenate %518, %519 in 1 : vector<64x128xbf16>, vector<64x128xbf16> -> vector<64x256xbf16>
    %c8_527 = arith.constant 8 : index
    %c0_528 = arith.constant 0 : index
    %c0_529 = arith.constant 0 : index
    %521 = vector.load %arg4[%c8_527, %c0_528, %c0_529] : memref<13x256x128xbf16, #tpu.memory_space<vmem>>, vector<1x256x128xbf16>
    %522 = vector.shape_cast %521 : vector<1x256x128xbf16> to vector<256x128xbf16>
    %cst_530 = arith.constant dense<0.000000e+00> : vector<64x128xf32>
    %523 = tpu.matmul %520, %522, %cst_530 {dimension_numbers = #tpu.dot_dimension_numbers<[1], [0], [0], [1], [0, 0, 1, 1], [], []>} : vector<64x256xbf16>, vector<256x128xbf16>, vector<64x128xf32> -> vector<64x128xf32>
    %524 = arith.addf %517, %523 : vector<64x128xf32>
    %c117 = arith.constant 117 : index
    %c0_531 = arith.constant 0 : index
    %525 = vector.load %arg14[%c117, %c0_531] : memref<224x128xbf16, #tpu.memory_space<vmem>>, vector<64x128xbf16>
    %c118 = arith.constant 118 : index
    %c0_532 = arith.constant 0 : index
    %526 = vector.load %arg14[%c118, %c0_532] : memref<224x128xbf16, #tpu.memory_space<vmem>>, vector<64x128xbf16>
    %527 = tpu.concatenate %525, %526 in 1 : vector<64x128xbf16>, vector<64x128xbf16> -> vector<64x256xbf16>
    %c9_533 = arith.constant 9 : index
    %c0_534 = arith.constant 0 : index
    %c0_535 = arith.constant 0 : index
    %528 = vector.load %arg4[%c9_533, %c0_534, %c0_535] : memref<13x256x128xbf16, #tpu.memory_space<vmem>>, vector<1x256x128xbf16>
    %529 = vector.shape_cast %528 : vector<1x256x128xbf16> to vector<256x128xbf16>
    %cst_536 = arith.constant dense<0.000000e+00> : vector<64x128xf32>
    %530 = tpu.matmul %527, %529, %cst_536 {dimension_numbers = #tpu.dot_dimension_numbers<[1], [0], [0], [1], [0, 0, 1, 1], [], []>} : vector<64x256xbf16>, vector<256x128xbf16>, vector<64x128xf32> -> vector<64x128xf32>
    %531 = arith.addf %524, %530 : vector<64x128xf32>
    %c128_537 = arith.constant 128 : index
    %c0_538 = arith.constant 0 : index
    %532 = vector.load %arg14[%c128_537, %c0_538] : memref<224x128xbf16, #tpu.memory_space<vmem>>, vector<64x128xbf16>
    %c129 = arith.constant 129 : index
    %c0_539 = arith.constant 0 : index
    %533 = vector.load %arg14[%c129, %c0_539] : memref<224x128xbf16, #tpu.memory_space<vmem>>, vector<64x128xbf16>
    %534 = tpu.concatenate %532, %533 in 1 : vector<64x128xbf16>, vector<64x128xbf16> -> vector<64x256xbf16>
    %c10_540 = arith.constant 10 : index
    %c0_541 = arith.constant 0 : index
    %c0_542 = arith.constant 0 : index
    %535 = vector.load %arg4[%c10_540, %c0_541, %c0_542] : memref<13x256x128xbf16, #tpu.memory_space<vmem>>, vector<1x256x128xbf16>
    %536 = vector.shape_cast %535 : vector<1x256x128xbf16> to vector<256x128xbf16>
    %cst_543 = arith.constant dense<0.000000e+00> : vector<64x128xf32>
    %537 = tpu.matmul %534, %536, %cst_543 {dimension_numbers = #tpu.dot_dimension_numbers<[1], [0], [0], [1], [0, 0, 1, 1], [], []>} : vector<64x256xbf16>, vector<256x128xbf16>, vector<64x128xf32> -> vector<64x128xf32>
    %538 = arith.addf %531, %537 : vector<64x128xf32>
    %c130 = arith.constant 130 : index
    %c0_544 = arith.constant 0 : index
    %539 = vector.load %arg14[%c130, %c0_544] : memref<224x128xbf16, #tpu.memory_space<vmem>>, vector<64x128xbf16>
    %c131 = arith.constant 131 : index
    %c0_545 = arith.constant 0 : index
    %540 = vector.load %arg14[%c131, %c0_545] : memref<224x128xbf16, #tpu.memory_space<vmem>>, vector<64x128xbf16>
    %541 = tpu.concatenate %539, %540 in 1 : vector<64x128xbf16>, vector<64x128xbf16> -> vector<64x256xbf16>
    %c11_546 = arith.constant 11 : index
    %c0_547 = arith.constant 0 : index
    %c0_548 = arith.constant 0 : index
    %542 = vector.load %arg4[%c11_546, %c0_547, %c0_548] : memref<13x256x128xbf16, #tpu.memory_space<vmem>>, vector<1x256x128xbf16>
    %543 = vector.shape_cast %542 : vector<1x256x128xbf16> to vector<256x128xbf16>
    %cst_549 = arith.constant dense<0.000000e+00> : vector<64x128xf32>
    %544 = tpu.matmul %541, %543, %cst_549 {dimension_numbers = #tpu.dot_dimension_numbers<[1], [0], [0], [1], [0, 0, 1, 1], [], []>} : vector<64x256xbf16>, vector<256x128xbf16>, vector<64x128xf32> -> vector<64x128xf32>
    %545 = arith.addf %538, %544 : vector<64x128xf32>
    %c132 = arith.constant 132 : index
    %c0_550 = arith.constant 0 : index
    %546 = vector.load %arg14[%c132, %c0_550] : memref<224x128xbf16, #tpu.memory_space<vmem>>, vector<64x128xbf16>
    %c132_551 = arith.constant 132 : index
    %c0_552 = arith.constant 0 : index
    %547 = vector.load %arg14[%c132_551, %c0_552] : memref<224x128xbf16, #tpu.memory_space<vmem>>, vector<64x128xbf16>
    %548 = tpu.concatenate %546, %547 in 1 : vector<64x128xbf16>, vector<64x128xbf16> -> vector<64x256xbf16>
    %c12_553 = arith.constant 12 : index
    %c0_554 = arith.constant 0 : index
    %c0_555 = arith.constant 0 : index
    %549 = vector.load %arg4[%c12_553, %c0_554, %c0_555] : memref<13x256x128xbf16, #tpu.memory_space<vmem>>, vector<1x256x128xbf16>
    %550 = vector.shape_cast %549 : vector<1x256x128xbf16> to vector<256x128xbf16>
    %cst_556 = arith.constant dense<0.000000e+00> : vector<64x128xf32>
    %551 = tpu.matmul %548, %550, %cst_556 {dimension_numbers = #tpu.dot_dimension_numbers<[1], [0], [0], [1], [0, 0, 1, 1], [], []>} : vector<64x256xbf16>, vector<256x128xbf16>, vector<64x128xf32> -> vector<64x128xf32>
    %552 = arith.addf %545, %551 : vector<64x128xf32>
    %553 = vector.broadcast %1 : vector<1x128xf32> to vector<64x128xf32>
    %554 = arith.addf %552, %553 : vector<64x128xf32>
    %cst_557 = arith.constant 0.000000e+00 : f32
    %555 = vector.broadcast %cst_557 : f32 to vector<64x128xf32>
    %556 = arith.maximumf %554, %555 : vector<64x128xf32>
    %c72_558 = arith.constant 72 : index
    %c0_559 = arith.constant 0 : index
    %557 = vector.load %arg15[%c72_558, %c0_559] : memref<144x128xf32, #tpu.memory_space<vmem>>, vector<64x128xf32>
    tpu.vector_store %arg15[%c72_558, %c0_559], %556 {strides = array<i32>} : memref<144x128xf32, #tpu.memory_space<vmem>>, vector<64x128xf32>,
    %c0_560 = arith.constant 0 : index
    %c0_561 = arith.constant 0 : index
    %558 = vector.load %arg15[%c0_560, %c0_561] : memref<144x128xf32, #tpu.memory_space<vmem>>, vector<14x128xf32>
    %c14_562 = arith.constant 14 : index
    %c0_563 = arith.constant 0 : index
    %559 = vector.load %arg15[%c14_562, %c0_563] : memref<144x128xf32, #tpu.memory_space<vmem>>, vector<14x128xf32>
    %560 = arith.maximumf %558, %559 : vector<14x128xf32>
    %c0_564 = arith.constant 0 : index
    %c0_565 = arith.constant 0 : index
    %561 = vector.load %arg17[%c0_564, %c0_565] : memref<32x128xf32, #tpu.memory_space<vmem>>, vector<14x128xf32>
    tpu.vector_store %arg17[%c0_564, %c0_565], %560 {strides = array<i32>} : memref<32x128xf32, #tpu.memory_space<vmem>>, vector<14x128xf32>,
    %c0_566 = arith.constant 0 : index
    %c0_567 = arith.constant 0 : index
    %562 = tpu.strided_load %arg17[%c0_566, %c0_567] {strides = array<i32: 2, 1>} : memref<32x128xf32, #tpu.memory_space<vmem>>, vector<5x128xf32>
    %c1_568 = arith.constant 1 : index
    %c0_569 = arith.constant 0 : index
    %563 = tpu.strided_load %arg17[%c1_568, %c0_569] {strides = array<i32: 2, 1>} : memref<32x128xf32, #tpu.memory_space<vmem>>, vector<5x128xf32>
    %564 = arith.maximumf %562, %563 : vector<5x128xf32>
    %c0_570 = arith.constant 0 : index
    %c0_571 = arith.constant 0 : index
    %565 = vector.load %arg16[%c0_570, %c0_571] : memref<32x128xf32, #tpu.memory_space<vmem>>, vector<5x128xf32>
    tpu.vector_store %arg16[%c0_570, %c0_571], %564 {strides = array<i32>} : memref<32x128xf32, #tpu.memory_space<vmem>>, vector<5x128xf32>,
    %c28_572 = arith.constant 28 : index
    %c0_573 = arith.constant 0 : index
    %566 = vector.load %arg15[%c28_572, %c0_573] : memref<144x128xf32, #tpu.memory_space<vmem>>, vector<14x128xf32>
    %c42_574 = arith.constant 42 : index
    %c0_575 = arith.constant 0 : index
    %567 = vector.load %arg15[%c42_574, %c0_575] : memref<144x128xf32, #tpu.memory_space<vmem>>, vector<14x128xf32>
    %568 = arith.maximumf %566, %567 : vector<14x128xf32>
    %c0_576 = arith.constant 0 : index
    %c0_577 = arith.constant 0 : index
    %569 = vector.load %arg17[%c0_576, %c0_577] : memref<32x128xf32, #tpu.memory_space<vmem>>, vector<14x128xf32>
    tpu.vector_store %arg17[%c0_576, %c0_577], %568 {strides = array<i32>} : memref<32x128xf32, #tpu.memory_space<vmem>>, vector<14x128xf32>,
    %c0_578 = arith.constant 0 : index
    %c0_579 = arith.constant 0 : index
    %570 = tpu.strided_load %arg17[%c0_578, %c0_579] {strides = array<i32: 2, 1>} : memref<32x128xf32, #tpu.memory_space<vmem>>, vector<5x128xf32>
    %c1_580 = arith.constant 1 : index
    %c0_581 = arith.constant 0 : index
    %571 = tpu.strided_load %arg17[%c1_580, %c0_581] {strides = array<i32: 2, 1>} : memref<32x128xf32, #tpu.memory_space<vmem>>, vector<5x128xf32>
    %572 = arith.maximumf %570, %571 : vector<5x128xf32>
    %c5_582 = arith.constant 5 : index
    %c0_583 = arith.constant 0 : index
    %573 = vector.load %arg16[%c5_582, %c0_583] : memref<32x128xf32, #tpu.memory_space<vmem>>, vector<5x128xf32>
    tpu.vector_store %arg16[%c5_582, %c0_583], %572 {strides = array<i32>} : memref<32x128xf32, #tpu.memory_space<vmem>>, vector<5x128xf32>,
    %c56_584 = arith.constant 56 : index
    %c0_585 = arith.constant 0 : index
    %574 = vector.load %arg15[%c56_584, %c0_585] : memref<144x128xf32, #tpu.memory_space<vmem>>, vector<14x128xf32>
    %c70_586 = arith.constant 70 : index
    %c0_587 = arith.constant 0 : index
    %575 = vector.load %arg15[%c70_586, %c0_587] : memref<144x128xf32, #tpu.memory_space<vmem>>, vector<14x128xf32>
    %576 = arith.maximumf %574, %575 : vector<14x128xf32>
    %c0_588 = arith.constant 0 : index
    %c0_589 = arith.constant 0 : index
    %577 = vector.load %arg17[%c0_588, %c0_589] : memref<32x128xf32, #tpu.memory_space<vmem>>, vector<14x128xf32>
    tpu.vector_store %arg17[%c0_588, %c0_589], %576 {strides = array<i32>} : memref<32x128xf32, #tpu.memory_space<vmem>>, vector<14x128xf32>,
    %c0_590 = arith.constant 0 : index
    %c0_591 = arith.constant 0 : index
    %578 = tpu.strided_load %arg17[%c0_590, %c0_591] {strides = array<i32: 2, 1>} : memref<32x128xf32, #tpu.memory_space<vmem>>, vector<5x128xf32>
    %c1_592 = arith.constant 1 : index
    %c0_593 = arith.constant 0 : index
    %579 = tpu.strided_load %arg17[%c1_592, %c0_593] {strides = array<i32: 2, 1>} : memref<32x128xf32, #tpu.memory_space<vmem>>, vector<5x128xf32>
    %580 = arith.maximumf %578, %579 : vector<5x128xf32>
    %c10_594 = arith.constant 10 : index
    %c0_595 = arith.constant 0 : index
    %581 = vector.load %arg16[%c10_594, %c0_595] : memref<32x128xf32, #tpu.memory_space<vmem>>, vector<5x128xf32>
    tpu.vector_store %arg16[%c10_594, %c0_595], %580 {strides = array<i32>} : memref<32x128xf32, #tpu.memory_space<vmem>>, vector<5x128xf32>,
    %c84_596 = arith.constant 84 : index
    %c0_597 = arith.constant 0 : index
    %582 = vector.load %arg15[%c84_596, %c0_597] : memref<144x128xf32, #tpu.memory_space<vmem>>, vector<14x128xf32>
    %c98_598 = arith.constant 98 : index
    %c0_599 = arith.constant 0 : index
    %583 = vector.load %arg15[%c98_598, %c0_599] : memref<144x128xf32, #tpu.memory_space<vmem>>, vector<14x128xf32>
    %584 = arith.maximumf %582, %583 : vector<14x128xf32>
    %c0_600 = arith.constant 0 : index
    %c0_601 = arith.constant 0 : index
    %585 = vector.load %arg17[%c0_600, %c0_601] : memref<32x128xf32, #tpu.memory_space<vmem>>, vector<14x128xf32>
    tpu.vector_store %arg17[%c0_600, %c0_601], %584 {strides = array<i32>} : memref<32x128xf32, #tpu.memory_space<vmem>>, vector<14x128xf32>,
    %c0_602 = arith.constant 0 : index
    %c0_603 = arith.constant 0 : index
    %586 = tpu.strided_load %arg17[%c0_602, %c0_603] {strides = array<i32: 2, 1>} : memref<32x128xf32, #tpu.memory_space<vmem>>, vector<5x128xf32>
    %c1_604 = arith.constant 1 : index
    %c0_605 = arith.constant 0 : index
    %587 = tpu.strided_load %arg17[%c1_604, %c0_605] {strides = array<i32: 2, 1>} : memref<32x128xf32, #tpu.memory_space<vmem>>, vector<5x128xf32>
    %588 = arith.maximumf %586, %587 : vector<5x128xf32>
    %c15_606 = arith.constant 15 : index
    %c0_607 = arith.constant 0 : index
    %589 = vector.load %arg16[%c15_606, %c0_607] : memref<32x128xf32, #tpu.memory_space<vmem>>, vector<5x128xf32>
    tpu.vector_store %arg16[%c15_606, %c0_607], %588 {strides = array<i32>} : memref<32x128xf32, #tpu.memory_space<vmem>>, vector<5x128xf32>,
    %c112_608 = arith.constant 112 : index
    %c0_609 = arith.constant 0 : index
    %590 = vector.load %arg15[%c112_608, %c0_609] : memref<144x128xf32, #tpu.memory_space<vmem>>, vector<14x128xf32>
    %c126_610 = arith.constant 126 : index
    %c0_611 = arith.constant 0 : index
    %591 = vector.load %arg15[%c126_610, %c0_611] : memref<144x128xf32, #tpu.memory_space<vmem>>, vector<14x128xf32>
    %592 = arith.maximumf %590, %591 : vector<14x128xf32>
    %c0_612 = arith.constant 0 : index
    %c0_613 = arith.constant 0 : index
    %593 = vector.load %arg17[%c0_612, %c0_613] : memref<32x128xf32, #tpu.memory_space<vmem>>, vector<14x128xf32>
    tpu.vector_store %arg17[%c0_612, %c0_613], %592 {strides = array<i32>} : memref<32x128xf32, #tpu.memory_space<vmem>>, vector<14x128xf32>,
    %c0_614 = arith.constant 0 : index
    %c0_615 = arith.constant 0 : index
    %594 = tpu.strided_load %arg17[%c0_614, %c0_615] {strides = array<i32: 2, 1>} : memref<32x128xf32, #tpu.memory_space<vmem>>, vector<5x128xf32>
    %c1_616 = arith.constant 1 : index
    %c0_617 = arith.constant 0 : index
    %595 = tpu.strided_load %arg17[%c1_616, %c0_617] {strides = array<i32: 2, 1>} : memref<32x128xf32, #tpu.memory_space<vmem>>, vector<5x128xf32>
    %596 = arith.maximumf %594, %595 : vector<5x128xf32>
    %c20 = arith.constant 20 : index
    %c0_618 = arith.constant 0 : index
    %597 = vector.load %arg16[%c20, %c0_618] : memref<32x128xf32, #tpu.memory_space<vmem>>, vector<5x128xf32>
    tpu.vector_store %arg16[%c20, %c0_618], %596 {strides = array<i32>} : memref<32x128xf32, #tpu.memory_space<vmem>>, vector<5x128xf32>,
    %c0_619 = arith.constant 0 : index
    %c0_620 = arith.constant 0 : index
    %598 = tpu.strided_load %arg16[%c0_619, %c0_620] {strides = array<i32: 32, 1>} : memref<32x128xf32, #tpu.memory_space<vmem>>, vector<1x16xf32>
    %599 = arith.truncf %598 : vector<1x16xf32> to vector<1x16xbf16>
    %c0_621 = arith.constant 0 : index
    %c0_622 = arith.constant 0 : index
    %c0_623 = arith.constant 0 : index
    %600 = vector.load %arg6[%c0_621, %c0_622, %c0_623] : memref<25x16x128xbf16, #tpu.memory_space<vmem>>, vector<1x16x128xbf16>
    %601 = vector.shape_cast %600 : vector<1x16x128xbf16> to vector<16x128xbf16>
    %cst_624 = arith.constant dense<0.000000e+00> : vector<1x128xf32>
    %602 = tpu.matmul %599, %601, %cst_624 {dimension_numbers = #tpu.dot_dimension_numbers<[1], [0], [0], [1], [0, 0, 1, 1], [], []>} : vector<1x16xbf16>, vector<16x128xbf16>, vector<1x128xf32> -> vector<1x128xf32>
    %c1_625 = arith.constant 1 : index
    %c0_626 = arith.constant 0 : index
    %603 = tpu.strided_load %arg16[%c1_625, %c0_626] {strides = array<i32: 32, 1>} : memref<32x128xf32, #tpu.memory_space<vmem>>, vector<1x16xf32>
    %604 = arith.truncf %603 : vector<1x16xf32> to vector<1x16xbf16>
    %c1_627 = arith.constant 1 : index
    %c0_628 = arith.constant 0 : index
    %c0_629 = arith.constant 0 : index
    %605 = vector.load %arg6[%c1_627, %c0_628, %c0_629] : memref<25x16x128xbf16, #tpu.memory_space<vmem>>, vector<1x16x128xbf16>
    %606 = vector.shape_cast %605 : vector<1x16x128xbf16> to vector<16x128xbf16>
    %cst_630 = arith.constant dense<0.000000e+00> : vector<1x128xf32>
    %607 = tpu.matmul %604, %606, %cst_630 {dimension_numbers = #tpu.dot_dimension_numbers<[1], [0], [0], [1], [0, 0, 1, 1], [], []>} : vector<1x16xbf16>, vector<16x128xbf16>, vector<1x128xf32> -> vector<1x128xf32>
    %608 = arith.addf %602, %607 : vector<1x128xf32>
    %c2_631 = arith.constant 2 : index
    %c0_632 = arith.constant 0 : index
    %609 = tpu.strided_load %arg16[%c2_631, %c0_632] {strides = array<i32: 32, 1>} : memref<32x128xf32, #tpu.memory_space<vmem>>, vector<1x16xf32>
    %610 = arith.truncf %609 : vector<1x16xf32> to vector<1x16xbf16>
    %c2_633 = arith.constant 2 : index
    %c0_634 = arith.constant 0 : index
    %c0_635 = arith.constant 0 : index
    %611 = vector.load %arg6[%c2_633, %c0_634, %c0_635] : memref<25x16x128xbf16, #tpu.memory_space<vmem>>, vector<1x16x128xbf16>
    %612 = vector.shape_cast %611 : vector<1x16x128xbf16> to vector<16x128xbf16>
    %cst_636 = arith.constant dense<0.000000e+00> : vector<1x128xf32>
    %613 = tpu.matmul %610, %612, %cst_636 {dimension_numbers = #tpu.dot_dimension_numbers<[1], [0], [0], [1], [0, 0, 1, 1], [], []>} : vector<1x16xbf16>, vector<16x128xbf16>, vector<1x128xf32> -> vector<1x128xf32>
    %614 = arith.addf %608, %613 : vector<1x128xf32>
    %c3_637 = arith.constant 3 : index
    %c0_638 = arith.constant 0 : index
    %615 = tpu.strided_load %arg16[%c3_637, %c0_638] {strides = array<i32: 32, 1>} : memref<32x128xf32, #tpu.memory_space<vmem>>, vector<1x16xf32>
    %616 = arith.truncf %615 : vector<1x16xf32> to vector<1x16xbf16>
    %c3_639 = arith.constant 3 : index
    %c0_640 = arith.constant 0 : index
    %c0_641 = arith.constant 0 : index
    %617 = vector.load %arg6[%c3_639, %c0_640, %c0_641] : memref<25x16x128xbf16, #tpu.memory_space<vmem>>, vector<1x16x128xbf16>
    %618 = vector.shape_cast %617 : vector<1x16x128xbf16> to vector<16x128xbf16>
    %cst_642 = arith.constant dense<0.000000e+00> : vector<1x128xf32>
    %619 = tpu.matmul %616, %618, %cst_642 {dimension_numbers = #tpu.dot_dimension_numbers<[1], [0], [0], [1], [0, 0, 1, 1], [], []>} : vector<1x16xbf16>, vector<16x128xbf16>, vector<1x128xf32> -> vector<1x128xf32>
    %620 = arith.addf %614, %619 : vector<1x128xf32>
    %c4_643 = arith.constant 4 : index
    %c0_644 = arith.constant 0 : index
    %621 = tpu.strided_load %arg16[%c4_643, %c0_644] {strides = array<i32: 32, 1>} : memref<32x128xf32, #tpu.memory_space<vmem>>, vector<1x16xf32>
    %622 = arith.truncf %621 : vector<1x16xf32> to vector<1x16xbf16>
    %c4_645 = arith.constant 4 : index
    %c0_646 = arith.constant 0 : index
    %c0_647 = arith.constant 0 : index
    %623 = vector.load %arg6[%c4_645, %c0_646, %c0_647] : memref<25x16x128xbf16, #tpu.memory_space<vmem>>, vector<1x16x128xbf16>
    %624 = vector.shape_cast %623 : vector<1x16x128xbf16> to vector<16x128xbf16>
    %cst_648 = arith.constant dense<0.000000e+00> : vector<1x128xf32>
    %625 = tpu.matmul %622, %624, %cst_648 {dimension_numbers = #tpu.dot_dimension_numbers<[1], [0], [0], [1], [0, 0, 1, 1], [], []>} : vector<1x16xbf16>, vector<16x128xbf16>, vector<1x128xf32> -> vector<1x128xf32>
    %626 = arith.addf %620, %625 : vector<1x128xf32>
    %c5_649 = arith.constant 5 : index
    %c0_650 = arith.constant 0 : index
    %627 = tpu.strided_load %arg16[%c5_649, %c0_650] {strides = array<i32: 32, 1>} : memref<32x128xf32, #tpu.memory_space<vmem>>, vector<1x16xf32>
    %628 = arith.truncf %627 : vector<1x16xf32> to vector<1x16xbf16>
    %c5_651 = arith.constant 5 : index
    %c0_652 = arith.constant 0 : index
    %c0_653 = arith.constant 0 : index
    %629 = vector.load %arg6[%c5_651, %c0_652, %c0_653] : memref<25x16x128xbf16, #tpu.memory_space<vmem>>, vector<1x16x128xbf16>
    %630 = vector.shape_cast %629 : vector<1x16x128xbf16> to vector<16x128xbf16>
    %cst_654 = arith.constant dense<0.000000e+00> : vector<1x128xf32>
    %631 = tpu.matmul %628, %630, %cst_654 {dimension_numbers = #tpu.dot_dimension_numbers<[1], [0], [0], [1], [0, 0, 1, 1], [], []>} : vector<1x16xbf16>, vector<16x128xbf16>, vector<1x128xf32> -> vector<1x128xf32>
    %632 = arith.addf %626, %631 : vector<1x128xf32>
    %c6_655 = arith.constant 6 : index
    %c0_656 = arith.constant 0 : index
    %633 = tpu.strided_load %arg16[%c6_655, %c0_656] {strides = array<i32: 32, 1>} : memref<32x128xf32, #tpu.memory_space<vmem>>, vector<1x16xf32>
    %634 = arith.truncf %633 : vector<1x16xf32> to vector<1x16xbf16>
    %c6_657 = arith.constant 6 : index
    %c0_658 = arith.constant 0 : index
    %c0_659 = arith.constant 0 : index
    %635 = vector.load %arg6[%c6_657, %c0_658, %c0_659] : memref<25x16x128xbf16, #tpu.memory_space<vmem>>, vector<1x16x128xbf16>
    %636 = vector.shape_cast %635 : vector<1x16x128xbf16> to vector<16x128xbf16>
    %cst_660 = arith.constant dense<0.000000e+00> : vector<1x128xf32>
    %637 = tpu.matmul %634, %636, %cst_660 {dimension_numbers = #tpu.dot_dimension_numbers<[1], [0], [0], [1], [0, 0, 1, 1], [], []>} : vector<1x16xbf16>, vector<16x128xbf16>, vector<1x128xf32> -> vector<1x128xf32>
    %638 = arith.addf %632, %637 : vector<1x128xf32>
    %c7_661 = arith.constant 7 : index
    %c0_662 = arith.constant 0 : index
    %639 = tpu.strided_load %arg16[%c7_661, %c0_662] {strides = array<i32: 32, 1>} : memref<32x128xf32, #tpu.memory_space<vmem>>, vector<1x16xf32>
    %640 = arith.truncf %639 : vector<1x16xf32> to vector<1x16xbf16>
    %c7_663 = arith.constant 7 : index
    %c0_664 = arith.constant 0 : index
    %c0_665 = arith.constant 0 : index
    %641 = vector.load %arg6[%c7_663, %c0_664, %c0_665] : memref<25x16x128xbf16, #tpu.memory_space<vmem>>, vector<1x16x128xbf16>
    %642 = vector.shape_cast %641 : vector<1x16x128xbf16> to vector<16x128xbf16>
    %cst_666 = arith.constant dense<0.000000e+00> : vector<1x128xf32>
    %643 = tpu.matmul %640, %642, %cst_666 {dimension_numbers = #tpu.dot_dimension_numbers<[1], [0], [0], [1], [0, 0, 1, 1], [], []>} : vector<1x16xbf16>, vector<16x128xbf16>, vector<1x128xf32> -> vector<1x128xf32>
    %644 = arith.addf %638, %643 : vector<1x128xf32>
    %c8_667 = arith.constant 8 : index
    %c0_668 = arith.constant 0 : index
    %645 = tpu.strided_load %arg16[%c8_667, %c0_668] {strides = array<i32: 32, 1>} : memref<32x128xf32, #tpu.memory_space<vmem>>, vector<1x16xf32>
    %646 = arith.truncf %645 : vector<1x16xf32> to vector<1x16xbf16>
    %c8_669 = arith.constant 8 : index
    %c0_670 = arith.constant 0 : index
    %c0_671 = arith.constant 0 : index
    %647 = vector.load %arg6[%c8_669, %c0_670, %c0_671] : memref<25x16x128xbf16, #tpu.memory_space<vmem>>, vector<1x16x128xbf16>
    %648 = vector.shape_cast %647 : vector<1x16x128xbf16> to vector<16x128xbf16>
    %cst_672 = arith.constant dense<0.000000e+00> : vector<1x128xf32>
    %649 = tpu.matmul %646, %648, %cst_672 {dimension_numbers = #tpu.dot_dimension_numbers<[1], [0], [0], [1], [0, 0, 1, 1], [], []>} : vector<1x16xbf16>, vector<16x128xbf16>, vector<1x128xf32> -> vector<1x128xf32>
    %650 = arith.addf %644, %649 : vector<1x128xf32>
    %c9_673 = arith.constant 9 : index
    %c0_674 = arith.constant 0 : index
    %651 = tpu.strided_load %arg16[%c9_673, %c0_674] {strides = array<i32: 32, 1>} : memref<32x128xf32, #tpu.memory_space<vmem>>, vector<1x16xf32>
    %652 = arith.truncf %651 : vector<1x16xf32> to vector<1x16xbf16>
    %c9_675 = arith.constant 9 : index
    %c0_676 = arith.constant 0 : index
    %c0_677 = arith.constant 0 : index
    %653 = vector.load %arg6[%c9_675, %c0_676, %c0_677] : memref<25x16x128xbf16, #tpu.memory_space<vmem>>, vector<1x16x128xbf16>
    %654 = vector.shape_cast %653 : vector<1x16x128xbf16> to vector<16x128xbf16>
    %cst_678 = arith.constant dense<0.000000e+00> : vector<1x128xf32>
    %655 = tpu.matmul %652, %654, %cst_678 {dimension_numbers = #tpu.dot_dimension_numbers<[1], [0], [0], [1], [0, 0, 1, 1], [], []>} : vector<1x16xbf16>, vector<16x128xbf16>, vector<1x128xf32> -> vector<1x128xf32>
    %656 = arith.addf %650, %655 : vector<1x128xf32>
    %c10_679 = arith.constant 10 : index
    %c0_680 = arith.constant 0 : index
    %657 = tpu.strided_load %arg16[%c10_679, %c0_680] {strides = array<i32: 32, 1>} : memref<32x128xf32, #tpu.memory_space<vmem>>, vector<1x16xf32>
    %658 = arith.truncf %657 : vector<1x16xf32> to vector<1x16xbf16>
    %c10_681 = arith.constant 10 : index
    %c0_682 = arith.constant 0 : index
    %c0_683 = arith.constant 0 : index
    %659 = vector.load %arg6[%c10_681, %c0_682, %c0_683] : memref<25x16x128xbf16, #tpu.memory_space<vmem>>, vector<1x16x128xbf16>
    %660 = vector.shape_cast %659 : vector<1x16x128xbf16> to vector<16x128xbf16>
    %cst_684 = arith.constant dense<0.000000e+00> : vector<1x128xf32>
    %661 = tpu.matmul %658, %660, %cst_684 {dimension_numbers = #tpu.dot_dimension_numbers<[1], [0], [0], [1], [0, 0, 1, 1], [], []>} : vector<1x16xbf16>, vector<16x128xbf16>, vector<1x128xf32> -> vector<1x128xf32>
    %662 = arith.addf %656, %661 : vector<1x128xf32>
    %c11_685 = arith.constant 11 : index
    %c0_686 = arith.constant 0 : index
    %663 = tpu.strided_load %arg16[%c11_685, %c0_686] {strides = array<i32: 32, 1>} : memref<32x128xf32, #tpu.memory_space<vmem>>, vector<1x16xf32>
    %664 = arith.truncf %663 : vector<1x16xf32> to vector<1x16xbf16>
    %c11_687 = arith.constant 11 : index
    %c0_688 = arith.constant 0 : index
    %c0_689 = arith.constant 0 : index
    %665 = vector.load %arg6[%c11_687, %c0_688, %c0_689] : memref<25x16x128xbf16, #tpu.memory_space<vmem>>, vector<1x16x128xbf16>
    %666 = vector.shape_cast %665 : vector<1x16x128xbf16> to vector<16x128xbf16>
    %cst_690 = arith.constant dense<0.000000e+00> : vector<1x128xf32>
    %667 = tpu.matmul %664, %666, %cst_690 {dimension_numbers = #tpu.dot_dimension_numbers<[1], [0], [0], [1], [0, 0, 1, 1], [], []>} : vector<1x16xbf16>, vector<16x128xbf16>, vector<1x128xf32> -> vector<1x128xf32>
    %668 = arith.addf %662, %667 : vector<1x128xf32>
    %c12_691 = arith.constant 12 : index
    %c0_692 = arith.constant 0 : index
    %669 = tpu.strided_load %arg16[%c12_691, %c0_692] {strides = array<i32: 32, 1>} : memref<32x128xf32, #tpu.memory_space<vmem>>, vector<1x16xf32>
    %670 = arith.truncf %669 : vector<1x16xf32> to vector<1x16xbf16>
    %c12_693 = arith.constant 12 : index
    %c0_694 = arith.constant 0 : index
    %c0_695 = arith.constant 0 : index
    %671 = vector.load %arg6[%c12_693, %c0_694, %c0_695] : memref<25x16x128xbf16, #tpu.memory_space<vmem>>, vector<1x16x128xbf16>
    %672 = vector.shape_cast %671 : vector<1x16x128xbf16> to vector<16x128xbf16>
    %cst_696 = arith.constant dense<0.000000e+00> : vector<1x128xf32>
    %673 = tpu.matmul %670, %672, %cst_696 {dimension_numbers = #tpu.dot_dimension_numbers<[1], [0], [0], [1], [0, 0, 1, 1], [], []>} : vector<1x16xbf16>, vector<16x128xbf16>, vector<1x128xf32> -> vector<1x128xf32>
    %674 = arith.addf %668, %673 : vector<1x128xf32>
    %c13 = arith.constant 13 : index
    %c0_697 = arith.constant 0 : index
    %675 = tpu.strided_load %arg16[%c13, %c0_697] {strides = array<i32: 32, 1>} : memref<32x128xf32, #tpu.memory_space<vmem>>, vector<1x16xf32>
    %676 = arith.truncf %675 : vector<1x16xf32> to vector<1x16xbf16>
    %c13_698 = arith.constant 13 : index
    %c0_699 = arith.constant 0 : index
    %c0_700 = arith.constant 0 : index
    %677 = vector.load %arg6[%c13_698, %c0_699, %c0_700] : memref<25x16x128xbf16, #tpu.memory_space<vmem>>, vector<1x16x128xbf16>
    %678 = vector.shape_cast %677 : vector<1x16x128xbf16> to vector<16x128xbf16>
    %cst_701 = arith.constant dense<0.000000e+00> : vector<1x128xf32>
    %679 = tpu.matmul %676, %678, %cst_701 {dimension_numbers = #tpu.dot_dimension_numbers<[1], [0], [0], [1], [0, 0, 1, 1], [], []>} : vector<1x16xbf16>, vector<16x128xbf16>, vector<1x128xf32> -> vector<1x128xf32>
    %680 = arith.addf %674, %679 : vector<1x128xf32>
    %c14_702 = arith.constant 14 : index
    %c0_703 = arith.constant 0 : index
    %681 = tpu.strided_load %arg16[%c14_702, %c0_703] {strides = array<i32: 32, 1>} : memref<32x128xf32, #tpu.memory_space<vmem>>, vector<1x16xf32>
    %682 = arith.truncf %681 : vector<1x16xf32> to vector<1x16xbf16>
    %c14_704 = arith.constant 14 : index
    %c0_705 = arith.constant 0 : index
    %c0_706 = arith.constant 0 : index
    %683 = vector.load %arg6[%c14_704, %c0_705, %c0_706] : memref<25x16x128xbf16, #tpu.memory_space<vmem>>, vector<1x16x128xbf16>
    %684 = vector.shape_cast %683 : vector<1x16x128xbf16> to vector<16x128xbf16>
    %cst_707 = arith.constant dense<0.000000e+00> : vector<1x128xf32>
    %685 = tpu.matmul %682, %684, %cst_707 {dimension_numbers = #tpu.dot_dimension_numbers<[1], [0], [0], [1], [0, 0, 1, 1], [], []>} : vector<1x16xbf16>, vector<16x128xbf16>, vector<1x128xf32> -> vector<1x128xf32>
    %686 = arith.addf %680, %685 : vector<1x128xf32>
    %c15_708 = arith.constant 15 : index
    %c0_709 = arith.constant 0 : index
    %687 = tpu.strided_load %arg16[%c15_708, %c0_709] {strides = array<i32: 32, 1>} : memref<32x128xf32, #tpu.memory_space<vmem>>, vector<1x16xf32>
    %688 = arith.truncf %687 : vector<1x16xf32> to vector<1x16xbf16>
    %c15_710 = arith.constant 15 : index
    %c0_711 = arith.constant 0 : index
    %c0_712 = arith.constant 0 : index
    %689 = vector.load %arg6[%c15_710, %c0_711, %c0_712] : memref<25x16x128xbf16, #tpu.memory_space<vmem>>, vector<1x16x128xbf16>
    %690 = vector.shape_cast %689 : vector<1x16x128xbf16> to vector<16x128xbf16>
    %cst_713 = arith.constant dense<0.000000e+00> : vector<1x128xf32>
    %691 = tpu.matmul %688, %690, %cst_713 {dimension_numbers = #tpu.dot_dimension_numbers<[1], [0], [0], [1], [0, 0, 1, 1], [], []>} : vector<1x16xbf16>, vector<16x128xbf16>, vector<1x128xf32> -> vector<1x128xf32>
    %692 = arith.addf %686, %691 : vector<1x128xf32>
    %c16_714 = arith.constant 16 : index
    %c0_715 = arith.constant 0 : index
    %693 = tpu.strided_load %arg16[%c16_714, %c0_715] {strides = array<i32: 32, 1>} : memref<32x128xf32, #tpu.memory_space<vmem>>, vector<1x16xf32>
    %694 = arith.truncf %693 : vector<1x16xf32> to vector<1x16xbf16>
    %c16_716 = arith.constant 16 : index
    %c0_717 = arith.constant 0 : index
    %c0_718 = arith.constant 0 : index
    %695 = vector.load %arg6[%c16_716, %c0_717, %c0_718] : memref<25x16x128xbf16, #tpu.memory_space<vmem>>, vector<1x16x128xbf16>
    %696 = vector.shape_cast %695 : vector<1x16x128xbf16> to vector<16x128xbf16>
    %cst_719 = arith.constant dense<0.000000e+00> : vector<1x128xf32>
    %697 = tpu.matmul %694, %696, %cst_719 {dimension_numbers = #tpu.dot_dimension_numbers<[1], [0], [0], [1], [0, 0, 1, 1], [], []>} : vector<1x16xbf16>, vector<16x128xbf16>, vector<1x128xf32> -> vector<1x128xf32>
    %698 = arith.addf %692, %697 : vector<1x128xf32>
    %c17_720 = arith.constant 17 : index
    %c0_721 = arith.constant 0 : index
    %699 = tpu.strided_load %arg16[%c17_720, %c0_721] {strides = array<i32: 32, 1>} : memref<32x128xf32, #tpu.memory_space<vmem>>, vector<1x16xf32>
    %700 = arith.truncf %699 : vector<1x16xf32> to vector<1x16xbf16>
    %c17_722 = arith.constant 17 : index
    %c0_723 = arith.constant 0 : index
    %c0_724 = arith.constant 0 : index
    %701 = vector.load %arg6[%c17_722, %c0_723, %c0_724] : memref<25x16x128xbf16, #tpu.memory_space<vmem>>, vector<1x16x128xbf16>
    %702 = vector.shape_cast %701 : vector<1x16x128xbf16> to vector<16x128xbf16>
    %cst_725 = arith.constant dense<0.000000e+00> : vector<1x128xf32>
    %703 = tpu.matmul %700, %702, %cst_725 {dimension_numbers = #tpu.dot_dimension_numbers<[1], [0], [0], [1], [0, 0, 1, 1], [], []>} : vector<1x16xbf16>, vector<16x128xbf16>, vector<1x128xf32> -> vector<1x128xf32>
    %704 = arith.addf %698, %703 : vector<1x128xf32>
    %c18_726 = arith.constant 18 : index
    %c0_727 = arith.constant 0 : index
    %705 = tpu.strided_load %arg16[%c18_726, %c0_727] {strides = array<i32: 32, 1>} : memref<32x128xf32, #tpu.memory_space<vmem>>, vector<1x16xf32>
    %706 = arith.truncf %705 : vector<1x16xf32> to vector<1x16xbf16>
    %c18_728 = arith.constant 18 : index
    %c0_729 = arith.constant 0 : index
    %c0_730 = arith.constant 0 : index
    %707 = vector.load %arg6[%c18_728, %c0_729, %c0_730] : memref<25x16x128xbf16, #tpu.memory_space<vmem>>, vector<1x16x128xbf16>
    %708 = vector.shape_cast %707 : vector<1x16x128xbf16> to vector<16x128xbf16>
    %cst_731 = arith.constant dense<0.000000e+00> : vector<1x128xf32>
    %709 = tpu.matmul %706, %708, %cst_731 {dimension_numbers = #tpu.dot_dimension_numbers<[1], [0], [0], [1], [0, 0, 1, 1], [], []>} : vector<1x16xbf16>, vector<16x128xbf16>, vector<1x128xf32> -> vector<1x128xf32>
    %710 = arith.addf %704, %709 : vector<1x128xf32>
    %c19 = arith.constant 19 : index
    %c0_732 = arith.constant 0 : index
    %711 = tpu.strided_load %arg16[%c19, %c0_732] {strides = array<i32: 32, 1>} : memref<32x128xf32, #tpu.memory_space<vmem>>, vector<1x16xf32>
    %712 = arith.truncf %711 : vector<1x16xf32> to vector<1x16xbf16>
    %c19_733 = arith.constant 19 : index
    %c0_734 = arith.constant 0 : index
    %c0_735 = arith.constant 0 : index
    %713 = vector.load %arg6[%c19_733, %c0_734, %c0_735] : memref<25x16x128xbf16, #tpu.memory_space<vmem>>, vector<1x16x128xbf16>
    %714 = vector.shape_cast %713 : vector<1x16x128xbf16> to vector<16x128xbf16>
    %cst_736 = arith.constant dense<0.000000e+00> : vector<1x128xf32>
    %715 = tpu.matmul %712, %714, %cst_736 {dimension_numbers = #tpu.dot_dimension_numbers<[1], [0], [0], [1], [0, 0, 1, 1], [], []>} : vector<1x16xbf16>, vector<16x128xbf16>, vector<1x128xf32> -> vector<1x128xf32>
    %716 = arith.addf %710, %715 : vector<1x128xf32>
    %c20_737 = arith.constant 20 : index
    %c0_738 = arith.constant 0 : index
    %717 = tpu.strided_load %arg16[%c20_737, %c0_738] {strides = array<i32: 32, 1>} : memref<32x128xf32, #tpu.memory_space<vmem>>, vector<1x16xf32>
    %718 = arith.truncf %717 : vector<1x16xf32> to vector<1x16xbf16>
    %c20_739 = arith.constant 20 : index
    %c0_740 = arith.constant 0 : index
    %c0_741 = arith.constant 0 : index
    %719 = vector.load %arg6[%c20_739, %c0_740, %c0_741] : memref<25x16x128xbf16, #tpu.memory_space<vmem>>, vector<1x16x128xbf16>
    %720 = vector.shape_cast %719 : vector<1x16x128xbf16> to vector<16x128xbf16>
    %cst_742 = arith.constant dense<0.000000e+00> : vector<1x128xf32>
    %721 = tpu.matmul %718, %720, %cst_742 {dimension_numbers = #tpu.dot_dimension_numbers<[1], [0], [0], [1], [0, 0, 1, 1], [], []>} : vector<1x16xbf16>, vector<16x128xbf16>, vector<1x128xf32> -> vector<1x128xf32>
    %722 = arith.addf %716, %721 : vector<1x128xf32>
    %c21 = arith.constant 21 : index
    %c0_743 = arith.constant 0 : index
    %723 = tpu.strided_load %arg16[%c21, %c0_743] {strides = array<i32: 32, 1>} : memref<32x128xf32, #tpu.memory_space<vmem>>, vector<1x16xf32>
    %724 = arith.truncf %723 : vector<1x16xf32> to vector<1x16xbf16>
    %c21_744 = arith.constant 21 : index
    %c0_745 = arith.constant 0 : index
    %c0_746 = arith.constant 0 : index
    %725 = vector.load %arg6[%c21_744, %c0_745, %c0_746] : memref<25x16x128xbf16, #tpu.memory_space<vmem>>, vector<1x16x128xbf16>
    %726 = vector.shape_cast %725 : vector<1x16x128xbf16> to vector<16x128xbf16>
    %cst_747 = arith.constant dense<0.000000e+00> : vector<1x128xf32>
    %727 = tpu.matmul %724, %726, %cst_747 {dimension_numbers = #tpu.dot_dimension_numbers<[1], [0], [0], [1], [0, 0, 1, 1], [], []>} : vector<1x16xbf16>, vector<16x128xbf16>, vector<1x128xf32> -> vector<1x128xf32>
    %728 = arith.addf %722, %727 : vector<1x128xf32>
    %c22 = arith.constant 22 : index
    %c0_748 = arith.constant 0 : index
    %729 = tpu.strided_load %arg16[%c22, %c0_748] {strides = array<i32: 32, 1>} : memref<32x128xf32, #tpu.memory_space<vmem>>, vector<1x16xf32>
    %730 = arith.truncf %729 : vector<1x16xf32> to vector<1x16xbf16>
    %c22_749 = arith.constant 22 : index
    %c0_750 = arith.constant 0 : index
    %c0_751 = arith.constant 0 : index
    %731 = vector.load %arg6[%c22_749, %c0_750, %c0_751] : memref<25x16x128xbf16, #tpu.memory_space<vmem>>, vector<1x16x128xbf16>
    %732 = vector.shape_cast %731 : vector<1x16x128xbf16> to vector<16x128xbf16>
    %cst_752 = arith.constant dense<0.000000e+00> : vector<1x128xf32>
    %733 = tpu.matmul %730, %732, %cst_752 {dimension_numbers = #tpu.dot_dimension_numbers<[1], [0], [0], [1], [0, 0, 1, 1], [], []>} : vector<1x16xbf16>, vector<16x128xbf16>, vector<1x128xf32> -> vector<1x128xf32>
    %734 = arith.addf %728, %733 : vector<1x128xf32>
    %c23 = arith.constant 23 : index
    %c0_753 = arith.constant 0 : index
    %735 = tpu.strided_load %arg16[%c23, %c0_753] {strides = array<i32: 32, 1>} : memref<32x128xf32, #tpu.memory_space<vmem>>, vector<1x16xf32>
    %736 = arith.truncf %735 : vector<1x16xf32> to vector<1x16xbf16>
    %c23_754 = arith.constant 23 : index
    %c0_755 = arith.constant 0 : index
    %c0_756 = arith.constant 0 : index
    %737 = vector.load %arg6[%c23_754, %c0_755, %c0_756] : memref<25x16x128xbf16, #tpu.memory_space<vmem>>, vector<1x16x128xbf16>
    %738 = vector.shape_cast %737 : vector<1x16x128xbf16> to vector<16x128xbf16>
    %cst_757 = arith.constant dense<0.000000e+00> : vector<1x128xf32>
    %739 = tpu.matmul %736, %738, %cst_757 {dimension_numbers = #tpu.dot_dimension_numbers<[1], [0], [0], [1], [0, 0, 1, 1], [], []>} : vector<1x16xbf16>, vector<16x128xbf16>, vector<1x128xf32> -> vector<1x128xf32>
    %740 = arith.addf %734, %739 : vector<1x128xf32>
    %c24 = arith.constant 24 : index
    %c0_758 = arith.constant 0 : index
    %741 = tpu.strided_load %arg16[%c24, %c0_758] {strides = array<i32: 32, 1>} : memref<32x128xf32, #tpu.memory_space<vmem>>, vector<1x16xf32>
    %742 = arith.truncf %741 : vector<1x16xf32> to vector<1x16xbf16>
    %c24_759 = arith.constant 24 : index
    %c0_760 = arith.constant 0 : index
    %c0_761 = arith.constant 0 : index
    %743 = vector.load %arg6[%c24_759, %c0_760, %c0_761] : memref<25x16x128xbf16, #tpu.memory_space<vmem>>, vector<1x16x128xbf16>
    %744 = vector.shape_cast %743 : vector<1x16x128xbf16> to vector<16x128xbf16>
    %cst_762 = arith.constant dense<0.000000e+00> : vector<1x128xf32>
    %745 = tpu.matmul %742, %744, %cst_762 {dimension_numbers = #tpu.dot_dimension_numbers<[1], [0], [0], [1], [0, 0, 1, 1], [], []>} : vector<1x16xbf16>, vector<16x128xbf16>, vector<1x128xf32> -> vector<1x128xf32>
    %746 = arith.addf %740, %745 : vector<1x128xf32>
    %c0_763 = arith.constant 0 : index
    %c0_764 = arith.constant 0 : index
    %747 = vector.load %arg7[%c0_763, %c0_764] : memref<1x128xf32, #tpu.memory_space<vmem>>, vector<1x128xf32>
    %748 = arith.addf %746, %747 : vector<1x128xf32>
    %cst_765 = arith.constant 0.000000e+00 : f32
    %749 = vector.broadcast %cst_765 : f32 to vector<1x128xf32>
    %750 = arith.maximumf %748, %749 : vector<1x128xf32>
    %751 = arith.truncf %750 : vector<1x128xf32> to vector<1x128xbf16>
    %c0_766 = arith.constant 0 : index
    %c0_767 = arith.constant 0 : index
    %752 = vector.load %arg8[%c0_766, %c0_767] : memref<128x128xbf16, #tpu.memory_space<vmem>>, vector<128x128xbf16>
    %cst_768 = arith.constant dense<0.000000e+00> : vector<1x128xf32>
    %753 = tpu.matmul %751, %752, %cst_768 {dimension_numbers = #tpu.dot_dimension_numbers<[1], [0], [0], [1], [0, 0, 1, 1], [], []>} : vector<1x128xbf16>, vector<128x128xbf16>, vector<1x128xf32> -> vector<1x128xf32>
    %c0_769 = arith.constant 0 : index
    %c0_770 = arith.constant 0 : index
    %754 = vector.load %arg9[%c0_769, %c0_770] : memref<1x128xf32, #tpu.memory_space<vmem>>, vector<1x128xf32>
    %755 = arith.addf %753, %754 : vector<1x128xf32>
    %cst_771 = arith.constant 0.000000e+00 : f32
    %756 = vector.broadcast %cst_771 : f32 to vector<1x128xf32>
    %757 = arith.maximumf %755, %756 : vector<1x128xf32>
    %758 = arith.truncf %757 : vector<1x128xf32> to vector<1x128xbf16>
    %c0_772 = arith.constant 0 : index
    %c0_773 = arith.constant 0 : index
    %759 = vector.load %arg10[%c0_772, %c0_773] : memref<128x128xbf16, #tpu.memory_space<vmem>>, vector<128x128xbf16>
    %cst_774 = arith.constant dense<0.000000e+00> : vector<1x128xf32>
    %760 = tpu.matmul %758, %759, %cst_774 {dimension_numbers = #tpu.dot_dimension_numbers<[1], [0], [0], [1], [0, 0, 1, 1], [], []>} : vector<1x128xbf16>, vector<128x128xbf16>, vector<1x128xf32> -> vector<1x128xf32>
    %c0_775 = arith.constant 0 : index
    %c0_776 = arith.constant 0 : index
    %761 = vector.load %arg11[%c0_775, %c0_776] : memref<1x128xf32, #tpu.memory_space<vmem>>, vector<1x128xf32>
    %762 = arith.addf %760, %761 : vector<1x128xf32>
    %c0_777 = arith.constant 0 : index
    %c0_778 = arith.constant 0 : index
    %c0_779 = arith.constant 0 : index
    %763 = vector.load %arg12[%c0_777, %c0_778, %c0_779] : memref<1x1x128xf32, #tpu.memory_space<vmem>>, vector<1x1x128xf32>
    %764 = vector.shape_cast %763 : vector<1x1x128xf32> to vector<1x128xf32>
    %765 = vector.shape_cast %762 : vector<1x128xf32> to vector<1x1x128xf32>
    tpu.vector_store %arg12[%c0_777, %c0_778, %c0_779], %765 {strides = array<i32>} : memref<1x1x128xf32, #tpu.memory_space<vmem>>, vector<1x1x128xf32>,
    return
  }
  func.func @transform_0(%arg0: i32) -> (i32, i32, i32) {
    %c0_i32 = arith.constant 0 : i32
    %c0_i32_0 = arith.constant 0 : i32
    %c0_i32_1 = arith.constant 0 : i32
    return %arg0, %c0_i32, %c0_i32_0 : i32, i32, i32
  }
  func.func @transform_1(%arg0: i32) -> (i32, i32, i32) {
    %c0_i32 = arith.constant 0 : i32
    %c0_i32_0 = arith.constant 0 : i32
    %c0_i32_1 = arith.constant 0 : i32
    %c0_i32_2 = arith.constant 0 : i32
    return %c0_i32, %c0_i32_0, %c0_i32_1 : i32, i32, i32
  }
  func.func @transform_2(%arg0: i32) -> (i32, i32) {
    %c0_i32 = arith.constant 0 : i32
    %c0_i32_0 = arith.constant 0 : i32
    %c0_i32_1 = arith.constant 0 : i32
    return %c0_i32, %c0_i32_0 : i32, i32
  }
  func.func @transform_3(%arg0: i32) -> (i32, i32, i32) {
    %c0_i32 = arith.constant 0 : i32
    %c0_i32_0 = arith.constant 0 : i32
    %c0_i32_1 = arith.constant 0 : i32
    %c0_i32_2 = arith.constant 0 : i32
    return %c0_i32, %c0_i32_0, %c0_i32_1 : i32, i32, i32
  }
  func.func @transform_4(%arg0: i32) -> (i32, i32) {
    %c0_i32 = arith.constant 0 : i32
    %c0_i32_0 = arith.constant 0 : i32
    %c0_i32_1 = arith.constant 0 : i32
    return %c0_i32, %c0_i32_0 : i32, i32
  }
  func.func @transform_5(%arg0: i32) -> (i32, i32, i32) {
    %c0_i32 = arith.constant 0 : i32
    %c0_i32_0 = arith.constant 0 : i32
    %c0_i32_1 = arith.constant 0 : i32
    %c0_i32_2 = arith.constant 0 : i32
    return %c0_i32, %c0_i32_0, %c0_i32_1 : i32, i32, i32
  }
  func.func @transform_6(%arg0: i32) -> (i32, i32) {
    %c0_i32 = arith.constant 0 : i32
    %c0_i32_0 = arith.constant 0 : i32
    %c0_i32_1 = arith.constant 0 : i32
    return %c0_i32, %c0_i32_0 : i32, i32
  }
  func.func @transform_7(%arg0: i32) -> (i32, i32) {
    %c0_i32 = arith.constant 0 : i32
    %c0_i32_0 = arith.constant 0 : i32
    %c0_i32_1 = arith.constant 0 : i32
    return %c0_i32, %c0_i32_0 : i32, i32
  }
  func.func @transform_8(%arg0: i32) -> (i32, i32) {
    %c0_i32 = arith.constant 0 : i32
    %c0_i32_0 = arith.constant 0 : i32
    %c0_i32_1 = arith.constant 0 : i32
    return %c0_i32, %c0_i32_0 : i32, i32
  }
  func.func @transform_9(%arg0: i32) -> (i32, i32) {
    %c0_i32 = arith.constant 0 : i32
    %c0_i32_0 = arith.constant 0 : i32
    %c0_i32_1 = arith.constant 0 : i32
    return %c0_i32, %c0_i32_0 : i32, i32
  }
  func.func @transform_10(%arg0: i32) -> (i32, i32) {
    %c0_i32 = arith.constant 0 : i32
    %c0_i32_0 = arith.constant 0 : i32
    %c0_i32_1 = arith.constant 0 : i32
    return %c0_i32, %c0_i32_0 : i32, i32
  }
  func.func @transform_11(%arg0: i32) -> (i32, i32, i32) {
    %c0_i32 = arith.constant 0 : i32
    %c0_i32_0 = arith.constant 0 : i32
    %c0_i32_1 = arith.constant 0 : i32
    return %arg0, %c0_i32, %c0_i32_0 : i32, i32, i32
  }
}

</mosaic_0001>

<bundles_post_ra>
// kernel: convnet_forward.1
= control target key start
LH: loop header
LB: loop body
LE: loop exit
PB: predicated region body
PF: predicated region fallthrough
CT: control target
= control target key end

     0   :  { %16 = vsyncpa [#allocation8], 0  ;;  %s27053_s0 = inlined_call_operand.vmem [shape: bf16[2,1024,16], index: 0, kind: input, shape index: {}]   ;;  %s27054_s1 = inlined_call_operand.vmem [shape: bf16[5,16,128], index: 1, kind: input, shape index: {}]   ;;  %s27055_s2 = inlined_call_operand.vmem [shape: f32[1,128], index: 2, kind: input, shape index: {}]   ;;  %s27056_s3 = inlined_call_operand.vmem [shape: bf16[13,256,128], index: 3, kind: input, shape index: {}]   ;;  %s27057_s4 = inlined_call_operand.vmem [shape: f32[1,128], index: 4, kind: input, shape index: {}]   ;;  %s27058_s5 = inlined_call_operand.vmem [shape: bf16[25,16,128], index: 5, kind: input, shape index: {}]   ;;  %s27059_s6 = inlined_call_operand.vmem [shape: f32[1,128], index: 6, kind: input, shape index: {}]   ;;  %s27060_s7 = inlined_call_operand.vmem [shape: bf16[128,128], index: 7, kind: input, shape index: {}]   ;;  %s27061_s8 = inlined_call_operand.vmem [shape: f32[1,128], index: 8, kind: input, shape index: {}]   ;;  %s27062_s9 = inlined_call_operand.vmem [shape: bf16[128,128], index: 9, kind: input, shape index: {}]   ;;  %s27063_s10 = inlined_call_operand.vmem [shape: f32[1,128], index: 10, kind: input, shape index: {}]   ;;  %s27064_s11 = inlined_call_operand.hbm [shape: f32[2,1,128], index: 11, kind: output, shape index: {}]  }
   0x1   :  { %18 = vsyncpa [#allocation8 + $0x1], 0  ;;  %s21970_s17 = smov 0   ;;  %s21972_s18 = smov 0  }
   0x2   :  { %s21974_s19 = smov 0   ;;  %s21976_s20 = smov 0  }
   0x3 LB: > { %s21991_s21 = sadd.s32 4294967295, %s21905_s20   ;;  %s16351_s22 = sadd.s32 4294967294, %s21905_s20   ;;  %s21905_s20 = sphi %s21976_s20, %s27438_s20   ;;  %s21901_s19 = sphi %s21974_s19, %s27437_s19   ;;  %s21897_s18 = sphi %s21972_s18, %s27436_s18   ;;  %s21893_s17 = sphi %s21970_s17, %s27435_s17  }
   0x4   : > { %s21995_s23 = sadd.s32 1, %s21905_s20   ;;  %s267_s24 = sadd.s32 1, %s21901_s19 }
   0x5   : > { %s264_s25 = ssub.s32 %s21905_s20, %s21995_s23  ;;  %p277_p0 = scmp.ne.s32.totalorder %s21901_s19, %s21897_s18 }
   0x6   : > { %p265_p1 = scmp.eq.s32.totalorder %s264_s25, 0  ;;  %p278_p2 = scmp.eq.s32.totalorder %s21991_s21, 1 }
   0x7   : > { %p283_p3 = scmp.ne.s32.totalorder %s21897_s18, %s21893_s17  ;;  %p284_p4 = scmp.eq.s32.totalorder %s16351_s22, 1 }
   0x8   : > { %s22006_s26 = scalar_select %p265_p1, %s21901_s19, %s267_s24  }
   0x9   : > { %p22008_p5 = por %p278_p2, %p277_p0  ;;  %p22012_p6 = por %p284_p4, %p283_p3 }
   0xa   : > { %p16354_p7 = scmp.ge.s32.totalorder %s21905_s20, 1  ;;  %p340_p8 = scmp.lt.s32.totalorder %s21905_s20, 3 }
   0xc   : > { %p341_p9 = pnand %p16354_p7, %p340_p8 }
   0xe   : > { %344 = sbr.rel (%p341_p9) target bundleno = 2071 (0x817), region = 64 }
  0x15   : > { %v21080_v0 = vld [vmem:[%s27054_s1 + $0x8] sm:$0xff]   ;;  %p379_p10 = scmp.lt.s32.totalorder %s21991_s21, 1  ;;  %v21083_v2 = vld [vmem:[%s27054_s1] sm:$0xff]   ;;  %vm459_vm0 = vcmask 130048   ;;  %v21101_v6 = vld [vmem:[%s27054_s1 + $0x10] sm:$0xff]   ;;  %vm7651_vm2 = vcmask 1046528  }
  0x16   : > { %v21081_v1 = vld [vmem:[%s27054_s1 + $0x8] sm:$0xff]   ;;  %19771 = vmatprep.subr.bf16.mxu0 %v21080_v0  ;;  %v21099_v3 = vld [vmem:[%s27054_s1] sm:$0xff]   ;;  %v21105_v8 = vld [vmem:[%s27054_s1 + $0x10] sm:$0xff]   ;;  %vm7518_vm1 = vsmask.f32 7424  ;;  %vm8966_vm5 = vcmask 1041408  }
  0x17   : > { %s380_s14 = scalar_select %p379_p10, %s21991_s21, 1  ;;  %19772 = vmatpush3.bf16.msra.mxu0 %v21080_v0  ;;  %19861 = vmatprep.subr.bf16.mxu1 %v21081_v1  ;;  %v21107_v26 = vld [vmem:[%s27054_s1 + $0x18] sm:$0xff]   ;;  %v21125_v34 = vld [vmem:[%s27054_s1 + $0x20] sm:$0xff]   ;;  %v21144_v52 = vld [vmem:[%s27054_s1 + $0x8] sm:$0xff]   ;;  %vm8355_vm3 = vsmask.f32 256 }
  0x18   : > { %19862 = vmatpush3.bf16.msra.mxu1 %v21081_v1  ;;  %19789 = vmatprep.subr.bf16.mxu0 %v21083_v2  ;;  %v21123_v27 = vld [vmem:[%s27054_s1 + $0x18] sm:$0xff]   ;;  %v21141_v35 = vld [vmem:[%s27054_s1 + $0x20] sm:$0xff]   ;;  %v21159_v53 = vld [vmem:[%s27054_s1 + $0x8] sm:$0xff]   ;;  %vm10075_vm4 = vsmask.f32 1280  ;;  %vm8029_vm6 = vcmask 1042432  }
  0x19   : > { %s18269_s25 = sshll.u32 %s380_s14, 9  ;;  %19879 = vmatprep.subr.bf16.mxu1 %v21099_v3  ;;  %vm8076_vm7 = vcmask 1045504   ;;  %vm11972_vm8 = vsmask.f32 4352  ;;  %vm9225_vm9 = vcmask 1040384   ;;  %vm10409_vm11 = vcmask 1043456  }
  0x1a   : > { %s22035_s12 = scalar_lea.vmem %s27053_s0, %s18269_s25  ;;  %vm9755_vm10 = vsmask.f32 2304  ;;  %vm13642_vm12 = vsmask.f32 5376  ;;  %vm12268_vm13 = vsmask.f32 3328 }
  0x1b   : > { %v21082_v4 = vld [vmem:[%s22035_s12 + $0x10] sm:$0xff]   ;;  %v21085_v7 = vld [vmem:[%s22035_s12 + $0x18] sm:$0xff]   ;;  %v21087_v10 = vld [vmem:[%s22035_s12 + $0x20] sm:$0xff]   ;;  %vm12828_vm14 = vcmask 1044480   ;;  %vm13346_vm15 = vsmask.f32 6400 }
  0x1c   : > { %v21084_v5 = vld [vmem:[%s22035_s12 + $0x50] sm:$0xff]   ;;  %19773 = vmatprep.mubr.msk.bf16.mxu0 %vm459_vm0, %v21082_v4  ;;  %v21086_v9 = vld [vmem:[%s22035_s12 + $0x58] sm:$0xff]   ;;  %v21088_v11 = vld [vmem:[%s22035_s12 + $0x60] sm:$0xff]   ;;  %s377_s16 = sand.u32 1, %s21897_s18   ;;  %s18266_s25 = sshll.u32 %s21991_s21, 4 }
  0x1d   : > { %19863 = vmatprep.mubr.msk.bf16.mxu1 %vm459_vm0, %v21084_v5  ;;  %19774 = vmatmul.mubr.msk.bf16.vlgmr.msra.gmra.mrb[0].mxu0 %vm459_vm0, %v21085_v7  ;;  %v21089_v12 = vld [vmem:[%s22035_s12 + $0x28] sm:$0xff]   ;;  %v21091_v14 = vld [vmem:[%s22035_s12 + $0x30] sm:$0xff]   ;;  %v21093_v16 = vld [vmem:[%s22035_s12 + $0x38] sm:$0xff]   ;;  %s378_s29 = scalar_lea.vmem [#allocation7], %s377_s16  ;;  %s27011_s15 = scalar_lea.hbm %s27064_s11, %s18266_s25 }
  0x1e   : > { %19790 = vmatpush3.bf16.msra.mxu0 %v21083_v2  ;;  %19864 = vmatmul.mubr.msk.bf16.vlgmr.msra.gmra.mrb[0].mxu1 %vm459_vm0, %v21086_v9  ;;  %v21090_v13 = vld [vmem:[%s22035_s12 + $0x68] sm:$0xff]   ;;  %v21092_v15 = vld [vmem:[%s22035_s12 + $0x70] sm:$0xff]   ;;  %v21094_v17 = vld [vmem:[%s22035_s12 + $0x78] sm:$0xff]   ;;  %s16296_s30 = sshll.u32 %s378_s29, 4  ;;  %s16284_s14 = scalar_lea.sflag [#allocation8], %s377_s16  ;;  %s27013_s30 = int_to_ptr.vmem [resolvable:$true] %s16296_s30 }
  0x1f   : > { %19777 = vmatprep.mubr.msk.bf16.mxu0 %vm459_vm0, %v21087_v10  ;;  %19880 = vmatpush3.bf16.msra.mxu1 %v21099_v3  ;;  %v21095_v18 = vld [vmem:[%s22035_s12 + $0x40] sm:$0xff]   ;;  %v21097_v20 = vld [vmem:[%s22035_s12 + $0x48] sm:$0xff]   ;;  %v21111_v32 = vld [vmem:[%s22035_s12 + $0x30] sm:$0xff]   ;;  %s21843_s21 = scalar_lea.vmem %s27013_s30, 16  ;;  %s21909_s22 = smov [#allocation7]  }
  0x20   : > { %19867 = vmatprep.mubr.msk.bf16.mxu1 %vm459_vm0, %v21088_v11  ;;  %19807 = vmatprep.subr.bf16.mxu0 %v21101_v6  ;;  %v21096_v19 = vld [vmem:[%s22035_s12 + $0x80] sm:$0xff]   ;;  %v21098_v21 = vld [vmem:[%s22035_s12 + $0x88] sm:$0xff]   ;;  %v21112_v33 = vld [vmem:[%s22035_s12 + $0x70] sm:$0xff]   ;;  %p21844_p11 = scmp.ne.s32.totalorder %s27013_s30, %s21843_s21  ;;  %s21847_s24 = sshll.u32 %s21909_s22, 4  ;;  %s21848_s24 = int_to_ptr.vmem [resolvable:$false] %s21847_s24 }
  0x21   : > { %19897 = vmatprep.subr.bf16.mxu1 %v21105_v8  ;;  %v21100_v22 = vld [vmem:[%s22035_s12] sm:$0xff]   ;;  %v21103_v24 = vld [vmem:[%s22035_s12 + $0x8] sm:$0xff]   ;;  %v21113_v36 = vld [vmem:[%s22035_s12 + $0x38] sm:$0xff]   ;;  %p21850_p0 = scmp.lt.s32.totalorder %s27013_s30, %s21848_s24 }
  0x22   : > { %v21102_v23 = vld [vmem:[%s22035_s12 + $0x40] sm:$0xff]   ;;  %v21104_v25 = vld [vmem:[%s22035_s12 + $0x48] sm:$0xff]   ;;  %v21114_v37 = vld [vmem:[%s22035_s12 + $0x78] sm:$0xff]   ;;  %p21845_p12 = pnand %p21844_p11, %p22008_p5 }
  0x23   : > { %v21106_v28 = vld [vmem:[%s22035_s12 + $0x20] sm:$0xff]   ;;  %v21109_v30 = vld [vmem:[%s22035_s12 + $0x28] sm:$0xff]   ;;  %v21119_v42 = vld [vmem:[%s22035_s12 + $0x50] sm:$0xff]  }
  0x24   : > { %v21108_v29 = vld [vmem:[%s22035_s12 + $0x60] sm:$0xff]   ;;  %v21110_v31 = vld [vmem:[%s22035_s12 + $0x68] sm:$0xff]   ;;  %v21120_v43 = vld [vmem:[%s22035_s12 + $0x90] sm:$0xff]   ;;  %p21846_p13 = pneg %p21845_p12 }
  0x25   : > { %19778 = vmatmul.mubr.msk.bf16.gmra.mrb[4].mxu0 %vm459_vm0, %v21089_v12  ;;  %v21115_v38 = vld [vmem:[%s22035_s12 + $0x40] sm:$0xff]   ;;  %v21117_v40 = vld [vmem:[%s22035_s12 + $0x48] sm:$0xff]   ;;  %v21121_v44 = vld [vmem:[%s22035_s12 + $0x58] sm:$0xff]  }
  0x26   : > { %19868 = vmatmul.mubr.msk.bf16.gmra.mrb[4].mxu1 %vm459_vm0, %v21090_v13  ;;  %19781 = vmatprep.mubr.msk.bf16.mxu0 %vm459_vm0, %v21091_v14  ;;  %v21116_v39 = vld [vmem:[%s22035_s12 + $0x80] sm:$0xff]   ;;  %v21118_v41 = vld [vmem:[%s22035_s12 + $0x88] sm:$0xff]   ;;  %v21122_v45 = vld [vmem:[%s22035_s12 + $0x98] sm:$0xff]  }
  0x27   : > { %19871 = vmatprep.mubr.msk.bf16.mxu1 %vm459_vm0, %v21092_v15  ;;  %v21124_v46 = vld [vmem:[%s22035_s12 + $0x30] sm:$0xff]   ;;  %v21127_v48 = vld [vmem:[%s22035_s12 + $0x38] sm:$0xff]   ;;  %v21129_v50 = vld [vmem:[%s22035_s12 + $0x40] sm:$0xff]  }
  0x28   : > { %v21126_v47 = vld [vmem:[%s22035_s12 + $0x70] sm:$0xff]   ;;  %v21128_v49 = vld [vmem:[%s22035_s12 + $0x78] sm:$0xff]   ;;  %v21130_v51 = vld [vmem:[%s22035_s12 + $0x80] sm:$0xff]  }
  0x29   : > { %v21131_v54 = vld [vmem:[%s22035_s12 + $0x48] sm:$0xff]   ;;  %v21133_v56 = vld [vmem:[%s22035_s12 + $0x50] sm:$0xff]   ;;  %v21135_v58 = vld [vmem:[%s22035_s12 + $0x58] sm:$0xff]  }
  0x2a   : > { %v21132_v55 = vld [vmem:[%s22035_s12 + $0x88] sm:$0xff]   ;;  %v21134_v57 = vld [vmem:[%s22035_s12 + $0x90] sm:$0xff]   ;;  %v21136_v59 = vld [vmem:[%s22035_s12 + $0x98] sm:$0xff]  }
  0x2b   : > { %v21137_v60 = vld [vmem:[%s22035_s12 + $0x60] sm:$0xff]   ;;  %v21139_v62 = vld [vmem:[%s22035_s12 + $0x68] sm:$0xff]  }
  0x2c   : > { %v21138_v61 = vld [vmem:[%s22035_s12 + $0xa0] sm:$0xff]   ;;  %v21140_v63 = vld [vmem:[%s22035_s12 + $0xa8] sm:$0xff]  }
  0x2d   : > { %19782 = vmatmul.mubr.msk.bf16.gmra.mrb[8].mxu0 %vm459_vm0, %v21093_v16  ;;  %v21142_v0 = vld [vmem:[%s22035_s12 + $0x40] sm:$0xff]   ;;  %v21145_v2 = vld [vmem:[%s22035_s12 + $0x48] sm:$0xff]  }
  0x2e   : > { %19872 = vmatmul.mubr.msk.bf16.gmra.mrb[8].mxu1 %vm459_vm0, %v21094_v17  ;;  %19785 = vmatprep.mubr.msk.bf16.mxu0 %vm459_vm0, %v21095_v18  ;;  %v21143_v1 = vld [vmem:[%s22035_s12 + $0x80] sm:$0xff]   ;;  %v21146_v3 = vld [vmem:[%s22035_s12 + $0x88] sm:$0xff]   ;;  %v21160_v18 = vld [vmem:[%s22035_s12 + $0x90] sm:$0xff]  }
  0x2f   : > { %19875 = vmatprep.mubr.msk.bf16.mxu1 %vm459_vm0, %v21096_v19  ;;  %v21162_v19 = vld [vmem:[%s22035_s12 + $0xd0] sm:$0xff]  }
  0x35   : > { %19786 = vmatmul.mubr.msk.bf16.gmra.mrb[12].mxu0 %vm459_vm0, %v21097_v20  ;;  %v21163_v20 = vld [vmem:[%s22035_s12 + $0x98] sm:$0xff]  }
  0x36   : > { %19876 = vmatmul.mubr.msk.bf16.gmra.mrb[12].mxu1 %vm459_vm0, %v21098_v21  ;;  %19791 = vmatprep.mubr.msk.bf16.mxu0 %vm459_vm0, %v21100_v22  ;;  %v21164_v21 = vld [vmem:[%s22035_s12 + $0xd8] sm:$0xff]   ;;  %v21165_v22 = vld [vmem:[%s22035_s12 + $0xa0] sm:$0xff]  }
  0x37   : > { %19881 = vmatprep.mubr.msk.bf16.mxu1 %vm459_vm0, %v21102_v23  ;;  %v21166_v23 = vld [vmem:[%s22035_s12 + $0xe0] sm:$0xff]  }
  0x3d   : > { %19792 = vmatmul.mubr.msk.bf16.vlgmr.msra.gmra.mrb[0].mxu0 %vm459_vm0, %v21103_v24  ;;  %v21179_v24 = vld [vmem:[%s27054_s1 + $0x10] sm:$0xff]  }
  0x3e   : > { %19808 = vmatpush3.bf16.msra.mxu0 %v21101_v6  ;;  %19882 = vmatmul.mubr.msk.bf16.vlgmr.msra.gmra.mrb[0].mxu1 %vm459_vm0, %v21104_v25  ;;  %v21161_v6 = vld [vmem:[%s27054_s1] sm:$0xff]   ;;  %v21183_v25 = vld [vmem:[%s27054_s1 + $0x10] sm:$0xff]  }
  0x3f   : > { %19795 = vmatprep.mubr.msk.bf16.mxu0 %vm459_vm0, %v21082_v4  ;;  %19885 = vmatprep.mubr.msk.bf16.mxu1 %vm459_vm0, %v21084_v5  ;;  %v21147_v4 = vld [vmem:[%s22035_s12 + $0x50] sm:$0xff]  }
  0x40   : > { %19898 = vmatpush3.bf16.msra.mxu1 %v21105_v8  ;;  %19825 = vmatprep.subr.bf16.mxu0 %v21107_v26  ;;  %v21148_v5 = vld [vmem:[%s22035_s12 + $0x90] sm:$0xff]   ;;  %v21149_v8 = vld [vmem:[%s22035_s12 + $0x58] sm:$0xff]  }
  0x41   : > { %19915 = vmatprep.subr.bf16.mxu1 %v21123_v27 }
  0x45   : > { %19796 = vmatmul.mubr.msk.bf16.gmra.mrb[4].mxu0 %vm459_vm0, %v21085_v7  ;;  %v21177_v7 = vld [vmem:[%s27054_s1] sm:$0xff]  }
  0x46   : > { %19886 = vmatmul.mubr.msk.bf16.gmra.mrb[4].mxu1 %vm459_vm0, %v21086_v9  ;;  %19799 = vmatprep.mubr.msk.bf16.mxu0 %vm459_vm0, %v21087_v10  ;;  %v21150_v9 = vld [vmem:[%s22035_s12 + $0x98] sm:$0xff]   ;;  %v21151_v10 = vld [vmem:[%s22035_s12 + $0x60] sm:$0xff]  }
  0x47   : > { %19889 = vmatprep.mubr.msk.bf16.mxu1 %vm459_vm0, %v21088_v11  ;;  %v21152_v11 = vld [vmem:[%s22035_s12 + $0xa0] sm:$0xff]  }
  0x4d   : > { %19800 = vmatmul.mubr.msk.bf16.gmra.mrb[8].mxu0 %vm459_vm0, %v21089_v12  ;;  %v21153_v12 = vld [vmem:[%s22035_s12 + $0x68] sm:$0xff]  }
  0x4e   : > { %19890 = vmatmul.mubr.msk.bf16.gmra.mrb[8].mxu1 %vm459_vm0, %v21090_v13  ;;  %19803 = vmatprep.mubr.msk.bf16.mxu0 %vm459_vm0, %v21091_v14  ;;  %v21154_v13 = vld [vmem:[%s22035_s12 + $0xa8] sm:$0xff]   ;;  %v21155_v14 = vld [vmem:[%s22035_s12 + $0x70] sm:$0xff]  }
  0x4f   : > { %19893 = vmatprep.mubr.msk.bf16.mxu1 %vm459_vm0, %v21092_v15  ;;  %v21156_v15 = vld [vmem:[%s22035_s12 + $0xb0] sm:$0xff]  }
  0x55   : > { %19804 = vmatmul.mubr.msk.bf16.gmra.mrb[12].mxu0 %vm459_vm0, %v21093_v16  ;;  %v21157_v16 = vld [vmem:[%s22035_s12 + $0x78] sm:$0xff]  }
  0x56   : > { %19894 = vmatmul.mubr.msk.bf16.gmra.mrb[12].mxu1 %vm459_vm0, %v21094_v17  ;;  %19809 = vmatprep.mubr.msk.bf16.mxu0 %vm459_vm0, %v21106_v28  ;;  %v21158_v17 = vld [vmem:[%s22035_s12 + $0xb8] sm:$0xff]   ;;  %v21169_v28 = vld [vmem:[%s22035_s12 + $0xb0] sm:$0xff]  }
  0x57   : > { %19899 = vmatprep.mubr.msk.bf16.mxu1 %vm459_vm0, %v21108_v29  ;;  %v21170_v29 = vld [vmem:[%s22035_s12 + $0xf0] sm:$0xff]  }
  0x5d   : > { %19810 = vmatmul.mubr.msk.bf16.vlgmr.msra.gmra.mrb[0].mxu0 %vm459_vm0, %v21109_v30  ;;  %v21171_v30 = vld [vmem:[%s22035_s12 + $0xb8] sm:$0xff]  }
  0x5e   : > { %19826 = vmatpush3.bf16.msra.mxu0 %v21107_v26  ;;  %19900 = vmatmul.mubr.msk.bf16.vlgmr.msra.gmra.mrb[0].mxu1 %vm459_vm0, %v21110_v31  ;;  %v21167_v26 = vld [vmem:[%s22035_s12 + $0xa8] sm:$0xff]   ;;  %v21172_v31 = vld [vmem:[%s22035_s12 + $0xf8] sm:$0xff]  }
  0x5f   : > { %19813 = vmatprep.mubr.msk.bf16.mxu0 %vm459_vm0, %v21111_v32  ;;  %19903 = vmatprep.mubr.msk.bf16.mxu1 %vm459_vm0, %v21112_v33  ;;  %v21173_v32 = vld [vmem:[%s22035_s12 + $0xc0] sm:$0xff]  }
  0x60   : > { %19916 = vmatpush3.bf16.msra.mxu1 %v21123_v27  ;;  %19843 = vmatprep.subr.bf16.mxu0 %v21125_v34  ;;  %v21168_v27 = vld [vmem:[%s22035_s12 + $0xe8] sm:$0xff]   ;;  %v21174_v33 = vld [vmem:[%s22035_s12 + $0x100] sm:$0xff]  }
  0x61   : > { %19933 = vmatprep.subr.bf16.mxu1 %v21141_v35 }
  0x65   : > { %19814 = vmatmul.mubr.msk.bf16.gmra.mrb[4].mxu0 %vm459_vm0, %v21113_v36  ;;  %v21178_v36 = vld [vmem:[%s22035_s12 + $0x80] sm:$0xff]  }
  0x66   : > { %19904 = vmatmul.mubr.msk.bf16.gmra.mrb[4].mxu1 %vm459_vm0, %v21114_v37  ;;  %19817 = vmatprep.mubr.msk.bf16.mxu0 %vm459_vm0, %v21115_v38  ;;  %v21180_v37 = vld [vmem:[%s22035_s12 + $0xc0] sm:$0xff]   ;;  %v21181_v38 = vld [vmem:[%s22035_s12 + $0x88] sm:$0xff]  }
  0x67   : > { %19907 = vmatprep.mubr.msk.bf16.mxu1 %vm459_vm0, %v21116_v39  ;;  %v21182_v39 = vld [vmem:[%s22035_s12 + $0xc8] sm:$0xff]  }
  0x6d   : > { %19818 = vmatmul.mubr.msk.bf16.gmra.mrb[8].mxu0 %vm459_vm0, %v21117_v40  ;;  %v21185_v40 = vld [vmem:[%s27054_s1 + $0x18] sm:$0xff]  }
  0x6e   : > { %19908 = vmatmul.mubr.msk.bf16.gmra.mrb[8].mxu1 %vm459_vm0, %v21118_v41  ;;  %19821 = vmatprep.mubr.msk.bf16.mxu0 %vm459_vm0, %v21119_v42  ;;  %v21201_v41 = vld [vmem:[%s27054_s1 + $0x18] sm:$0xff]   ;;  %v21184_v42 = vld [vmem:[%s22035_s12 + $0xa0] sm:$0xff]  }
  0x6f   : > { %19911 = vmatprep.mubr.msk.bf16.mxu1 %vm459_vm0, %v21120_v43  ;;  %v21186_v43 = vld [vmem:[%s22035_s12 + $0xe0] sm:$0xff]  }
  0x75   : > { %19822 = vmatmul.mubr.msk.bf16.gmra.mrb[12].mxu0 %vm459_vm0, %v21121_v44  ;;  %v21187_v44 = vld [vmem:[%s22035_s12 + $0xa8] sm:$0xff]  }
  0x76   : > { %19912 = vmatmul.mubr.msk.bf16.gmra.mrb[12].mxu1 %vm459_vm0, %v21122_v45  ;;  %19827 = vmatprep.mubr.msk.bf16.mxu0 %vm459_vm0, %v21124_v46  ;;  %v21188_v45 = vld [vmem:[%s22035_s12 + $0xe8] sm:$0xff]   ;;  %v21189_v46 = vld [vmem:[%s22035_s12 + $0xb0] sm:$0xff]  }
  0x77   : > { %19917 = vmatprep.mubr.msk.bf16.mxu1 %vm459_vm0, %v21126_v47  ;;  %v21190_v47 = vld [vmem:[%s22035_s12 + $0xf0] sm:$0xff]  }
  0x7d   : > { %19828 = vmatmul.mubr.msk.bf16.vlgmr.msra.gmra.mrb[0].mxu0 %vm459_vm0, %v21127_v48  ;;  %v21203_v48 = vld [vmem:[%s27054_s1 + $0x20] sm:$0xff]  }
  0x7e   : > { %19844 = vmatpush3.bf16.msra.mxu0 %v21125_v34  ;;  %19918 = vmatmul.mubr.msk.bf16.vlgmr.msra.gmra.mrb[0].mxu1 %vm459_vm0, %v21128_v49  ;;  %v21175_v34 = vld [vmem:[%s22035_s12 + $0xc8] sm:$0xff]   ;;  %v21219_v49 = vld [vmem:[%s27054_s1 + $0x20] sm:$0xff]  }
  0x7f   : > { %19831 = vmatprep.mubr.msk.bf16.mxu0 %vm459_vm0, %v21129_v50  ;;  %19921 = vmatprep.mubr.msk.bf16.mxu1 %vm459_vm0, %v21130_v51  ;;  %v21191_v50 = vld [vmem:[%s22035_s12 + $0xb8] sm:$0xff]  }
  0x80   : > { %19934 = vmatpush3.bf16.msra.mxu1 %v21141_v35  ;;  %19951 = vmatprep.subr.bf16.mxu0 %v21144_v52  ;;  %v21176_v35 = vld [vmem:[%s22035_s12 + $0x108] sm:$0xff]   ;;  %v21192_v51 = vld [vmem:[%s22035_s12 + $0xf8] sm:$0xff]  }
  0x81   : > { %20041 = vmatprep.subr.bf16.mxu1 %v21159_v53 }
  0x85   : > { %19832 = vmatmul.mubr.msk.bf16.gmra.mrb[4].mxu0 %vm459_vm0, %v21131_v54  ;;  %v21195_v54 = vld [vmem:[%s22035_s12 + $0xc8] sm:$0xff]  }
  0x86   : > { %19922 = vmatmul.mubr.msk.bf16.gmra.mrb[4].mxu1 %vm459_vm0, %v21132_v55  ;;  %19835 = vmatprep.mubr.msk.bf16.mxu0 %vm459_vm0, %v21133_v56  ;;  %v21196_v55 = vld [vmem:[%s22035_s12 + $0x108] sm:$0xff]   ;;  %v21197_v56 = vld [vmem:[%s22035_s12 + $0xd0] sm:$0xff]  }
  0x87   : > { %19925 = vmatprep.mubr.msk.bf16.mxu1 %vm459_vm0, %v21134_v57  ;;  %v21198_v57 = vld [vmem:[%s22035_s12 + $0x110] sm:$0xff]  }
  0x8d   : > { %19836 = vmatmul.mubr.msk.bf16.gmra.mrb[8].mxu0 %vm459_vm0, %v21135_v58  ;;  %v21199_v58 = vld [vmem:[%s22035_s12 + $0xd8] sm:$0xff]  }
  0x8e   : > { %19926 = vmatmul.mubr.msk.bf16.gmra.mrb[8].mxu1 %vm459_vm0, %v21136_v59  ;;  %19839 = vmatprep.mubr.msk.bf16.mxu0 %vm459_vm0, %v21137_v60  ;;  %v21200_v59 = vld [vmem:[%s22035_s12 + $0x118] sm:$0xff]   ;;  %v21202_v60 = vld [vmem:[%s22035_s12 + $0xb0] sm:$0xff]  }
  0x8f   : > { %19929 = vmatprep.mubr.msk.bf16.mxu1 %vm459_vm0, %v21138_v61  ;;  %v21204_v61 = vld [vmem:[%s22035_s12 + $0xf0] sm:$0xff]  }
  0x95   : > { %19840 = vmatmul.mubr.msk.bf16.gmra.mrb[12].mxu0 %vm459_vm0, %v21139_v62  ;;  %v21205_v62 = vld [vmem:[%s22035_s12 + $0xb8] sm:$0xff]  }
  0x96   : > { %19930 = vmatmul.mubr.msk.bf16.gmra.mrb[12].mxu1 %vm459_vm0, %v21140_v63  ;;  %19845 = vmatprep.mubr.msk.bf16.mxu0 %vm459_vm0, %v21142_v0  ;;  %v21206_v63 = vld [vmem:[%s22035_s12 + $0xf8] sm:$0xff]   ;;  %v21207_v0 = vld [vmem:[%s22035_s12 + $0xc0] sm:$0xff]  }
  0x97   : > { %19935 = vmatprep.mubr.msk.bf16.mxu1 %vm459_vm0, %v21143_v1  ;;  %v21208_v1 = vld [vmem:[%s22035_s12 + $0x100] sm:$0xff]  }
  0x9d   : > { %19846 = vmatmul.mubr.msk.bf16.vlgmr.msra.gmra.mrb[0].mxu0 %vm459_vm0, %v21145_v2  ;;  %v21236_v2 = vld [vmem:[%s27054_s1 + $0x8] sm:$0xff]  }
  0x9e   : > { %19936 = vmatmul.mubr.msk.bf16.vlgmr.msra.gmra.mrb[0].mxu1 %vm459_vm0, %v21146_v3  ;;  %19952 = vmatpush3.bf16.msra.mxu0 %v21144_v52  ;;  %v21193_v52 = vld [vmem:[%s22035_s12 + $0xc0] sm:$0xff]   ;;  %v21237_v3 = vld [vmem:[%s27054_s1 + $0x8] sm:$0xff]  }
  0x9f   : > { %19849 = vmatprep.mubr.msk.bf16.mxu0 %vm459_vm0, %v21147_v4  ;;  %19939 = vmatprep.mubr.msk.bf16.mxu1 %vm459_vm0, %v21148_v5  ;;  %v21209_v4 = vld [vmem:[%s22035_s12 + $0xc8] sm:$0xff]  }
  0xa0   : > { %20042 = vmatpush3.bf16.msra.mxu1 %v21159_v53  ;;  %19969 = vmatprep.subr.bf16.mxu0 %v21161_v6  ;;  %v21194_v53 = vld [vmem:[%s22035_s12 + $0x100] sm:$0xff]   ;;  %v21210_v5 = vld [vmem:[%s22035_s12 + $0x108] sm:$0xff]  }
  0xa1   : > { %20059 = vmatprep.subr.bf16.mxu1 %v21177_v7 }
  0xa5   : > { %19850 = vmatmul.mubr.msk.bf16.gmra.mrb[4].mxu0 %vm459_vm0, %v21149_v8  ;;  %v21213_v8 = vld [vmem:[%s22035_s12 + $0xd8] sm:$0xff]  }
  0xa6   : > { %19940 = vmatmul.mubr.msk.bf16.gmra.mrb[4].mxu1 %vm459_vm0, %v21150_v9  ;;  %19853 = vmatprep.mubr.msk.bf16.mxu0 %vm459_vm0, %v21151_v10  ;;  %v21214_v9 = vld [vmem:[%s22035_s12 + $0x118] sm:$0xff]   ;;  %v21215_v10 = vld [vmem:[%s22035_s12 + $0xe0] sm:$0xff]  }
  0xa7   : > { %19943 = vmatprep.mubr.msk.bf16.mxu1 %vm459_vm0, %v21152_v11  ;;  %v21216_v11 = vld [vmem:[%s22035_s12 + $0x120] sm:$0xff]  }
  0xad   : > { %19854 = vmatmul.mubr.msk.bf16.gmra.mrb[8].mxu0 %vm459_vm0, %v21153_v12  ;;  %v21217_v12 = vld [vmem:[%s22035_s12 + $0xe8] sm:$0xff]  }
  0xae   : > { %19944 = vmatmul.mubr.msk.bf16.gmra.mrb[8].mxu1 %vm459_vm0, %v21154_v13  ;;  %19857 = vmatprep.mubr.msk.bf16.mxu0 %vm459_vm0, %v21155_v14  ;;  %v21218_v13 = vld [vmem:[%s22035_s12 + $0x128] sm:$0xff]   ;;  %v21220_v14 = vld [vmem:[%s22035_s12 + $0xc0] sm:$0xff]  }
  0xaf   : > { %19947 = vmatprep.mubr.msk.bf16.mxu1 %vm459_vm0, %v21156_v15  ;;  %v21221_v15 = vld [vmem:[%s22035_s12 + $0x100] sm:$0xff]  }
  0xb5   : > { %19858 = vmatmul.mubr.msk.bf16.gmra.mrb[12].mxu0 %vm459_vm0, %v21157_v16  ;;  %v21222_v16 = vld [vmem:[%s22035_s12 + $0xc8] sm:$0xff]  }
  0xb6   : > { %19948 = vmatmul.mubr.msk.bf16.gmra.mrb[12].mxu1 %vm459_vm0, %v21158_v17  ;;  %19953 = vmatprep.mubr.msk.bf16.mxu0 %vm459_vm0, %v21160_v18  ;;  %v21223_v17 = vld [vmem:[%s22035_s12 + $0x108] sm:$0xff]  }
  0xb7   : > { %20043 = vmatprep.mubr.msk.bf16.mxu1 %vm459_vm0, %v21162_v19 }
  0xbd   : > { %19954 = vmatmul.mubr.msk.bf16.vlgmr.msra.gmra.mrb[16].mxu0 %vm459_vm0, %v21163_v20 }
  0xbe   : > { %19970 = vmatpush3.bf16.msra.mxu0 %v21161_v6  ;;  %20044 = vmatmul.mubr.msk.bf16.vlgmr.msra.gmra.mrb[16].mxu1 %vm459_vm0, %v21164_v21  ;;  %v21211_v6 = vld [vmem:[%s22035_s12 + $0xd0] sm:$0xff]  }
  0xbf   : > { %19957 = vmatprep.mubr.msk.bf16.mxu0 %vm459_vm0, %v21165_v22  ;;  %20047 = vmatprep.mubr.msk.bf16.mxu1 %vm459_vm0, %v21166_v23 }
  0xc0   : > { %20060 = vmatpush3.bf16.msra.mxu1 %v21177_v7  ;;  %19987 = vmatprep.subr.bf16.mxu0 %v21179_v24  ;;  %v21212_v7 = vld [vmem:[%s22035_s12 + $0x110] sm:$0xff]  }
  0xc1   : > { %20077 = vmatprep.subr.bf16.mxu1 %v21183_v25 }
  0xc5   : > { %19958 = vmatmul.mubr.msk.bf16.gmra.mrb[20].mxu0 %vm459_vm0, %v21167_v26 }
  0xc6   : > { %20048 = vmatmul.mubr.msk.bf16.gmra.mrb[20].mxu1 %vm459_vm0, %v21168_v27  ;;  %19961 = vmatprep.mubr.msk.bf16.mxu0 %vm459_vm0, %v21169_v28 }
  0xc7   : > { %20051 = vmatprep.mubr.msk.bf16.mxu1 %vm459_vm0, %v21170_v29 }
  0xcd   : > { %19962 = vmatmul.mubr.msk.bf16.gmra.mrb[24].mxu0 %vm459_vm0, %v21171_v30 }
  0xce   : > { %20052 = vmatmul.mubr.msk.bf16.gmra.mrb[24].mxu1 %vm459_vm0, %v21172_v31  ;;  %19965 = vmatprep.mubr.msk.bf16.mxu0 %vm459_vm0, %v21173_v32  ;;  %v22392_v32 = vld [vmem:[%s22035_s12 + $0x110] sm:$0xff]  }
  0xcf   : > { %20055 = vmatprep.mubr.msk.bf16.mxu1 %vm459_vm0, %v21174_v33  ;;  %v22395_v33 = vld [vmem:[%s22035_s12 + $0x150] sm:$0xff]  }
  0xd5   : > { %19966 = vmatmul.mubr.msk.bf16.gmra.mrb[28].mxu0 %vm459_vm0, %v21175_v34  ;;  %v22404_v34 = vld [vmem:[%s22035_s12 + $0x118] sm:$0xff]  }
  0xd6   : > { %20056 = vmatmul.mubr.msk.bf16.gmra.mrb[28].mxu1 %vm459_vm0, %v21176_v35  ;;  %19971 = vmatprep.mubr.msk.bf16.mxu0 %vm459_vm0, %v21178_v36  ;;  %v22407_v35 = vld [vmem:[%s22035_s12 + $0x158] sm:$0xff]   ;;  %v22410_v36 = vld [vmem:[%s22035_s12 + $0x120] sm:$0xff]  }
  0xd7   : > { %20061 = vmatprep.mubr.msk.bf16.mxu1 %vm459_vm0, %v21180_v37  ;;  %v22413_v37 = vld [vmem:[%s22035_s12 + $0x160] sm:$0xff]  }
  0xdd   : > { %19972 = vmatmul.mubr.msk.bf16.vlgmr.msra.gmra.mrb[16].mxu0 %vm459_vm0, %v21181_v38  ;;  %v22418_v38 = vld [vmem:[%s27054_s1 + $0x10] sm:$0xff]  }
  0xde   : > { %19988 = vmatpush3.bf16.msra.mxu0 %v21179_v24  ;;  %20062 = vmatmul.mubr.msk.bf16.vlgmr.msra.gmra.mrb[16].mxu1 %vm459_vm0, %v21182_v39  ;;  %v21228_v24 = vld [vmem:[%s22035_s12 + $0xe0] sm:$0xff]   ;;  %v22425_v39 = vld [vmem:[%s27054_s1 + $0x10] sm:$0xff]  }
  0xdf   : > { %19975 = vmatprep.mubr.msk.bf16.mxu0 %vm459_vm0, %v21160_v18  ;;  %20065 = vmatprep.mubr.msk.bf16.mxu1 %vm459_vm0, %v21162_v19  ;;  %v21224_v18 = vld [vmem:[%s22035_s12 + $0xd0] sm:$0xff]  }
  0xe0   : > { %20078 = vmatpush3.bf16.msra.mxu1 %v21183_v25  ;;  %20005 = vmatprep.subr.bf16.mxu0 %v21185_v40  ;;  %v21225_v19 = vld [vmem:[%s22035_s12 + $0x110] sm:$0xff]   ;;  %v21229_v25 = vld [vmem:[%s22035_s12 + $0x120] sm:$0xff]  }
  0xe1   : > { %20095 = vmatprep.subr.bf16.mxu1 %v21201_v41 }
  0xe5   : > { %19976 = vmatmul.mubr.msk.bf16.gmra.mrb[20].mxu0 %vm459_vm0, %v21163_v20  ;;  %v21254_v20 = vld [vmem:[%s27054_s1] sm:$0xff]  }
  0xe6   : > { %20066 = vmatmul.mubr.msk.bf16.gmra.mrb[20].mxu1 %vm459_vm0, %v21164_v21  ;;  %19979 = vmatprep.mubr.msk.bf16.mxu0 %vm459_vm0, %v21165_v22  ;;  %v21255_v21 = vld [vmem:[%s27054_s1] sm:$0xff]   ;;  %v21226_v22 = vld [vmem:[%s22035_s12 + $0xd8] sm:$0xff]  }
  0xe7   : > { %20069 = vmatprep.mubr.msk.bf16.mxu1 %vm459_vm0, %v21166_v23  ;;  %v21227_v23 = vld [vmem:[%s22035_s12 + $0x118] sm:$0xff]  }
  0xed   : > { %19980 = vmatmul.mubr.msk.bf16.gmra.mrb[24].mxu0 %vm459_vm0, %v21167_v26  ;;  %v21230_v26 = vld [vmem:[%s22035_s12 + $0xe8] sm:$0xff]  }
  0xee   : > { %20070 = vmatmul.mubr.msk.bf16.gmra.mrb[24].mxu1 %vm459_vm0, %v21168_v27  ;;  %19983 = vmatprep.mubr.msk.bf16.mxu0 %vm459_vm0, %v21169_v28  ;;  %v21231_v27 = vld [vmem:[%s22035_s12 + $0x128] sm:$0xff]   ;;  %v21232_v28 = vld [vmem:[%s22035_s12 + $0xf0] sm:$0xff]  }
  0xef   : > { %20073 = vmatprep.mubr.msk.bf16.mxu1 %vm459_vm0, %v21170_v29  ;;  %v21233_v29 = vld [vmem:[%s22035_s12 + $0x130] sm:$0xff]  }
  0xf5   : > { %19984 = vmatmul.mubr.msk.bf16.gmra.mrb[28].mxu0 %vm459_vm0, %v21171_v30  ;;  %v21234_v30 = vld [vmem:[%s22035_s12 + $0xf8] sm:$0xff]  }
  0xf6   : > { %20074 = vmatmul.mubr.msk.bf16.gmra.mrb[28].mxu1 %vm459_vm0, %v21172_v31  ;;  %19989 = vmatprep.mubr.msk.bf16.mxu0 %vm459_vm0, %v21184_v42  ;;  %v21235_v31 = vld [vmem:[%s22035_s12 + $0x138] sm:$0xff]   ;;  %v22440_v42 = vld [vmem:[%s22035_s12 + $0x130] sm:$0xff]  }
  0xf7   : > { %20079 = vmatprep.mubr.msk.bf16.mxu1 %vm459_vm0, %v21186_v43  ;;  %v22445_v43 = vld [vmem:[%s22035_s12 + $0x170] sm:$0xff]  }
  0xfd   : > { %19990 = vmatmul.mubr.msk.bf16.vlgmr.msra.gmra.mrb[16].mxu0 %vm459_vm0, %v21187_v44  ;;  %v22456_v44 = vld [vmem:[%s22035_s12 + $0x138] sm:$0xff]  }
  0xfe   : > { %20006 = vmatpush3.bf16.msra.mxu0 %v21185_v40  ;;  %20080 = vmatmul.mubr.msk.bf16.vlgmr.msra.gmra.mrb[16].mxu1 %vm459_vm0, %v21188_v45  ;;  %v22434_v40 = vld [vmem:[%s22035_s12 + $0x128] sm:$0xff]   ;;  %v22459_v45 = vld [vmem:[%s22035_s12 + $0x178] sm:$0xff]  }
  0xff   : > { %19993 = vmatprep.mubr.msk.bf16.mxu0 %vm459_vm0, %v21189_v46  ;;  %20083 = vmatprep.mubr.msk.bf16.mxu1 %vm459_vm0, %v21190_v47  ;;  %v21250_v46 = vld [vmem:[%s22035_s12 + $0x140] sm:$0xff]  }
 0x100   : > { %20096 = vmatpush3.bf16.msra.mxu1 %v21201_v41  ;;  %20023 = vmatprep.subr.bf16.mxu0 %v21203_v48  ;;  %v22437_v41 = vld [vmem:[%s22035_s12 + $0x168] sm:$0xff]   ;;  %v21251_v47 = vld [vmem:[%s22035_s12 + $0x180] sm:$0xff]  }
 0x101   : > { %20113 = vmatprep.subr.bf16.mxu1 %v21219_v49 }
 0x105   : > { %19994 = vmatmul.mubr.msk.bf16.gmra.mrb[20].mxu0 %vm459_vm0, %v21191_v50 }
 0x106   : > { %20084 = vmatmul.mubr.msk.bf16.gmra.mrb[20].mxu1 %vm459_vm0, %v21192_v51  ;;  %19997 = vmatprep.mubr.msk.bf16.mxu0 %vm459_vm0, %v21193_v52  ;;  %v21253_v51 = vld [vmem:[%s22035_s12 + $0x188] sm:$0xff]   ;;  %v21256_v52 = vld [vmem:[%s22035_s12 + $0x100] sm:$0xff]  }
 0x107   : > { %20087 = vmatprep.mubr.msk.bf16.mxu1 %vm459_vm0, %v21194_v53 }
 0x10d   : > { %19998 = vmatmul.mubr.msk.bf16.gmra.mrb[24].mxu0 %vm459_vm0, %v21195_v54 }
 0x10e   : > { %20088 = vmatmul.mubr.msk.bf16.gmra.mrb[24].mxu1 %vm459_vm0, %v21196_v55  ;;  %20001 = vmatprep.mubr.msk.bf16.mxu0 %vm459_vm0, %v21197_v56 }
 0x10f   : > { %20091 = vmatprep.mubr.msk.bf16.mxu1 %vm459_vm0, %v21198_v57 }
 0x115   : > { %20002 = vmatmul.mubr.msk.bf16.gmra.mrb[28].mxu0 %vm459_vm0, %v21199_v58 }
 0x116   : > { %20092 = vmatmul.mubr.msk.bf16.gmra.mrb[28].mxu1 %vm459_vm0, %v21200_v59  ;;  %20007 = vmatprep.mubr.msk.bf16.mxu0 %vm459_vm0, %v21202_v60 }
 0x117   : > { %20097 = vmatprep.mubr.msk.bf16.mxu1 %vm459_vm0, %v21204_v61 }
 0x11d   : > { %20008 = vmatmul.mubr.msk.bf16.vlgmr.msra.gmra.mrb[16].mxu0 %vm459_vm0, %v21205_v62 }
 0x11e   : > { %20024 = vmatpush3.bf16.msra.mxu0 %v21203_v48  ;;  %20098 = vmatmul.mubr.msk.bf16.vlgmr.msra.gmra.mrb[16].mxu1 %vm459_vm0, %v21206_v63  ;;  %v22468_v48 = vld [vmem:[%s27055_s2] ss:$0 sm:$0xff] }
 0x11f   : > { %20011 = vmatprep.mubr.msk.bf16.mxu0 %vm459_vm0, %v21207_v0  ;;  %20101 = vmatprep.mubr.msk.bf16.mxu1 %vm459_vm0, %v21208_v1  ;;  %v21257_v0 = vld [vmem:[%s22035_s12 + $0x140] sm:$0xff]  }
 0x120   : > { %20114 = vmatpush3.bf16.msra.mxu1 %v21219_v49  ;;  %20131 = vmatprep.subr.bf16.mxu0 %v21236_v2  ;;  %v21252_v49 = vld [vmem:[%s22035_s12 + $0x148] sm:$0xff]  }
 0x121   : > { %20221 = vmatprep.subr.bf16.mxu1 %v21237_v3 }
 0x125   : > { %20012 = vmatmul.mubr.msk.bf16.gmra.mrb[20].mxu0 %vm459_vm0, %v21209_v4 }
 0x126   : > { %20102 = vmatmul.mubr.msk.bf16.gmra.mrb[20].mxu1 %vm459_vm0, %v21210_v5  ;;  %20015 = vmatprep.mubr.msk.bf16.mxu0 %vm459_vm0, %v21211_v6 }
 0x127   : > { %20105 = vmatprep.mubr.msk.bf16.mxu1 %vm459_vm0, %v21212_v7 }
 0x12d   : > { %20016 = vmatmul.mubr.msk.bf16.gmra.mrb[24].mxu0 %vm459_vm0, %v21213_v8 }
 0x12e   : > { %20106 = vmatmul.mubr.msk.bf16.gmra.mrb[24].mxu1 %vm459_vm0, %v21214_v9  ;;  %20019 = vmatprep.mubr.msk.bf16.mxu0 %vm459_vm0, %v21215_v10  ;;  %v21258_v9 = vld [vmem:[%s22035_s12 + $0x108] sm:$0xff]  }
 0x12f   : > { %20109 = vmatprep.mubr.msk.bf16.mxu1 %vm459_vm0, %v21216_v11 }
 0x135   : > { %20020 = vmatmul.mubr.msk.bf16.gmra.mrb[28].mxu0 %vm459_vm0, %v21217_v12  ;;  %v21259_v12 = vld [vmem:[%s22035_s12 + $0x148] sm:$0xff]  }
 0x136   : > { %20110 = vmatmul.mubr.msk.bf16.gmra.mrb[28].mxu1 %vm459_vm0, %v21218_v13  ;;  %20025 = vmatprep.mubr.msk.bf16.mxu0 %vm459_vm0, %v21220_v14 }
 0x137   : > { %20115 = vmatprep.mubr.msk.bf16.mxu1 %vm459_vm0, %v21221_v15 }
 0x13d   : > { %20026 = vmatmul.mubr.msk.bf16.vlgmr.msra.gmra.mrb[16].mxu0 %vm459_vm0, %v21222_v16 }
 0x13e   : > { %20116 = vmatmul.mubr.msk.bf16.vlgmr.msra.gmra.mrb[16].mxu1 %vm459_vm0, %v21223_v17  ;;  %20029 = vmatprep.mubr.msk.bf16.mxu0 %vm459_vm0, %v21224_v18 }
 0x13f   : > { %20119 = vmatprep.mubr.msk.bf16.mxu1 %vm459_vm0, %v21225_v19  ;;  %20132 = vmatpush3.bf16.msra.mxu0 %v21236_v2 }
 0x140   : > { %20222 = vmatpush3.bf16.msra.mxu1 %v21237_v3  ;;  %20149 = vmatprep.subr.bf16.mxu0 %v21254_v20 }
 0x141   : > { %20239 = vmatprep.subr.bf16.mxu1 %v21255_v21 }
 0x145   : > { %20030 = vmatmul.mubr.msk.bf16.gmra.mrb[20].mxu0 %vm459_vm0, %v21226_v22 }
 0x146   : > { %20120 = vmatmul.mubr.msk.bf16.gmra.mrb[20].mxu1 %vm459_vm0, %v21227_v23  ;;  %20033 = vmatprep.mubr.msk.bf16.mxu0 %vm459_vm0, %v21228_v24 }
 0x147   : > { %20123 = vmatprep.mubr.msk.bf16.mxu1 %vm459_vm0, %v21229_v25 }
 0x14d   : > { %20034 = vmatmul.mubr.msk.bf16.gmra.mrb[24].mxu0 %vm459_vm0, %v21230_v26 }
 0x14e   : > { %20124 = vmatmul.mubr.msk.bf16.gmra.mrb[24].mxu1 %vm459_vm0, %v21231_v27  ;;  %20037 = vmatprep.mubr.msk.bf16.mxu0 %vm459_vm0, %v21232_v28  ;;  %v22500_v27 = vld [vmem:[%s27054_s1 + $0x18] sm:$0xff]  }
 0x14f   : > { %20127 = vmatprep.mubr.msk.bf16.mxu1 %vm459_vm0, %v21233_v29 }
 0x155   : > { %20038 = vmatmul.mubr.msk.bf16.gmra.mrb[28].mxu0 %vm459_vm0, %v21234_v30 }
 0x156   : > { %20128 = vmatmul.mubr.msk.bf16.gmra.mrb[28].mxu1 %vm459_vm0, %v21235_v31  ;;  %20133 = vmatprep.mubr.msk.bf16.mxu0 %vm459_vm0, %v22392_v32 }
 0x157   : > { %20223 = vmatprep.mubr.msk.bf16.mxu1 %vm459_vm0, %v22395_v33 }
 0x15d   : > { %20134 = vmatmul.mubr.msk.bf16.vlgmr.msra.gmra.mrb[32].mxu0 %vm459_vm0, %v22404_v34 }
 0x15e   : > { %20224 = vmatmul.mubr.msk.bf16.vlgmr.msra.gmra.mrb[32].mxu1 %vm459_vm0, %v22407_v35  ;;  %20137 = vmatprep.mubr.msk.bf16.mxu0 %vm459_vm0, %v22410_v36 }
 0x15f   : > { %20227 = vmatprep.mubr.msk.bf16.mxu1 %vm459_vm0, %v22413_v37  ;;  %20150 = vmatpush3.bf16.msra.mxu0 %v21254_v20 }
 0x160   : > { %20240 = vmatpush3.bf16.msra.mxu1 %v21255_v21  ;;  %20167 = vmatprep.subr.bf16.mxu0 %v22418_v38 }
 0x161   : > { %20257 = vmatprep.subr.bf16.mxu1 %v22425_v39 }
 0x165   : > { %20138 = vmatmul.mubr.msk.bf16.gmra.mrb[36].mxu0 %vm459_vm0, %v22434_v40 }
 0x166   : > { %20228 = vmatmul.mubr.msk.bf16.gmra.mrb[36].mxu1 %vm459_vm0, %v22437_v41  ;;  %20141 = vmatprep.mubr.msk.bf16.mxu0 %vm459_vm0, %v22440_v42 }
 0x167   : > { %20231 = vmatprep.mubr.msk.bf16.mxu1 %vm459_vm0, %v22445_v43 }
 0x16d   : > { %20142 = vmatmul.mubr.msk.bf16.gmra.mrb[40].mxu0 %vm459_vm0, %v22456_v44 }
 0x16e   : > { %20232 = vmatmul.mubr.msk.bf16.gmra.mrb[40].mxu1 %vm459_vm0, %v22459_v45  ;;  %20145 = vmatprep.mubr.msk.bf16.mxu0 %vm459_vm0, %v21250_v46 }
 0x16f   : > { %20235 = vmatprep.mubr.msk.bf16.mxu1 %vm459_vm0, %v21251_v47  ;;  %v22507_v47 = vld [vmem:[%s27054_s1 + $0x18] sm:$0xff]  }
 0x170   : > { %v19847_v50 = vpop.f32.mrb[0].mxu0 }
 0x171   : > { %v19937_v53 = vpop.f32.mrb[0].mxu1  ;;  %v1227_v54 = vpop.f32.mrb[1].mxu0  ;;  %v1314_v55 = vadd.f32 %v19847_v50, %v22468_v48 }
 0x172   : > { %v2275_v56 = vadd.f32 %v19937_v53, %v22468_v48  ;;  %v2194_v57 = vpop.f32.mrb[1].mxu1  ;;  %v19848_v58 = vpop.f32.mrb[2].mxu0  ;;  %v1312_v59 = vadd.f32 %v22468_v48, %v1227_v54 }
 0x173   : > { %v2273_v60 = vadd.f32 %v22468_v48, %v2194_v57  ;;  %v1315_v61 = vadd.f32 %v19848_v58, %v22468_v48  ;;  %v19938_v62 = vpop.f32.mrb[2].mxu1  ;;  %v1230_v63 = vpop.f32.mrb[3].mxu0  ;;  %v1330_v3 = vmax.f32 %v1314_v55, 0.0 }
 0x174   : > { %v2276_v1 = vadd.f32 %v19938_v62, %v22468_v48  ;;  %v2197_v2 = vpop.f32.mrb[3].mxu1  ;;  %v2291_v4 = vmax.f32 %v2275_v56, 0.0  ;;  %v1328_v5 = vmax.f32 %v1312_v59, 0.0  ;;  %v1313_v8 = vadd.f32 %v22468_v48, %v1230_v63 }
 0x175   : > { %20146 = vmatmul.mubr.msk.bf16.gmra.mrb[44].mxu0 %vm459_vm0, %v21252_v49  ;;  %v2289_v6 = vmax.f32 %v2273_v60, 0.0  ;;  %v1331_v7 = vmax.f32 %v1315_v61, 0.0  ;;  %v2274_v16 = vadd.f32 %v22468_v48, %v2197_v2 }
 0x176   : > { %20236 = vmatmul.mubr.msk.bf16.gmra.mrb[44].mxu1 %vm459_vm0, %v21253_v51  ;;  %20151 = vmatprep.mubr.msk.bf16.mxu0 %vm459_vm0, %v21256_v52  ;;  %v2292_v10 = vmax.f32 %v2276_v1, 0.0  ;;  %v1329_v21 = vmax.f32 %v1313_v8, 0.0 }
 0x177   : > { %20241 = vmatprep.mubr.msk.bf16.mxu1 %vm459_vm0, %v21257_v0  ;;  %v2290_v57 = vmax.f32 %v2274_v16, 0.0 }
 0x178   : > { %v19851_v11 = vpop.f32.mrb[4].mxu0 }
 0x179   : > { %v1318_v13 = vadd.f32 %v19851_v11, %v22468_v48  ;;  %v19941_v14 = vpop.f32.mrb[4].mxu1  ;;  %v1243_v15 = vpop.f32.mrb[5].mxu0 }
 0x17a   : > { %v2279_v17 = vadd.f32 %v19941_v14, %v22468_v48  ;;  %v1316_v18 = vadd.f32 %v22468_v48, %v1243_v15  ;;  %v2210_v19 = vpop.f32.mrb[5].mxu1  ;;  %v19852_v20 = vpop.f32.mrb[6].mxu0 }
 0x17b   : > { %v1334_v22 = vmax.f32 %v1318_v13, 0.0  ;;  %v2277_v23 = vadd.f32 %v22468_v48, %v2210_v19  ;;  %v1319_v24 = vadd.f32 %v19852_v20, %v22468_v48  ;;  %v19942_v25 = vpop.f32.mrb[6].mxu1  ;;  %v1246_v26 = vpop.f32.mrb[7].mxu0 }
 0x17c   : > { %v2295_v28 = vmax.f32 %v2279_v17, 0.0  ;;  %v1332_v29 = vmax.f32 %v1316_v18, 0.0  ;;  %v2280_v30 = vadd.f32 %v19942_v25, %v22468_v48  ;;  %v1317_v31 = vadd.f32 %v22468_v48, %v1246_v26  ;;  %v2213_v46 = vpop.f32.mrb[7].mxu1 }
 0x17d   : > { %v7136_v49 = vmax.f32 %v1330_v3, %v1334_v22  ;;  %v2293_v50 = vmax.f32 %v2277_v23, 0.0  ;;  %v1335_v51 = vmax.f32 %v1319_v24, 0.0  ;;  %v2278_v52 = vadd.f32 %v22468_v48, %v2213_v46  ;;  %20152 = vmatmul.mubr.msk.bf16.vlgmr.msra.gmra.mrb[32].mxu0 %vm459_vm0, %v21258_v9 }
 0x17e   : > { %v22511_v53 = vmax.f32 %v2291_v4, %v2295_v28  ;;  %v7134_v54 = vmax.f32 %v1328_v5, %v1332_v29  ;;  %v2296_v55 = vmax.f32 %v2280_v30, 0.0  ;;  %v1333_v56 = vmax.f32 %v1317_v31, 0.0  ;;  %20242 = vmatmul.mubr.msk.bf16.vlgmr.msra.gmra.mrb[32].mxu1 %vm459_vm0, %v21259_v12  ;;  %20155 = vmatprep.mubr.msk.bf16.mxu0 %vm459_vm0, %v22392_v32 }
 0x17f   : > { %7140 = vst [vmem:[#allocation6 + $0x10] sm:$0xff] %v7136_v49  ;;  %v22516_v58 = vmax.f32 %v2289_v6, %v2293_v50  ;;  %v7137_v59 = vmax.f32 %v1331_v7, %v1335_v51  ;;  %v2294_v60 = vmax.f32 %v2278_v52, 0.0  ;;  %20245 = vmatprep.mubr.msk.bf16.mxu1 %vm459_vm0, %v22395_v33  ;;  %20168 = vmatpush3.bf16.msra.mxu0 %v22418_v38 }
 0x180   : > { %7138 = vst [vmem:[#allocation6] sm:$0xff] %v7134_v54  ;;  %v22521_v61 = vmax.f32 %v2292_v10, %v2296_v55  ;;  %v7135_v62 = vmax.f32 %v1329_v21, %v1333_v56  ;;  %v19855_v63 = vpop.f32.mrb[8].mxu0  ;;  %20258 = vmatpush3.bf16.msra.mxu1 %v22425_v39  ;;  %20185 = vmatprep.subr.bf16.mxu0 %v22500_v27 }
 0x181   : > { %7141 = vst [vmem:[#allocation6 + $0x18] sm:$0xff] %v7137_v59  ;;  %v22525_v32 = vmax.f32 %v2290_v57, %v2294_v60  ;;  %v1322_v0 = vadd.f32 %v19855_v63, %v22468_v48  ;;  %v19945_v1 = vpop.f32.mrb[8].mxu1  ;;  %v1259_v2 = vpop.f32.mrb[9].mxu0  ;;  %20275 = vmatprep.subr.bf16.mxu1 %v22507_v47 }
 0x182   : > { %7139 = vst [vmem:[#allocation6 + $0x8] sm:$0xff] %v7135_v62  ;;  %v2283_v33 = vadd.f32 %v19945_v1, %v22468_v48  ;;  %v1320_v38 = vadd.f32 %v22468_v48, %v1259_v2  ;;  %v2226_v3 = vpop.f32.mrb[9].mxu1  ;;  %v19856_v4 = vpop.f32.mrb[10].mxu0 }
 0x183   : > { %v2281_v39 = vadd.f32 %v22468_v48, %v2226_v3  ;;  %v1323_v5 = vadd.f32 %v19856_v4, %v22468_v48  ;;  %v19946_v6 = vpop.f32.mrb[10].mxu1  ;;  %v1262_v7 = vpop.f32.mrb[11].mxu0  ;;  %v1338_v11 = vmax.f32 %v1322_v0, 0.0  ;;  %v21262_v4 = vld [vmem:[%s22035_s12 + $0x120] sm:$0xff]  }
 0x184   : > { %v2284_v8 = vadd.f32 %v19946_v6, %v22468_v48  ;;  %v1321_v9 = vadd.f32 %v22468_v48, %v1262_v7  ;;  %v2229_v10 = vpop.f32.mrb[11].mxu1  ;;  %v2299_v12 = vmax.f32 %v2283_v33, 0.0  ;;  %v1336_v14 = vmax.f32 %v1320_v38, 0.0  ;;  %v21265_v6 = vld [vmem:[%s22035_s12 + $0x168] sm:$0xff]   ;;  %v21266_v7 = vld [vmem:[%s22035_s12 + $0x130] sm:$0xff]  }
 0x185   : > { %v2282_v13 = vadd.f32 %v22468_v48, %v2229_v10  ;;  %20156 = vmatmul.mubr.msk.bf16.gmra.mrb[36].mxu0 %vm459_vm0, %v22404_v34  ;;  %v2297_v15 = vmax.f32 %v2281_v39, 0.0  ;;  %v1339_v16 = vmax.f32 %v1323_v5, 0.0  ;;  %v21267_v10 = vld [vmem:[%s22035_s12 + $0x170] sm:$0xff]  }
 0x186   : > { %v2300_v17 = vmax.f32 %v2284_v8, 0.0  ;;  %20246 = vmatmul.mubr.msk.bf16.gmra.mrb[36].mxu1 %vm459_vm0, %v22407_v35  ;;  %20159 = vmatprep.mubr.msk.bf16.mxu0 %vm459_vm0, %v22410_v36  ;;  %v1337_v18 = vmax.f32 %v1321_v9, 0.0 }
 0x187   : > { %v2298_v19 = vmax.f32 %v2282_v13, 0.0  ;;  %20249 = vmatprep.mubr.msk.bf16.mxu1 %vm459_vm0, %v22413_v37 }
 0x188   : > { %v7144_v20 = vld [vmem:[#allocation6 + $0x10] ss:$2 sm:$0x3f]  ;;  %v7148_v21 = vld [vmem:[#allocation6 + $0x11] ss:$2 sm:$0x3f] }
 0x189   : > { %v7142_v22 = vld [vmem:[#allocation6] ss:$2 sm:$0xff]  ;;  %v7146_v23 = vld [vmem:[#allocation6 + $0x1] ss:$2 sm:$0xff]  ;;  %v19859_v34 = vpop.f32.mrb[12].mxu0  ;;  %v19949_v24 = vpop.f32.mrb[12].mxu1  ;;  %v7150_v37 = vmax.f32 %v7144_v20, %v7148_v21 }
 0x18a   : > { %v1326_v25 = vadd.f32 %v19859_v34, %v22468_v48  ;;  %v2287_v26 = vadd.f32 %v19949_v24, %v22468_v48  ;;  %v1275_v28 = vpop.f32.mrb[13].mxu0  ;;  %v2242_v35 = vpop.f32.mrb[13].mxu1  ;;  %v7149_v46 = vmax.f32 %v7142_v22, %v7146_v23  ;;  %v21272_v23 = vld [vmem:[%s22035_s12 + $0x148] sm:$0xff]  }
 0x18b   : > { %v1324_v29 = vadd.f32 %v22468_v48, %v1275_v28  ;;  %v2285_v36 = vadd.f32 %v22468_v48, %v2242_v35  ;;  %v19860_v30 = vpop.f32.mrb[14].mxu0  ;;  %v19950_v31 = vpop.f32.mrb[14].mxu1  ;;  %v21273_v34 = vld [vmem:[%s22035_s12 + $0x188] sm:$0xff]   ;;  %v21274_v35 = vld [vmem:[%s22035_s12 + $0x150] sm:$0xff]  }
 0x18c   : > { %v1342_v49 = vmax.f32 %v1326_v25, 0.0  ;;  %v2303_v50 = vmax.f32 %v2287_v26, 0.0  ;;  %v1327_v51 = vadd.f32 %v19860_v30, %v22468_v48  ;;  %v2288_v52 = vadd.f32 %v19950_v31, %v22468_v48  ;;  %v1278_v54 = vpop.f32.mrb[15].mxu0  ;;  %v2245_v55 = vpop.f32.mrb[15].mxu1 }
 0x18d   : > { %v1340_v56 = vmax.f32 %v1324_v29, 0.0  ;;  %v2301_v57 = vmax.f32 %v2285_v36, 0.0  ;;  %v1325_v59 = vadd.f32 %v22468_v48, %v1278_v54  ;;  %v2286_v60 = vadd.f32 %v22468_v48, %v2245_v55  ;;  %20160 = vmatmul.mubr.msk.bf16.gmra.mrb[40].mxu0 %vm459_vm0, %v22434_v40  ;;  %v21275_v36 = vld [vmem:[%s22035_s12 + $0x190] sm:$0xff]   ;;  %v21283_v54 = vld [vmem:[%s22035_s12 + $0x178] sm:$0xff]   ;;  %v21284_v55 = vld [vmem:[%s22035_s12 + $0x140] sm:$0xff]  }
 0x18e   : > { %v7163_v62 = vmax.f32 %v1338_v11, %v1342_v49  ;;  %v7219_v63 = vmax.f32 %v2299_v12, %v2303_v50  ;;  %v1343_v0 = vmax.f32 %v1327_v51, 0.0  ;;  %v2304_v1 = vmax.f32 %v2288_v52, 0.0  ;;  %20250 = vmatmul.mubr.msk.bf16.gmra.mrb[40].mxu1 %vm459_vm0, %v22437_v41  ;;  %20163 = vmatprep.mubr.msk.bf16.mxu0 %vm459_vm0, %v22440_v42  ;;  %v21263_v42 = vld [vmem:[%s22035_s12 + $0x160] sm:$0xff]   ;;  %v21277_v49 = vld [vmem:[%s22035_s12 + $0x198] sm:$0xff]   ;;  %v21280_v50 = vld [vmem:[%s22035_s12 + $0x130] sm:$0xff]  }
 0x18f   : > { %v7161_v2 = vmax.f32 %v1336_v14, %v1340_v56  ;;  %v7217_v33 = vmax.f32 %v2297_v15, %v2301_v57  ;;  %v1341_v38 = vmax.f32 %v1325_v59, 0.0  ;;  %v2302_v3 = vmax.f32 %v2286_v60, 0.0  ;;  %20253 = vmatprep.mubr.msk.bf16.mxu1 %vm459_vm0, %v22445_v43  ;;  %v21264_v43 = vld [vmem:[%s22035_s12 + $0x128] sm:$0xff]   ;;  %v21268_v14 = vld [vmem:[%s22035_s12 + $0x138] sm:$0xff]   ;;  %v21270_v15 = vld [vmem:[%s22035_s12 + $0x140] sm:$0xff]  }
 0x190   : > { %7167 = vst [vmem:[#allocation6 + $0x10] sm:$0xff] %v7163_v62  ;;  %v7164_v40 = vmax.f32 %v1339_v16, %v1343_v0  ;;  %v7220_v48 = vmax.f32 %v2300_v17, %v2304_v1  ;;  %v7151_v39 = vpack.c.bf16 %v7150_v37, %v7149_v46  ;;  %v21276_v37 = vld [vmem:[%s22035_s12 + $0x158] sm:$0xff]   ;;  %v21281_v51 = vld [vmem:[%s22035_s12 + $0x170] sm:$0xff]   ;;  %v21285_v56 = vld [vmem:[%s22035_s12 + $0x180] sm:$0xff]  }
 0x191   : > { %7165 = vst [vmem:[#allocation6] sm:$0xff] %v7161_v2  ;;  %v7162_v41 = vmax.f32 %v1337_v18, %v1341_v38  ;;  %v7218_v5 = vmax.f32 %v2298_v19, %v2302_v3  ;;  %v21271_v18 = vld [vmem:[%s22035_s12 + $0x180] sm:$0xff]   ;;  %v21282_v52 = vld [vmem:[%s22035_s12 + $0x138] sm:$0xff]   ;;  %v21328_v57 = vld [vmem:[%s27054_s1 + $0x8] sm:$0xff]  }
 0x192   : > { %7168 = vst [vmem:[#allocation6 + $0x18] sm:$0xff] %v7164_v40  ;;  %7152 = vst [vmem:[#allocation3] sm:$0x7f] %v7151_v39  ;;  %v21302_v59 = vld [vmem:[%s27056_s3 + $0xc0] sm:$0xff]   ;;  %v21286_v62 = vld [vmem:[%s22035_s12 + $0x148] sm:$0xff]  }
 0x193   : > { %7166 = vst [vmem:[#allocation6 + $0x8] sm:$0xff] %v7162_v41  ;;  %v21288_v0 = vld [vmem:[%s22035_s12 + $0x150] sm:$0xff]   ;;  %v21290_v40 = vld [vmem:[%s22035_s12 + $0x158] sm:$0xff]   ;;  %v21292_v39 = vld [vmem:[%s22035_s12 + $0x160] sm:$0xff]  }
 0x194   : > { %v21289_v1 = vld [vmem:[%s22035_s12 + $0x190] sm:$0xff]   ;;  %v21293_v41 = vld [vmem:[%s22035_s12 + $0x1a0] sm:$0xff]  }
 0x195   : > { %20164 = vmatmul.mubr.msk.bf16.gmra.mrb[44].mxu0 %vm459_vm0, %v22456_v44 }
 0x196   : > { %20254 = vmatmul.mubr.msk.bf16.gmra.mrb[44].mxu1 %vm459_vm0, %v22459_v45  ;;  %20169 = vmatprep.mubr.msk.bf16.mxu0 %vm459_vm0, %v21262_v4  ;;  %v22577_v45 = vld [vmem:[%s27054_s1 + $0x20] sm:$0xff]   ;;  %v21291_v4 = vld [vmem:[%s22035_s12 + $0x198] sm:$0xff]  }
 0x197   : > { %20259 = vmatprep.mubr.msk.bf16.mxu1 %vm459_vm0, %v21263_v42  ;;  %v21295_v42 = vld [vmem:[%s22035_s12 + $0x1a8] sm:$0xff]  }
 0x199   : > { %v7170_v8 = vld [vmem:[#allocation6 + $0x10] ss:$2 sm:$0x3f]  ;;  %v7172_v9 = vld [vmem:[#allocation6 + $0x11] ss:$2 sm:$0x3f] }
 0x19a   : > { %7195 = vst [vmem:[#allocation6 + $0x10] sm:$0xff] %v22511_v53  ;;  %7196 = vst [vmem:[#allocation6 + $0x18] sm:$0xff] %v22521_v61  ;;  %v7169_v11 = vld [vmem:[#allocation6] ss:$2 sm:$0xff]  ;;  %v7171_v44 = vld [vmem:[#allocation6 + $0x1] ss:$2 sm:$0xff]  ;;  %v7174_v12 = vmax.f32 %v7170_v8, %v7172_v9 }
 0x19b   : > { %7193 = vst [vmem:[#allocation6] sm:$0xff] %v22516_v58  ;;  %7194 = vst [vmem:[#allocation6 + $0x8] sm:$0xff] %v22525_v32  ;;  %v22584_v53 = vld [vmem:[%s27054_s1 + $0x20] sm:$0xff]   ;;  %v7173_v61 = vmax.f32 %v7169_v11, %v7171_v44  ;;  %v21269_v32 = vld [vmem:[%s22035_s12 + $0x178] sm:$0xff]  }
 0x19c   : > { %v21301_v8 = vld [vmem:[%s22035_s12 + $0x188] sm:$0xff]   ;;  %v21306_v9 = vld [vmem:[%s22035_s12 + $0x150] sm:$0xff]   ;;  %v21303_v44 = vld [vmem:[%s27056_s3 + $0x80] sm:$0xff]  }
 0x19d   : > { %20170 = vmatmul.mubr.msk.bf16.vlgmr.msra.gmra.mrb[32].mxu0 %vm459_vm0, %v21264_v43  ;;  %v7175_v13 = vpack.c.bf16 %v7174_v12, %v7173_v61  ;;  %v21298_v43 = vld [vmem:[%s22035_s12 + $0x140] sm:$0xff]   ;;  %v21307_v12 = vld [vmem:[%s22035_s12 + $0x190] sm:$0xff]  }
 0x19e   : > { %20260 = vmatmul.mubr.msk.bf16.vlgmr.msra.gmra.mrb[32].mxu1 %vm459_vm0, %v21265_v6  ;;  %20173 = vmatprep.mubr.msk.bf16.mxu0 %vm459_vm0, %v21266_v7  ;;  %v21299_v6 = vld [vmem:[%s22035_s12 + $0x180] sm:$0xff]   ;;  %v21300_v7 = vld [vmem:[%s22035_s12 + $0x148] sm:$0xff]  }
 0x19f   : > { %20263 = vmatprep.mubr.msk.bf16.mxu1 %vm459_vm0, %v21267_v10  ;;  %20186 = vmatpush3.bf16.msra.mxu0 %v22500_v27  ;;  %v7177_v58 = vrot.slane %v7175_v13, 1 }
 0x1a0   : > { %20276 = vmatpush3.bf16.msra.mxu1 %v22507_v47  ;;  %20203 = vmatprep.subr.bf16.mxu0 %v22577_v45 }
 0x1a1   : > { %v7198_v16 = vld [vmem:[#allocation6 + $0x10] ss:$2 sm:$0x3f]  ;;  %v7200_v17 = vld [vmem:[#allocation6 + $0x11] ss:$2 sm:$0x3f]  ;;  %20293 = vmatprep.subr.bf16.mxu1 %v22584_v53 }
 0x1a2   : > { %7179 = vst [vmem:[#allocation3] sm:$0x80] %v7177_v58  ;;  %7180 = vst [vmem:[#allocation3 + $0x8] sm:$0x3f] %v7177_v58  ;;  %v7197_v19 = vld [vmem:[#allocation6] ss:$2 sm:$0xff]  ;;  %v7202_v20 = vmax.f32 %v7198_v16, %v7200_v17 }
 0x1a3   : > { %7223 = vst [vmem:[#allocation6 + $0x10] sm:$0xff] %v7219_v63  ;;  %7224 = vst [vmem:[#allocation6 + $0x18] sm:$0xff] %v7220_v48  ;;  %v7199_v27 = vld [vmem:[#allocation6 + $0x1] ss:$2 sm:$0xff]  ;;  %v21310_v58 = vld [vmem:[%s27056_s3 + $0xd0] sm:$0xff]  }
 0x1a4   : > { %7221 = vst [vmem:[#allocation6] sm:$0xff] %v7217_v33  ;;  %7222 = vst [vmem:[#allocation6 + $0x8] sm:$0xff] %v7218_v5  ;;  %v7201_v47 = vmax.f32 %v7197_v19, %v7199_v27  ;;  %v21287_v63 = vld [vmem:[%s22035_s12 + $0x188] sm:$0xff]   ;;  %v21309_v16 = vld [vmem:[%s22035_s12 + $0x198] sm:$0xff]  }
 0x1a5   : > { %20174 = vmatmul.mubr.msk.bf16.gmra.mrb[36].mxu0 %vm459_vm0, %v21268_v14  ;;  %v21294_v5 = vld [vmem:[%s22035_s12 + $0x168] sm:$0xff]   ;;  %v22695_v14 = vld [vmem:[%s27054_s1] sm:$0xff]   ;;  %v21312_v19 = vld [vmem:[%s27056_s3 + $0xd8] sm:$0xff]  }
 0x1a6   : > { %v7203_v21 = vpack.c.bf16 %v7202_v20, %v7201_v47  ;;  %20264 = vmatmul.mubr.msk.bf16.gmra.mrb[36].mxu1 %vm459_vm0, %v21269_v32  ;;  %20177 = vmatprep.mubr.msk.bf16.mxu0 %vm459_vm0, %v21270_v15  ;;  %v21308_v32 = vld [vmem:[%s22035_s12 + $0x158] sm:$0xff]   ;;  %v21314_v17 = vld [vmem:[%s22035_s12 + $0x160] sm:$0xff]  }
 0x1a7   : > { %20267 = vmatprep.mubr.msk.bf16.mxu1 %vm459_vm0, %v21271_v18  ;;  %v21311_v18 = vld [vmem:[%s27056_s3 + $0x90] sm:$0xff]   ;;  %v21315_v27 = vld [vmem:[%s22035_s12 + $0x1a0] sm:$0xff]  }
 0x1a8   : > { %v7205_v22 = vrot.slane %v7203_v21, 2  ;;  %v21313_v21 = vld [vmem:[%s27056_s3 + $0x98] sm:$0xff]  }
 0x1a9   : > { %v22704_v15 = vld [vmem:[#allocation3] sm:$0xfe] }
 0x1aa   : > { %v7226_v24 = vld [vmem:[#allocation6 + $0x10] ss:$2 sm:$0x3f]  ;;  %v7228_v25 = vld [vmem:[#allocation6 + $0x11] ss:$2 sm:$0x3f] }
 0x1ab   : > { %7207 = vst [vmem:[#allocation3 + $0x8] sm:$0xc0] %v7205_v22  ;;  %7208 = vst [vmem:[#allocation3 + $0x10] sm:$0x1f] %v7205_v22  ;;  %v7225_v26 = vld [vmem:[#allocation6] ss:$2 sm:$0xff]  ;;  %v7230_v29 = vmax.f32 %v7226_v24, %v7228_v25 }
 0x1ac   : > { %v7227_v28 = vld [vmem:[#allocation6 + $0x1] ss:$2 sm:$0xff]  ;;  %v7600_v47 = vshll.u32 %v22704_v15, 16 }
 0x1ad   : > { %v7229_v30 = vmax.f32 %v7225_v26, %v7227_v28  ;;  %20178 = vmatmul.mubr.msk.bf16.gmra.mrb[40].mxu0 %vm459_vm0, %v21272_v23  ;;  %v21316_v24 = vld [vmem:[%s22035_s12 + $0x168] sm:$0xff]   ;;  %v21319_v28 = vld [vmem:[%s27056_s3 + $0xa0] sm:$0xff]  }
 0x1ae   : > { %20268 = vmatmul.mubr.msk.bf16.gmra.mrb[40].mxu1 %vm459_vm0, %v21273_v34  ;;  %20181 = vmatprep.mubr.msk.bf16.mxu0 %vm459_vm0, %v21274_v35  ;;  %v21318_v34 = vld [vmem:[%s27056_s3 + $0xe0] sm:$0xff]   ;;  %v21317_v25 = vld [vmem:[%s22035_s12 + $0x1a8] sm:$0xff]   ;;  %v21322_v35 = vld [vmem:[%s22035_s12 + $0x170] sm:$0xff]  }
 0x1af   : > { %v7231_v31 = vpack.c.bf16 %v7230_v29, %v7229_v30  ;;  %20271 = vmatprep.mubr.msk.bf16.mxu1 %vm459_vm0, %v21275_v36  ;;  %v21320_v36 = vld [vmem:[%s27056_s3 + $0xe8] sm:$0xff]   ;;  %v21323_v30 = vld [vmem:[%s22035_s12 + $0x1b0] sm:$0xff]  }
 0x1b1   : > { %v7233_v46 = vrot.slane %v7231_v31, 3  ;;  %v7602_v31 = vrot.slane %v7600_v47, 1  ;;  %v22864_v47 = vld [vmem:[%s27055_s2] ss:$0 sm:$0xff] }
 0x1b2   : > { %v22675_v10 = vld [vmem:[#allocation3 + $0x8] sm:$0xff] }
 0x1b3   : > { %7235 = vst [vmem:[#allocation3 + $0x18] ss:$-4 sps:$4 sm:$0xef] %v7233_v46   ;;  %v7527_v61 = vshll.u32 %v22675_v10, 16  ;;  %v7531_v22 = vshrl.u32 %v22675_v10, 16  ;;  %v21321_v46 = vld [vmem:[%s27056_s3 + $0xa8] sm:$0xff]  }
 0x1b5   : > { %20182 = vmatmul.mubr.msk.bf16.gmra.mrb[44].mxu0 %vm459_vm0, %v21276_v37  ;;  %v22716_v20 = vrot.slane %v7527_v61, 1  ;;  %v7598_v37 = vshrl.u32 %v22704_v15, 16  ;;  %v21358_v61 = vld [vmem:[%s27056_s3 + $0x60] sm:$0xff]  }
 0x1b6   : > { %20272 = vmatmul.mubr.msk.bf16.gmra.mrb[44].mxu1 %vm459_vm0, %v21277_v49  ;;  %20187 = vmatprep.mubr.msk.bf16.mxu0 %vm459_vm0, %v21280_v50  ;;  %v21326_v50 = vld [vmem:[%s27056_s3 + $0xf0] sm:$0xff]  }
 0x1b7   : > { %20277 = vmatprep.mubr.msk.bf16.mxu1 %vm459_vm0, %v21281_v51  ;;  %v7533_v26 = vor.u32 %v7531_v22, %v22716_v20  ;;  %v21324_v51 = vld [vmem:[%s22035_s12 + $0x178] sm:$0xff]  }
 0x1ba   : > { %v22633_v60 = vld [vmem:[#allocation3 + $0x10] sm:$0xc0] }
 0x1bb   : > { %v27065_v2 = vshrl.u32 %v22633_v60, 16  ;;  %v27069_v33 = vshll.u32 %v22633_v60, 16  ;;  %v22677_v11 = vld [vmem:[#allocation3 + $0x10] sm:$0xff] }
 0x1bc   : > { %v7535_v13 = vshll.u32 %v22677_v11, 16 }
 0x1bd   : > { %20188 = vmatmul.mubr.msk.bf16.vlgmr.msra.gmra.mrb[32].mxu0 %vm459_vm0, %v21282_v52  ;;  %v22647_v38 = vrot.slane %v27065_v2, 6  ;;  %v22651_v3 = vrot.slane %v27069_v33, 7  ;;  %v7603_v52 = vor.u32 %v7602_v31, %v7598_v37  ;;  %v21368_v37 = vld [vmem:[%s27056_s3 + $0x78] sm:$0xff]   ;;  %v23215_v2 = vld [vmem:[#allocation3 + $0x10] sm:$0xff] }
 0x1be   : > { %20278 = vmatmul.mubr.msk.bf16.vlgmr.msra.gmra.mrb[32].mxu1 %vm459_vm0, %v21283_v54  ;;  %20191 = vmatprep.mubr.msk.bf16.mxu0 %vm459_vm0, %v21284_v55  ;;  %v22724_v23 = vrot.slane %v7535_v13, 1  ;;  %v21325_v54 = vld [vmem:[%s22035_s12 + $0x1b8] sm:$0xff]   ;;  %v22762_v55 = vld [vmem:[%s22035_s12 + $0x190] sm:$0xff]  }
 0x1bf   : > { %20281 = vmatprep.mubr.msk.bf16.mxu1 %vm459_vm0, %v21285_v56  ;;  %20204 = vmatpush3.bf16.msra.mxu0 %v22577_v45  ;;  %v21304_v45 = vld [vmem:[%s27056_s3 + $0xc8] sm:$0xff]   ;;  %v7604_v56 = vsel %vm7518_vm1, %v7603_v52, %v22716_v20  ;;  %v22842_v13 = vld [vmem:[%s22035_s12 + $0x1b8] sm:$0xff]  }
 0x1c0   : > { %20294 = vmatpush3.bf16.msra.mxu1 %v22584_v53  ;;  %20311 = vmatprep.subr.bf16.mxu0 %v21328_v57  ;;  %v21305_v53 = vld [vmem:[%s27056_s3 + $0x88] sm:$0xff]   ;;  %v22741_v29 = vsel %vm7518_vm1, %v7533_v26, %v22724_v23 }
 0x1c1   : > { %18585 = vmatprep.subr.bf16.mxu1 %v21302_v59  ;;  %v7656_v49 = vrot.slane %v22741_v29, 1  ;;  %v7655_v59 = vrot.slane %v7604_v56, 1  ;;  %v21372_v56 = vld [vmem:[%s27056_s3 + $0x140] sm:$0xff]  }
 0x1c5   : > { %20192 = vmatmul.mubr.msk.bf16.gmra.mrb[36].mxu0 %vm459_vm0, %v21286_v62  ;;  %v21329_v62 = vld [vmem:[%s27056_s3 + $0xf8] sm:$0xff]  }
 0x1c6   : > { %20282 = vmatmul.mubr.msk.bf16.gmra.mrb[36].mxu1 %vm459_vm0, %v21287_v63  ;;  %20195 = vmatprep.mubr.msk.bf16.mxu0 %vm459_vm0, %v21288_v0  ;;  %v21330_v63 = vld [vmem:[%s27056_s3 + $0xb8] sm:$0xff]   ;;  %v7657_v0 = vsel %vm7651_vm2, %v7655_v59, %v7656_v49 }
 0x1c7   : > { %20285 = vmatprep.mubr.msk.bf16.mxu1 %vm459_vm0, %v21289_v1  ;;  %v22783_v1 = vld [vmem:[%s22035_s12 + $0x198] sm:$0xff]  }
 0x1cd   : > { %20196 = vmatmul.mubr.msk.bf16.gmra.mrb[40].mxu0 %vm459_vm0, %v21290_v40  ;;  %v7653_v40 = vrot.slane %v22675_v10, 1 }
 0x1ce   : > { %20286 = vmatmul.mubr.msk.bf16.gmra.mrb[40].mxu1 %vm459_vm0, %v21291_v4  ;;  %20199 = vmatprep.mubr.msk.bf16.mxu0 %vm459_vm0, %v21292_v39  ;;  %v21345_v4 = vld [vmem:[%s27056_s3 + $0x40] sm:$0xff]  }
 0x1cf   : > { %20289 = vmatprep.mubr.msk.bf16.mxu1 %vm459_vm0, %v21293_v41  ;;  %v22790_v39 = vld [vmem:[%s22035_s12 + $0x1a0] sm:$0xff]   ;;  %v7652_v41 = vrot.slane %v22704_v15, 1  ;;  %v21363_v15 = vld [vmem:[%s27056_s3 + $0x28] sm:$0xff]  }
 0x1d5   : > { %20200 = vmatmul.mubr.msk.bf16.gmra.mrb[44].mxu0 %vm459_vm0, %v21294_v5  ;;  %v22796_v5 = vld [vmem:[%s27054_s1 + $0x10] sm:$0xff]  }
 0x1d6   : > { %20290 = vmatmul.mubr.msk.bf16.gmra.mrb[44].mxu1 %vm459_vm0, %v21295_v42  ;;  %20205 = vmatprep.mubr.msk.bf16.mxu0 %vm459_vm0, %v21298_v43  ;;  %v21346_v42 = vld [vmem:[%s27056_s3] sm:$0xff]   ;;  %v21349_v43 = vld [vmem:[%s27056_s3 + $0x48] sm:$0xff]  }
 0x1d7   : > { %20295 = vmatprep.mubr.msk.bf16.mxu1 %vm459_vm0, %v21299_v6  ;;  %v7654_v6 = vsel %vm7651_vm2, %v7652_v41, %v7653_v40 }
 0x1dd   : > { %20206 = vmatmul.mubr.msk.bf16.vlgmr.msra.gmra.mrb[32].mxu0 %vm459_vm0, %v21300_v7  ;;  %v21350_v7 = vld [vmem:[%s27056_s3 + $0x8] sm:$0xff]  }
 0x1de   : > { %20296 = vmatmul.mubr.msk.bf16.vlgmr.msra.gmra.mrb[32].mxu1 %vm459_vm0, %v21301_v8  ;;  %20209 = vmatprep.mubr.msk.bf16.mxu0 %vm459_vm0, %v21306_v9  ;;  %v21351_v8 = vld [vmem:[%s27056_s3 + $0x50] sm:$0xff]   ;;  %v22818_v9 = vld [vmem:[%s22035_s12 + $0x1a8] sm:$0xff]  }
 0x1df   : > { %18586 = vmatpush3.bf16.msra.mxu1 %v21303_v44  ;;  %20299 = vmatprep.mubr.msk.bf16.mxu1 %vm459_vm0, %v21307_v12  ;;  %v22823_v44 = vld [vmem:[%s22035_s12 + $0x1b0] sm:$0xff]   ;;  %v21355_v12 = vld [vmem:[%s27056_s3 + $0x58] sm:$0xff]  }
 0x1e0   : > { %18587 = vmatprep.subr.bf16.mxu1 %v21304_v45  ;;  %20312 = vmatpush3.bf16.msra.mxu0 %v21328_v57  ;;  %v21327_v57 = vld [vmem:[%s27056_s3 + $0xb0] sm:$0xff]  }
 0x1e1   : > { %20329 = vmatprep.subr.bf16.mxu0 %v22695_v14  ;;  %v21352_v45 = vld [vmem:[%s27056_s3 + $0x10] sm:$0xff]  }
 0x1e3   : > { %18588 = vmatpush3.bf16.msra.mxu1 %v21305_v53  ;;  %v21356_v53 = vld [vmem:[%s27056_s3 + $0x18] sm:$0xff]  }
 0x1e4   : > { %18589 = vmatprep.subr.bf16.mxu1 %v21310_v58  ;;  %v21360_v58 = vld [vmem:[%s27056_s3 + $0x20] sm:$0xff]  }
 0x1e5   : > { %20210 = vmatmul.mubr.msk.bf16.gmra.mrb[36].mxu0 %vm459_vm0, %v21308_v32  ;;  %v21362_v32 = vld [vmem:[%s27056_s3 + $0x68] sm:$0xff]  }
 0x1e6   : > { %20300 = vmatmul.mubr.msk.bf16.gmra.mrb[36].mxu1 %vm459_vm0, %v21309_v16  ;;  %20213 = vmatprep.mubr.msk.bf16.mxu0 %vm459_vm0, %v21314_v17  ;;  %v21338_v16 = vld [vmem:[%s22035_s12 + $0x1c8] sm:$0xff]  }
 0x1e7   : > { %18590 = vmatpush3.bf16.msra.mxu1 %v21311_v18  ;;  %20303 = vmatprep.mubr.msk.bf16.mxu1 %vm459_vm0, %v21315_v27  ;;  %v21366_v18 = vld [vmem:[%s27056_s3 + $0x70] sm:$0xff]  }
 0x1e8   : > { %18591 = vmatprep.subr.bf16.mxu1 %v21312_v19 }
 0x1eb   : > { %18592 = vmatpush3.bf16.msra.mxu1 %v21313_v21 }
 0x1ec   : > { %18593 = vmatprep.subr.bf16.mxu1 %v21318_v34 }
 0x1ed   : > { %20214 = vmatmul.mubr.msk.bf16.gmra.mrb[40].mxu0 %vm459_vm0, %v21316_v24 }
 0x1ee   : > { %20304 = vmatmul.mubr.msk.bf16.gmra.mrb[40].mxu1 %vm459_vm0, %v21317_v25  ;;  %20217 = vmatprep.mubr.msk.bf16.mxu0 %vm459_vm0, %v21322_v35  ;;  %v21340_v25 = vld [vmem:[%s22035_s12 + $0x180] sm:$0xff]  }
 0x1ef   : > { %18594 = vmatpush3.bf16.msra.mxu1 %v21319_v28  ;;  %20307 = vmatprep.mubr.msk.bf16.mxu1 %vm459_vm0, %v21323_v30  ;;  %v21367_v30 = vld [vmem:[%s27056_s3 + $0x30] sm:$0xff]  }
 0x1f0   : > { %18595 = vmatprep.subr.bf16.mxu1 %v21320_v36 }
 0x1f3   : > { %18596 = vmatpush3.bf16.msra.mxu1 %v21321_v46 }
 0x1f4   : > { %18597 = vmatprep.subr.bf16.mxu1 %v21326_v50  ;;  %v21370_v50 = vld [vmem:[%s27056_s3 + $0x38] sm:$0xff]  }
 0x1f5   : > { %20218 = vmatmul.mubr.msk.bf16.gmra.mrb[44].mxu0 %vm459_vm0, %v21324_v51 }
 0x1f6   : > { %20308 = vmatmul.mubr.msk.bf16.gmra.mrb[44].mxu1 %vm459_vm0, %v21325_v54  ;;  %20313 = vmatprep.mubr.msk.bf16.mxu0 %vm459_vm0, %v22762_v55 }
 0x1f7   : > { %18598 = vmatpush3.bf16.msra.mxu1 %v21327_v57  ;;  %7808 = vmatprep.mubr.bf16.mxu1 %v7657_v0 }
 0x1f8   : > { %18599 = vmatprep.subr.bf16.mxu1 %v21329_v62 }
 0x1fb   : > { %18600 = vmatpush3.bf16.msra.mxu1 %v21330_v63  ;;  %v21341_v63 = vld [vmem:[%s22035_s12 + $0x188] sm:$0xff]  }
 0x1fc   : > { %18631 = vmatprep.subr.bf16.mxu1 %v21345_v4 }
 0x1fd   : > { %20314 = vmatmul.mubr.msk.bf16.vlgmr.msra.gmra.mrb[48].mxu0 %vm459_vm0, %v22783_v1 }
 0x1fe   : > { %7809 = vmatmul.mubr.bf16.vlgmr.msra.gmra.mrb[48].mxu1 %v7654_v6  ;;  %20317 = vmatprep.mubr.msk.bf16.mxu0 %vm459_vm0, %v22790_v39 }
 0x1ff   : > { %20330 = vmatpush3.bf16.msra.mxu0 %v22695_v14  ;;  %18632 = vmatpush3.bf16.msra.mxu1 %v21346_v42  ;;  %v21337_v14 = vld [vmem:[%s22035_s12 + $0x1c0] sm:$0xff]  }
 0x200   : > { %20347 = vmatprep.subr.bf16.mxu0 %v22796_v5  ;;  %18633 = vmatprep.subr.bf16.mxu1 %v21349_v43 }
 0x203   : > { %18634 = vmatpush3.bf16.msra.mxu1 %v21350_v7 }
 0x204   : > { %18635 = vmatprep.subr.bf16.mxu1 %v21351_v8 }
 0x205   : > { %20318 = vmatmul.mubr.msk.bf16.gmra.mrb[52].mxu0 %vm459_vm0, %v22818_v9 }
 0x206   : > { %20321 = vmatprep.mubr.msk.bf16.mxu0 %vm459_vm0, %v22823_v44 }
 0x207   : > { %18636 = vmatpush3.bf16.msra.mxu1 %v21352_v45 }
 0x208   : > { %18637 = vmatprep.subr.bf16.mxu1 %v21355_v12 }
 0x20b   : > { %18638 = vmatpush3.bf16.msra.mxu1 %v21356_v53 }
 0x20c   : > { %18639 = vmatprep.subr.bf16.mxu1 %v21358_v61 }
 0x20d   : > { %20322 = vmatmul.mubr.msk.bf16.gmra.mrb[56].mxu0 %vm459_vm0, %v22842_v13 }
 0x20e   : > { %20325 = vmatprep.mubr.msk.bf16.mxu0 %vm459_vm0, %v21337_v14 }
 0x20f   : > { %18640 = vmatpush3.bf16.msra.mxu1 %v21360_v58 }
 0x210   : > { %v20027_v17 = vpop.f32.mrb[16].mxu0  ;;  %18641 = vmatprep.subr.bf16.mxu1 %v21362_v32 }
 0x211   : > { %v20117_v19 = vpop.f32.mrb[16].mxu1  ;;  %v3155_v27 = vpop.f32.mrb[17].mxu0  ;;  %v3236_v21 = vadd.f32 %v22864_v47, %v20027_v17  ;;  %v22898_v17 = vld [vmem:[%s27054_s1 + $0x18] sm:$0xff]  }
 0x212   : > { %v4197_v22 = vadd.f32 %v22864_v47, %v20117_v19  ;;  %v4116_v34 = vpop.f32.mrb[17].mxu1  ;;  %v20028_v24 = vpop.f32.mrb[18].mxu0  ;;  %v3234_v26 = vadd.f32 %v22864_v47, %v3155_v27 }
 0x213   : > { %v4195_v28 = vadd.f32 %v22864_v47, %v4116_v34  ;;  %v20118_v35 = vpop.f32.mrb[18].mxu1  ;;  %v3158_v36 = vpop.f32.mrb[19].mxu0  ;;  %18642 = vmatpush3.bf16.msra.mxu1 %v21363_v15  ;;  %v3237_v31 = vadd.f32 %v22864_v47, %v20028_v24  ;;  %v3252_v51 = vmax.f32 %v3236_v21, 0.0 }
 0x214   : > { %v4119_v46 = vpop.f32.mrb[19].mxu1  ;;  %18643 = vmatprep.subr.bf16.mxu1 %v21366_v18  ;;  %v4213_v52 = vmax.f32 %v4197_v22, 0.0  ;;  %v4198_v54 = vadd.f32 %v22864_v47, %v20118_v35  ;;  %v3250_v57 = vmax.f32 %v3234_v26, 0.0  ;;  %v3235_v62 = vadd.f32 %v22864_v47, %v3158_v36 }
 0x215   : > { %20326 = vmatmul.mubr.msk.bf16.gmra.mrb[60].mxu0 %vm459_vm0, %v21338_v16  ;;  %v4211_v59 = vmax.f32 %v4195_v28, 0.0  ;;  %v3253_v0 = vmax.f32 %v3237_v31, 0.0  ;;  %v4196_v7 = vadd.f32 %v22864_v47, %v4119_v46 }
 0x216   : > { %20331 = vmatprep.mubr.msk.bf16.mxu0 %vm459_vm0, %v21340_v25  ;;  %v4214_v6 = vmax.f32 %v4198_v54, 0.0  ;;  %v3251_v61 = vmax.f32 %v3235_v62, 0.0 }
 0x217   : > { %18644 = vmatpush3.bf16.msra.mxu1 %v21367_v30  ;;  %v4212_v31 = vmax.f32 %v4196_v7, 0.0 }
 0x218   : > { %v20031_v4 = vpop.f32.mrb[20].mxu0  ;;  %18645 = vmatprep.subr.bf16.mxu1 %v21368_v37 }
 0x219   : > { %v3240_v41 = vadd.f32 %v22864_v47, %v20031_v4  ;;  %v20121_v42 = vpop.f32.mrb[20].mxu1  ;;  %v3171_v43 = vpop.f32.mrb[21].mxu0 }
 0x21a   : > { %v4201_v8 = vadd.f32 %v22864_v47, %v20121_v42  ;;  %v3238_v45 = vadd.f32 %v22864_v47, %v3171_v43  ;;  %v4132_v12 = vpop.f32.mrb[21].mxu1  ;;  %v20032_v53 = vpop.f32.mrb[22].mxu0 }
 0x21b   : > { %v3256_v14 = vmax.f32 %v3240_v41, 0.0  ;;  %v4199_v58 = vadd.f32 %v22864_v47, %v4132_v12  ;;  %v3241_v32 = vadd.f32 %v22864_v47, %v20032_v53  ;;  %v20122_v15 = vpop.f32.mrb[22].mxu1  ;;  %v3174_v16 = vpop.f32.mrb[23].mxu0  ;;  %18646 = vmatpush3.bf16.msra.mxu1 %v21370_v50 }
 0x21c   : > { %v4217_v18 = vmax.f32 %v4201_v8, 0.0  ;;  %v3254_v19 = vmax.f32 %v3238_v45, 0.0  ;;  %v4202_v27 = vadd.f32 %v22864_v47, %v20122_v15  ;;  %v3239_v21 = vadd.f32 %v22864_v47, %v3174_v16  ;;  %v4135_v22 = vpop.f32.mrb[23].mxu1  ;;  %18677 = vmatprep.subr.bf16.mxu1 %v21372_v56 }
 0x21d   : > { %v7247_v34 = vmax.f32 %v3252_v51, %v3256_v14  ;;  %v4215_v24 = vmax.f32 %v4199_v58, 0.0  ;;  %v3257_v25 = vmax.f32 %v3241_v32, 0.0  ;;  %v4200_v26 = vadd.f32 %v22864_v47, %v4135_v22  ;;  %20332 = vmatmul.mubr.msk.bf16.vlgmr.msra.gmra.mrb[48].mxu0 %vm459_vm0, %v21341_v63 }
 0x21e   : > { %v22904_v28 = vmax.f32 %v4213_v52, %v4217_v18  ;;  %v7245_v35 = vmax.f32 %v3250_v57, %v3254_v19  ;;  %v4218_v36 = vmax.f32 %v4202_v27, 0.0  ;;  %v3255_v30 = vmax.f32 %v3239_v21, 0.0  ;;  %20335 = vmatprep.mubr.msk.bf16.mxu0 %vm459_vm0, %v22762_v55  ;;  %20348 = vmatpush3.bf16.msra.mxu0 %v22796_v5 }
 0x21f   : > { %7251 = vst [vmem:[#allocation6 + $0x10] sm:$0xff] %v7247_v34  ;;  %v22909_v46 = vmax.f32 %v4211_v59, %v4215_v24  ;;  %v7248_v37 = vmax.f32 %v3253_v0, %v3257_v25  ;;  %v4216_v50 = vmax.f32 %v4200_v26, 0.0  ;;  %20365 = vmatprep.subr.bf16.mxu0 %v22898_v17 }
 0x220   : > { %7249 = vst [vmem:[#allocation6] sm:$0xff] %v7245_v35  ;;  %v22912_v51 = vmax.f32 %v4214_v6, %v4218_v36  ;;  %v7246_v52 = vmax.f32 %v3251_v61, %v3255_v30  ;;  %v20035_v54 = vpop.f32.mrb[24].mxu0 }
 0x221   : > { %7252 = vst [vmem:[#allocation6 + $0x18] sm:$0xff] %v7248_v37  ;;  %v22914_v56 = vmax.f32 %v4212_v31, %v4216_v50  ;;  %v3244_v55 = vadd.f32 %v22864_v47, %v20035_v54  ;;  %v20125_v57 = vpop.f32.mrb[24].mxu1  ;;  %v3187_v5 = vpop.f32.mrb[25].mxu0 }
 0x222   : > { %7250 = vst [vmem:[#allocation6 + $0x8] sm:$0xff] %v7246_v52  ;;  %v4205_v59 = vadd.f32 %v22864_v47, %v20125_v57  ;;  %v3242_v62 = vadd.f32 %v22864_v47, %v3187_v5  ;;  %v4148_v63 = vpop.f32.mrb[25].mxu1  ;;  %v20036_v0 = vpop.f32.mrb[26].mxu0 }
 0x223   : > { %v4203_v4 = vadd.f32 %v22864_v47, %v4148_v63  ;;  %v3245_v41 = vadd.f32 %v22864_v47, %v20036_v0  ;;  %v20126_v42 = vpop.f32.mrb[26].mxu1  ;;  %v3190_v43 = vpop.f32.mrb[27].mxu0  ;;  %v3260_v8 = vmax.f32 %v3244_v55, 0.0 }
 0x224   : > { %v4206_v6 = vadd.f32 %v22864_v47, %v20126_v42  ;;  %v4151_v7 = vpop.f32.mrb[27].mxu1  ;;  %v4221_v45 = vmax.f32 %v4205_v59, 0.0  ;;  %v3258_v12 = vmax.f32 %v3242_v62, 0.0  ;;  %v3243_v61 = vadd.f32 %v22864_v47, %v3190_v43 }
 0x225   : > { %20336 = vmatmul.mubr.msk.bf16.gmra.mrb[52].mxu0 %vm459_vm0, %v22783_v1  ;;  %v4219_v53 = vmax.f32 %v4203_v4, 0.0  ;;  %v4204_v14 = vadd.f32 %v22864_v47, %v4151_v7  ;;  %v3261_v58 = vmax.f32 %v3245_v41, 0.0 }
 0x226   : > { %20339 = vmatprep.mubr.msk.bf16.mxu0 %vm459_vm0, %v22790_v39  ;;  %v4222_v32 = vmax.f32 %v4206_v6, 0.0  ;;  %v3259_v22 = vmax.f32 %v3243_v61, 0.0 }
 0x227   : > { %v4220_v34 = vmax.f32 %v4204_v14, 0.0 }
 0x228   : > { %v7254_v15 = vld [vmem:[#allocation6 + $0x10] ss:$2 sm:$0x3f]  ;;  %v7256_v16 = vld [vmem:[#allocation6 + $0x11] ss:$2 sm:$0x3f] }
 0x229   : > { %v7253_v18 = vld [vmem:[#allocation6] ss:$2 sm:$0xff]  ;;  %v7255_v19 = vld [vmem:[#allocation6 + $0x1] ss:$2 sm:$0xff]  ;;  %v20039_v27 = vpop.f32.mrb[28].mxu0  ;;  %v20129_v21 = vpop.f32.mrb[28].mxu1  ;;  %v7258_v37 = vmax.f32 %v7254_v15, %v7256_v16 }
 0x22a   : > { %v3248_v1 = vadd.f32 %v22864_v47, %v20039_v27  ;;  %v4209_v24 = vadd.f32 %v22864_v47, %v20129_v21  ;;  %v3203_v25 = vpop.f32.mrb[29].mxu0  ;;  %v4164_v26 = vpop.f32.mrb[29].mxu1  ;;  %v7257_v31 = vmax.f32 %v7253_v18, %v7255_v19 }
 0x22b   : > { %v3246_v35 = vadd.f32 %v22864_v47, %v3203_v25  ;;  %v4207_v39 = vadd.f32 %v22864_v47, %v4164_v26  ;;  %v20040_v36 = vpop.f32.mrb[30].mxu0  ;;  %v20130_v30 = vpop.f32.mrb[30].mxu1 }
 0x22c   : > { %v3264_v50 = vmax.f32 %v3248_v1, 0.0  ;;  %v4225_v52 = vmax.f32 %v4209_v24, 0.0  ;;  %v3249_v54 = vadd.f32 %v22864_v47, %v20040_v36  ;;  %v4210_v55 = vadd.f32 %v22864_v47, %v20130_v30  ;;  %v3206_v57 = vpop.f32.mrb[31].mxu0  ;;  %v4167_v5 = vpop.f32.mrb[31].mxu1 }
 0x22d   : > { %v3262_v59 = vmax.f32 %v3246_v35, 0.0  ;;  %v4223_v62 = vmax.f32 %v4207_v39, 0.0  ;;  %v3247_v63 = vadd.f32 %v22864_v47, %v3206_v57  ;;  %v4208_v0 = vadd.f32 %v22864_v47, %v4167_v5  ;;  %20340 = vmatmul.mubr.msk.bf16.gmra.mrb[56].mxu0 %vm459_vm0, %v22818_v9 }
 0x22e   : > { %v7275_v4 = vmax.f32 %v3260_v8, %v3264_v50  ;;  %v22938_v41 = vmax.f32 %v4221_v45, %v4225_v52  ;;  %v3265_v42 = vmax.f32 %v3249_v54, 0.0  ;;  %v4226_v43 = vmax.f32 %v4210_v55, 0.0  ;;  %20343 = vmatprep.mubr.msk.bf16.mxu0 %vm459_vm0, %v22823_v44  ;;  %v21343_v45 = vld [vmem:[%s22035_s12 + $0x1a0] sm:$0xff]   ;;  %v21344_v44 = vld [vmem:[%s22035_s12 + $0x1a8] sm:$0xff]  }
 0x22f   : > { %v7273_v6 = vmax.f32 %v3258_v12, %v3262_v59  ;;  %v7329_v7 = vmax.f32 %v4219_v53, %v4223_v62  ;;  %v3263_v61 = vmax.f32 %v3247_v63, 0.0  ;;  %v4224_v14 = vmax.f32 %v4208_v0, 0.0  ;;  %v21347_v12 = vld [vmem:[%s22035_s12 + $0x1b0] sm:$0xff]   ;;  %v21353_v54 = vld [vmem:[%s22035_s12 + $0x1c0] sm:$0xff]   ;;  %v21354_v0 = vld [vmem:[%s22035_s12 + $0x1c8] sm:$0xff]  }
 0x230   : > { %7279 = vst [vmem:[#allocation6 + $0x10] sm:$0xff] %v7275_v4  ;;  %v7276_v47 = vmax.f32 %v3261_v58, %v3265_v42  ;;  %v7332_v15 = vmax.f32 %v4222_v32, %v4226_v43  ;;  %v7259_v16 = vpack.c.bf16 %v7258_v37, %v7257_v31  ;;  %v22948_v53 = vld [vmem:[#allocation3 + $0x10] sm:$0xff]  ;;  %v7539_v1 = vshrl.u32 %v22677_v11, 16  ;;  %v21348_v31 = vld [vmem:[%s22035_s12 + $0x1b8] sm:$0xff]  }
 0x231   : > { %7277 = vst [vmem:[#allocation6] sm:$0xff] %v7273_v6  ;;  %v7274_v9 = vmax.f32 %v3259_v22, %v3263_v61  ;;  %v7330_v8 = vmax.f32 %v4220_v34, %v4224_v14  ;;  %v22959_v34 = vld [vmem:[%s27054_s1 + $0x20] sm:$0xff]   ;;  %v7658_v36 = vrot.slane %v22677_v11, 1  ;;  %v27070_v55 = vshrl.u32 %v22948_v53, 16  ;;  %v21357_v42 = vld [vmem:[%s22035_s12 + $0x1d0] sm:$0xff]  }
 0x232   : > { %7280 = vst [vmem:[#allocation6 + $0x18] sm:$0xff] %v7276_v47  ;;  %v7261_v18 = vrot.slane %v7259_v16, 4  ;;  %v7541_v24 = vor.u32 %v7539_v1, %v22724_v23 }
 0x233   : > { %7278 = vst [vmem:[#allocation6 + $0x8] sm:$0xff] %v7274_v9  ;;  %v7659_v5 = vsel %vm7651_vm2, %v7653_v40, %v7658_v36 }
 0x234   : > { %7263 = vst [vmem:[#allocation3 + $0x20] ss:$-4 sps:$4 sm:$0xf7] %v7261_v18  }
 0x235   : > { %20344 = vmatmul.mubr.msk.bf16.gmra.mrb[60].mxu0 %vm459_vm0, %v22842_v13 }
 0x236   : > { %20349 = vmatprep.mubr.msk.bf16.mxu0 %vm459_vm0, %v21343_v45 }
 0x239   : > { %v7282_v58 = vld [vmem:[#allocation6 + $0x10] ss:$2 sm:$0x3f]  ;;  %v7284_v32 = vld [vmem:[#allocation6 + $0x11] ss:$2 sm:$0x3f] }
 0x23a   : > { %7308 = vst [vmem:[#allocation6 + $0x18] sm:$0xff] %v22912_v51  ;;  %7307 = vst [vmem:[#allocation6 + $0x10] sm:$0xff] %v22904_v28  ;;  %v7281_v19 = vld [vmem:[#allocation6] ss:$2 sm:$0xff]  ;;  %v7283_v27 = vld [vmem:[#allocation6 + $0x1] ss:$2 sm:$0xff]  ;;  %v7286_v21 = vmax.f32 %v7282_v58, %v7284_v32 }
 0x23b   : > { %7305 = vst [vmem:[#allocation6] sm:$0xff] %v22909_v46  ;;  %7306 = vst [vmem:[#allocation6 + $0x8] sm:$0xff] %v22914_v56  ;;  %v22954_v13 = vld [vmem:[#allocation3 + $0x18] sm:$0xff]  ;;  %v7285_v22 = vmax.f32 %v7281_v19, %v7283_v27  ;;  %v27067_v56 = vshll.u32 %v22948_v53, 16 }
 0x23c   : > { %v7543_v51 = vshll.u32 %v22954_v13, 16  ;;  %v7547_v28 = vshrl.u32 %v22954_v13, 16 }
 0x23d   : > { %20350 = vmatmul.mubr.msk.bf16.vlgmr.msra.gmra.mrb[48].mxu0 %vm459_vm0, %v21344_v44  ;;  %v7287_v46 = vpack.c.bf16 %v7286_v21, %v7285_v22 }
 0x23e   : > { %v7545_v25 = vrot.slane %v7543_v51, 1  ;;  %20353 = vmatprep.mubr.msk.bf16.mxu0 %vm459_vm0, %v21347_v12  ;;  %20366 = vmatpush3.bf16.msra.mxu0 %v22898_v17  ;;  %v22969_v26 = vrot.slane %v7547_v28, 7  ;;  %v22983_v17 = vrot.slane %v27067_v56, 1 }
 0x23f   : > { %v7289_v35 = vrot.slane %v7287_v46, 5  ;;  %20383 = vmatprep.subr.bf16.mxu0 %v22959_v34  ;;  %v21364_v46 = vld [vmem:[%s22035_s12 + $0x1b0] sm:$0xff]  }
 0x240   : > { %27165 = vst [vmem:[#allocation10_spill] sm:$0xff] %v22969_v26  ;;  %v22973_v39 = vsel %vm7518_vm1, %v7541_v24, %v7545_v25  ;;  %v22977_v30 = vor.u32 %v22969_v26, %v7543_v51  ;;  %v23013_v6 = vor.u32 %v7547_v28, %v7545_v25  ;;  %v21359_v28 = vld [vmem:[%s22035_s12 + $0x1d8] sm:$0xff]  }
 0x241   : > { %v7660_v23 = vrot.slane %v22973_v39, 1  ;;  %7291 = vst [vmem:[#allocation3 + $0x20] sm:$0xf8] %v7289_v35  ;;  %7292 = vst [vmem:[#allocation3 + $0x28] sm:$0x3] %v7289_v35 }
 0x242   : > { %27166 = vst [vmem:[#allocation11_spill] sm:$0xff] %v22977_v30  ;;  %v7310_v37 = vld [vmem:[#allocation6 + $0x10] ss:$2 sm:$0x3f]  ;;  %v7309_v50 = vld [vmem:[#allocation6] ss:$2 sm:$0xff] }
 0x243   : > { %v7311_v52 = vld [vmem:[#allocation6 + $0x1] ss:$2 sm:$0xff]  ;;  %v7661_v11 = vsel %vm7651_vm2, %v7656_v49, %v7660_v23  ;;  %v7312_v57 = vld [vmem:[#allocation6 + $0x11] ss:$2 sm:$0x3f]  ;;  %v22998_v49 = vor.u32 %v27070_v55, %v22983_v17 }
 0x244   : > { %7333 = vst [vmem:[#allocation6] sm:$0xff] %v7329_v7  ;;  %7334 = vst [vmem:[#allocation6 + $0x8] sm:$0xff] %v7330_v8  ;;  %7816 = vmatprep.mubr.bf16.mxu1 %v7661_v11  ;;  %v7313_v59 = vmax.f32 %v7309_v50, %v7311_v52  ;;  %v7314_v62 = vmax.f32 %v7310_v37, %v7312_v57  ;;  %v7512_v11 = vld [vmem:[#allocation3] sm:$0xff]  ;;  %v21393_v55 = vld [vmem:[%s27056_s3 + $0x128] sm:$0xff]  }
 0x245   : > { %7335 = vst [vmem:[#allocation6 + $0x10] sm:$0xff] %v22938_v41  ;;  %7336 = vst [vmem:[#allocation6 + $0x18] sm:$0xff] %v7332_v15  ;;  %7817 = vmatmul.mubr.bf16.gmra.mrb[52].mxu1 %v7659_v5  ;;  %20354 = vmatmul.mubr.msk.bf16.gmra.mrb[52].mxu0 %vm459_vm0, %v21348_v31  ;;  %v23003_v10 = vsel %vm7518_vm1, %v22998_v49, %v7545_v25  ;;  %v7662_v15 = vrot.slane %v22954_v13, 1 }
 0x246   : > { %20357 = vmatprep.mubr.msk.bf16.mxu0 %vm459_vm0, %v21353_v54  ;;  %v7315_v63 = vpack.c.bf16 %v7314_v62, %v7313_v59  ;;  %v27068_v43 = vshll.u32 %v23003_v10, 16  ;;  %v8379_v24 = vshrl.u32 %v23003_v10, 16 }
 0x247   : > { %v7663_v21 = vsel %vm7651_vm2, %v7658_v36, %v7662_v15 }
 0x248   : > { %v23005_v40 = vld [vmem:[#allocation3 + $0x20] sm:$0x3f]  ;;  %v7317_v16 = vrot.slane %v7315_v63, 6  ;;  %v23024_v12 = vrot.slane %v27068_v43, 1  ;;  %v23058_v5 = vrot.slane %v8379_v24, 7 }
 0x249   : > { %v7606_v4 = vshll.u32 %v23005_v40, 16  ;;  %v23009_v41 = vld [vmem:[#allocation3 + $0x20] sm:$0xff]  ;;  %v7610_v61 = vshrl.u32 %v23005_v40, 16 }
 0x24a   : > { %v27066_v14 = vshll.u32 %v23009_v41, 16  ;;  %7319 = vst [vmem:[#allocation3 + $0x28] sm:$0xfc] %v7317_v16  ;;  %7320 = vst [vmem:[#allocation3 + $0x30] sm:$0x1] %v7317_v16  ;;  %v8666_v31 = vor.u32 %v23024_v12, %v8379_v24  ;;  %v7520_v16 = vshrl.u32 %v7512_v11, 16 }
 0x24b   : > { %v7608_v7 = vrot.slane %v7606_v4, 1  ;;  %v7337_v47 = vld [vmem:[#allocation6] ss:$2 sm:$0xff]  ;;  %v7339_v9 = vld [vmem:[#allocation6 + $0x1] ss:$2 sm:$0xff] }
 0x24c   : > { %v7338_v18 = vld [vmem:[#allocation6 + $0x10] ss:$2 sm:$0x3f]  ;;  %v23028_v58 = vrot.slane %v27066_v14, 1  ;;  %v7341_v1 = vmax.f32 %v7337_v47, %v7339_v9  ;;  %v21371_v9 = vld [vmem:[%s22035_s12 + $0x1c8] sm:$0xff]  }
 0x24d   : > { %20358 = vmatmul.mubr.msk.bf16.gmra.mrb[56].mxu0 %vm459_vm0, %v21354_v0  ;;  %v7609_v8 = vsel %vm7518_vm1, %v23013_v6, %v7608_v7  ;;  %v7612_v45 = vor.u32 %v7610_v61, %v7608_v7  ;;  %v7340_v19 = vld [vmem:[#allocation6 + $0x11] ss:$2 sm:$0x3f]  ;;  %v7522_v0 = vshll.u32 %v7512_v11, 16  ;;  %v21369_v7 = vld [vmem:[%s22035_s12 + $0x1c0] sm:$0xff]  }
 0x24e   : > { %v7664_v44 = vrot.slane %v7609_v8, 1  ;;  %20361 = vmatprep.mubr.msk.bf16.mxu0 %vm459_vm0, %v21357_v42  ;;  %v23035_v22 = vsel %vm7518_vm1, %v23013_v6, %v23028_v58  ;;  %v7342_v36 = vmax.f32 %v7338_v18, %v7340_v19  ;;  %v21365_v42 = vld [vmem:[%s22035_s12 + $0x1b8] sm:$0xff]   ;;  %v21389_v61 = vld [vmem:[%s27056_s3 + $0x240] sm:$0xff]   ;;  %v21376_v19 = vld [vmem:[%s27056_s3 + $0x148] sm:$0xff]  }
 0x24f   : > { %v7668_v32 = vrot.slane %v7612_v45, 1  ;;  %v8393_v25 = vshll.u32 %v23035_v22, 16  ;;  %v27071_v35 = vshrl.u32 %v23035_v22, 16  ;;  %v7524_v47 = vrot.slane %v7522_v0, 1  ;;  %v21374_v45 = vld [vmem:[%s22035_s12 + $0x1d0] sm:$0xff]   ;;  %v23080_v18 = vld [vmem:[#allocation3 + $0x18] sm:$0xff] }
 0x250   : > { %v7665_v27 = vsel %vm7651_vm2, %v7660_v23, %v7664_v44  ;;  %v23043_v23 = vld [vmem:[#allocation3 + $0x20] sm:$0x1f]  ;;  %v7343_v52 = vpack.c.bf16 %v7342_v36, %v7341_v1  ;;  %v23129_v0 = vshrl.u32 %v23080_v18, 16 }
 0x251   : > { %7824 = vmatprep.mubr.bf16.mxu1 %v7665_v27  ;;  %v7669_v51 = vsel %vm7651_vm2, %v7664_v44, %v7668_v32  ;;  %v23046_v37 = vrot.slane %v8393_v25, 1  ;;  %v23050_v50 = vrot.slane %v27071_v35, 7  ;;  %v7666_v54 = vrot.slane %v23043_v23, 1  ;;  %v10025_v44 = vld [vmem:[#allocation3 + $0x10] sm:$0x80]  ;;  %v23093_v27 = vld [vmem:[#allocation3 + $0x20] sm:$0xff] }
 0x252   : > { %7825 = vmatmul.mubr.bf16.gmra.mrb[56].mxu1 %v7663_v21  ;;  %v7345_v63 = vrot.slane %v7343_v52, 7  ;;  %27170 = vst [vmem:[#allocation15_spill] sm:$0xff] %v23093_v27  ;;  %v21380_v21 = vld [vmem:[%s22035_s12 + $0x1e0] sm:$0xff]   ;;  %v23096_v1 = vld [vmem:[#allocation3 + $0x28] sm:$0xff]  ;;  %v10029_v24 = vshll.u32 %v10025_v44, 16  ;;  %v21379_v52 = vld [vmem:[%s27056_s3 + $0x110] sm:$0xff]  }
 0x253   : > { %7832 = vmatprep.mubr.bf16.mxu1 %v7669_v51  ;;  %27167 = vst [vmem:[#allocation12_spill] sm:$0xff] %v23050_v50  ;;  %v23056_v57 = vsel %vm7518_vm1, %v8666_v31, %v23046_v37  ;;  %v8395_v59 = vor.u32 %v8393_v25, %v23050_v50  ;;  %v7667_v4 = vsel %vm7651_vm2, %v7662_v15, %v7666_v54  ;;  %v21377_v51 = vld [vmem:[%s27056_s3 + $0x108] sm:$0xff]   ;;  %v21378_v25 = vld [vmem:[%s27056_s3 + $0x150] sm:$0xff]   ;;  %27174 = vst [vmem:[#allocation19_spill] sm:$0xff] %v23129_v0 }
 0x254   : > { %7347 = vst [vmem:[#allocation3 + $0x30] sm:$0xfe] %v7345_v63  ;;  %v7525_v15 = vor.u32 %v7524_v47, %v7520_v16  ;;  %v23126_v63 = vld [vmem:[#allocation3 + $0x8] sm:$0xff]  ;;  %v10031_v47 = vrot.slane %v10029_v24, 1  ;;  %v23173_v24 = vshrl.u32 %v23096_v1, 16  ;;  %v7555_v30 = vshrl.u32 %v23043_v23, 16 }
 0x255   : > { %20362 = vmatmul.mubr.msk.bf16.gmra.mrb[60].mxu0 %vm459_vm0, %v21359_v28  ;;  %v23064_v62 = vsel %vm8355_vm3, %v23058_v5, %v8395_v59  ;;  %v23102_v28 = vld [vmem:[#allocation3 + $0x8] sm:$0xfe]  ;;  %v10027_v59 = vshrl.u32 %v10025_v44, 16  ;;  %v21385_v44 = vld [vmem:[%s22035_s12 + $0x1c0] sm:$0xff]  }
 0x256   : > { %20367 = vmatprep.mubr.msk.bf16.mxu0 %vm459_vm0, %v21364_v46  ;;  %27168 = vst [vmem:[#allocation13_spill] sm:$0xff] %v23064_v62  ;;  %v7530_v8 = vsel %vm7518_vm1, %v7525_v15, %v22716_v20  ;;  %v23091_v20 = vshll.u32 %v23080_v18, 16  ;;  %v23105_v46 = vshll.u32 %v23093_v27, 16  ;;  %27178 = vst [vmem:[#allocation23_spill] sm:$0xff] %v23173_v24 }
 0x258   : > { %27169 = vst [vmem:[#allocation14_spill] sm:$0xff] %v23091_v20  ;;  %27171 = vst [vmem:[#allocation16_spill] sm:$0xff] %v23105_v46  ;;  %v23111_v36 = vrot.slane %v23091_v20, 1 }
 0x25a   : > { %7833 = vmatmul.mubr.bf16.gmra.mrb[60].mxu1 %v7667_v4  ;;  %v23132_v4 = vrot.slane %v23105_v46, 1  ;;  %v23143_v16 = vor.u32 %v23129_v0, %v23111_v36 }
 0x25b   : > { %7840 = vmatprep.mubr.bf16.mxu1 %v7668_v32  ;;  %v21375_v32 = vld [vmem:[%s22035_s12 + $0x1d8] sm:$0xff]   ;;  %v23117_v31 = vld [vmem:[#allocation3 + $0x30] sm:$0xff] }
 0x25c   : > { %27173 = vst [vmem:[#allocation18_spill] sm:$0xff] %v23117_v31  ;;  %27175 = vst [vmem:[#allocation20_spill] sm:$0xff] %v23132_v4 }
 0x25d   : > { %20368 = vmatmul.mubr.msk.bf16.vlgmr.msra.gmra.mrb[48].mxu0 %vm459_vm0, %v21365_v42  ;;  %v21381_v42 = vld [vmem:[%s22035_s12 + $0x1e8] sm:$0xff]  }
 0x25e   : > { %20371 = vmatprep.mubr.msk.bf16.mxu0 %vm459_vm0, %v21369_v7  ;;  %20384 = vmatpush3.bf16.msra.mxu0 %v22959_v34  ;;  %v21373_v34 = vld [vmem:[%s27056_s3 + $0x100] sm:$0xff]   ;;  %v21382_v7 = vld [vmem:[%s27056_s3 + $0x158] sm:$0xff]  }
 0x25f   : > { %18769 = vmatprep.subr.bf16.mxu0 %v21389_v61  ;;  %v23139_v61 = vshll.u32 %v23117_v31, 16 }
 0x262   : > { %7841 = vmatmul.mubr.bf16.gmra.mrb[64].mxu1 %v7666_v54  ;;  %v23123_v54 = vld [vmem:[#allocation3] sm:$0x80] }
 0x263   : > { %7976 = vmatprep.mubr.bf16.mxu1 %v7530_v8  ;;  %v23151_v8 = vld [vmem:[#allocation3 + $0x8] sm:$0xff] }
 0x265   : > { %20372 = vmatmul.mubr.msk.bf16.gmra.mrb[52].mxu0 %vm459_vm0, %v21371_v9  ;;  %v23149_v9 = vshrl.u32 %v23093_v27, 16 }
 0x266   : > { %20375 = vmatprep.mubr.msk.bf16.mxu0 %vm459_vm0, %v21374_v45  ;;  %v7551_v45 = vshll.u32 %v23043_v23, 16  ;;  %v21400_v23 = vld [vmem:[%s27056_s3 + $0x130] sm:$0xff]  }
 0x267   : > { %27176 = vst [vmem:[#allocation21_spill] sm:$0xff] %v23149_v9 }
 0x268   : > { %v7553_v56 = vrot.slane %v7551_v45, 1  ;;  %v23222_v45 = vrot.slane %v23096_v1, 6 }
 0x26a   : > { %7977 = vmatmul.mubr.bf16.vlgmr.msra.gmra.mrb[68].mxu1 %v7512_v11  ;;  %v8611_v11 = vshll.u32 %v23102_v28, 16  ;;  %27181 = vst [vmem:[#allocation26_spill] sm:$0xff] %v23222_v45  ;;  %v7557_v62 = vor.u32 %v7555_v30, %v7553_v56  ;;  %v27187_v30 = vor.u32 %v22651_v3, %v22647_v38  ;;  %v21404_v3 = vld [vmem:[%s22035_s12 + $0x1e0] sm:$0xff]  }
 0x26b   : > { %18678 = vmatpush3.bf16.msra.mxu1 %v21373_v34  ;;  %7984 = vmatprep.mubr.bf16.mxu1 %v22741_v29  ;;  %v23115_v29 = vshll.u32 %v23096_v1, 16  ;;  %v21383_v34 = vld [vmem:[%s27056_s3 + $0x118] sm:$0xff]  }
 0x26c   : > { %18679 = vmatprep.subr.bf16.mxu1 %v21376_v19  ;;  %v23164_v19 = vsel %vm7518_vm1, %v23143_v16, %v23132_v4  ;;  %v23178_v14 = vrot.slane %v8611_v11, 1  ;;  %v21387_v11 = vld [vmem:[%s22035_s12 + $0x1c8] sm:$0xff]  }
 0x26d   : > { %20376 = vmatmul.mubr.msk.bf16.gmra.mrb[56].mxu0 %vm459_vm0, %v21375_v32  ;;  %27172 = vst [vmem:[#allocation17_spill] sm:$0xff] %v23115_v29  ;;  %v23146_v15 = vrot.slane %v23115_v29, 1  ;;  %27177 = vst [vmem:[#allocation22_spill] sm:$0xff] %v23164_v19  ;;  %v7554_v32 = vsel %vm7518_vm1, %v23013_v6, %v7553_v56  ;;  %v27182_v1 = vshll.u32 %v23164_v19, 16  ;;  %v10104_v38 = vrot.slane %v23115_v29, 7 }
 0x26e   : > { %20379 = vmatprep.mubr.msk.bf16.mxu0 %vm459_vm0, %v21380_v21  ;;  %v9697_v21 = vor.u32 %v23149_v9, %v23132_v4 }
 0x26f   : > { %18680 = vmatpush3.bf16.msra.mxu1 %v21377_v51  ;;  %v23187_v43 = vor.u32 %v23173_v24, %v23146_v15  ;;  %v21395_v51 = vld [vmem:[%s22035_s12 + $0x1d0] sm:$0xff]   ;;  %v10092_v26 = vrot.slane %v27182_v1, 7 }
 0x270   : > { %18681 = vmatprep.subr.bf16.mxu1 %v21378_v25  ;;  %v27072_v25 = vrot.slane %v23139_v61, 1 }
 0x271   : > { %27179 = vst [vmem:[#allocation24_spill] sm:$0xff] %v23187_v43 }
 0x272   : > { %7985 = vmatmul.mubr.bf16.gmra.mrb[72].mxu1 %v23151_v8  ;;  %v23209_v33 = vsel %vm7518_vm1, %v23187_v43, %v27072_v25 }
 0x273   : > { %7992 = vmatprep.mubr.bf16.mxu1 %v22973_v39  ;;  %18682 = vmatpush3.bf16.msra.mxu1 %v21379_v52  ;;  %v21386_v39 = vld [vmem:[%s27056_s3 + $0x160] sm:$0xff]   ;;  %v10032_v52 = vor.u32 %v10031_v47, %v10027_v59  ;;  %v27074_v59 = vshrl.u32 %v23164_v19, 16  ;;  %27180 = vst [vmem:[#allocation25_spill] sm:$0xff] %v23209_v33  ;;  %v10615_v19 = vld [vmem:[#allocation3 + $0x18] sm:$0xe0] }
 0x274   : > { %18683 = vmatprep.subr.bf16.mxu1 %v21382_v7  ;;  %v23182_v7 = vsel %vm7518_vm1, %v9697_v21, %v23146_v15  ;;  %v21388_v47 = vld [vmem:[%s27056_s3 + $0x120] sm:$0xff]  }
 0x275   : > { %20380 = vmatmul.mubr.msk.bf16.gmra.mrb[60].mxu0 %vm459_vm0, %v21381_v42  ;;  %v10033_v42 = vsel %vm7518_vm1, %v10032_v52, %v23111_v36  ;;  %v21390_v21 = vld [vmem:[%s27056_s3 + $0x200] sm:$0xff]   ;;  %v10091_v48 = vrot.slane %v27074_v59, 6  ;;  %v21398_v52 = vld [vmem:[%s27056_s3 + $0x170] sm:$0xff]   ;;  %v10080_v59 = vrot.slane %v23091_v20, 7  ;;  %v27183_v43 = vshrl.u32 %v23182_v7, 16 }
 0x276   : > { %20385 = vmatprep.mubr.msk.bf16.mxu0 %vm459_vm0, %v21385_v44  ;;  %v10084_v35 = vshrl.u32 %v10033_v42, 16  ;;  %v10087_v25 = vshll.u32 %v10033_v42, 16  ;;  %v10079_v42 = vrot.slane %v23129_v0, 6  ;;  %v27082_v20 = vrot.slane %v23093_v27, 6 }
 0x277   : > { %18684 = vmatpush3.bf16.msra.mxu1 %v21383_v34  ;;  %v21391_v34 = vld [vmem:[%s27056_s3 + $0x168] sm:$0xff]   ;;  %v10099_v50 = vrot.slane %v27183_v43, 6  ;;  %v10093_v1 = vor.u32 %v10092_v26, %v10091_v48  ;;  %v10095_v0 = vrot.slane %v23149_v9, 6  ;;  %v21396_v48 = vld [vmem:[%s22035_s12 + $0x1d8] sm:$0xff]  }
 0x278   : > { %18685 = vmatprep.subr.bf16.mxu1 %v21386_v39  ;;  %v21392_v39 = vld [vmem:[%s27056_s3 + $0x248] sm:$0xff]   ;;  %v10086_v44 = vrot.slane %v10084_v35, 6  ;;  %v10081_v6 = vor.u32 %v10080_v59, %v10079_v42  ;;  %v21399_v59 = vld [vmem:[%s27056_s3 + $0x210] sm:$0xff]  }
 0x279   : > { %v21394_v35 = vld [vmem:[%s27056_s3 + $0x208] sm:$0xff]  }
 0x27a   : > { %7993 = vmatmul.mubr.bf16.gmra.mrb[76].mxu1 %v23215_v2 }
 0x27b   : > { %8000 = vmatprep.mubr.bf16.mxu1 %v7554_v32  ;;  %18686 = vmatpush3.bf16.msra.mxu1 %v21388_v47  ;;  %v10089_v47 = vrot.slane %v10087_v25, 7  ;;  %v23249_v25 = vshrl.u32 %v23117_v31, 16  ;;  %v27184_v32 = vshll.u32 %v23182_v7, 16 }
 0x27c   : > { %18687 = vmatprep.subr.bf16.mxu1 %v21391_v34  ;;  %v21397_v34 = vld [vmem:[%s27056_s3 + $0x250] sm:$0xff]  }
 0x27d   : > { %20386 = vmatmul.mubr.msk.bf16.vlgmr.msra.gmra.mrb[48].mxu0 %vm459_vm0, %v21387_v11  ;;  %v10100_v43 = vrot.slane %v27184_v32, 7  ;;  %v10090_v11 = vor.u32 %v10089_v47, %v10086_v44  ;;  %v21403_v44 = vld [vmem:[%s27056_s3 + $0x178] sm:$0xff]  }
 0x27e   : > { %18770 = vmatpush3.bf16.msra.mxu0 %v21390_v21  ;;  %20389 = vmatprep.mubr.msk.bf16.mxu0 %vm459_vm0, %v21395_v51  ;;  %v10096_v21 = vrot.slane %v23105_v46, 7  ;;  %v27185_v51 = vshrl.u32 %v23209_v33, 16 }
 0x27f   : > { %18771 = vmatprep.subr.bf16.mxu0 %v21392_v39  ;;  %18688 = vmatpush3.bf16.msra.mxu1 %v21393_v55  ;;  %v10101_v26 = vor.u32 %v10100_v43, %v10099_v50  ;;  %v23270_v56 = vsel %vm10075_vm4, %v10090_v11, %v10093_v1  ;;  %v23276_v55 = vsel %vm10075_vm4, %v27187_v30, %v10081_v6  ;;  %v27189_v50 = vshll.u32 %v23209_v33, 16 }
 0x280   : > { %v10107_v32 = vrot.slane %v27185_v51, 6  ;;  %18689 = vmatprep.subr.bf16.mxu1 %v21398_v52  ;;  %27186 = vst [vmem:[#allocation27_spill] sm:$0xff] %v23270_v56  ;;  %27188 = vst [vmem:[#allocation28_spill] sm:$0xff] %v23276_v55  ;;  %v23284_v39 = vsel %vm8966_vm5, %v27082_v20, %v23222_v45  ;;  %v10097_v47 = vor.u32 %v10096_v21, %v10095_v0  ;;  %v10103_v43 = vrot.slane %v23173_v24, 6  ;;  %v21401_v0 = vld [vmem:[%s27056_s3 + $0x258] sm:$0xff]  }
 0x281   : > { %v10108_v52 = vrot.slane %v27189_v50, 7  ;;  %27190 = vst [vmem:[#allocation29_spill] sm:$0xff] %v23284_v39  ;;  %v23287_v42 = vsel %vm10075_vm4, %v10093_v1, %v10101_v26  ;;  %v10111_v30 = vrot.slane %v23249_v25, 6  ;;  %v10112_v50 = vrot.slane %v23139_v61, 7  ;;  %v21405_v39 = vld [vmem:[%s27056_s3 + $0x138] sm:$0xff]  }
 0x282   : > { %27191 = vst [vmem:[#allocation30_spill] sm:$0xff] %v23287_v42  ;;  %8001 = vmatmul.mubr.bf16.gmra.mrb[80].mxu1 %v22954_v13  ;;  %18772 = vmatpush3.bf16.msra.mxu0 %v21394_v35  ;;  %v27193_v1 = vrot.slane %v22948_v53, 5  ;;  %v27194_v21 = vrot.slane %v23126_v63, 5  ;;  %v10620_v20 = vshll.u32 %v10615_v19, 16  ;;  %v27228_v56 = vshll.u32 %v22948_v53, 16 }
 0x283   : > { %v23293_v11 = vor.u32 %v10108_v52, %v10107_v32  ;;  %8008 = vmatprep.mubr.bf16.mxu1 %v7557_v62  ;;  %18773 = vmatprep.subr.bf16.mxu0 %v21397_v34  ;;  %v23309_v32 = vsel %vm10075_vm4, %v10081_v6, %v10097_v47  ;;  %v10105_v52 = vor.u32 %v10104_v38, %v10103_v43  ;;  %v27197_v34 = vrot.slane %v23123_v54, 5  ;;  %v21409_v38 = vld [vmem:[%s27056_s3 + $0x1c0] sm:$0xff]  }
 0x284   : > { %v23306_v35 = vsel %vm8029_vm6, %v27194_v21, %v27193_v1  ;;  %27195 = vst [vmem:[#allocation32_spill] sm:$0xff] %v23309_v32  ;;  %18690 = vmatpush3.bf16.msra.mxu1 %v21400_v23  ;;  %v27196_v62 = vmov %v27194_v21  ;;  %v27199_v6 = vrot.slane %v23117_v31, 6  ;;  %v23329_v23 = vor.u32 %v10112_v50, %v10111_v30 }
 0x285   : > { %27192 = vst [vmem:[#allocation31_spill] sm:$0xff] %v23293_v11  ;;  %v8032_v51 = vsel %vm8029_vm6, %v27197_v34, %v27196_v62  ;;  %v23321_v1 = vsel %vm10075_vm4, %v10101_v26, %v23293_v11  ;;  %20390 = vmatmul.mubr.msk.bf16.gmra.mrb[52].mxu0 %vm459_vm0, %v21396_v48  ;;  %18691 = vmatprep.subr.bf16.mxu1 %v21403_v44  ;;  %v27202_v21 = vshrl.u32 %v23102_v28, 16  ;;  %v10618_v34 = vshrl.u32 %v10615_v19, 16  ;;  %v21402_v48 = vld [vmem:[%s27056_s3 + $0x218] sm:$0xff]  }
 0x286   : > { %27198 = vst [vmem:[#allocation33_spill] sm:$0xff] %v23321_v1  ;;  %v23327_v43 = vsel %vm8966_vm5, %v23222_v45, %v27199_v6  ;;  %27201 = vst [vmem:[#allocation35_spill] sm:$0xff] %v23329_v23  ;;  %v23339_v62 = vsel %vm10075_vm4, %v10097_v47, %v10105_v52  ;;  %v10622_v31 = vrot.slane %v10620_v20, 1  ;;  %18774 = vmatpush3.bf16.msra.mxu0 %v21399_v59  ;;  %v8081_v30 = vrot.slane %v23306_v35, 2  ;;  %v21407_v20 = vld [vmem:[%s27056_s3 + $0x260] sm:$0xff]  }
 0x287   : > { %27200 = vst [vmem:[#allocation34_spill] sm:$0xff] %v23327_v43  ;;  %v8614_v26 = vor.u32 %v23178_v14, %v27202_v21  ;;  %27203 = vst [vmem:[#allocation36_spill] sm:$0xff] %v23339_v62  ;;  %20393 = vmatprep.mubr.msk.bf16.mxu0 %vm459_vm0, %v21404_v3  ;;  %v23348_v28 = vsel %vm10075_vm4, %v10105_v52, %v23329_v23  ;;  %v10675_v14 = vrot.slane %v23182_v7, 5  ;;  %v27085_v44 = vrot.slane %v23209_v33, 5  ;;  %v8016_v3 = vld [vmem:[#allocation3] sm:$0xfc] }
 0x288   : > { %27204 = vst [vmem:[#allocation37_spill] sm:$0xff] %v23348_v28  ;;  %18775 = vmatprep.subr.bf16.mxu0 %v21401_v0  ;;  %v8035_v19 = vrot.slane %v22954_v13, 5  ;;  %v10623_v59 = vor.u32 %v10622_v31, %v10618_v34  ;;  %v8080_v47 = vrot.slane %v8032_v51, 2  ;;  %18692 = vmatpush3.bf16.msra.mxu1 %v21405_v39  ;;  %v7516_v0 = vld [vmem:[#allocation3 + $0x20] sm:$0xf]  ;;  %v21406_v52 = vld [vmem:[%s22035_s12 + $0x1e8] sm:$0xff]  }
 0x289   : > { %v8615_v50 = vsel %vm7518_vm1, %v8614_v26, %v22983_v17  ;;  %v23361_v35 = vsel %vm8029_vm6, %v10675_v14, %v27085_v44  ;;  %18723 = vmatprep.subr.bf16.mxu1 %v21409_v38  ;;  %v21408_v39 = vld [vmem:[%s27056_s3 + $0x220] sm:$0xff]   ;;  %v21413_v51 = vld [vmem:[%s22035_s12 + $0x1f0] sm:$0xff]   ;;  %v21411_v26 = vld [vmem:[%s27056_s3 + $0x268] sm:$0xff]   ;;  %v27206_v38 = vrot.slane %v22948_v53, 5 }
 0x28a   : > { %27205 = vst [vmem:[#allocation38_spill] sm:$0xff] %v23361_v35  ;;  %v10624_v6 = vsel %vm7518_vm1, %v10623_v59, %v23132_v4  ;;  %8009 = vmatmul.mubr.bf16.gmra.mrb[84].mxu1 %v7516_v0  ;;  %v8082_v31 = vsel %vm8076_vm7, %v8080_v47, %v8081_v30  ;;  %18776 = vmatpush3.bf16.msra.mxu0 %v21402_v48  ;;  %v8660_v59 = vshll.u32 %v8615_v50, 16  ;;  %v8077_v47 = vrot.slane %v8016_v3, 2  ;;  %v21414_v44 = vld [vmem:[%s22035_s12 + $0x1f8] sm:$0xff]   ;;  %v11652_v23 = vld [vmem:[#allocation3 + $0x30] sm:$0xff]  ;;  %s21849_s12 = scalar_lea.vmem %s21848_s24, 32 }
 0x28b   : > { %v10674_v21 = vrot.slane %v10624_v6, 5  ;;  %8233 = vmatprep.mubr.bf16.mxu1 %v8082_v31  ;;  %18777 = vmatprep.subr.bf16.mxu0 %v21407_v20  ;;  %v23377_v34 = vsel %vm8029_vm6, %v27206_v38, %v8035_v19  ;;  %v8078_v0 = vrot.slane %v23151_v8, 2  ;;  %v21412_v6 = vld [vmem:[%s27056_s3 + $0x228] sm:$0xff]   ;;  %v21418_v8 = vld [vmem:[%s27056_s3 + $0x230] sm:$0xff]   ;;  %p21851_p1 = scmp.lt.s32.totalorder %s21849_s12, %s21843_s21 }
 0x28c   : > { %v23389_v31 = vld [vmem:[#allocation3 + $0x28] sm:$0x1f]  ;;  %v8662_v3 = vrot.slane %v8660_v59, 1  ;;  %v27214_v43 = vrot.slane %v23377_v34, 2 }
 0x28d   : > { %v23380_v48 = vsel %vm8029_vm6, %v10674_v21, %v10675_v14  ;;  %20394 = vmatmul.mubr.msk.bf16.gmra.mrb[56].mxu0 %vm459_vm0, %v21406_v52  ;;  %v21410_v14 = vld [vmem:[%s27056_s3 + $0x180] sm:$0xff]   ;;  %v8658_v21 = vshrl.u32 %v8615_v50, 16  ;;  %v8079_v38 = vsel %vm8076_vm7, %v8077_v47, %v8078_v0  ;;  %v8617_v20 = vshll.u32 %v23389_v31, 16  ;;  %v21417_v50 = vld [vmem:[%s27056_s3 + $0x188] sm:$0xff]   ;;  %p21852_p2 = por %p21851_p1, %p21850_p0 }
 0x28e   : > { %27207 = vst [vmem:[#allocation39_spill] sm:$0xff] %v23380_v48  ;;  %18778 = vmatpush3.bf16.msra.mxu0 %v21408_v39  ;;  %20397 = vmatprep.mubr.msk.bf16.mxu0 %vm459_vm0, %v21413_v51  ;;  %v21415_v39 = vld [vmem:[%s27056_s3 + $0x1c8] sm:$0xff]   ;;  %v21416_v51 = vld [vmem:[%s27056_s3 + $0x270] sm:$0xff]   ;;  %v8357_v52 = vshrl.u32 %v23123_v54, 16 }
 0x28f   : > { %18779 = vmatprep.subr.bf16.mxu0 %v21411_v26  ;;  %v27208_v26 = vrot.slane %v23377_v34, 2  ;;  %v8663_v47 = vor.u32 %v8662_v3, %v8658_v21  ;;  %v21420_v54 = vld [vmem:[%s27056_s3 + $0x1d0] sm:$0xff]   ;;  %v8022_v3 = vld [vmem:[#allocation3 + $0x28] sm:$0x7]  ;;  %v8619_v35 = vrot.slane %v8617_v20, 1  ;;  %p21853_p3 = pnand %p21852_p2, %p21846_p13 }
 0x290   : > { %v23436_v48 = vld [vmem:[#allocation3 + $0x8] sm:$0x80] }
 0x291   : > { %v8086_v59 = vsel %vm8076_vm7, %v8081_v30, %v27208_v26  ;;  %v27209_v30 = vrot.slane %v23009_v41, 5  ;;  %v8665_v21 = vsel %vm7518_vm1, %v8663_v47, %v23024_v12  ;;  %v21422_v12 = vld [vmem:[%s27056_s3 + $0x190] sm:$0xff]  }
 0x292   : > { %8234 = vmatmul.mubr.bf16.vlgmr.msra.gmra.mrb[88].mxu1 %v8079_v38  ;;  %18780 = vmatpush3.bf16.msra.mxu0 %v21412_v6  ;;  %v21419_v38 = vld [vmem:[%s27056_s3 + $0x278] sm:$0xff]  }
 0x293   : > { %18724 = vmatpush3.bf16.msra.mxu1 %v21410_v14  ;;  %8241 = vmatprep.mubr.bf16.mxu1 %v8086_v59  ;;  %v23421_v6 = vsel %vm8029_vm6, %v8035_v19, %v27209_v30  ;;  %v27210_v14 = vshll.u32 %v23126_v63, 16  ;;  %v8287_v59 = vshrl.u32 %v23126_v63, 16  ;;  %v27089_v19 = vrot.slane %v23215_v2, 2 }
 0x294   : > { %18725 = vmatprep.subr.bf16.mxu1 %v21415_v39  ;;  %18781 = vmatprep.subr.bf16.mxu0 %v21416_v51  ;;  %v27087_v30 = vshrl.u32 %v23009_v41, 16  ;;  %v21421_v39 = vld [vmem:[%s27056_s3 + $0x238] sm:$0xff]   ;;  %v8039_v51 = vrot.slane %v8022_v3, 5  ;;  %v23461_v3 = vshll.u32 %v11652_v23, 16  ;;  %v27213_v28 = vrot.slane %v23421_v6, 2 }
 0x295   : > { %v23428_v26 = vrot.slane %v27210_v14, 1  ;;  %20398 = vmatmul.mubr.msk.bf16.gmra.mrb[60].mxu0 %vm459_vm0, %v21414_v44  ;;  %v11651_v44 = vld [vmem:[#allocation3 + $0x28] sm:$0xf8]  ;;  %v23452_v47 = vrot.slane %v8287_v59, 7  ;;  %v23463_v14 = vshrl.u32 %v11652_v23, 16  ;;  %v21424_v23 = vld [vmem:[%s27056_s3 + $0x198] sm:$0xff]  }
 0x296   : > { %18782 = vmatpush3.bf16.msra.mxu0 %v21418_v8  ;;  %8824 = vmatprep.mubr.bf16.mxu0 %v8665_v21  ;;  %v23448_v20 = vor.u32 %v27087_v30, %v23028_v58  ;;  %v23450_v8 = vrot.slane %v8357_v52, 7  ;;  %27211 = vst [vmem:[#allocation40_spill] sm:$0xff] %v23461_v3  ;;  %v8084_v52 = vsel %vm8076_vm7, %v8078_v0, %v27089_v19  ;;  %v11974_v30 = vshrl.u32 %v11651_v44, 16  ;;  %v21428_v0 = vld [vmem:[%s27056_s3 + $0x300] sm:$0xff]  }
 0x297   : > { %18726 = vmatpush3.bf16.msra.mxu1 %v21417_v50  ;;  %18783 = vmatprep.subr.bf16.mxu0 %v21419_v38  ;;  %v8289_v21 = vor.u32 %v8287_v59, %v23428_v26  ;;  %v21423_v50 = vld [vmem:[%s27056_s3 + $0x1d8] sm:$0xff]   ;;  %v21427_v38 = vld [vmem:[%s27056_s3 + $0x340] sm:$0xff]   ;;  %27212 = vst [vmem:[#allocation41_spill] sm:$0xff] %v23463_v14  ;;  %v8364_v59 = vshrl.u32 %v23428_v26, 16  ;;  %v8090_v62 = vsel %vm8076_vm7, %v27214_v43, %v27213_v28  ;;  %v23485_v26 = vld [vmem:[#allocation3 + $0x8] sm:$0xc0] }
 0x298   : > { %18727 = vmatprep.subr.bf16.mxu1 %v21420_v54  ;;  %v23470_v54 = vsel %vm7518_vm1, %v23448_v20, %v8619_v35  ;;  %v27215_v43 = vrot.slane %v23009_v41, 5  ;;  %v11976_v1 = vrot.slane %v11974_v30, 3  ;;  %v11982_v19 = vrot.slane %v23461_v3, 4  ;;  %v21433_v3 = vld [vmem:[%s27056_s3 + $0x350] sm:$0xff]  }
 0x299   : > { %v23489_v34 = vsel %vm7518_vm1, %v8289_v21, %v22983_v17  ;;  %v11981_v21 = vrot.slane %v23463_v14, 3 }
 0x29a   : > { %8242 = vmatmul.mubr.bf16.gmra.mrb[92].mxu1 %v8084_v52  ;;  %18784 = vmatpush3.bf16.msra.mxu0 %v21421_v39  ;;  %v11977_v52 = vshll.u32 %v11651_v44, 16  ;;  %v23494_v28 = vsel %vm8029_vm6, %v27215_v43, %v8039_v51  ;;  %v21430_v39 = vld [vmem:[%s27056_s3 + $0x348] sm:$0xff]   ;;  %v8671_v44 = vshll.u32 %v23470_v54, 16  ;;  %v8087_v51 = vrot.slane %v22954_v13, 2 }
 0x29b   : > { %8249 = vmatprep.mubr.bf16.mxu1 %v8090_v62  ;;  %18728 = vmatpush3.bf16.msra.mxu1 %v21422_v12  ;;  %v21425_v62 = vld [vmem:[%s27056_s3 + $0x1e0] sm:$0xff]   ;;  %v8621_v43 = vshrl.u32 %v23389_v31, 16  ;;  %v8093_v30 = vrot.slane %v23494_v28, 2  ;;  %v23517_v13 = vor.u32 %v11982_v19, %v11981_v21  ;;  %v27218_v19 = vrot.slane %v23215_v2, 2  ;;  %v21435_v2 = vld [vmem:[%s27056_s3 + $0x310] sm:$0xff]  }
 0x29c   : > { %18729 = vmatprep.subr.bf16.mxu1 %v21423_v50  ;;  %18861 = vmatprep.subr.bf16.mxu0 %v21427_v38  ;;  %v11979_v12 = vrot.slane %v11977_v52, 4  ;;  %v21426_v50 = vld [vmem:[%s27056_s3 + $0x1a0] sm:$0xff]   ;;  %v21432_v38 = vld [vmem:[%s27056_s3 + $0x308] sm:$0xff]   ;;  %v23551_v21 = vrot.slane %v8364_v59, 7 }
 0x29d   : > { %8825 = vmatmul.mubr.bf16.vlgmr.msra.gmra.mrb[64].mxu0 %v23489_v34  ;;  %27216 = vst [vmem:[#allocation42_spill] sm:$0xff] %v23517_v13  ;;  %v23522_v31 = vor.u32 %v8621_v43, %v8619_v35  ;;  %v21431_v35 = vld [vmem:[%s27056_s3 + $0x1a8] sm:$0xff]  }
 0x29e   : > { %8832 = vmatprep.mubr.bf16.mxu0 %v23056_v57  ;;  %18862 = vmatpush3.bf16.msra.mxu0 %v21428_v0  ;;  %v11980_v14 = vor.u32 %v11979_v12, %v11976_v1  ;;  %v21429_v57 = vld [vmem:[%s27056_s3 + $0x1e8] sm:$0xff]   ;;  %v8673_v0 = vrot.slane %v8671_v44, 1  ;;  %v21437_v12 = vld [vmem:[%s27056_s3 + $0x358] sm:$0xff]  }
 0x29f   : > { %18730 = vmatpush3.bf16.msra.mxu1 %v21424_v23  ;;  %18863 = vmatprep.subr.bf16.mxu0 %v21430_v39  ;;  %v8088_v23 = vsel %vm8076_vm7, %v27218_v19, %v8087_v51  ;;  %v8368_v39 = vshrl.u32 %v23489_v34, 16  ;;  %v8679_v19 = vshll.u32 %v23522_v31, 16 }
 0x2a0   : > { %18731 = vmatprep.subr.bf16.mxu1 %v21425_v62  ;;  %v23530_v1 = vsel %vm11972_vm8, %v11980_v14, %v23517_v13  ;;  %v27219_v62 = vrot.slane %v23421_v6, 2  ;;  %v21434_v14 = vld [vmem:[%s27056_s3 + $0x1f0] sm:$0xff]   ;;  %v27220_v6 = vshrl.u32 %v23035_v22, 16 }
 0x2a1   : > { %27217 = vst [vmem:[#allocation43_spill] sm:$0xff] %v23530_v1 }
 0x2a2   : > { %8250 = vmatmul.mubr.bf16.gmra.mrb[96].mxu1 %v8088_v23  ;;  %v8094_v44 = vsel %vm8076_vm7, %v27219_v62, %v8093_v30  ;;  %18864 = vmatpush3.bf16.msra.mxu0 %v21432_v38  ;;  %v8669_v43 = vor.u32 %v23046_v37, %v27220_v6  ;;  %v8091_v38 = vrot.slane %v23005_v40, 2  ;;  %v23558_v23 = vld [vmem:[#allocation3 + $0x28] sm:$0xf]  ;;  %v21438_v62 = vld [vmem:[%s27056_s3 + $0x318] sm:$0xff]   ;;  %v8675_v37 = vshrl.u32 %v23470_v54, 16 }
 0x2a3   : > { %8257 = vmatprep.mubr.bf16.mxu1 %v8094_v44  ;;  %18732 = vmatpush3.bf16.msra.mxu1 %v21426_v50  ;;  %v21436_v50 = vld [vmem:[%s27056_s3 + $0x1b0] sm:$0xff]   ;;  %v21441_v44 = vld [vmem:[%s27056_s3 + $0x360] sm:$0xff]  }
 0x2a4   : > { %18733 = vmatprep.subr.bf16.mxu1 %v21429_v57  ;;  %18865 = vmatprep.subr.bf16.mxu0 %v21433_v3  ;;  %v8674_v59 = vsel %vm7518_vm1, %v8669_v43, %v8673_v0  ;;  %v23569_v57 = vrot.slane %v8368_v39, 7  ;;  %v21439_v3 = vld [vmem:[%s27056_s3 + $0x1f8] sm:$0xff]   ;;  %v8677_v6 = vor.u32 %v8675_v37, %v8673_v0  ;;  %v8681_v43 = vrot.slane %v8679_v19, 1  ;;  %v21445_v0 = vld [vmem:[%s27056_s3 + $0x368] sm:$0xff]  }
 0x2a5   : > { %8833 = vmatmul.mubr.bf16.gmra.mrb[68].mxu0 %v23003_v10  ;;  %v21440_v39 = vld [vmem:[%s27056_s3 + $0x1b8] sm:$0xff]  }
 0x2a6   : > { %8840 = vmatprep.mubr.bf16.mxu0 %v8674_v59  ;;  %18866 = vmatpush3.bf16.msra.mxu0 %v21435_v2  ;;  %v27094_v2 = vshll.u32 %v23558_v23, 16  ;;  %v8883_v59 = vshll.u32 %v23485_v26, 16 }
 0x2a7   : > { %18734 = vmatpush3.bf16.msra.mxu1 %v21431_v35  ;;  %18867 = vmatprep.subr.bf16.mxu0 %v21437_v12  ;;  %v8092_v35 = vsel %vm8076_vm7, %v8087_v51, %v8091_v38  ;;  %v21442_v12 = vld [vmem:[%s27056_s3 + $0x320] sm:$0xff]  }
 0x2a8   : > { %18735 = vmatprep.subr.bf16.mxu1 %v21434_v14  ;;  %v8371_v14 = vshll.u32 %v23489_v34, 16  ;;  %v21443_v51 = vld [vmem:[%s27056_s3 + $0x2c0] sm:$0xff]   ;;  %v8317_v19 = vrot.slane %v27094_v2, 1  ;;  %v23624_v2 = vrot.slane %v8883_v59, 1  ;;  %v23638_v59 = vsel %vm7518_vm1, %v22998_v49, %v23111_v36 }
 0x2aa   : > { %8258 = vmatmul.mubr.bf16.gmra.mrb[100].mxu1 %v8092_v35  ;;  %18868 = vmatpush3.bf16.msra.mxu0 %v21438_v62  ;;  %v27221_v62 = vshrl.u32 %v23436_v48, 16  ;;  %v8373_v37 = vor.u32 %v8371_v14, %v23569_v57  ;;  %v23609_v35 = vld [vmem:[#allocation3 + $0x10] sm:$0xff] }
 0x2ab   : > { %8265 = vmatprep.mubr.bf16.mxu1 %v8093_v30  ;;  %18736 = vmatpush3.bf16.msra.mxu1 %v21436_v50  ;;  %v8682_v30 = vsel %vm7518_vm1, %v8677_v6, %v8681_v43  ;;  %v21446_v50 = vld [vmem:[%s27056_s3 + $0x328] sm:$0xff]   ;;  %v27222_v6 = vshrl.u32 %v22948_v53, 16 }
 0x2ac   : > { %18737 = vmatprep.subr.bf16.mxu1 %v21439_v3  ;;  %18869 = vmatprep.subr.bf16.mxu0 %v21441_v44  ;;  %v23601_v34 = vsel %vm7518_vm1, %v27221_v62, %v22983_v17  ;;  %v23622_v62 = vsel %vm7518_vm1, %v23448_v20, %v8317_v19  ;;  %v21450_v3 = vld [vmem:[%s27056_s3 + $0x330] sm:$0xff]  }
 0x2ad   : > { %8841 = vmatmul.mubr.bf16.gmra.mrb[72].mxu0 %v23035_v22  ;;  %v21448_v22 = vld [vmem:[%s27056_s3 + $0x370] sm:$0xff]   ;;  %v23618_v14 = vrot.slane %v27222_v6, 7  ;;  %v8374_v6 = vsel %vm8355_vm3, %v23551_v21, %v8373_v37  ;;  %v23652_v21 = vld [vmem:[%s27055_s2] ss:$0 sm:$0xff] }
 0x2ae   : > { %8848 = vmatprep.mubr.bf16.mxu0 %v8682_v30  ;;  %18870 = vmatpush3.bf16.msra.mxu0 %v21442_v12 }
 0x2af   : > { %18738 = vmatpush3.bf16.msra.mxu1 %v21440_v39  ;;  %18871 = vmatprep.subr.bf16.mxu0 %v21445_v0  ;;  %v27223_v39 = vshll.u32 %v23126_v63, 16  ;;  %v27095_v0 = vshrl.u32 %v23558_v23, 16  ;;  %v23643_v63 = vsel %vm7518_vm1, %v23143_v16, %v23028_v58  ;;  %v8683_v58 = vshrl.u32 %v23522_v31, 16 }
 0x2b0   : > { %v20207_v30 = vpop.f32.mrb[32].mxu0  ;;  %18815 = vmatprep.subr.bf16.mxu1 %v21443_v51  ;;  %v27224_v51 = vshll.u32 %v22633_v60, 16  ;;  %v8401_v16 = vshrl.u32 %v23622_v62, 16 }
 0x2b1   : > { %v8361_v12 = vor.u32 %v23452_v47, %v27223_v39  ;;  %v20297_v28 = vpop.f32.mrb[32].mxu1  ;;  %v5077_v52 = vpop.f32.mrb[33].mxu0  ;;  %v23655_v37 = vadd.f32 %v23652_v21, %v20207_v30  ;;  %v8685_v27 = vor.u32 %v8683_v58, %v8681_v43  ;;  %v21453_v58 = vld [vmem:[%s27056_s3 + $0x338] sm:$0xff]  }
 0x2b2   : > { %v23647_v39 = vrot.slane %v27224_v51, 1  ;;  %v6038_v44 = vpop.f32.mrb[33].mxu1  ;;  %8266 = vmatmul.mubr.bf16.gmra.mrb[104].mxu1 %v8091_v38  ;;  %v20208_v49 = vpop.f32.mrb[34].mxu0  ;;  %18872 = vmatpush3.bf16.msra.mxu0 %v21446_v50  ;;  %v23663_v51 = vor.u32 %v27095_v0, %v8317_v19  ;;  %v23666_v1 = vadd.f32 %v23652_v21, %v20297_v28  ;;  %v23669_v30 = vadd.f32 %v23652_v21, %v5077_v52  ;;  %v21451_v50 = vld [vmem:[%s27056_s3 + $0x378] sm:$0xff]  }
 0x2b3   : > { %v23672_v32 = vadd.f32 %v23652_v21, %v6038_v44  ;;  %v20298_v40 = vpop.f32.mrb[34].mxu1  ;;  %8557 = vmatprep.mubr.bf16.mxu1 %v8374_v6  ;;  %v5080_v38 = vpop.f32.mrb[35].mxu0  ;;  %18873 = vmatprep.subr.bf16.mxu0 %v21448_v22  ;;  %v23679_v0 = vadd.f32 %v23652_v21, %v20208_v49  ;;  %v27099_v52 = vrot.slane %v23638_v59, 7  ;;  %v27225_v44 = vshrl.u32 %v23009_v41, 16 }
 0x2b4   : > { %v6041_v28 = vpop.f32.mrb[35].mxu1  ;;  %v27226_v22 = vshll.u32 %v23003_v10, 16  ;;  %v5174_v49 = vmax.f32 %v23655_v37, 0.0  ;;  %v23694_v43 = vadd.f32 %v23652_v21, %v20298_v40  ;;  %v5157_v37 = vadd.f32 %v23652_v21, %v5080_v38 }
 0x2b5   : > { %v23684_v42 = vrot.slane %v27225_v44, 7  ;;  %8849 = vmatmul.mubr.bf16.gmra.mrb[76].mxu0 %v23470_v54  ;;  %v23699_v54 = vrot.slane %v8401_v16, 7  ;;  %v5172_v44 = vmax.f32 %v23669_v30, 0.0  ;;  %v21459_v16 = vld [vmem:[%s27056_s3 + $0x440] sm:$0xff]  }
 0x2b6   : > { %v8384_v6 = vor.u32 %v27226_v22, %v23058_v5  ;;  %8856 = vmatprep.mubr.bf16.mxu0 %v8685_v27  ;;  %18874 = vmatpush3.bf16.msra.mxu0 %v21450_v3  ;;  %v6135_v5 = vmax.f32 %v23666_v1, 0.0  ;;  %v6133_v22 = vmax.f32 %v23672_v32, 0.0  ;;  %v21444_v27 = vld [vmem:[%s27056_s3 + $0x280] sm:$0xff]   ;;  %v21447_v3 = vld [vmem:[%s27056_s3 + $0x2c8] sm:$0xff]   ;;  %v5175_v1 = vmax.f32 %v23679_v0, 0.0 }
 0x2b7   : > { %18875 = vmatprep.subr.bf16.mxu0 %v21451_v50  ;;  %v8362_v32 = vsel %vm8355_vm3, %v23450_v8, %v8361_v12  ;;  %v27227_v50 = vrot.slane %v23601_v34, 7  ;;  %v8376_v0 = vor.u32 %v23618_v14, %v27228_v56  ;;  %v6136_v13 = vmax.f32 %v23694_v43, 0.0  ;;  %v21449_v34 = vld [vmem:[%s27056_s3 + $0x288] sm:$0xff]  }
 0x2b8   : > { %v20211_v30 = vpop.f32.mrb[36].mxu0  ;;  %v8385_v19 = vsel %vm8355_vm3, %v23569_v57, %v8384_v6  ;;  %v6118_v8 = vadd.f32 %v23652_v21, %v6041_v28  ;;  %v5173_v6 = vmax.f32 %v5157_v37, 0.0 }
 0x2b9   : > { %v5162_v40 = vadd.f32 %v23652_v21, %v20211_v30  ;;  %v20301_v38 = vpop.f32.mrb[36].mxu1  ;;  %v5093_v10 = vpop.f32.mrb[37].mxu0  ;;  %v9231_v55 = vsel %vm9225_vm9, %v27227_v50, %v27099_v52  ;;  %v23738_v50 = vld [vmem:[#allocation3 + $0x30] sm:$0xf] }
 0x2ba   : > { %v6123_v12 = vadd.f32 %v23652_v21, %v20301_v38  ;;  %v5160_v30 = vadd.f32 %v23652_v21, %v5093_v10  ;;  %v6054_v4 = vpop.f32.mrb[37].mxu1  ;;  %8558 = vmatmul.mubr.bf16.vlgmr.msra.gmra.mrb[108].mxu1 %v8362_v32  ;;  %v20212_v57 = vpop.f32.mrb[38].mxu0  ;;  %18876 = vmatpush3.bf16.msra.mxu0 %v21453_v58 }
 0x2bb   : > { %v5178_v53 = vmax.f32 %v5162_v40, 0.0  ;;  %v6121_v56 = vadd.f32 %v23652_v21, %v6054_v4  ;;  %18816 = vmatpush3.bf16.msra.mxu1 %v21444_v27  ;;  %v5163_v43 = vadd.f32 %v23652_v21, %v20212_v57  ;;  %v20302_v28 = vpop.f32.mrb[38].mxu1  ;;  %8565 = vmatprep.mubr.bf16.mxu1 %v8385_v19  ;;  %v5096_v38 = vpop.f32.mrb[39].mxu0  ;;  %v21452_v4 = vld [vmem:[%s27056_s3 + $0x2d0] sm:$0xff]  }
 0x2bc   : > { %v6139_v10 = vmax.f32 %v6123_v12, 0.0  ;;  %v5176_v32 = vmax.f32 %v5160_v30, 0.0  ;;  %v6124_v52 = vadd.f32 %v23652_v21, %v20302_v28  ;;  %v5161_v45 = vadd.f32 %v23652_v21, %v5096_v38  ;;  %v6057_v29 = vpop.f32.mrb[39].mxu1  ;;  %18817 = vmatprep.subr.bf16.mxu1 %v21447_v3  ;;  %18953 = vmatprep.subr.bf16.mxu0 %v21459_v16  ;;  %v21454_v40 = vld [vmem:[%s27056_s3 + $0x290] sm:$0xff]  }
 0x2bd   : > { %v7358_v58 = vmax.f32 %v5174_v49, %v5178_v53  ;;  %v6137_v37 = vmax.f32 %v6121_v56, 0.0  ;;  %v5179_v27 = vmax.f32 %v5163_v43, 0.0  ;;  %v6122_v19 = vadd.f32 %v23652_v21, %v6057_v29  ;;  %8857 = vmatmul.mubr.bf16.gmra.mrb[80].mxu0 %v23522_v31  ;;  %v21455_v49 = vld [vmem:[%s27056_s3 + $0x2d8] sm:$0xff]  }
 0x2be   : > { %v23750_v12 = vmax.f32 %v6135_v5, %v6139_v10  ;;  %v7356_v30 = vmax.f32 %v5172_v44, %v5176_v32  ;;  %v6140_v3 = vmax.f32 %v6124_v52, 0.0  ;;  %v5177_v57 = vmax.f32 %v5161_v45, 0.0  ;;  %9386 = vmatprep.mubr.bf16.mxu0 %v9231_v55  ;;  %v21460_v55 = vld [vmem:[%s27056_s3 + $0x400] sm:$0xff]  }
 0x2bf   : > { %v6134_v16 = vmax.f32 %v6118_v8, 0.0  ;;  %v23755_v53 = vmax.f32 %v6133_v22, %v6137_v37  ;;  %v7359_v29 = vmax.f32 %v5175_v1, %v5179_v27  ;;  %v6138_v56 = vmax.f32 %v6122_v19, 0.0  ;;  %18818 = vmatpush3.bf16.msra.mxu1 %v21449_v34  ;;  %7362 = vst [vmem:[#allocation6 + $0x10] sm:$0xff] %v7358_v58  ;;  %v27233_v27 = vld [vmem:[#allocation13_spill] sm:$0xff] }
 0x2c0   : > { %7360 = vst [vmem:[#allocation6] sm:$0xff] %v7356_v30  ;;  %v23757_v31 = vmax.f32 %v6136_v13, %v6140_v3  ;;  %v7357_v5 = vmax.f32 %v5173_v6, %v5177_v57  ;;  %v20215_v43 = vpop.f32.mrb[40].mxu0  ;;  %18819 = vmatprep.subr.bf16.mxu1 %v21452_v4  ;;  %v23762_v45 = vsel %vm7518_vm1, %v23448_v20, %v23146_v15  ;;  %v9183_v52 = vshll.u32 %v23738_v50, 16  ;;  %v21462_v3 = vld [vmem:[%s27056_s3 + $0x448] sm:$0xff]  }
 0x2c1   : > { %v23768_v44 = vmax.f32 %v6134_v16, %v6138_v56  ;;  %v23771_v22 = vadd.f32 %v23652_v21, %v20215_v43  ;;  %v20305_v13 = vpop.f32.mrb[40].mxu1  ;;  %v5109_v1 = vpop.f32.mrb[41].mxu0  ;;  %v8377_v8 = vsel %vm8355_vm3, %v23452_v47, %v8376_v0  ;;  %7363 = vst [vmem:[#allocation6 + $0x18] sm:$0xff] %v7359_v29  ;;  %v27229_v28 = vrot.slane %v23609_v35, 7  ;;  %v21457_v43 = vld [vmem:[%s27056_s3 + $0x2e0] sm:$0xff]  }
 0x2c2   : > { %7361 = vst [vmem:[#allocation6 + $0x8] sm:$0xff] %v7357_v5  ;;  %v23776_v15 = vadd.f32 %v23652_v21, %v20305_v13  ;;  %v23779_v20 = vadd.f32 %v23652_v21, %v5109_v1  ;;  %v6070_v34 = vpop.f32.mrb[41].mxu1  ;;  %8566 = vmatmul.mubr.bf16.gmra.mrb[112].mxu1 %v8377_v8  ;;  %v20216_v6 = vpop.f32.mrb[42].mxu0  ;;  %v27230_v38 = vrot.slane %v23436_v48, 7  ;;  %v27231_v32 = vrot.slane %v23643_v63, 7  ;;  %v21456_v48 = vld [vmem:[%s27056_s3 + $0x298] sm:$0xff]  }
 0x2c3   : > { %v27232_v47 = vrot.slane %v23638_v59, 7  ;;  %v23792_v4 = vadd.f32 %v23652_v21, %v6070_v34  ;;  %v23795_v58 = vadd.f32 %v23652_v21, %v20216_v6  ;;  %v20306_v37 = vpop.f32.mrb[42].mxu1  ;;  %8573 = vmatprep.mubr.bf16.mxu1 %v27233_v27  ;;  %v5112_v19 = vpop.f32.mrb[43].mxu0  ;;  %18820 = vmatpush3.bf16.msra.mxu1 %v21454_v40  ;;  %v27103_v30 = vrot.slane %v23762_v45, 7  ;;  %v27236_v27 = vld [vmem:[#allocation11_spill] sm:$0xff] }
 0x2c4   : > { %v9228_v10 = vsel %vm9225_vm9, %v27230_v38, %v27229_v28  ;;  %v8415_v57 = vshll.u32 %v23663_v51, 16  ;;  %v23807_v16 = vadd.f32 %v23652_v21, %v20306_v37  ;;  %v23810_v29 = vadd.f32 %v23652_v21, %v5112_v19  ;;  %v6073_v56 = vpop.f32.mrb[43].mxu1  ;;  %18821 = vmatprep.subr.bf16.mxu1 %v21455_v49  ;;  %v21458_v49 = vld [vmem:[%s27056_s3 + $0x2a0] sm:$0xff]  }
 0x2c5   : > { %v9235_v0 = vsel %vm9225_vm9, %v27232_v47, %v27231_v32  ;;  %v27234_v40 = vshll.u32 %v23622_v62, 16  ;;  %v27235_v13 = vshrl.u32 %v23663_v51, 16  ;;  %v5182_v8 = vmax.f32 %v23771_v22, 0.0  ;;  %9387 = vmatmul.mubr.bf16.vlgmr.msra.gmra.mrb[84].mxu0 %v9228_v10  ;;  %v21464_v62 = vld [vmem:[%s27056_s3 + $0x408] sm:$0xff]   ;;  %v21465_v32 = vld [vmem:[%s27056_s3 + $0x450] sm:$0xff]  }
 0x2c6   : > { %v23829_v28 = vrot.slane %v9183_v52, 1  ;;  %v23834_v22 = vadd.f32 %v23652_v21, %v6073_v56  ;;  %9394 = vmatprep.mubr.bf16.mxu0 %v9235_v0  ;;  %18954 = vmatpush3.bf16.msra.mxu0 %v21460_v55  ;;  %v21461_v10 = vld [vmem:[%s27056_s3 + $0x2e8] sm:$0xff]   ;;  %v8388_v0 = vsel %vm8355_vm3, %v23618_v14, %v27236_v27  ;;  %v27237_v55 = vrot.slane %v23080_v18, 7  ;;  %v21467_v14 = vld [vmem:[%s27056_s3 + $0x410] sm:$0xff]  }
 0x2c7   : > { %v8406_v5 = vor.u32 %v27234_v40, %v23699_v54  ;;  %v8414_v1 = vrot.slane %v27235_v13, 7  ;;  %18822 = vmatpush3.bf16.msra.mxu1 %v21456_v48  ;;  %18955 = vmatprep.subr.bf16.mxu0 %v21462_v3  ;;  %v27238_v19 = vrot.slane %v23609_v35, 7  ;;  %v27239_v40 = vrot.slane %v23643_v63, 7 }
 0x2c8   : > { %v20219_v37 = vpop.f32.mrb[44].mxu0  ;;  %18823 = vmatprep.subr.bf16.mxu1 %v21457_v43  ;;  %v27240_v48 = vshll.u32 %v23009_v41, 16  ;;  %v7365_v43 = vld [vmem:[#allocation6 + $0x10] ss:$2 sm:$0x3f]  ;;  %v6142_v51 = vmax.f32 %v23834_v22, 0.0 }
 0x2c9   : > { %v9233_v56 = vsel %vm9225_vm9, %v27238_v19, %v27237_v55  ;;  %v9239_v13 = vsel %vm9225_vm9, %v27239_v40, %v27103_v30  ;;  %v5170_v27 = vadd.f32 %v23652_v21, %v20219_v37  ;;  %v20309_v47 = vpop.f32.mrb[44].mxu1  ;;  %v5125_v55 = vpop.f32.mrb[45].mxu0  ;;  %v27241_v19 = vld [vmem:[#allocation12_spill] sm:$0xff]  ;;  %v23868_v38 = vor.u32 %v8415_v57, %v8414_v1  ;;  %v7366_v30 = vld [vmem:[#allocation6 + $0x1] ss:$2 sm:$0xff] }
 0x2ca   : > { %v23860_v3 = vor.u32 %v23684_v42, %v27240_v48  ;;  %v8407_v52 = vsel %vm8355_vm3, %v27241_v19, %v8406_v5  ;;  %v27242_v40 = vld [vmem:[#allocation24_spill] sm:$0xff]  ;;  %v7364_v48 = vld [vmem:[#allocation6] ss:$2 sm:$0xff]  ;;  %v6131_v6 = vadd.f32 %v23652_v21, %v20309_v47  ;;  %v5168_v37 = vadd.f32 %v23652_v21, %v5125_v55  ;;  %v6086_v34 = vpop.f32.mrb[45].mxu1  ;;  %8574 = vmatmul.mubr.bf16.gmra.mrb[116].mxu1 %v8388_v0  ;;  %v20220_v24 = vpop.f32.mrb[46].mxu0 }
 0x2cb   : > { %v23873_v41 = vsel %vm7518_vm1, %v27242_v40, %v23829_v28  ;;  %18956 = vmatpush3.bf16.msra.mxu0 %v21464_v62  ;;  %v7367_v5 = vld [vmem:[#allocation6 + $0x11] ss:$2 sm:$0x3f]  ;;  %v7368_v57 = vmax.f32 %v7364_v48, %v7366_v30  ;;  %v5186_v1 = vmax.f32 %v5170_v27, 0.0  ;;  %v6129_v19 = vadd.f32 %v23652_v21, %v6086_v34  ;;  %v20310_v46 = vpop.f32.mrb[46].mxu1  ;;  %8581 = vmatprep.mubr.bf16.mxu1 %v8407_v52  ;;  %v5128_v40 = vpop.f32.mrb[47].mxu0 }
 0x2cc   : > { %v5171_v33 = vadd.f32 %v23652_v21, %v20220_v24  ;;  %18824 = vmatpush3.bf16.msra.mxu1 %v21458_v49  ;;  %v21463_v22 = vld [vmem:[%s27056_s3 + $0x2a8] sm:$0xff]   ;;  %v21469_v47 = vld [vmem:[%s27056_s3 + $0x458] sm:$0xff]   ;;  %v7369_v62 = vmax.f32 %v7365_v43, %v7367_v5  ;;  %v6147_v0 = vmax.f32 %v6131_v6, 0.0  ;;  %v5184_v30 = vmax.f32 %v5168_v37, 0.0  ;;  %v6089_v24 = vpop.f32.mrb[47].mxu1  ;;  %18957 = vmatprep.subr.bf16.mxu0 %v21465_v32  ;;  %v21466_v49 = vld [vmem:[%s27056_s3 + $0x2f0] sm:$0xff]  }
 0x2cd   : > { %v6132_v27 = vadd.f32 %v23652_v21, %v20310_v46  ;;  %v5169_v34 = vadd.f32 %v23652_v21, %v5128_v40  ;;  %18825 = vmatprep.subr.bf16.mxu1 %v21461_v10  ;;  %v21470_v52 = vld [vmem:[%s27056_s3 + $0x418] sm:$0xff]   ;;  %v7382_v55 = vmax.f32 %v5182_v8, %v5186_v1  ;;  %v6145_v48 = vmax.f32 %v6129_v19, 0.0  ;;  %9395 = vmatmul.mubr.bf16.gmra.mrb[88].mxu0 %v9233_v56  ;;  %v21473_v19 = vld [vmem:[%s27056_s3 + $0x460] sm:$0xff]  }
 0x2ce   : > { %v5187_v43 = vmax.f32 %v5171_v33, 0.0  ;;  %v6130_v6 = vadd.f32 %v23652_v21, %v6089_v24  ;;  %v27243_v46 = vmax.f32 %v23776_v15, 0.0  ;;  %v27244_v10 = vmax.f32 %v23779_v20, 0.0  ;;  %9402 = vmatprep.mubr.bf16.mxu0 %v9239_v13  ;;  %v21468_v15 = vld [vmem:[%s27056_s3 + $0x2b0] sm:$0xff]   ;;  %v21471_v20 = vld [vmem:[%s27056_s3 + $0x2f8] sm:$0xff]  }
 0x2cf   : > { %v6148_v37 = vmax.f32 %v6132_v27, 0.0  ;;  %v5185_v5 = vmax.f32 %v5169_v34, 0.0  ;;  %18958 = vmatpush3.bf16.msra.mxu0 %v21467_v14  ;;  %v27245_v9 = vmax.f32 %v23792_v4, 0.0  ;;  %v27246_v33 = vmax.f32 %v23795_v58, 0.0  ;;  %7386 = vst [vmem:[#allocation6 + $0x10] sm:$0xff] %v7382_v55  ;;  %v23919_v14 = vld [vmem:[#allocation3 + $0x20] sm:$0xff] }
 0x2d0   : > { %v23897_v40 = vmax.f32 %v27243_v46, %v6147_v0  ;;  %v7380_v32 = vmax.f32 %v27244_v10, %v5184_v30  ;;  %v6146_v21 = vmax.f32 %v6130_v6, 0.0  ;;  %18826 = vmatpush3.bf16.msra.mxu1 %v21463_v22  ;;  %18959 = vmatprep.subr.bf16.mxu0 %v21469_v47  ;;  %v7370_v56 = vpack.c.bf16 %v7369_v62, %v7368_v57  ;;  %v21472_v30 = vld [vmem:[%s27056_s3 + $0x2b8] sm:$0xff]   ;;  %v21474_v27 = vld [vmem:[%s27056_s3 + $0x420] sm:$0xff]   ;;  %v21477_v6 = vld [vmem:[%s27056_s3 + $0x468] sm:$0xff]  }
 0x2d1   : > { %v23903_v11 = vmax.f32 %v27245_v9, %v6145_v48  ;;  %v7383_v8 = vmax.f32 %v27246_v33, %v5187_v43  ;;  %v27247_v4 = vmax.f32 %v23807_v16, 0.0  ;;  %v27248_v58 = vmax.f32 %v23810_v29, 0.0  ;;  %18827 = vmatprep.subr.bf16.mxu1 %v21466_v49  ;;  %v18601_v57 = vpop.f32.mrb[48].mxu1  ;;  %v27249_v16 = vld [vmem:[#allocation10_spill] sm:$0xff] }
 0x2d2   : > { %v9236_v1 = vrot.slane %v23919_v14, 7  ;;  %7384 = vst [vmem:[#allocation6] sm:$0xff] %v7380_v32  ;;  %v23925_v22 = vmax.f32 %v6142_v51, %v6146_v21  ;;  %v8399_v47 = vsel %vm8355_vm3, %v27249_v16, %v23860_v3  ;;  %v9242_v29 = vrot.slane %v23873_v41, 7  ;;  %v23939_v51 = vld [vmem:[#allocation3 + $0x10] sm:$0xe0]  ;;  %v18602_v34 = vpop.f32.mrb[49].mxu1 }
 0x2d3   : > { %v23915_v9 = vmax.f32 %v27247_v4, %v6148_v37  ;;  %v7381_v13 = vmax.f32 %v27248_v58, %v5185_v5  ;;  %v27250_v62 = vshrl.u32 %v23558_v23, 16  ;;  %7371 = vst [vmem:[#allocation3 + $0x38] sm:$0x7f] %v7370_v56  ;;  %7387 = vst [vmem:[#allocation6 + $0x18] sm:$0xff] %v7383_v8  ;;  %8582 = vmatmul.mubr.bf16.gmra.mrb[120].mxu1 %v8399_v47  ;;  %v27251_v24 = vshrl.u32 %v23485_v26, 16  ;;  %v18604_v43 = vpop.f32.mrb[50].mxu1 }
 0x2d4   : > { %v8418_v3 = vsel %vm8355_vm3, %v23699_v54, %v23868_v38  ;;  %18960 = vmatpush3.bf16.msra.mxu0 %v21470_v52  ;;  %v9187_v55 = vshrl.u32 %v23738_v50, 16  ;;  %v23948_v48 = vadd.f32 %v18602_v34, %v18601_v57  ;;  %18828 = vmatpush3.bf16.msra.mxu1 %v21468_v15  ;;  %v18605_v46 = vpop.f32.mrb[51].mxu1  ;;  %v27252_v54 = vrot.slane %v23080_v18, 7  ;;  %v21475_v38 = vld [vmem:[%s27056_s3 + $0x3c0] sm:$0xff]   ;;  %v21478_v33 = vld [vmem:[%s27056_s3 + $0x428] sm:$0xff]   ;;  %v21480_v8 = vld [vmem:[%s27056_s3 + $0x470] sm:$0xff]  }
 0x2d5   : > { %v8408_v0 = vrot.slane %v27250_v62, 7  ;;  %v8886_v49 = vor.u32 %v23624_v2, %v27251_v24  ;;  %7385 = vst [vmem:[#allocation6 + $0x8] sm:$0xff] %v7381_v13  ;;  %8589 = vmatprep.mubr.bf16.mxu1 %v8418_v3  ;;  %18829 = vmatprep.subr.bf16.mxu1 %v21471_v20  ;;  %v23963_v52 = vadd.f32 %v18605_v46, %v18604_v43  ;;  %v27253_v10 = vrot.slane %v23762_v45, 7  ;;  %v23984_v20 = vld [vmem:[#allocation3 + $0x28] sm:$0xff]  ;;  %v21485_v41 = vld [vmem:[%s27056_s3 + $0x438] sm:$0xff]  }
 0x2d6   : > { %v9237_v2 = vsel %vm9225_vm9, %v27252_v54, %v9236_v1  ;;  %18961 = vmatprep.subr.bf16.mxu0 %v21473_v19  ;;  %v27254_v32 = vshll.u32 %v23558_v23, 16  ;;  %v8971_v5 = vrot.slane %v23638_v59, 6  ;;  %v27255_v21 = vshrl.u32 %v22633_v60, 16 }
 0x2d7   : > { %v8891_v50 = vsel %vm7518_vm1, %v8886_v49, %v22983_v17  ;;  %9403 = vmatmul.mubr.bf16.gmra.mrb[92].mxu0 %v9237_v2  ;;  %v9243_v18 = vsel %vm9225_vm9, %v27253_v10, %v9242_v29  ;;  %v9189_v17 = vor.u32 %v9187_v55, %v23829_v28  ;;  %v9757_v23 = vshrl.u32 %v23939_v51, 16 }
 0x2d8   : > { %v8409_v37 = vor.u32 %v8408_v0, %v27254_v32  ;;  %9410 = vmatprep.mubr.bf16.mxu0 %v9243_v18  ;;  %18962 = vmatpush3.bf16.msra.mxu0 %v21474_v27  ;;  %v9681_v15 = vor.u32 %v23647_v39, %v27255_v21  ;;  %v8970_v28 = vrot.slane %v8891_v50, 6  ;;  %v9240_v56 = vrot.slane %v23984_v20, 7  ;;  %v21479_v18 = vld [vmem:[%s27056_s3 + $0x3c8] sm:$0xff]   ;;  %v21491_v21 = vld [vmem:[%s27056_s3 + $0x540] sm:$0xff]  }
 0x2d9   : > { %18830 = vmatpush3.bf16.msra.mxu1 %v21472_v30  ;;  %18963 = vmatprep.subr.bf16.mxu0 %v21477_v6  ;;  %v9760_v58 = vshll.u32 %v23939_v51, 16  ;;  %v9246_v39 = vrot.slane %v9189_v17, 7  ;;  %v8967_v47 = vrot.slane %v23485_v26, 6  ;;  %v8968_v62 = vrot.slane %v23609_v35, 6  ;;  %v21483_v26 = vld [vmem:[%s27056_s3 + $0x478] sm:$0xff]  }
 0x2da   : > { %18907 = vmatprep.subr.bf16.mxu1 %v21475_v38  ;;  %v9686_v4 = vsel %vm7518_vm1, %v9681_v15, %v23111_v36  ;;  %v7389_v13 = vld [vmem:[#allocation6 + $0x10] ss:$2 sm:$0x3f]  ;;  %v8410_v60 = vsel %vm8355_vm3, %v23684_v42, %v8409_v37  ;;  %v8972_v16 = vsel %vm8966_vm5, %v8970_v28, %v8971_v5  ;;  %v7391_v0 = vld [vmem:[#allocation6 + $0x11] ss:$2 sm:$0x3f] }
 0x2db   : > { %8590 = vmatmul.mubr.bf16.gmra.mrb[124].mxu1 %v8410_v60  ;;  %v21482_v36 = vld [vmem:[%s27056_s3 + $0x430] sm:$0xff]   ;;  %v9769_v42 = vshrl.u32 %v9686_v4, 16  ;;  %v9772_v27 = vshll.u32 %v9686_v4, 16  ;;  %v24005_v34 = vrot.slane %v9757_v23, 5  ;;  %v7393_v3 = vmax.f32 %v7389_v13, %v7391_v0  ;;  %7414 = vst [vmem:[#allocation6 + $0x10] sm:$0xff] %v23750_v12  ;;  %7415 = vst [vmem:[#allocation6 + $0x18] sm:$0xff] %v23757_v31 }
 0x2dc   : > { %v7388_v19 = vld [vmem:[#allocation6] ss:$2 sm:$0xff]  ;;  %v7390_v57 = vld [vmem:[#allocation6 + $0x1] ss:$2 sm:$0xff]  ;;  %18964 = vmatpush3.bf16.msra.mxu0 %v21478_v33  ;;  %9127 = vmatprep.mubr.bf16.mxu1 %v8972_v16  ;;  %v24009_v24 = vld [vmem:[#allocation3 + $0x38] sm:$0x7]  ;;  %v9247_v12 = vsel %vm9225_vm9, %v9242_v29, %v9246_v39  ;;  %v8969_v33 = vsel %vm8966_vm5, %v8967_v47, %v8968_v62 }
 0x2dd   : > { %v7392_v30 = vmax.f32 %v7388_v19, %v7390_v57  ;;  %7412 = vst [vmem:[#allocation6] sm:$0xff] %v23755_v53  ;;  %7413 = vst [vmem:[#allocation6 + $0x8] sm:$0xff] %v23768_v44  ;;  %18965 = vmatprep.subr.bf16.mxu0 %v21480_v8  ;;  %v9241_v53 = vsel %vm9225_vm9, %v9236_v1, %v9240_v56  ;;  %v24016_v44 = vld [vmem:[#allocation3 + $0x30] sm:$0x7]  ;;  %v24018_v49 = vrot.slane %v9760_v58, 6  ;;  %v27117_v55 = vshll.u32 %v24009_v24, 16 }
 0x2de   : > { %v27256_v31 = vld [vmem:[#allocation22_spill] sm:$0xff]  ;;  %v8975_v50 = vrot.slane %v23643_v63, 6  ;;  %v27259_v29 = vrot.slane %v23139_v61, 1  ;;  %v9771_v32 = vrot.slane %v9769_v42, 5  ;;  %v9774_v37 = vrot.slane %v9772_v27, 6  ;;  %v24065_v60 = vld [vmem:[#allocation3 + $0x18] sm:$0xff] }
 0x2df   : > { %9411 = vmatmul.mubr.bf16.gmra.mrb[96].mxu0 %v9241_v53  ;;  %v27257_v43 = vshrl.u32 %v27256_v31, 16  ;;  %v27258_v46 = vshll.u32 %v27256_v31, 16  ;;  %v7394_v2 = vpack.c.bf16 %v7393_v3, %v7392_v30  ;;  %v21476_v1 = vld [vmem:[%s27056_s3 + $0x380] sm:$0xff]   ;;  %v24042_v10 = vrot.slane %v27117_v55, 1  ;;  %v27260_v57 = vld [vmem:[#allocation19_spill] sm:$0xff] }
 0x2e0   : > { %9418 = vmatprep.mubr.bf16.mxu0 %v9247_v12  ;;  %18966 = vmatpush3.bf16.msra.mxu0 %v21482_v36  ;;  %v24038_v38 = vor.u32 %v23249_v25, %v27259_v29  ;;  %v9244_v8 = vrot.slane %v24016_v44, 7  ;;  %v8920_v23 = vshll.u32 %v24016_v44, 16  ;;  %v8976_v13 = vsel %vm8966_vm5, %v8971_v5, %v8975_v50  ;;  %v24070_v47 = vld [vmem:[#allocation3 + $0x38] sm:$0x3]  ;;  %v21481_v36 = vld [vmem:[%s27056_s3 + $0x388] sm:$0xff]   ;;  %v21484_v3 = vld [vmem:[%s27056_s3 + $0x3d0] sm:$0xff]  }
 0x2e1   : > { %v9779_v6 = vrot.slane %v27257_v43, 5  ;;  %v9782_v54 = vrot.slane %v27258_v46, 6  ;;  %18967 = vmatprep.subr.bf16.mxu0 %v21483_v26  ;;  %v7396_v17 = vrot.slane %v7394_v2, 1  ;;  %v8973_v39 = vrot.slane %v24065_v60, 6  ;;  %v27261_v0 = vld [vmem:[#allocation14_spill] sm:$0xff] }
 0x2e2   : > { %v10038_v15 = vsel %vm7518_vm1, %v24038_v38, %v24042_v10  ;;  %v8979_v19 = vrot.slane %v23762_v45, 6  ;;  %v9764_v16 = vrot.slane %v27260_v57, 5  ;;  %v9775_v59 = vor.u32 %v9774_v37, %v9771_v32  ;;  %v7419_v29 = vld [vmem:[#allocation6 + $0x11] ss:$2 sm:$0x3f]  ;;  %v27296_v55 = vld [vmem:[#allocation30_spill] sm:$0xff] }
 0x2e3   : > { %v24058_v28 = vor.u32 %v9782_v54, %v9779_v6  ;;  %7398 = vst [vmem:[#allocation3 + $0x38] sm:$0x80] %v7396_v17  ;;  %7399 = vst [vmem:[#allocation3 + $0x40] sm:$0x3f] %v7396_v17  ;;  %v10116_v4 = vshrl.u32 %v10038_v15, 16  ;;  %v10119_v58 = vshll.u32 %v10038_v15, 16  ;;  %9128 = vmatmul.mubr.bf16.vlgmr.msra.gmra.mrb[128].mxu1 %v8969_v33  ;;  %v9245_v26 = vsel %vm9225_vm9, %v9240_v56, %v9244_v8 }
 0x2e4   : > { %18968 = vmatpush3.bf16.msra.mxu0 %v21485_v41  ;;  %18908 = vmatpush3.bf16.msra.mxu1 %v21476_v1  ;;  %v9765_v5 = vrot.slane %v27261_v0, 6  ;;  %v24076_v27 = vld [vmem:[#allocation6] ss:$2 sm:$0xff]  ;;  %v27262_v53 = vshrl.u32 %v23182_v7, 16  ;;  %v27263_v31 = vshll.u32 %v23182_v7, 16  ;;  %v24090_v54 = vrot.slane %v8920_v23, 1 }
 0x2e5   : > { %9135 = vmatprep.mubr.bf16.mxu1 %v8976_v13  ;;  %v10118_v30 = vrot.slane %v10116_v4, 6  ;;  %v10121_v42 = vrot.slane %v10119_v58, 7  ;;  %18909 = vmatprep.subr.bf16.mxu1 %v21479_v18  ;;  %v7417_v6 = vld [vmem:[#allocation6 + $0x10] ss:$2 sm:$0x3f]  ;;  %v9784_v46 = vsel %vm9755_vm10, %v9775_v59, %v24058_v28  ;;  %v9715_v56 = vshll.u32 %v24070_v47, 16 }
 0x2e6   : > { %v9792_v12 = vrot.slane %v27262_v53, 5  ;;  %v9795_v43 = vrot.slane %v27263_v31, 6  ;;  %19045 = vmatprep.subr.bf16.mxu0 %v21491_v21  ;;  %v7418_v1 = vld [vmem:[#allocation6 + $0x1] ss:$2 sm:$0xff]  ;;  %v21486_v41 = vld [vmem:[%s27056_s3 + $0x390] sm:$0xff]   ;;  %7442 = vst [vmem:[#allocation6 + $0x10] sm:$0xff] %v23897_v40  ;;  %v8974_v37 = vsel %vm8966_vm5, %v8968_v62, %v8973_v39  ;;  %v8980_v35 = vsel %vm8966_vm5, %v8975_v50, %v8979_v19 }
 0x2e7   : > { %9419 = vmatmul.mubr.bf16.gmra.mrb[100].mxu0 %v9245_v26  ;;  %v24093_v2 = vor.u32 %v10121_v42, %v10118_v30  ;;  %7440 = vst [vmem:[#allocation6] sm:$0xff] %v23903_v11  ;;  %7441 = vst [vmem:[#allocation6 + $0x8] sm:$0xff] %v23925_v22  ;;  %v27264_v18 = vld [vmem:[#allocation31_spill] sm:$0xff]  ;;  %v9763_v11 = vor.u32 %v24018_v49, %v24005_v34  ;;  %v24114_v22 = vor.u32 %v9765_v5, %v9764_v16  ;;  %v21487_v40 = vld [vmem:[%s27056_s3 + $0x3d8] sm:$0xff]   ;;  %vm21908_vm3 = vmmov 0  }
 0x2e8   : > { %9975 = vmatprep.mubr.bf16.mxu0 %v9784_v46  ;;  %18910 = vmatpush3.bf16.msra.mxu1 %v21481_v36  ;;  %7443 = vst [vmem:[#allocation6 + $0x18] sm:$0xff] %v23915_v9  ;;  %v24116_v17 = vor.u32 %v9795_v43, %v9792_v12  ;;  %v8977_v62 = vrot.slane %v23919_v14, 6  ;;  %v24131_v34 = vrot.slane %v9715_v56, 1  ;;  %v27265_v8 = vld [vmem:[#allocation21_spill] sm:$0xff]  ;;  %v7420_v63 = vmax.f32 %v24076_v27, %v7418_v1  ;;  %v27266_v58 = vld [vmem:[#allocation24_spill] sm:$0xff]  ;;  %v21494_v36 = vld [vmem:[%s27056_s3 + $0x548] sm:$0xff]  }
 0x2e9   : > { %v24103_v32 = vsel %vm10075_vm4, %v27264_v18, %v24093_v2  ;;  %18911 = vmatprep.subr.bf16.mxu1 %v21484_v3  ;;  %v9785_v21 = vrot.slane %v27265_v8, 5  ;;  %v21492_v15 = vld [vmem:[%s27056_s3 + $0x500] sm:$0xff]   ;;  %v7421_v4 = vmax.f32 %v7417_v6, %v7419_v29  ;;  %v21488_v50 = vld [vmem:[%s27056_s3 + $0x398] sm:$0xff]   ;;  %v24145_v13 = vsel %vm7518_vm1, %v27266_v58, %v24090_v54  ;;  %v21496_v1 = vld [vmem:[%s27056_s3 + $0x508] sm:$0xff]  }
 0x2ea   : > { %v24121_v33 = vld [vmem:[#allocation3 + $0x38] sm:$0xff]  ;;  %v10616_v9 = vld [vmem:[#allocation3 + $0x40] sm:$0x3]  ;;  %v9767_v5 = vsel %vm9755_vm10, %v9763_v11, %v24114_v22  ;;  %v9797_v30 = vsel %vm9755_vm10, %v24058_v28, %v24116_v17  ;;  %v9718_v31 = vsel %vm7518_vm1, %v24038_v38, %v24131_v34  ;;  %v8983_v46 = vrot.slane %v24145_v13, 6  ;;  %v21493_v8 = vld [vmem:[%s27056_s3 + $0x3e8] sm:$0xff]  }
 0x2eb   : > { %v10362_v49 = vshll.u32 %v24121_v33, 16  ;;  %9136 = vmatmul.mubr.bf16.gmra.mrb[132].mxu1 %v8974_v37  ;;  %v10626_v23 = vshll.u32 %v10616_v9, 16  ;;  %v27267_v57 = vld [vmem:[#allocation16_spill] sm:$0xff]  ;;  %v10366_v0 = vshrl.u32 %v24121_v33, 16  ;;  %v21489_v42 = vld [vmem:[%s27056_s3 + $0x3e0] sm:$0xff]   ;;  %v7422_v29 = vpack.c.bf16 %v7421_v4, %v7420_v63 }
 0x2ec   : > { %9143 = vmatprep.mubr.bf16.mxu1 %v8980_v35  ;;  %18912 = vmatpush3.bf16.msra.mxu1 %v21486_v41  ;;  %v9786_v16 = vrot.slane %v27267_v57, 6  ;;  %v27268_v27 = vld [vmem:[#allocation25_spill] sm:$0xff]  ;;  %v10685_v18 = vrot.slane %v24121_v33, 5  ;;  %v8924_v11 = vshrl.u32 %v24016_v44, 16  ;;  %v24189_v9 = vld [vmem:[#allocation3 + $0x30] sm:$0xff] }
 0x2ed   : > { %v10364_v59 = vrot.slane %v10362_v49, 1  ;;  %18913 = vmatprep.subr.bf16.mxu1 %v21487_v40  ;;  %v27269_v26 = vshrl.u32 %v27268_v27, 16  ;;  %v27270_v53 = vshll.u32 %v27268_v27, 16  ;;  %v24173_v6 = vrot.slane %v10626_v23, 1  ;;  %v24187_v40 = vld [vmem:[#allocation3 + $0x40] sm:$0x1] }
 0x2ee   : > { %v24184_v37 = vor.u32 %v9786_v16, %v9785_v21  ;;  %v24192_v35 = vrot.slane %v24189_v9, 5  ;;  %v21497_v44 = vld [vmem:[%s27056_s3 + $0x550] sm:$0xff]   ;;  %v9816_v21 = vshrl.u32 %v9718_v31, 16  ;;  %v27271_v23 = vrot.slane %v27268_v27, 5 }
 0x2ef   : > { %v9805_v3 = vrot.slane %v27269_v26, 5  ;;  %v9808_v12 = vrot.slane %v27270_v53, 6  ;;  %9976 = vmatmul.mubr.bf16.vlgmr.msra.gmra.mrb[104].mxu0 %v9767_v5  ;;  %v24169_v43 = vsel %vm7518_vm1, %v24038_v38, %v10364_v59  ;;  %v24171_v28 = vor.u32 %v10366_v0, %v10364_v59  ;;  %v21490_v38 = vld [vmem:[%s27056_s3 + $0x3a0] sm:$0xff]  }
 0x2f0   : > { %9983 = vmatprep.mubr.bf16.mxu0 %v9797_v30  ;;  %19046 = vmatpush3.bf16.msra.mxu0 %v21492_v15  ;;  %v10683_v41 = vrot.slane %v24169_v43, 5  ;;  %v9819_v15 = vshll.u32 %v9718_v31, 16  ;;  %v7424_v57 = vrot.slane %v7422_v29, 2  ;;  %v24220_v16 = vsel %vm8029_vm6, %v24192_v35, %v10685_v18 }
 0x2f1   : > { %18914 = vmatpush3.bf16.msra.mxu1 %v21488_v50  ;;  %19047 = vmatprep.subr.bf16.mxu0 %v21494_v36  ;;  %v24197_v49 = vsel %vm7518_vm1, %v24171_v28, %v24173_v6  ;;  %v8978_v50 = vsel %vm8966_vm5, %v8973_v39, %v8977_v62  ;;  %v24216_v58 = vor.u32 %v9808_v12, %v9805_v3  ;;  %v21499_v39 = vld [vmem:[%s27056_s3 + $0x510] sm:$0xff]   ;;  %v10689_v5 = vrot.slane %v24187_v40, 5  ;;  %v27273_v3 = vld [vmem:[#allocation17_spill] sm:$0xff] }
 0x2f2   : > { %18915 = vmatprep.subr.bf16.mxu1 %v21489_v42  ;;  %v24208_v63 = vsel %vm8029_vm6, %v27271_v23, %v10683_v41  ;;  %v27116_v4 = vrot.slane %v24197_v49, 5  ;;  %v8984_v36 = vsel %vm8966_vm5, %v8979_v19, %v8983_v46  ;;  %v8926_v59 = vor.u32 %v8924_v11, %v24090_v54  ;;  %v21495_v19 = vld [vmem:[%s27056_s3 + $0x3a8] sm:$0xff]   ;;  %v21501_v42 = vld [vmem:[%s27056_s3 + $0x558] sm:$0xff]   ;;  %7426 = vst [vmem:[#allocation3 + $0x40] sm:$0xc0] %v7424_v57 }
 0x2f3   : > { %9144 = vmatmul.mubr.bf16.gmra.mrb[136].mxu1 %v8978_v50  ;;  %v9788_v45 = vsel %vm9755_vm10, %v24114_v22, %v24184_v37  ;;  %v27272_v54 = vld [vmem:[#allocation23_spill] sm:$0xff]  ;;  %v9719_v26 = vshrl.u32 %v24070_v47, 16  ;;  %7427 = vst [vmem:[#allocation3 + $0x48] sm:$0x1f] %v7424_v57  ;;  %v9799_v53 = vrot.slane %v27273_v3, 6  ;;  %v9818_v12 = vrot.slane %v9816_v21, 5 }
 0x2f4   : > { %19048 = vmatpush3.bf16.msra.mxu0 %v21496_v1  ;;  %v24234_v0 = vsel %vm8029_vm6, %v10683_v41, %v27116_v4  ;;  %9151 = vmatprep.mubr.bf16.mxu1 %v8984_v36  ;;  %v9798_v30 = vrot.slane %v27272_v54, 5  ;;  %v21498_v22 = vld [vmem:[%s27056_s3 + $0x3f0] sm:$0xff]   ;;  %v9821_v31 = vrot.slane %v9819_v15, 6  ;;  %v24253_v1 = vsel %vm8029_vm6, %v10685_v18, %v10689_v5  ;;  %v21502_v11 = vld [vmem:[%s27056_s3 + $0x518] sm:$0xff]   ;;  %v27274_v21 = vld [vmem:[#allocation26_spill] sm:$0xff] }
 0x2f5   : > { %18916 = vmatpush3.bf16.msra.mxu1 %v21490_v38  ;;  %19049 = vmatprep.subr.bf16.mxu0 %v21497_v44  ;;  %v9810_v41 = vsel %vm9755_vm10, %v24116_v17, %v24216_v58  ;;  %v9721_v29 = vor.u32 %v9719_v26, %v24131_v34  ;;  %v8987_v38 = vrot.slane %v8926_v59, 6  ;;  %v21500_v18 = vld [vmem:[%s27056_s3 + $0x3b0] sm:$0xff]   ;;  %v21503_v34 = vld [vmem:[%s27056_s3 + $0x3f8] sm:$0xff]   ;;  %v21505_v44 = vld [vmem:[%s27056_s3 + $0x560] sm:$0xff]   ;;  %v8982_v15 = vsel %vm8966_vm5, %v8977_v62, %v27274_v21 }
 0x2f6   : > { %18917 = vmatprep.subr.bf16.mxu1 %v21493_v8  ;;  %v24267_v8 = vld [vmem:[#allocation3 + $0x18] sm:$0xf0]  ;;  %v9800_v17 = vor.u32 %v9799_v53, %v9798_v30  ;;  %v9822_v23 = vor.u32 %v9821_v31, %v9818_v12  ;;  %v8878_v59 = vld [vmem:[#allocation3 + $0x30] sm:$0x3]  ;;  %v21509_v5 = vld [vmem:[%s27056_s3 + $0x568] sm:$0xff]   ;;  %v27124_v4 = vshrl.u32 %v24009_v24, 16 }
 0x2f7   : > { %9984 = vmatmul.mubr.bf16.gmra.mrb[108].mxu0 %v9788_v45  ;;  %v9829_v50 = vshrl.u32 %v9721_v29, 16  ;;  %v9832_v57 = vshll.u32 %v9721_v29, 16  ;;  %v8988_v36 = vsel %vm8966_vm5, %v8983_v46, %v8987_v38  ;;  %v21504_v62 = vld [vmem:[%s27056_s3 + $0x3b8] sm:$0xff]   ;;  %v10333_v13 = vshll.u32 %v24267_v8, 16  ;;  %v21507_v54 = vld [vmem:[%s27056_s3 + $0x4c0] sm:$0xff]   ;;  %v21514_v31 = vld [vmem:[%s27056_s3 + $0x530] sm:$0xff]  }
 0x2f8   : > { %9991 = vmatprep.mubr.bf16.mxu0 %v9810_v41  ;;  %19050 = vmatpush3.bf16.msra.mxu0 %v21499_v39  ;;  %v21506_v39 = vld [vmem:[%s27056_s3 + $0x520] sm:$0xff]   ;;  %v9801_v46 = vsel %vm9755_vm10, %v24184_v37, %v9800_v17  ;;  %v9811_v45 = vrot.slane %v23249_v25, 5  ;;  %v9823_v30 = vsel %vm9755_vm10, %v24216_v58, %v9822_v23  ;;  %v9448_v37 = vrot.slane %v24065_v60, 5 }
 0x2f9   : > { %18918 = vmatpush3.bf16.msra.mxu1 %v21495_v19  ;;  %19051 = vmatprep.subr.bf16.mxu0 %v21501_v42  ;;  %v9812_v19 = vrot.slane %v23139_v61, 6  ;;  %v8985_v42 = vrot.slane %v8878_v59, 6  ;;  %v9831_v3 = vrot.slane %v9829_v50, 5  ;;  %v9834_v53 = vrot.slane %v9832_v57, 6  ;;  %v21510_v61 = vld [vmem:[%s27056_s3 + $0x528] sm:$0xff]   ;;  %v21508_v47 = vld [vmem:[%s27056_s3 + $0x480] sm:$0xff]  }
 0x2fa   : > { %18919 = vmatprep.subr.bf16.mxu1 %v21498_v22  ;;  %v9447_v25 = vrot.slane %v23939_v51, 5  ;;  %v21512_v22 = vld [vmem:[%s27056_s3 + $0x570] sm:$0xff]   ;;  %v10335_v58 = vrot.slane %v10333_v13, 1  ;;  %v7444_v41 = vld [vmem:[#allocation6] ss:$2 sm:$0xff]  ;;  %v9825_v57 = vrot.slane %v9715_v56, 6 }
 0x2fb   : > { %9152 = vmatmul.mubr.bf16.gmra.mrb[140].mxu1 %v8982_v15  ;;  %v9813_v12 = vor.u32 %v9812_v19, %v9811_v45  ;;  %v8986_v29 = vsel %vm8966_vm5, %v27274_v21, %v8985_v42  ;;  %v9835_v38 = vor.u32 %v9834_v53, %v9831_v3  ;;  %v21515_v15 = vld [vmem:[%s27056_s3 + $0x578] sm:$0xff]   ;;  %v9824_v21 = vrot.slane %v9719_v26, 5  ;;  %v21511_v56 = vld [vmem:[%s27056_s3 + $0x4c8] sm:$0xff]   ;;  %v21523_v45 = vld [vmem:[%s27056_s3 + $0x640] sm:$0xff]  }
 0x2fc   : > { %19052 = vmatpush3.bf16.msra.mxu0 %v21502_v11  ;;  %9159 = vmatprep.mubr.bf16.mxu1 %v8988_v36  ;;  %v7446_v11 = vld [vmem:[#allocation6 + $0x1] ss:$2 sm:$0xff]  ;;  %v9449_v51 = vsel %vm8029_vm6, %v9447_v25, %v9448_v37  ;;  %v21517_v26 = vld [vmem:[%s27056_s3 + $0x538] sm:$0xff]   ;;  %v21820_v42 = vld [vmem:[#allocation3 + $0x10] sm:$0xff] }
 0x2fd   : > { %18920 = vmatpush3.bf16.msra.mxu1 %v21500_v18  ;;  %19053 = vmatprep.subr.bf16.mxu0 %v21505_v44  ;;  %v7445_v18 = vld [vmem:[#allocation6 + $0x10] ss:$2 sm:$0x3f]  ;;  %v10331_v44 = vshrl.u32 %v24267_v8, 16  ;;  %v9814_v50 = vsel %vm9755_vm10, %v9800_v17, %v9813_v12  ;;  %v9836_v36 = vsel %vm9755_vm10, %v9822_v23, %v9835_v38 }
 0x2fe   : > { %18921 = vmatprep.subr.bf16.mxu1 %v21503_v34  ;;  %v7447_v34 = vld [vmem:[#allocation6 + $0x11] ss:$2 sm:$0x3f] }
 0x2ff   : > { %9992 = vmatmul.mubr.bf16.gmra.mrb[112].mxu0 %v9801_v46  ;;  %v10336_v59 = vor.u32 %v10335_v58, %v10331_v44  ;;  %v27275_v17 = vld [vmem:[#allocation20_spill] sm:$0xff]  ;;  %v9826_v46 = vor.u32 %v9825_v57, %v9824_v21 }
 0x300   : > { %9999 = vmatprep.mubr.bf16.mxu0 %v9823_v30  ;;  %19054 = vmatpush3.bf16.msra.mxu0 %v21506_v39  ;;  %v7448_v39 = vmax.f32 %v7444_v41, %v7446_v11  ;;  %v24344_v19 = vld [vmem:[#allocation3 + $0x38] sm:$0xff] }
 0x301   : > { %18922 = vmatpush3.bf16.msra.mxu1 %v21504_v62  ;;  %19055 = vmatprep.subr.bf16.mxu0 %v21509_v5  ;;  %v7449_v62 = vmax.f32 %v7445_v18, %v7447_v34  ;;  %v24325_v5 = vld [vmem:[#allocation3 + $0x20] sm:$0xff]  ;;  %v10341_v23 = vsel %vm7518_vm1, %v10336_v59, %v27275_v17  ;;  %27276 = vst [vmem:[#allocation13_spill] sm:$0xff] %v24344_v19  ;;  %v21519_v44 = vld [vmem:[%s27056_s3 + $0x4d8] sm:$0xff]  }
 0x302   : > { %18999 = vmatprep.subr.bf16.mxu1 %v21507_v54  ;;  %v24328_v13 = vrot.slane %v24325_v5, 5  ;;  %v10414_v54 = vrot.slane %v23182_v7, 4  ;;  %v10413_v53 = vrot.slane %v10341_v23, 4  ;;  %v27112_v7 = vrot.slane %v24344_v19, 4  ;;  %v21524_v59 = vld [vmem:[%s27056_s3 + $0x600] sm:$0xff]   ;;  %v21525_v23 = vld [vmem:[%s27056_s3 + $0x4e8] sm:$0xff]  }
 0x303   : > { %9160 = vmatmul.mubr.bf16.gmra.mrb[144].mxu1 %v8986_v29  ;;  %v7450_v30 = vpack.c.bf16 %v7449_v62, %v7448_v39  ;;  %v9827_v41 = vsel %vm9755_vm10, %v9813_v12, %v9826_v46  ;;  %v9452_v12 = vrot.slane %v23984_v20, 5  ;;  %v10411_v34 = vrot.slane %v24325_v5, 4  ;;  %v21526_v39 = vld [vmem:[%s27056_s3 + $0x648] sm:$0xff]   ;;  %v21529_v46 = vld [vmem:[%s27056_s3 + $0x650] sm:$0xff]  }
 0x304   : > { %19056 = vmatpush3.bf16.msra.mxu0 %v21510_v61  ;;  %9624 = vmatprep.mubr.bf16.mxu1 %v9449_v51  ;;  %v9451_v3 = vsel %vm8029_vm6, %v9448_v37, %v24328_v13  ;;  %v21513_v61 = vld [vmem:[%s27056_s3 + $0x488] sm:$0xff]   ;;  %v21516_v37 = vld [vmem:[%s27056_s3 + $0x4d0] sm:$0xff]   ;;  %v10415_v29 = vsel %vm10409_vm11, %v10413_v53, %v10414_v54 }
 0x305   : > { %19057 = vmatprep.subr.bf16.mxu0 %v21512_v22  ;;  %v7452_v25 = vrot.slane %v7450_v30, 3  ;;  %v24352_v22 = vld [vmem:[#allocation3 + $0x30] sm:$0xff]  ;;  %v9453_v57 = vsel %vm8029_vm6, %v24328_v13, %v9452_v12  ;;  %v10422_v30 = vrot.slane %v24169_v43, 4  ;;  %v9455_v53 = vsel %vm8029_vm6, %v9452_v12, %v24192_v35 }
 0x306   : > { %27277 = vst [vmem:[#allocation11_spill] sm:$0xff] %v24352_v22  ;;  %v27115_v58 = vrot.slane %v24352_v22, 4  ;;  %v21518_v51 = vld [vmem:[%s27056_s3 + $0x490] sm:$0xff]  }
 0x307   : > { %10000 = vmatmul.mubr.bf16.gmra.mrb[116].mxu0 %v9814_v50  ;;  %7454 = vst [vmem:[#allocation3 + $0x50] ss:$-4 sps:$4 sm:$0xef] %v7452_v25   ;;  %v10418_v50 = vrot.slane %v27268_v27, 4  ;;  %v21520_v27 = vld [vmem:[%s27056_s3 + $0x498] sm:$0xff]   ;;  %v24432_v25 = vld [vmem:[#allocation3 + $0x40] sm:$0xff] }
 0x308   : > { %10007 = vmatprep.mubr.bf16.mxu0 %v9836_v36  ;;  %19058 = vmatpush3.bf16.msra.mxu0 %v21514_v31  ;;  %v24356_v31 = vld [vmem:[#allocation3 + $0x38] sm:$0xfc]  ;;  %v24368_v38 = vsel %vm10409_vm11, %v27115_v58, %v27112_v7  ;;  %v10410_v36 = vrot.slane %v24267_v8, 4  ;;  %v21521_v8 = vld [vmem:[%s27056_s3 + $0x4e0] sm:$0xff]   ;;  %27280 = vst [vmem:[#allocation22_spill] sm:$0xff] %v24432_v25  ;;  %v21544_v43 = vld [vmem:[%s27056_s3 + $0x670] sm:$0xff]  }
 0x309   : > { %19059 = vmatprep.subr.bf16.mxu0 %v21515_v15  ;;  %27278 = vst [vmem:[#allocation12_spill] sm:$0xff] %v24356_v31  ;;  %27279 = vst [vmem:[#allocation10_spill] sm:$0xff] %v24368_v38  ;;  %v27113_v11 = vshrl.u32 %v24356_v31, 16  ;;  %v27114_v18 = vshll.u32 %v24356_v31, 16  ;;  %v10419_v5 = vsel %vm10409_vm11, %v10414_v54, %v10418_v50 }
 0x30a   : > { %v10412_v62 = vsel %vm10409_vm11, %v10410_v36, %v10411_v34  ;;  %v24452_v36 = vshll.u32 %v24344_v19, 16 }
 0x30b   : > { %9625 = vmatmul.mubr.bf16.vlgmr.msra.gmra.mrb[148].mxu1 %v21820_v42  ;;  %v24382_v15 = vrot.slane %v27113_v11, 2  ;;  %v24387_v21 = vrot.slane %v27114_v18, 3  ;;  %v27122_v11 = vrot.slane %v24432_v25, 4  ;;  %v27294_v18 = vld [vmem:[#allocation28_spill] sm:$0xff] }
 0x30c   : > { %19060 = vmatpush3.bf16.msra.mxu0 %v21517_v26  ;;  %19000 = vmatpush3.bf16.msra.mxu1 %v21508_v47  ;;  %v21528_v26 = vld [vmem:[%s27056_s3 + $0x608] sm:$0xff]   ;;  %v21522_v47 = vld [vmem:[%s27056_s3 + $0x4a0] sm:$0xff]  }
 0x30d   : > { %9632 = vmatprep.mubr.bf16.mxu1 %v9451_v3  ;;  %19001 = vmatprep.subr.bf16.mxu1 %v21511_v56  ;;  %v10416_v56 = vrot.slane %v23984_v20, 4 }
 0x30e   : > { %19137 = vmatprep.subr.bf16.mxu0 %v21523_v45  ;;  %v10370_v45 = vshll.u32 %v24187_v40, 16  ;;  %v9440_v40 = vld [vmem:[#allocation3 + $0x38] sm:$0x1] }
 0x30f   : > { %10008 = vmatmul.mubr.bf16.gmra.mrb[120].mxu0 %v9827_v41 }
 0x310   : > { %10566 = vmatprep.mubr.bf16.mxu0 %v10415_v29  ;;  %19002 = vmatpush3.bf16.msra.mxu1 %v21513_v61  ;;  %v21531_v61 = vld [vmem:[%s27056_s3 + $0x610] sm:$0xff]   ;;  %v24441_v29 = vshrl.u32 %v24344_v19, 16 }
 0x311   : > { %19003 = vmatprep.subr.bf16.mxu1 %v21516_v37  ;;  %v21527_v37 = vld [vmem:[%s27056_s3 + $0x4a8] sm:$0xff]  }
 0x313   : > { %9633 = vmatmul.mubr.bf16.gmra.mrb[152].mxu1 %v24065_v60  ;;  %v24603_v60 = vld [vmem:[#allocation3 + $0x28] sm:$0xf8] }
 0x314   : > { %9640 = vmatprep.mubr.bf16.mxu1 %v9453_v57  ;;  %19004 = vmatpush3.bf16.msra.mxu1 %v21518_v51  ;;  %v10417_v51 = vsel %vm10409_vm11, %v10411_v34, %v10416_v56  ;;  %v10372_v57 = vrot.slane %v10370_v45, 1  ;;  %v24461_v34 = vshrl.u32 %v24432_v25, 16 }
 0x315   : > { %19005 = vmatprep.subr.bf16.mxu1 %v21519_v44  ;;  %v21530_v44 = vld [vmem:[%s27056_s3 + $0x4f0] sm:$0xff]  }
 0x316   : > { %v12015_v45 = vrot.slane %v24461_v34, 3 }
 0x317   : > { %10567 = vmatmul.mubr.bf16.vlgmr.msra.gmra.mrb[124].mxu0 %v10412_v62  ;;  %v24465_v62 = vsel %vm7518_vm1, %v24171_v28, %v10372_v57  ;;  %v21535_v28 = vld [vmem:[%s27056_s3 + $0x4f8] sm:$0xff]   ;;  %v27283_v57 = vld [vmem:[#allocation42_spill] sm:$0xff] }
 0x318   : > { %10574 = vmatprep.mubr.bf16.mxu0 %v10419_v5  ;;  %19138 = vmatpush3.bf16.msra.mxu0 %v21524_v59  ;;  %v18607_v17 = vpop.f32.mrb[52].mxu1  ;;  %v10423_v59 = vsel %vm10409_vm11, %v10418_v50, %v10422_v30  ;;  %v21532_v50 = vld [vmem:[%s27056_s3 + $0x4b0] sm:$0xff]   ;;  %v12002_v5 = vrot.slane %v24441_v29, 3 }
 0x319   : > { %19006 = vmatpush3.bf16.msra.mxu1 %v21520_v27  ;;  %19139 = vmatprep.subr.bf16.mxu0 %v21526_v39  ;;  %v18608_v54 = vpop.f32.mrb[53].mxu1  ;;  %v24458_v27 = vshll.u32 %v24432_v25, 16  ;;  %v9456_v39 = vrot.slane %v9440_v40, 5  ;;  %v24497_v40 = vld [vmem:[#allocation3 + $0x48] sm:$0xff] }
 0x31a   : > { %19007 = vmatprep.subr.bf16.mxu1 %v21521_v8  ;;  %v24424_v42 = vadd.f32 %v18608_v54, %v18607_v17  ;;  %v18610_v3 = vpop.f32.mrb[54].mxu1  ;;  %v21534_v8 = vld [vmem:[%s27056_s3 + $0x618] sm:$0xff]   ;;  %v12003_v17 = vrot.slane %v24452_v36, 4  ;;  %v24593_v58 = vshrl.u32 %v24497_v40, 16 }
 0x31b   : > { %9641 = vmatmul.mubr.bf16.gmra.mrb[156].mxu1 %v23919_v14  ;;  %v18611_v41 = vpop.f32.mrb[55].mxu1  ;;  %v21533_v14 = vld [vmem:[%s27056_s3 + $0x658] sm:$0xff]   ;;  %v12016_v54 = vrot.slane %v24458_v27, 4 }
 0x31c   : > { %19140 = vmatpush3.bf16.msra.mxu0 %v21528_v26  ;;  %9648 = vmatprep.mubr.bf16.mxu1 %v9455_v53  ;;  %v24443_v12 = vadd.f32 %v18611_v41, %v18610_v3  ;;  %v10420_v26 = vrot.slane %v24189_v9, 4  ;;  %v9457_v9 = vsel %vm8029_vm6, %v24192_v35, %v9456_v39  ;;  %v21538_v3 = vld [vmem:[%s27056_s3 + $0x620] sm:$0xff]   ;;  %v12004_v53 = vor.u32 %v12003_v17, %v12002_v5  ;;  %v21541_v41 = vld [vmem:[%s27056_s3 + $0x668] sm:$0xff]   ;;  %v24532_v17 = vld [vmem:[#allocation3 + $0x38] sm:$0xff] }
 0x31d   : > { %19008 = vmatpush3.bf16.msra.mxu1 %v21522_v47  ;;  %19141 = vmatprep.subr.bf16.mxu0 %v21529_v46  ;;  %v21537_v47 = vld [vmem:[%s27056_s3 + $0x660] sm:$0xff]   ;;  %27287 = vst [vmem:[#allocation16_spill] sm:$0xff] %v24532_v17  ;;  %27295 = vst [vmem:[#allocation42_spill] sm:$0xff] %v24593_v58 }
 0x31e   : > { %19009 = vmatprep.subr.bf16.mxu1 %v21525_v23  ;;  %v10426_v23 = vrot.slane %v24465_v62, 4  ;;  %v13026_v46 = vld [vmem:[#allocation3 + $0x40] sm:$0xff] }
 0x31f   : > { %10575 = vmatmul.mubr.bf16.gmra.mrb[128].mxu0 %v10417_v51  ;;  %v21539_v51 = vld [vmem:[%s27056_s3 + $0x5c0] sm:$0xff]  }
 0x320   : > { %10582 = vmatprep.mubr.bf16.mxu0 %v10423_v59  ;;  %19142 = vmatpush3.bf16.msra.mxu0 %v21531_v61  ;;  %v21536_v61 = vld [vmem:[%s27056_s3 + $0x4b8] sm:$0xff]   ;;  %v24511_v59 = vsel %vm11972_vm8, %v27283_v57, %v12004_v53 }
 0x321   : > { %19010 = vmatpush3.bf16.msra.mxu1 %v21527_v37  ;;  %19143 = vmatprep.subr.bf16.mxu0 %v21533_v14  ;;  %v24499_v37 = vor.u32 %v12016_v54, %v12015_v45  ;;  %v10421_v14 = vsel %vm10409_vm11, %v10416_v56, %v10420_v26  ;;  %27284 = vst [vmem:[#allocation31_spill] sm:$0xff] %v24511_v59 }
 0x322   : > { %19011 = vmatprep.subr.bf16.mxu1 %v21530_v44  ;;  %v24507_v44 = vshll.u32 %v13026_v46, 16 }
 0x323   : > { %9649 = vmatmul.mubr.bf16.gmra.mrb[160].mxu1 %v23984_v20  ;;  %27281 = vst [vmem:[#allocation19_spill] sm:$0xff] %v24499_v37  ;;  %v10427_v20 = vsel %vm10409_vm11, %v10422_v30, %v10426_v23  ;;  %v24518_v56 = vsel %vm11972_vm8, %v12004_v53, %v24499_v37 }
 0x324   : > { %19144 = vmatpush3.bf16.msra.mxu0 %v21534_v8  ;;  %9656 = vmatprep.mubr.bf16.mxu1 %v9457_v9  ;;  %27282 = vst [vmem:[#allocation14_spill] sm:$0xff] %v24507_v44  ;;  %27285 = vst [vmem:[#allocation21_spill] sm:$0xff] %v24518_v56  ;;  %v21542_v8 = vld [vmem:[%s27056_s3 + $0x628] sm:$0xff]   ;;  %v24535_v45 = vrot.slane %v24507_v44, 1  ;;  %v21822_v9 = vld [vmem:[#allocation3 + $0x30] sm:$0xf] }
 0x325   : > { %19012 = vmatpush3.bf16.msra.mxu1 %v21532_v50  ;;  %19145 = vmatprep.subr.bf16.mxu0 %v21537_v47  ;;  %v18613_v39 = vpop.f32.mrb[56].mxu1  ;;  %v24524_v50 = vshll.u32 %v24497_v40, 16  ;;  %v10424_v47 = vrot.slane %v24121_v33, 4  ;;  %v27290_v33 = vld [vmem:[#allocation27_spill] sm:$0xff] }
 0x326   : > { %19013 = vmatprep.subr.bf16.mxu1 %v21535_v28  ;;  %v18614_v62 = vpop.f32.mrb[57].mxu1  ;;  %27288 = vst [vmem:[#allocation25_spill] sm:$0xff] %v24535_v45 }
 0x327   : > { %10583 = vmatmul.mubr.bf16.gmra.mrb[132].mxu0 %v10421_v14  ;;  %27286 = vst [vmem:[#allocation24_spill] sm:$0xff] %v24524_v50  ;;  %v24526_v5 = vadd.f32 %v18614_v62, %v18613_v39  ;;  %v18616_v28 = vpop.f32.mrb[58].mxu1  ;;  %v24543_v53 = vrot.slane %v24524_v50, 1  ;;  %v27111_v14 = vrot.slane %v24532_v17, 2  ;;  %v10425_v57 = vsel %vm10409_vm11, %v10420_v26, %v10424_v47  ;;  %v21540_v26 = vld [vmem:[%s27056_s3 + $0x580] sm:$0xff]  }
 0x328   : > { %10590 = vmatprep.mubr.bf16.mxu0 %v10427_v20  ;;  %19146 = vmatpush3.bf16.msra.mxu0 %v21538_v3  ;;  %v18617_v30 = vpop.f32.mrb[59].mxu1  ;;  %v21546_v3 = vld [vmem:[%s27056_s3 + $0x630] sm:$0xff]  }
 0x329   : > { %19014 = vmatpush3.bf16.msra.mxu1 %v21536_v61  ;;  %19147 = vmatprep.subr.bf16.mxu0 %v21541_v41  ;;  %v24537_v54 = vadd.f32 %v18617_v30, %v18616_v28  ;;  %v24545_v61 = vshrl.u32 %v13026_v46, 16  ;;  %v21547_v41 = vld [vmem:[%s27056_s3 + $0x678] sm:$0xff]  }
 0x32a   : > { %19091 = vmatprep.subr.bf16.mxu1 %v21539_v51  ;;  %v27110_v51 = vrot.slane %v24432_v25, 2  ;;  %v10880_v46 = vld [vmem:[#allocation3 + $0x18] sm:$0xc0] }
 0x32b   : > { %9657 = vmatmul.mubr.bf16.gmra.mrb[164].mxu1 %v21822_v9  ;;  %27289 = vst [vmem:[#allocation23_spill] sm:$0xff] %v24545_v61  ;;  %v24556_v39 = vor.u32 %v24545_v61, %v24535_v45  ;;  %v21549_v28 = vld [vmem:[%s27056_s3 + $0x638] sm:$0xff]  }
 0x32c   : > { %19148 = vmatpush3.bf16.msra.mxu0 %v21542_v8  ;;  %10275 = vmatprep.mubr.bf16.mxu1 %v27290_v33  ;;  %v24563_v62 = vsel %vm8076_vm7, %v27111_v14, %v27110_v51  ;;  %v13593_v33 = vld [vmem:[#allocation3 + $0x38] sm:$0xf8]  ;;  %v27123_v51 = vrot.slane %v24532_v17, 4  ;;  %v13646_v14 = vrot.slane %v24545_v61, 2  ;;  %v24790_v61 = vld [vmem:[#allocation3 + $0x40] sm:$0x3] }
 0x32d   : > { %19149 = vmatprep.subr.bf16.mxu0 %v21544_v43  ;;  %27291 = vst [vmem:[#allocation17_spill] sm:$0xff] %v24556_v39  ;;  %v18619_v20 = vpop.f32.mrb[60].mxu1  ;;  %27292 = vst [vmem:[#allocation26_spill] sm:$0xff] %v24563_v62  ;;  %v24574_v43 = vsel %vm7518_vm1, %v24556_v39, %v24543_v53 }
 0x32e   : > { %v18620_v8 = vpop.f32.mrb[61].mxu1  ;;  %27293 = vst [vmem:[#allocation20_spill] sm:$0xff] %v24574_v43  ;;  %v24611_v40 = vsel %vm10409_vm11, %v27123_v51, %v27122_v11  ;;  %v27300_v39 = vshrl.u32 %v24574_v43, 16 }
 0x32f   : > { %10591 = vmatmul.mubr.bf16.gmra.mrb[136].mxu0 %v10425_v57  ;;  %v24576_v30 = vadd.f32 %v18620_v8, %v18619_v20  ;;  %v18622_v9 = vpop.f32.mrb[62].mxu1  ;;  %v13647_v8 = vrot.slane %v24507_v44, 3  ;;  %27297 = vst [vmem:[#allocation27_spill] sm:$0xff] %v24611_v40  ;;  %v13595_v20 = vshrl.u32 %v13593_v33, 16  ;;  %v27311_v40 = vrot.slane %v24603_v60, 5 }
 0x330   : > { %10598 = vmatprep.mubr.bf16.mxu0 %v10426_v23  ;;  %19150 = vmatpush3.bf16.msra.mxu0 %v21546_v3  ;;  %v21543_v23 = vld [vmem:[%s27056_s3 + $0x5c8] sm:$0xff]   ;;  %v18623_v57 = vpop.f32.mrb[63].mxu1  ;;  %v21555_v3 = vld [vmem:[%s27056_s3 + $0x140] sm:$0xff]   ;;  %v13658_v17 = vrot.slane %v27300_v39, 2 }
 0x331   : > { %19151 = vmatprep.subr.bf16.mxu0 %v21547_v41  ;;  %v24586_v7 = vadd.f32 %v18623_v57, %v18622_v9  ;;  %v10916_v41 = vrot.slane %v10880_v46, 6  ;;  %v21545_v9 = vld [vmem:[%s27056_s3 + $0x588] sm:$0xff]   ;;  %v21548_v57 = vld [vmem:[%s27056_s3 + $0x5d0] sm:$0xff]   ;;  %v13648_v37 = vor.u32 %v13647_v8, %v13646_v14  ;;  %v27302_v14 = vor.u32 %v24387_v21, %v24382_v15 }
 0x332   : > { %v27298_v46 = vld [vmem:[#allocation15_spill] sm:$0xff]  ;;  %v27306_v21 = vld [vmem:[#allocation32_spill] sm:$0xff] }
 0x333   : > { %10276 = vmatmul.mubr.bf16.vlgmr.msra.gmra.mrb[168].mxu1 %v27294_v18  ;;  %v24632_v39 = vsel %vm13642_vm12, %v27302_v14, %v13648_v37 }
 0x334   : > { %19152 = vmatpush3.bf16.msra.mxu0 %v21549_v28  ;;  %19092 = vmatpush3.bf16.msra.mxu1 %v21540_v26  ;;  %v27299_v26 = vrot.slane %v27298_v46, 6  ;;  %v13662_v46 = vrot.slane %v24593_v58, 2  ;;  %27303 = vst [vmem:[#allocation28_spill] sm:$0xff] %v24632_v39 }
 0x335   : > { %10283 = vmatprep.mubr.bf16.mxu1 %v27296_v55  ;;  %v13597_v55 = vshll.u32 %v13593_v33, 16  ;;  %19093 = vmatprep.subr.bf16.mxu1 %v21543_v23  ;;  %v18625_v62 = vpop.f32.mrb[64].mxu1  ;;  %v27301_v23 = vshll.u32 %v24574_v43, 16 }
 0x336   : > { %v10918_v28 = vsel %vm8966_vm5, %v10916_v41, %v27299_v26  ;;  %19263 = vmatprep.subr.bf16.mxu0 %v21555_v3  ;;  %v18626_v11 = vpop.f32.mrb[65].mxu1  ;;  %v13663_v3 = vrot.slane %v24524_v50, 3  ;;  %v27317_v50 = vld [vmem:[#allocation37_spill] sm:$0xff] }
 0x337   : > { %10599 = vmatmul.mubr.bf16.gmra.mrb[140].mxu0 %v10424_v47  ;;  %v13599_v18 = vrot.slane %v13597_v55, 1  ;;  %v13659_v51 = vrot.slane %v27301_v23, 3  ;;  %v24623_v41 = vadd.f32 %v18626_v11, %v18625_v62  ;;  %v18628_v33 = vpop.f32.mrb[66].mxu1  ;;  %v21550_v47 = vld [vmem:[%s27056_s3 + $0x590] sm:$0xff]   ;;  %v21551_v11 = vld [vmem:[%s27056_s3 + $0x5d8] sm:$0xff]   ;;  %v10041_v62 = vor.u32 %v27124_v4, %v24042_v10 }
 0x338   : > { %11060 = vmatprep.mubr.bf16.mxu0 %v10918_v28  ;;  %19094 = vmatpush3.bf16.msra.mxu1 %v21545_v9  ;;  %v18629_v8 = vpop.f32.mrb[67].mxu1  ;;  %v24642_v26 = vor.u32 %v13663_v3, %v13662_v46  ;;  %v27308_v10 = vld [vmem:[#allocation33_spill] sm:$0xff]  ;;  %v24665_v33 = vrot.slane %v24352_v22, 5 }
 0x339   : > { %v13600_v55 = vor.u32 %v13599_v18, %v13595_v20  ;;  %19095 = vmatprep.subr.bf16.mxu1 %v21548_v57  ;;  %v24640_v9 = vor.u32 %v13659_v51, %v13658_v17  ;;  %v21556_v20 = vld [vmem:[%s27056_s3 + $0x100] sm:$0xff]   ;;  %v21552_v17 = vld [vmem:[%s27056_s3 + $0x598] sm:$0xff]   ;;  %v21558_v51 = vld [vmem:[%s27056_s3 + $0x148] sm:$0xff]   ;;  %v10129_v14 = vshrl.u32 %v10041_v62, 16  ;;  %v10132_v3 = vshll.u32 %v10041_v62, 16 }
 0x33a   : > { %27305 = vst [vmem:[#allocation15_spill] sm:$0xff] %v24642_v26  ;;  %v24652_v23 = vsel %vm13642_vm12, %v13648_v37, %v24642_v26  ;;  %v24661_v46 = vld [vmem:[#allocation3 + $0x18] sm:$0xe0]  ;;  %v27309_v37 = vrot.slane %v24603_v60, 5  ;;  %v24693_v56 = vsel %vm8029_vm6, %v27311_v40, %v24665_v33  ;;  %v27313_v60 = vld [vmem:[#allocation36_spill] sm:$0xff] }
 0x33b   : > { %27304 = vst [vmem:[#allocation30_spill] sm:$0xff] %v24640_v9  ;;  %v13601_v15 = vsel %vm7518_vm1, %v13600_v55, %v24535_v45  ;;  %10284 = vmatmul.mubr.bf16.gmra.mrb[172].mxu1 %v27306_v21  ;;  %27307 = vst [vmem:[#allocation32_spill] sm:$0xff] %v24652_v23  ;;  %v27310_v23 = vld [vmem:[#allocation29_spill] sm:$0xff]  ;;  %v27324_v45 = vrot.slane %v24661_v46, 5 }
 0x33c   : > { %v13651_v57 = vshrl.u32 %v13601_v15, 16  ;;  %v13654_v18 = vshll.u32 %v13601_v15, 16  ;;  %10291 = vmatprep.mubr.bf16.mxu1 %v27308_v10  ;;  %19096 = vmatpush3.bf16.msra.mxu1 %v21550_v47  ;;  %v24669_v55 = vrot.slane %v27309_v37, 6  ;;  %v21553_v47 = vld [vmem:[%s27056_s3 + $0x5e0] sm:$0xff]  }
 0x33d   : > { %19097 = vmatprep.subr.bf16.mxu1 %v21551_v11  ;;  %v18647_v21 = vpop.f32.mrb[68].mxu1  ;;  %v21554_v10 = vld [vmem:[%s27056_s3 + $0x5a0] sm:$0xff]   ;;  %v21560_v11 = vld [vmem:[%s27056_s3 + $0x108] sm:$0xff]   ;;  %v10673_v31 = vsel %vm8029_vm6, %v27324_v45, %v24328_v13  ;;  %v24848_v45 = vrot.slane %v24344_v19, 5 }
 0x33e   : > { %v13653_v8 = vrot.slane %v13651_v57, 2  ;;  %v13656_v15 = vrot.slane %v13654_v18, 3  ;;  %v18648_v4 = vpop.f32.mrb[69].mxu1  ;;  %v24681_v37 = vld [vmem:[#allocation3 + $0x20] sm:$0xc0] }
 0x33f   : > { %11061 = vmatmul.mubr.bf16.vlgmr.msra.gmra.mrb[144].mxu0 %v10918_v28  ;;  %v18649_v57 = vadd.f32 %v18648_v4, %v18647_v21  ;;  %v18650_v18 = vpop.f32.mrb[70].mxu1  ;;  %v21557_v28 = vld [vmem:[%s27056_s3 + $0x5e8] sm:$0xff]  }
 0x340   : > { %11068 = vmatprep.mubr.bf16.mxu0 %v27310_v23  ;;  %19264 = vmatpush3.bf16.msra.mxu0 %v21556_v20  ;;  %v13657_v39 = vor.u32 %v13656_v15, %v13653_v8  ;;  %v18651_v62 = vpop.f32.mrb[71].mxu1  ;;  %v21561_v20 = vld [vmem:[%s27056_s3 + $0x150] sm:$0xff]   ;;  %v10131_v8 = vrot.slane %v10129_v14, 6  ;;  %v24705_v21 = vld [vmem:[#allocation3 + $0x28] sm:$0xff] }
 0x341   : > { %19098 = vmatpush3.bf16.msra.mxu1 %v21552_v17  ;;  %19265 = vmatprep.subr.bf16.mxu0 %v21558_v51  ;;  %v24700_v17 = vadd.f32 %v18649_v57, %v23948_v48  ;;  %v18652_v51 = vadd.f32 %v18651_v62, %v18650_v18  ;;  %v21563_v15 = vld [vmem:[%s27056_s3 + $0x110] sm:$0xff]   ;;  %v21559_v48 = vld [vmem:[%s27056_s3 + $0x5a8] sm:$0xff]   ;;  %v21566_v62 = vld [vmem:[%s27056_s3 + $0x118] sm:$0xff]  }
 0x342   : > { %19099 = vmatprep.subr.bf16.mxu1 %v21553_v47  ;;  %v24697_v4 = vsel %vm13642_vm12, %v13657_v39, %v24640_v9  ;;  %v10134_v47 = vrot.slane %v10132_v3, 7  ;;  %v21565_v39 = vld [vmem:[%s27056_s3 + $0x158] sm:$0xff]   ;;  %v24719_v14 = vld [vmem:[#allocation3 + $0x28] sm:$0xff]  ;;  %v21564_v18 = vld [vmem:[%s27056_s3 + $0x5b0] sm:$0xff]   ;;  %v27315_v3 = vshrl.u32 %v24009_v24, 16 }
 0x343   : > { %27312 = vst [vmem:[#allocation33_spill] sm:$0xff] %v24697_v4  ;;  %10292 = vmatmul.mubr.bf16.gmra.mrb[176].mxu1 %v27313_v60  ;;  %v24709_v40 = vadd.f32 %v18652_v51, %v23963_v52  ;;  %v21567_v60 = vld [vmem:[%s27056_s3 + $0x5f8] sm:$0xff]   ;;  %v21577_v9 = vld [vmem:[%s27056_s3 + $0x88] sm:$0xff]  }
 0x344   : > { %19266 = vmatpush3.bf16.msra.mxu0 %v21560_v11  ;;  %10299 = vmatprep.mubr.bf16.mxu1 %v24103_v32  ;;  %v21562_v32 = vld [vmem:[%s27056_s3 + $0x5f0] sm:$0xff]   ;;  %v10124_v4 = vrot.slane %v27315_v3, 6 }
 0x345   : > { %19100 = vmatpush3.bf16.msra.mxu1 %v21554_v10  ;;  %19267 = vmatprep.subr.bf16.mxu0 %v21561_v20  ;;  %v18653_v57 = vpop.f32.mrb[72].mxu1  ;;  %v10135_v20 = vor.u32 %v10134_v47, %v10131_v8 }
 0x346   : > { %19101 = vmatprep.subr.bf16.mxu1 %v21557_v28  ;;  %v18654_v51 = vpop.f32.mrb[73].mxu1  ;;  %v27314_v28 = vld [vmem:[#allocation34_spill] sm:$0xff] }
 0x347   : > { %11069 = vmatmul.mubr.bf16.gmra.mrb[148].mxu0 %v27310_v23  ;;  %v18655_v52 = vadd.f32 %v18654_v51, %v18653_v57  ;;  %v18656_v10 = vpop.f32.mrb[74].mxu1  ;;  %v21569_v23 = vld [vmem:[%s27056_s3 + $0x160] sm:$0xff]   ;;  %v27316_v57 = vshll.u32 %v24009_v24, 16  ;;  %v10136_v3 = vsel %vm10075_vm4, %v24093_v2, %v10135_v20  ;;  %v21568_v24 = vld [vmem:[%s27056_s3 + $0x5b8] sm:$0xff]   ;;  %v27322_v2 = vld [vmem:[#allocation35_spill] sm:$0xff]  ;;  %27326 = vst [vmem:[#allocation34_spill] sm:$0xff] %v24848_v45 }
 0x348   : > { %11076 = vmatprep.mubr.bf16.mxu0 %v27314_v28  ;;  %19268 = vmatpush3.bf16.msra.mxu0 %v21563_v15  ;;  %v18657_v11 = vpop.f32.mrb[75].mxu1  ;;  %v21826_v15 = vld [vmem:[#allocation3 + $0x38] sm:$0xff] }
 0x349   : > { %19102 = vmatpush3.bf16.msra.mxu1 %v21559_v48  ;;  %19269 = vmatprep.subr.bf16.mxu0 %v21565_v39  ;;  %v24744_v8 = vadd.f32 %v18655_v52, %v24424_v42  ;;  %v18658_v47 = vadd.f32 %v18657_v11, %v18656_v10  ;;  %v10923_v59 = vrot.slane %v21826_v15, 6  ;;  %v10125_v51 = vrot.slane %v27316_v57, 7  ;;  %v21570_v48 = vld [vmem:[%s27056_s3 + $0x120] sm:$0xff]   ;;  %v21573_v11 = vld [vmem:[%s27056_s3 + $0x168] sm:$0xff]  }
 0x34a   : > { %19103 = vmatprep.subr.bf16.mxu1 %v21562_v32  ;;  %v24751_v39 = vld [vmem:[#allocation3 + $0x20] sm:$0xe0]  ;;  %v27318_v32 = vld [vmem:[#allocation40_spill] sm:$0xff] }
 0x34b   : > { %10300 = vmatmul.mubr.bf16.gmra.mrb[180].mxu1 %v27317_v50  ;;  %v24757_v42 = vadd.f32 %v18658_v47, %v24443_v12  ;;  %v11156_v50 = vshll.u32 %v24705_v21, 16  ;;  %v21571_v12 = vld [vmem:[%s27056_s3 + $0xc0] sm:$0xff]   ;;  %v24772_v10 = vrot.slane %v27318_v32, 1  ;;  %v10126_v15 = vor.u32 %v10125_v51, %v10124_v4 }
 0x34c   : > { %19270 = vmatpush3.bf16.msra.mxu0 %v21566_v62  ;;  %10307 = vmatprep.mubr.bf16.mxu1 %v10136_v3  ;;  %v27320_v62 = vld [vmem:[#allocation18_spill] sm:$0xff]  ;;  %v11224_v57 = vshll.u32 %v24751_v39, 16 }
 0x34d   : > { %19104 = vmatpush3.bf16.msra.mxu1 %v21564_v18  ;;  %19271 = vmatprep.subr.bf16.mxu0 %v21569_v23  ;;  %27319 = vst [vmem:[#allocation29_spill] sm:$0xff] %v24772_v10  ;;  %v18659_v18 = vpop.f32.mrb[76].mxu1  ;;  %v27321_v20 = vrot.slane %v27320_v62, 6  ;;  %v10127_v44 = vsel %vm10075_vm4, %v27322_v2, %v10126_v15  ;;  %v21579_v2 = vld [vmem:[%s27056_s3 + $0x178] sm:$0xff]   ;;  %v24805_v15 = vrot.slane %v11156_v50, 1 }
 0x34e   : > { %19105 = vmatprep.subr.bf16.mxu1 %v21567_v60  ;;  %v18660_v3 = vpop.f32.mrb[77].mxu1  ;;  %v21574_v60 = vld [vmem:[%s27056_s3 + $0x128] sm:$0xff]  }
 0x34f   : > { %11077 = vmatmul.mubr.bf16.gmra.mrb[152].mxu0 %v27314_v28  ;;  %v10924_v47 = vsel %vm8966_vm5, %v27321_v20, %v10923_v59  ;;  %v18661_v23 = vadd.f32 %v18660_v3, %v18659_v18  ;;  %v18662_v52 = vpop.f32.mrb[78].mxu1  ;;  %v21576_v28 = vld [vmem:[%s27056_s3 + $0x170] sm:$0xff]  }
 0x350   : > { %11084 = vmatprep.mubr.bf16.mxu0 %v10924_v47  ;;  %19272 = vmatpush3.bf16.msra.mxu0 %v21570_v48  ;;  %v18663_v62 = vpop.f32.mrb[79].mxu1  ;;  %v20387_v20 = vpop.f32.mrb[48].mxu0 }
 0x351   : > { %19106 = vmatpush3.bf16.msra.mxu1 %v21568_v24  ;;  %19273 = vmatprep.subr.bf16.mxu0 %v21573_v11  ;;  %v24786_v4 = vadd.f32 %v18661_v23, %v24526_v5  ;;  %v18664_v51 = vadd.f32 %v18663_v62, %v18662_v52  ;;  %v6999_v48 = vpop.f32.mrb[49].mxu0  ;;  %v10925_v24 = vrot.slane %v24790_v61, 6  ;;  %v24793_v11 = vld [vmem:[#allocation3 + $0x28] sm:$0xe0] }
 0x352   : > { %19183 = vmatprep.subr.bf16.mxu1 %v21571_v12  ;;  %v20388_v18 = vpop.f32.mrb[50].mxu0  ;;  %v21578_v12 = vld [vmem:[%s27056_s3 + $0x130] sm:$0xff]  }
 0x353   : > { %10308 = vmatmul.mubr.bf16.gmra.mrb[184].mxu1 %v10127_v44  ;;  %v24799_v5 = vadd.f32 %v18664_v51, %v24537_v54  ;;  %v27323_v52 = vld [vmem:[#allocation39_spill] sm:$0xff]  ;;  %v7002_v3 = vpop.f32.mrb[51].mxu0  ;;  %v10926_v54 = vsel %vm8966_vm5, %v10923_v59, %v10925_v24  ;;  %v24814_v51 = vrot.slane %v11224_v57, 1  ;;  %v24826_v59 = vld [vmem:[%s27055_s2] ss:$0 sm:$0xff] }
 0x354   : > { %19274 = vmatpush3.bf16.msra.mxu0 %v21574_v60  ;;  %10831 = vmatprep.mubr.bf16.mxu1 %v27323_v52  ;;  %v21575_v60 = vld [vmem:[%s27056_s3 + $0xc8] sm:$0xff]   ;;  %v7080_v57 = vadd.f32 %v24826_v59, %v20387_v20  ;;  %v21583_v44 = vld [vmem:[%s27056_s3 + $0x240] sm:$0xff]   ;;  %v7081_v23 = vadd.f32 %v24826_v59, %v20388_v18  ;;  %v7079_v20 = vadd.f32 %v24826_v59, %v7002_v3 }
 0x355   : > { %19275 = vmatprep.subr.bf16.mxu0 %v21576_v28  ;;  %v18665_v62 = vpop.f32.mrb[80].mxu1  ;;  %v21572_v28 = vld [vmem:[%s27056_s3 + $0x80] sm:$0xff]  }
 0x356   : > { %v18666_v50 = vpop.f32.mrb[81].mxu1 }
 0x357   : > { %11085 = vmatmul.mubr.bf16.gmra.mrb[156].mxu0 %v10924_v47  ;;  %v21581_v47 = vld [vmem:[%s27056_s3 + $0x138] sm:$0xff]   ;;  %v18667_v24 = vadd.f32 %v18666_v50, %v18665_v62  ;;  %v18668_v52 = vpop.f32.mrb[82].mxu1 }
 0x358   : > { %11092 = vmatprep.mubr.bf16.mxu0 %v10926_v54  ;;  %19276 = vmatpush3.bf16.msra.mxu0 %v21578_v12  ;;  %v7078_v12 = vadd.f32 %v24826_v59, %v6999_v48  ;;  %v18669_v43 = vpop.f32.mrb[83].mxu1  ;;  %v20391_v38 = vpop.f32.mrb[52].mxu0 }
 0x359   : > { %19277 = vmatprep.subr.bf16.mxu0 %v21579_v2  ;;  %v24840_v62 = vadd.f32 %v18667_v24, %v24576_v30  ;;  %v18670_v2 = vadd.f32 %v18669_v43, %v18668_v52  ;;  %v7084_v50 = vadd.f32 %v24826_v59, %v20391_v38  ;;  %v7015_v26 = vpop.f32.mrb[53].mxu0  ;;  %v7096_v30 = vmax.f32 %v7080_v57, 0.0  ;;  %v21580_v52 = vld [vmem:[%s27056_s3 + $0xd0] sm:$0xff]  }
 0x35a   : > { %v7082_v48 = vadd.f32 %v24826_v59, %v7015_v26  ;;  %v20392_v18 = vpop.f32.mrb[54].mxu0  ;;  %v27329_v57 = vrot.slane %v24693_v56, 6 }
 0x35b   : > { %27325 = vst [vmem:[#allocation36_spill] sm:$0xff] %v24840_v62  ;;  %10832 = vmatmul.mubr.bf16.vlgmr.msra.gmra.mrb[188].mxu1 %v10673_v31  ;;  %v24852_v43 = vadd.f32 %v18670_v2, %v24586_v7  ;;  %v7100_v38 = vmax.f32 %v7084_v50, 0.0  ;;  %v7085_v26 = vadd.f32 %v24826_v59, %v20392_v18  ;;  %v27328_v31 = vld [vmem:[#allocation38_spill] sm:$0xff]  ;;  %v7018_v3 = vpop.f32.mrb[55].mxu0  ;;  %v7095_v2 = vmax.f32 %v7079_v20, 0.0 }
 0x35c   : > { %19278 = vmatpush3.bf16.msra.mxu0 %v21581_v47  ;;  %19184 = vmatpush3.bf16.msra.mxu1 %v21572_v28  ;;  %v7094_v47 = vmax.f32 %v7078_v12, 0.0  ;;  %v7098_v24 = vmax.f32 %v7082_v48, 0.0  ;;  %v7083_v19 = vadd.f32 %v24826_v59, %v7018_v3  ;;  %v11709_v7 = vsel %vm8966_vm5, %v24669_v55, %v27329_v57  ;;  %v21582_v12 = vld [vmem:[%s27056_s3 + $0x90] sm:$0xff]  }
 0x35d   : > { %27327 = vst [vmem:[#allocation37_spill] sm:$0xff] %v24852_v43  ;;  %10839 = vmatprep.mubr.bf16.mxu1 %v27328_v31  ;;  %19185 = vmatprep.subr.bf16.mxu1 %v21575_v60  ;;  %v7097_v28 = vmax.f32 %v7081_v23, 0.0  ;;  %v7466_v50 = vmax.f32 %v7096_v30, %v7100_v38  ;;  %v7101_v18 = vmax.f32 %v7085_v26, 0.0  ;;  %v18671_v31 = vpop.f32.mrb[84].mxu1  ;;  %v24870_v60 = vsel %vm8029_vm6, %v24665_v33, %v24848_v45 }
 0x35e   : > { %19343 = vmatprep.subr.bf16.mxu0 %v21583_v44  ;;  %v7464_v48 = vmax.f32 %v7094_v47, %v7098_v24  ;;  %v7099_v46 = vmax.f32 %v7083_v19, 0.0  ;;  %v18672_v3 = vpop.f32.mrb[85].mxu1  ;;  %v27330_v19 = vrot.slane %v24719_v14, 5  ;;  %v27331_v47 = vshrl.u32 %v24705_v21, 16 }
 0x35f   : > { %11093 = vmatmul.mubr.bf16.gmra.mrb[160].mxu0 %v10926_v54  ;;  %v7467_v55 = vmax.f32 %v7097_v28, %v7101_v18  ;;  %v18673_v44 = vadd.f32 %v18672_v3, %v18671_v31  ;;  %v18674_v23 = vpop.f32.mrb[86].mxu1  ;;  %v21585_v54 = vld [vmem:[%s27056_s3 + $0xd8] sm:$0xff]   ;;  %7470 = vst [vmem:[#allocation6 + $0x10] sm:$0xff] %v7466_v50  ;;  %v10630_v28 = vshrl.u32 %v24790_v61, 16  ;;  %v21587_v61 = vld [vmem:[%s27056_s3 + $0x248] sm:$0xff]   ;;  %v21589_v18 = vld [vmem:[%s27056_s3 + $0xe0] sm:$0xff]  }
 0x360   : > { %11858 = vmatprep.mubr.bf16.mxu0 %v11709_v7  ;;  %19186 = vmatpush3.bf16.msra.mxu1 %v21577_v9  ;;  %v7465_v20 = vmax.f32 %v7095_v2, %v7099_v46  ;;  %v18675_v30 = vpop.f32.mrb[87].mxu1  ;;  %v20395_v38 = vpop.f32.mrb[56].mxu0  ;;  %v10678_v26 = vsel %vm8029_vm6, %v24328_v13, %v27330_v19  ;;  %v11162_v24 = vor.u32 %v27331_v47, %v24805_v15  ;;  %v27137_v7 = vrot.slane %v24870_v60, 6  ;;  %v24888_v2 = vld [vmem:[#allocation3 + $0x28] sm:$0xf0]  ;;  %v21586_v50 = vld [vmem:[%s27056_s3 + $0x98] sm:$0xff]  }
 0x361   : > { %19187 = vmatprep.subr.bf16.mxu1 %v21580_v52  ;;  %7468 = vst [vmem:[#allocation6] sm:$0xff] %v7464_v48  ;;  %v24883_v9 = vadd.f32 %v18673_v44, %v24623_v41  ;;  %v7031_v57 = vpop.f32.mrb[57].mxu0  ;;  %v27136_v46 = vrot.slane %v24432_v25, 5  ;;  %7471 = vst [vmem:[#allocation6 + $0x18] sm:$0xff] %v7467_v55  ;;  %v21584_v52 = vld [vmem:[%s27056_s3 + $0x200] sm:$0xff]   ;;  %v24904_v31 = vor.u32 %v10630_v28, %v24173_v6  ;;  %v27333_v48 = vshll.u32 %v24793_v11, 16 }
 0x362   : > { %v20396_v13 = vpop.f32.mrb[58].mxu0  ;;  %7469 = vst [vmem:[#allocation6 + $0x8] sm:$0xff] %v7465_v20  ;;  %v27334_v55 = vrot.slane %v24705_v21, 6  ;;  %v27335_v44 = vrot.slane %v24681_v37, 6  ;;  %v27336_v6 = vmov %v27330_v19  ;;  %v27337_v30 = vrot.slane %v24352_v22, 6 }
 0x363   : > { %27332 = vst [vmem:[#allocation40_spill] sm:$0xff] %v24883_v9  ;;  %10840 = vmatmul.mubr.bf16.gmra.mrb[192].mxu1 %v10678_v26  ;;  %v7034_v41 = vpop.f32.mrb[59].mxu0  ;;  %v12225_v3 = vrot.slane %v27333_v48, 1  ;;  %v10682_v20 = vsel %vm8029_vm6, %v27336_v6, %v24192_v35  ;;  %v24929_v47 = vld [vmem:[#allocation3 + $0x48] sm:$0x7]  ;;  %v27340_v14 = vrot.slane %v24693_v56, 6 }
 0x364   : > { %10847 = vmatprep.mubr.bf16.mxu1 %v24208_v63  ;;  %19188 = vmatpush3.bf16.msra.mxu1 %v21582_v12  ;;  %v24908_v63 = vsel %vm7518_vm1, %v11162_v24, %v24772_v10  ;;  %v11919_v12 = vrot.slane %v24452_v36, 1  ;;  %v11706_v23 = vsel %vm8966_vm5, %v27335_v44, %v27334_v55  ;;  %v27338_v19 = vmov %v27334_v55  ;;  %v27339_v24 = vld [vmem:[#allocation41_spill] sm:$0xff]  ;;  %v21588_v56 = vld [vmem:[%s27056_s3 + $0x208] sm:$0xff]  }
 0x365   : > { %19189 = vmatprep.subr.bf16.mxu1 %v21585_v54  ;;  %v24927_v26 = vsel %vm8966_vm5, %v27338_v19, %v27337_v30  ;;  %v11170_v37 = vor.u32 %v27339_v24, %v24772_v10  ;;  %v18693_v28 = vpop.f32.mrb[88].mxu1  ;;  %v11713_v35 = vsel %vm8966_vm5, %v27340_v14, %v27137_v7  ;;  %v24942_v54 = vsel %vm8029_vm6, %v24848_v45, %v27136_v46  ;;  %v21590_v55 = vld [vmem:[%s27056_s3 + $0xa0] sm:$0xff]  }
 0x366   : > { %v7088_v44 = vadd.f32 %v24826_v59, %v20395_v38  ;;  %v18694_v6 = vpop.f32.mrb[89].mxu1  ;;  %v21591_v38 = vld [vmem:[%s27056_s3 + $0x250] sm:$0xff]   ;;  %v7089_v45 = vadd.f32 %v24826_v59, %v20396_v13  ;;  %v7087_v62 = vadd.f32 %v24826_v59, %v7034_v41 }
 0x367   : > { %11859 = vmatmul.mubr.bf16.vlgmr.msra.gmra.mrb[164].mxu0 %v11706_v23  ;;  %v18695_v19 = vadd.f32 %v18694_v6, %v18693_v28  ;;  %v18696_v14 = vpop.f32.mrb[90].mxu1  ;;  %v11668_v23 = vrot.slane %v24929_v47, 5  ;;  %v27341_v28 = vshrl.u32 %v24751_v39, 16  ;;  %v24973_v46 = vsel %vm7518_vm1, %v11170_v37, %v11919_v12  ;;  %v21592_v13 = vld [vmem:[%s27056_s3 + $0x210] sm:$0xff]  }
 0x368   : > { %11866 = vmatprep.mubr.bf16.mxu0 %v11713_v35  ;;  %19344 = vmatpush3.bf16.msra.mxu0 %v21584_v52  ;;  %v21593_v52 = vld [vmem:[%s27056_s3 + $0xe8] sm:$0xff]   ;;  %v18697_v6 = vpop.f32.mrb[91].mxu1  ;;  %v20399_v30 = vpop.f32.mrb[60].mxu0  ;;  %v27342_v35 = vshrl.u32 %v24793_v11, 16  ;;  %v7104_v43 = vmax.f32 %v7088_v44, 0.0 }
 0x369   : > { %19190 = vmatpush3.bf16.msra.mxu1 %v21586_v50  ;;  %19345 = vmatprep.subr.bf16.mxu0 %v21587_v61  ;;  %v24966_v50 = vor.u32 %v24814_v51, %v27341_v28  ;;  %v7086_v61 = vadd.f32 %v24826_v59, %v7031_v57  ;;  %v7473_v7 = vld [vmem:[#allocation6 + $0x10] ss:$2 sm:$0x3f]  ;;  %v24979_v51 = vadd.f32 %v18695_v19, %v24700_v17  ;;  %v7472_v9 = vld [vmem:[#allocation6] ss:$2 sm:$0xff] }
 0x36a   : > { %19191 = vmatprep.subr.bf16.mxu1 %v21589_v18  ;;  %v12226_v47 = vor.u32 %v12225_v3, %v27342_v35  ;;  %v18698_v57 = vadd.f32 %v18697_v6, %v18696_v14  ;;  %v7092_v28 = vadd.f32 %v24826_v59, %v20399_v30  ;;  %v7047_v18 = vpop.f32.mrb[61].mxu0  ;;  %v7474_v48 = vld [vmem:[#allocation6 + $0x1] ss:$2 sm:$0xff]  ;;  %v7475_v17 = vld [vmem:[#allocation6 + $0x11] ss:$2 sm:$0x3f] }
 0x36b   : > { %v7090_v37 = vadd.f32 %v24826_v59, %v7047_v18  ;;  %10848 = vmatmul.mubr.bf16.gmra.mrb[196].mxu1 %v10682_v20  ;;  %v20400_v11 = vpop.f32.mrb[62].mxu0  ;;  %v7476_v3 = vmax.f32 %v7472_v9, %v7474_v48  ;;  %v21594_v20 = vld [vmem:[%s27056_s3 + $0x258] sm:$0xff]   ;;  %v21595_v44 = vld [vmem:[%s27056_s3 + $0xa8] sm:$0xff]   ;;  %v7102_v9 = vmax.f32 %v7086_v61, 0.0  ;;  %v27343_v35 = vrot.slane %v24942_v54, 6  ;;  %v21598_v6 = vld [vmem:[%s27056_s3 + $0xf0] sm:$0xff]  }
 0x36c   : > { %19346 = vmatpush3.bf16.msra.mxu0 %v21588_v56  ;;  %v24988_v19 = vadd.f32 %v18698_v57, %v24709_v40  ;;  %v7108_v30 = vmax.f32 %v7092_v28, 0.0  ;;  %v7093_v14 = vadd.f32 %v24826_v59, %v20400_v11  ;;  %10855 = vmatprep.mubr.bf16.mxu1 %v24234_v0  ;;  %v7050_v41 = vpop.f32.mrb[63].mxu0  ;;  %v7477_v56 = vmax.f32 %v7473_v7, %v7475_v17 }
 0x36d   : > { %19192 = vmatpush3.bf16.msra.mxu1 %v21590_v55  ;;  %v7106_v48 = vmax.f32 %v7090_v37, 0.0  ;;  %v7091_v40 = vadd.f32 %v24826_v59, %v7050_v41  ;;  %19347 = vmatprep.subr.bf16.mxu0 %v21591_v38  ;;  %v27344_v0 = vrot.slane %v24870_v60, 6  ;;  %v7105_v57 = vmax.f32 %v7089_v45, 0.0  ;;  %v18699_v7 = vpop.f32.mrb[92].mxu1 }
 0x36e   : > { %19193 = vmatprep.subr.bf16.mxu1 %v21593_v52  ;;  %v7494_v28 = vmax.f32 %v7104_v43, %v7108_v30  ;;  %v7109_v18 = vmax.f32 %v7093_v14, 0.0  ;;  %v7478_v61 = vpack.c.bf16 %v7477_v56, %v7476_v3  ;;  %v7103_v59 = vmax.f32 %v7087_v62, 0.0  ;;  %v18700_v11 = vpop.f32.mrb[93].mxu1  ;;  %v21596_v52 = vld [vmem:[%s27056_s3 + $0x218] sm:$0xff]   ;;  %v21597_v62 = vld [vmem:[%s27056_s3 + $0x260] sm:$0xff]  }
 0x36f   : > { %v11717_v55 = vsel %vm8966_vm5, %v27344_v0, %v27343_v35  ;;  %11867 = vmatmul.mubr.bf16.gmra.mrb[168].mxu0 %v24927_v26  ;;  %v7492_v38 = vmax.f32 %v7102_v9, %v7106_v48  ;;  %v7107_v37 = vmax.f32 %v7091_v40, 0.0  ;;  %v27345_v17 = vrot.slane %v24432_v25, 5  ;;  %v18702_v14 = vpop.f32.mrb[94].mxu1  ;;  %v25021_v9 = vld [vmem:[#allocation3 + $0x38] sm:$0xff] }
 0x370   : > { %11874 = vmatprep.mubr.bf16.mxu0 %v11717_v55  ;;  %19348 = vmatpush3.bf16.msra.mxu0 %v21592_v13  ;;  %v7495_v43 = vmax.f32 %v7105_v57, %v7109_v18  ;;  %v18701_v30 = vadd.f32 %v18700_v11, %v18699_v7  ;;  %v25019_v26 = vsel %vm7518_vm1, %v12226_v47, %v24772_v10  ;;  %v7480_v13 = vrot.slane %v7478_v61, 4  ;;  %v18703_v41 = vpop.f32.mrb[95].mxu1  ;;  %v18785_v56 = vpop.f32.mrb[64].mxu0  ;;  %v21603_v55 = vld [vmem:[%s27056_s3 + $0xf8] sm:$0xff]   ;;  %v21599_v61 = vld [vmem:[%s27056_s3 + $0x220] sm:$0xff]  }
 0x371   : > { %v11669_v45 = vsel %vm8029_vm6, %v27345_v17, %v11668_v23  ;;  %19349 = vmatprep.subr.bf16.mxu0 %v21594_v20  ;;  %19194 = vmatpush3.bf16.msra.mxu1 %v21595_v44  ;;  %7498 = vst [vmem:[#allocation6 + $0x10] sm:$0xff] %v7494_v28  ;;  %v7493_v3 = vmax.f32 %v7103_v59, %v7107_v37  ;;  %v11714_v23 = vrot.slane %v25021_v9, 6  ;;  %v21600_v20 = vld [vmem:[%s27056_s3 + $0xb0] sm:$0xff]   ;;  %v27140_v44 = vshrl.u32 %v24973_v46, 16  ;;  %v18786_v35 = vpop.f32.mrb[65].mxu0  ;;  %v21601_v37 = vld [vmem:[%s27056_s3 + $0x268] sm:$0xff]  }
 0x372   : > { %19195 = vmatprep.subr.bf16.mxu1 %v21598_v6  ;;  %v27139_v48 = vshll.u32 %v24973_v46, 16  ;;  %7496 = vst [vmem:[#allocation6] sm:$0xff] %v7492_v38  ;;  %v25030_v47 = vadd.f32 %v18701_v30, %v24744_v8  ;;  %v18704_v40 = vadd.f32 %v18703_v41, %v18702_v14  ;;  %v11720_v0 = vrot.slane %v11669_v45, 6  ;;  %7482 = vst [vmem:[#allocation3 + $0x58] ss:$-4 sps:$4 sm:$0xf7] %v7480_v13  }
 0x373   : > { %v25036_v6 = vrot.slane %v24458_v27, 1  ;;  %7499 = vst [vmem:[#allocation6 + $0x18] sm:$0xff] %v7495_v43  ;;  %v25038_v57 = vadd.f32 %v18786_v35, %v18785_v56  ;;  %10856 = vmatmul.mubr.bf16.gmra.mrb[200].mxu1 %v24220_v16  ;;  %v18788_v28 = vpop.f32.mrb[66].mxu0  ;;  %v27346_v8 = vrot.slane %v24904_v31, 5  ;;  %v27347_v18 = vrot.slane %v24197_v49, 5  ;;  %7497 = vst [vmem:[#allocation6 + $0x8] sm:$0xff] %v7493_v3 }
 0x374   : > { %19350 = vmatpush3.bf16.msra.mxu0 %v21596_v52  ;;  %v25052_v59 = vsel %vm7518_vm1, %v24966_v50, %v24805_v15  ;;  %v12273_v38 = vrot.slane %v27318_v32, 5  ;;  %v25055_v16 = vld [vmem:[#allocation3 + $0x20] sm:$0xf0]  ;;  %v25058_v31 = vadd.f32 %v18704_v40, %v24757_v42  ;;  %v18789_v49 = vpop.f32.mrb[67].mxu0  ;;  %v12277_v11 = vshrl.u32 %v25019_v26, 16  ;;  %v21604_v43 = vld [vmem:[%s27056_s3 + $0xb8] sm:$0xff]  }
 0x375   : > { %v10692_v7 = vsel %vm8029_vm6, %v27347_v18, %v27346_v8  ;;  %19351 = vmatprep.subr.bf16.mxu0 %v21597_v62  ;;  %v12280_v50 = vshll.u32 %v25019_v26, 16  ;;  %v25068_v32 = vor.u32 %v24441_v29, %v11919_v12  ;;  %v25070_v52 = vld [vmem:[#allocation3 + $0x48] sm:$0x1f]  ;;  %v25072_v42 = vadd.f32 %v18789_v49, %v18788_v28  ;;  %19196 = vmatpush3.bf16.msra.mxu1 %v21600_v20  ;;  %v25082_v30 = vld [vmem:[#allocation3 + $0x40] sm:$0x3f]  ;;  %v18705_v62 = vpop.f32.mrb[96].mxu1 }
 0x376   : > { %10863 = vmatprep.mubr.bf16.mxu1 %v10692_v7  ;;  %v27348_v17 = vrot.slane %v24352_v22, 6  ;;  %v12284_v12 = vrot.slane %v27140_v44, 4  ;;  %v12285_v14 = vrot.slane %v27139_v48, 5  ;;  %v27349_v26 = vrot.slane %v24942_v54, 6  ;;  %19197 = vmatprep.subr.bf16.mxu1 %v21603_v55  ;;  %v21607_v3 = vld [vmem:[%s27056_s3 + $0x40] sm:$0xff]   ;;  %v18706_v54 = vpop.f32.mrb[97].mxu1 }
 0x377   : > { %v27350_v41 = vshrl.u32 %v24888_v2, 16  ;;  %v27351_v20 = vshll.u32 %v24888_v2, 16  ;;  %v25105_v35 = vsel %vm7518_vm1, %v25068_v32, %v25036_v6  ;;  %v21602_v55 = vld [vmem:[%s27056_s3 + $0x228] sm:$0xff]   ;;  %v27353_v28 = vrot.slane %v27339_v24, 4 }
 0x378   : > { %v11715_v45 = vsel %vm8966_vm5, %v27348_v17, %v11714_v23  ;;  %v11721_v13 = vsel %vm8966_vm5, %v27349_v26, %v11720_v0  ;;  %27352 = vst [vmem:[#allocation18_spill] sm:$0xff] %v25105_v35  ;;  %19352 = vmatpush3.bf16.msra.mxu0 %v21599_v61  ;;  %v11277_v0 = vrot.slane %v25052_v59, 5  ;;  %v27143_v18 = vshll.u32 %v25070_v52, 16  ;;  %v18708_v17 = vpop.f32.mrb[98].mxu1  ;;  %v21605_v61 = vld [vmem:[%s27056_s3 + $0x270] sm:$0xff]  }
 0x379   : > { %11875 = vmatmul.mubr.bf16.gmra.mrb[172].mxu0 %v11715_v45  ;;  %v25096_v56 = vrot.slane %v27350_v41, 4  ;;  %v25100_v40 = vrot.slane %v27351_v20, 5  ;;  %v25113_v8 = vor.u32 %v12273_v38, %v27353_v28  ;;  %v11151_v7 = vshll.u32 %v25055_v16, 16  ;;  %19353 = vmatprep.subr.bf16.mxu0 %v21601_v37  ;;  %v18791_v41 = vpop.f32.mrb[68].mxu0 }
 0x37a   : > { %11882 = vmatprep.mubr.bf16.mxu0 %v11721_v13  ;;  %v18707_v49 = vadd.f32 %v18706_v54, %v18705_v62  ;;  %v11230_v45 = vshll.u32 %v25082_v30, 16  ;;  %v12279_v59 = vrot.slane %v12277_v11, 4  ;;  %v12282_v26 = vrot.slane %v12280_v50, 5  ;;  %v18709_v13 = vpop.f32.mrb[99].mxu1  ;;  %19198 = vmatpush3.bf16.msra.mxu1 %v21604_v43  ;;  %v25129_v62 = vld [vmem:[#allocation3 + $0x50] sm:$0xff]  ;;  %v18792_v50 = vpop.f32.mrb[69].mxu0 }
 0x37b   : > { %v11718_v24 = vrot.slane %v25082_v30, 6  ;;  %v25122_v38 = vor.u32 %v12285_v14, %v12284_v12  ;;  %v27142_v20 = vshrl.u32 %v25105_v35, 16  ;;  %v25127_v37 = vor.u32 %v24461_v34, %v25036_v6  ;;  %19223 = vmatprep.subr.bf16.mxu1 %v21607_v3  ;;  %10864 = vmatmul.mubr.bf16.gmra.mrb[204].mxu1 %v24253_v1  ;;  %v18794_v14 = vpop.f32.mrb[70].mxu0 }
 0x37c   : > { %v25132_v54 = vadd.f32 %v18707_v49, %v24786_v4  ;;  %v18710_v11 = vadd.f32 %v18709_v13, %v18708_v17  ;;  %v27141_v43 = vshll.u32 %v25105_v35, 16  ;;  %v25136_v28 = vshll.u32 %v25129_v62, 16  ;;  %19354 = vmatpush3.bf16.msra.mxu0 %v21602_v55  ;;  %v21606_v4 = vld [vmem:[%s27056_s3 + $0x230] sm:$0xff]   ;;  %v18795_v1 = vpop.f32.mrb[71].mxu0  ;;  %v7502_v35 = vld [vmem:[#allocation6 + $0x1] ss:$2 sm:$0xff] }
 0x37d   : > { %27354 = vst [vmem:[#allocation35_spill] sm:$0xff] %v25127_v37  ;;  %v25138_v12 = vadd.f32 %v18792_v50, %v18791_v41  ;;  %v27355_v48 = vrot.slane %v24908_v63, 5  ;;  %v25149_v3 = vrot.slane %v27143_v18, 1  ;;  %v25151_v49 = vrot.slane %v11151_v7, 1  ;;  %19355 = vmatprep.subr.bf16.mxu0 %v21605_v61 }
 0x37e   : > { %v25154_v17 = vadd.f32 %v18710_v11, %v24799_v5  ;;  %v12283_v13 = vor.u32 %v12282_v26, %v12279_v59  ;;  %v25162_v55 = vadd.f32 %v18795_v1, %v18794_v14  ;;  %v11719_v7 = vsel %vm8966_vm5, %v11714_v23, %v11718_v24  ;;  %v21610_v24 = vld [vmem:[%s27056_s3 + $0x238] sm:$0xff]  }
 0x37f   : > { %v11279_v44 = vsel %vm8029_vm6, %v11277_v0, %v27355_v48  ;;  %v21609_v48 = vld [vmem:[%s27056_s3 + $0x278] sm:$0xff]   ;;  %v25160_v0 = vrot.slane %v25136_v28, 1  ;;  %v25167_v41 = vrot.slane %v11230_v45, 1  ;;  %v12232_v5 = vsel %vm7518_vm1, %v25127_v37, %v25149_v3 }
 0x380   : > { %11428 = vmatprep.mubr.bf16.mxu1 %v11279_v44  ;;  %v18711_v44 = vpop.f32.mrb[100].mxu1  ;;  %v12287_v61 = vsel %vm12268_vm13, %v12283_v13, %v25122_v38  ;;  %v12292_v59 = vrot.slane %v27142_v20, 4  ;;  %v12293_v26 = vrot.slane %v27141_v43, 5  ;;  %v25180_v9 = vor.u32 %v24593_v58, %v24543_v53  ;;  %19356 = vmatpush3.bf16.msra.mxu0 %v21606_v4  ;;  %v7501_v37 = vld [vmem:[#allocation6 + $0x10] ss:$2 sm:$0x3f] }
 0x381   : > { %11883 = vmatmul.mubr.bf16.gmra.mrb[176].mxu0 %v11719_v7  ;;  %v18712_v23 = vpop.f32.mrb[101].mxu1  ;;  %v12288_v11 = vrot.slane %v24441_v29, 4  ;;  %v12289_v50 = vrot.slane %v24452_v36, 5  ;;  %v21608_v7 = vld [vmem:[%s27056_s3] sm:$0xff]   ;;  %19357 = vmatprep.subr.bf16.mxu0 %v21609_v48  ;;  %v12301_v4 = vshrl.u32 %v12232_v5, 16  ;;  %v18797_v29 = vpop.f32.mrb[72].mxu0  ;;  %v12271_v48 = vor.u32 %v25100_v40, %v25096_v56 }
 0x382   : > { %27356 = vst [vmem:[#allocation39_spill] sm:$0xff] %v25180_v9  ;;  %12458 = vmatprep.mubr.bf16.mxu0 %v12287_v61  ;;  %v18713_v1 = vadd.f32 %v18712_v23, %v18711_v44  ;;  %v18714_v13 = vpop.f32.mrb[102].mxu1  ;;  %v12304_v61 = vshll.u32 %v12232_v5, 16  ;;  %v25195_v43 = vsel %vm7518_vm1, %v25180_v9, %v25160_v0  ;;  %v27357_v36 = vrot.slane %v24705_v21, 5  ;;  %v21611_v23 = vld [vmem:[%s27056_s3 + $0x48] sm:$0xff]   ;;  %v21613_v5 = vld [vmem:[%s27056_s3 + $0x340] sm:$0xff]  }
 0x383   : > { %v18715_v20 = vpop.f32.mrb[103].mxu1  ;;  %v27358_v18 = vrot.slane %v24751_v39, 5  ;;  %v7500_v39 = vld [vmem:[#allocation6] ss:$2 sm:$0xff]  ;;  %v25221_v58 = vsel %vm7518_vm1, %v25068_v32, %v25167_v41  ;;  %v27360_v56 = vld [vmem:[#allocation36_spill] sm:$0xff]  ;;  %v27362_v21 = vrot.slane %v24973_v46, 5 }
 0x384   : > { %v27359_v14 = vmov %v27357_v36  ;;  %v18716_v25 = vadd.f32 %v18715_v20, %v18714_v13  ;;  %v25224_v40 = vadd.f32 %v18713_v1, %v27360_v56  ;;  %v27363_v20 = vrot.slane %v24908_v63, 5  ;;  %19358 = vmatpush3.bf16.msra.mxu0 %v21610_v24  ;;  %v7503_v13 = vld [vmem:[#allocation6 + $0x11] ss:$2 sm:$0x3f]  ;;  %v21617_v24 = vld [vmem:[%s27056_s3 + $0x348] sm:$0xff]  }
 0x385   : > { %v11276_v44 = vsel %vm8029_vm6, %v27358_v18, %v27357_v36  ;;  %v25214_v45 = vsel %vm8029_vm6, %v27359_v14, %v24665_v33  ;;  %v18798_v18 = vpop.f32.mrb[73].mxu0  ;;  %v25216_v36 = vor.u32 %v12293_v26, %v12292_v59  ;;  %v12275_v26 = vsel %vm12268_vm13, %v12271_v48, %v25113_v8  ;;  %v21614_v14 = vld [vmem:[%s27056_s3 + $0x300] sm:$0xff]   ;;  %19423 = vmatprep.subr.bf16.mxu0 %v21613_v5  ;;  %v21615_v1 = vld [vmem:[%s27056_s3 + $0x50] sm:$0xff]   ;;  %v18717_v10 = vpop.f32.mrb[104].mxu1  ;;  %v25267_v5 = vld [vmem:[#allocation3 + $0x58] sm:$0x7] }
 0x386   : > { %27361 = vst [vmem:[#allocation38_spill] sm:$0xff] %v25224_v40  ;;  %v25226_v22 = vadd.f32 %v18798_v18, %v18797_v29  ;;  %11429 = vmatmul.mubr.bf16.vlgmr.msra.gmra.mrb[208].mxu1 %v11276_v44  ;;  %v18800_v33 = vpop.f32.mrb[74].mxu0  ;;  %v11283_v59 = vsel %vm8029_vm6, %v27363_v20, %v27362_v21  ;;  %v21612_v44 = vld [vmem:[%s27056_s3 + $0x8] sm:$0xff]   ;;  %v11234_v48 = vshrl.u32 %v25082_v30, 16  ;;  %v27364_v18 = vshrl.u32 %v25070_v52, 16  ;;  %v27365_v21 = vld [vmem:[#allocation37_spill] sm:$0xff] }
 0x387   : > { %19224 = vmatpush3.bf16.msra.mxu1 %v21608_v7  ;;  %11436 = vmatprep.mubr.bf16.mxu1 %v11283_v59  ;;  %v18801_v29 = vpop.f32.mrb[75].mxu0  ;;  %v25252_v20 = vadd.f32 %v18716_v25, %v27365_v21  ;;  %v27154_v7 = vshll.u32 %v25195_v43, 16  ;;  %v27155_v30 = vrot.slane %v25221_v58, 5  ;;  %v12303_v40 = vrot.slane %v12301_v4, 4  ;;  %27366 = vst [vmem:[#allocation41_spill] sm:$0xff] %v25267_v5  ;;  %v21618_v4 = vld [vmem:[%s27056_s3 + $0x308] sm:$0xff]  }
 0x388   : > { %v25249_v56 = vor.u32 %v27364_v18, %v25149_v3  ;;  %v25255_v59 = vadd.f32 %v18801_v29, %v18800_v33  ;;  %19225 = vmatprep.subr.bf16.mxu1 %v21611_v23  ;;  %v12306_v9 = vrot.slane %v12304_v61, 5  ;;  %v12295_v25 = vsel %vm12268_vm13, %v25122_v38, %v25216_v36  ;;  %v18718_v29 = vpop.f32.mrb[105].mxu1  ;;  %v25277_v38 = vld [vmem:[#allocation3 + $0x38] sm:$0xff]  ;;  %v18803_v18 = vpop.f32.mrb[76].mxu0 }
 0x389   : > { %12459 = vmatmul.mubr.bf16.vlgmr.msra.gmra.mrb[180].mxu0 %v12275_v26  ;;  %v25265_v3 = vshrl.u32 %v25129_v62, 16  ;;  %v7504_v33 = vmax.f32 %v7500_v39, %v7502_v35  ;;  %v7505_v23 = vmax.f32 %v7501_v37, %v7503_v13  ;;  %v25272_v61 = vor.u32 %v12289_v50, %v12288_v11  ;;  %v18720_v13 = vpop.f32.mrb[106].mxu1  ;;  %v21619_v21 = vld [vmem:[%s27056_s3 + $0x58] sm:$0xff]   ;;  %v25317_v62 = vld [vmem:[#allocation3 + $0x30] sm:$0xf8] }
 0x38a   : > { %12466 = vmatprep.mubr.bf16.mxu0 %v12295_v25  ;;  %19424 = vmatpush3.bf16.msra.mxu0 %v21614_v14  ;;  %v25275_v26 = vor.u32 %v11234_v48, %v25167_v41  ;;  %v27367_v35 = vshrl.u32 %v25195_v43, 16  ;;  %v18719_v39 = vadd.f32 %v18718_v29, %v18717_v10  ;;  %v21616_v14 = vld [vmem:[%s27056_s3 + $0x10] sm:$0xff]   ;;  %v12314_v11 = vshrl.u32 %v25249_v56, 16  ;;  %v18721_v48 = vpop.f32.mrb[107].mxu1 }
 0x38b   : > { %19226 = vmatpush3.bf16.msra.mxu1 %v21612_v44  ;;  %19425 = vmatprep.subr.bf16.mxu0 %v21617_v24  ;;  %v7506_v50 = vpack.c.bf16 %v7505_v23, %v7504_v33  ;;  %v13667_v41 = vrot.slane %v27154_v7, 3  ;;  %v27368_v10 = vrot.slane %v24973_v46, 5  ;;  %v21621_v24 = vld [vmem:[%s27056_s3 + $0x350] sm:$0xff]   ;;  %v12317_v25 = vshll.u32 %v25249_v56, 16  ;;  %v18804_v23 = vpop.f32.mrb[77].mxu0 }
 0x38c   : > { %v13666_v37 = vrot.slane %v27367_v35, 2  ;;  %19227 = vmatprep.subr.bf16.mxu1 %v21615_v1  ;;  %v25302_v33 = vor.u32 %v25265_v3, %v25160_v0  ;;  %v27156_v1 = vshll.u32 %v25267_v5, 16  ;;  %v25305_v29 = vor.u32 %v12306_v9, %v12303_v40  ;;  %v27369_v35 = vld [vmem:[#allocation40_spill] sm:$0xff]  ;;  %v18806_v56 = vpop.f32.mrb[78].mxu0 }
 0x38d   : > { %v11287_v44 = vsel %vm8029_vm6, %v27368_v10, %v27155_v30  ;;  %v25308_v13 = vadd.f32 %v18719_v39, %v27369_v35  ;;  %v7508_v48 = vrot.slane %v7506_v50, 5  ;;  %v13670_v10 = vrot.slane %v25265_v3, 2  ;;  %v21622_v30 = vld [vmem:[%s27056_s3 + $0x310] sm:$0xff]   ;;  %v18807_v50 = vpop.f32.mrb[79].mxu0  ;;  %v27371_v35 = vld [vmem:[#allocation30_spill] sm:$0xff] }
 0x38e   : > { %v25311_v7 = vadd.f32 %v18804_v23, %v18803_v18  ;;  %11437 = vmatmul.mubr.bf16.gmra.mrb[212].mxu1 %v25214_v45  ;;  %19426 = vmatpush3.bf16.msra.mxu0 %v21618_v4  ;;  %v25319_v9 = vor.u32 %v13667_v41, %v13666_v37  ;;  %v25323_v40 = vrot.slane %v27156_v1, 1  ;;  %v13671_v39 = vrot.slane %v25136_v28, 3  ;;  %v21620_v45 = vld [vmem:[%s27056_s3 + $0x18] sm:$0xff]  }
 0x38f   : > { %19228 = vmatpush3.bf16.msra.mxu1 %v21616_v14  ;;  %11444 = vmatprep.mubr.bf16.mxu1 %v11287_v44  ;;  %v12291_v4 = vsel %vm12268_vm13, %v25113_v8, %v25272_v61  ;;  %v21625_v37 = vld [vmem:[%s27056_s3 + $0x358] sm:$0xff]   ;;  %v12296_v41 = vrot.slane %v24461_v34, 4  ;;  %v12297_v18 = vrot.slane %v24458_v27, 5  ;;  %v25337_v23 = vrot.slane %v12314_v11, 4  ;;  %7510 = vst [vmem:[#allocation3 + $0x58] sm:$0xf8] %v7508_v48 }
 0x390   : > { %27370 = vst [vmem:[#allocation36_spill] sm:$0xff] %v25323_v40  ;;  %7511 = vst [vmem:[#allocation3 + $0x60] sm:$0x3] %v7508_v48  ;;  %v25339_v14 = vadd.f32 %v18807_v50, %v18806_v56  ;;  %19229 = vmatprep.subr.bf16.mxu1 %v21619_v21  ;;  %19427 = vmatprep.subr.bf16.mxu0 %v21621_v24  ;;  %v21623_v8 = vld [vmem:[%s27056_s3 + $0x60] sm:$0xff]   ;;  %v25344_v44 = vrot.slane %v12317_v25, 5  ;;  %v25349_v34 = vsel %vm13642_vm12, %v27371_v35, %v25319_v9  ;;  %v18739_v11 = vpop.f32.mrb[108].mxu1 }
 0x391   : > { %27372 = vst [vmem:[#allocation37_spill] sm:$0xff] %v25349_v34  ;;  %v13606_v27 = vsel %vm7518_vm1, %v25302_v33, %v25323_v40  ;;  %12467 = vmatmul.mubr.bf16.gmra.mrb[184].mxu0 %v12291_v4  ;;  %v12308_v21 = vsel %vm12268_vm13, %v25216_v36, %v25305_v29  ;;  %v25357_v56 = vor.u32 %v13671_v39, %v13670_v10  ;;  %v18740_v25 = vpop.f32.mrb[109].mxu1  ;;  %v11290_v50 = vrot.slane %v25275_v26, 5  ;;  %v21626_v35 = vld [vmem:[%s27056_s3 + $0x318] sm:$0xff]   ;;  %v21624_v10 = vld [vmem:[%s27056_s3 + $0x20] sm:$0xff]   ;;  %v27374_v26 = vld [vmem:[#allocation15_spill] sm:$0xff] }
 0x392   : > { %v13675_v24 = vshrl.u32 %v13606_v27, 16  ;;  %v13678_v48 = vshll.u32 %v13606_v27, 16  ;;  %12474 = vmatprep.mubr.bf16.mxu0 %v12308_v21  ;;  %19428 = vmatpush3.bf16.msra.mxu0 %v21622_v30  ;;  %v11149_v1 = vshrl.u32 %v25055_v16, 16  ;;  %v12781_v4 = vshll.u32 %v25317_v62, 16  ;;  %v18742_v36 = vpop.f32.mrb[110].mxu1  ;;  %v18809_v34 = vpop.f32.mrb[80].mxu0 }
 0x393   : > { %27373 = vst [vmem:[#allocation40_spill] sm:$0xff] %v25357_v56  ;;  %v18741_v5 = vadd.f32 %v18740_v25, %v18739_v11  ;;  %19230 = vmatpush3.bf16.msra.mxu1 %v21620_v45  ;;  %19429 = vmatprep.subr.bf16.mxu0 %v21625_v37  ;;  %v25371_v27 = vsel %vm13642_vm12, %v27374_v26, %v25357_v56  ;;  %v18743_v21 = vpop.f32.mrb[111].mxu1  ;;  %v21627_v45 = vld [vmem:[%s27056_s3 + $0x68] sm:$0xff]   ;;  %v21629_v37 = vld [vmem:[%s27056_s3 + $0x360] sm:$0xff]  }
 0x394   : > { %v13677_v39 = vrot.slane %v13675_v24, 2  ;;  %v13680_v30 = vrot.slane %v13678_v48, 3  ;;  %27375 = vst [vmem:[#allocation30_spill] sm:$0xff] %v25371_v27  ;;  %19231 = vmatprep.subr.bf16.mxu1 %v21623_v8  ;;  %v25376_v11 = vor.u32 %v12297_v18, %v12296_v41  ;;  %v11154_v24 = vor.u32 %v25151_v49, %v11149_v1  ;;  %v18810_v8 = vpop.f32.mrb[81].mxu0 }
 0x395   : > { %v27376_v48 = vshll.u32 %v25277_v38, 16  ;;  %v8597_v26 = vadd.f32 %v18741_v5, %v24979_v51  ;;  %v18744_v56 = vadd.f32 %v18743_v21, %v18742_v36  ;;  %v12320_v27 = vor.u32 %v25344_v44, %v25337_v23  ;;  %v18812_v18 = vpop.f32.mrb[82].mxu0  ;;  %v21630_v51 = vld [vmem:[%s27056_s3 + $0x320] sm:$0xff]  }
 0x396   : > { %v25389_v40 = vor.u32 %v13680_v30, %v13677_v39  ;;  %v25391_v41 = vadd.f32 %v18810_v8, %v18809_v34  ;;  %11445 = vmatmul.mubr.bf16.gmra.mrb[216].mxu1 %v24870_v60  ;;  %v27377_v49 = vrot.slane %v25221_v58, 5  ;;  %19430 = vmatpush3.bf16.msra.mxu0 %v21626_v35  ;;  %v25400_v5 = vld [vmem:[#allocation3 + $0x40] sm:$0x1f]  ;;  %v12517_v23 = vshrl.u32 %v25277_v38, 16  ;;  %v18813_v60 = vpop.f32.mrb[83].mxu0  ;;  %v21628_v58 = vld [vmem:[%s27056_s3 + $0x28] sm:$0xff]  }
 0x397   : > { %v25384_v25 = vrot.slane %v27376_v48, 1  ;;  %v12783_v44 = vrot.slane %v12781_v4, 1  ;;  %v8598_v34 = vadd.f32 %v18744_v56, %v24988_v19  ;;  %19232 = vmatpush3.bf16.msra.mxu1 %v21624_v10  ;;  %v11159_v35 = vsel %vm7518_vm1, %v11154_v24, %v24805_v15  ;;  %19431 = vmatprep.subr.bf16.mxu0 %v21629_v37  ;;  %v21631_v56 = vld [vmem:[%s27056_s3 + $0x70] sm:$0xff]  }
 0x398   : > { %v11291_v1 = vsel %vm8029_vm6, %v27377_v49, %v11290_v50  ;;  %v21633_v50 = vld [vmem:[%s27056_s3 + $0x368] sm:$0xff]   ;;  %v12779_v36 = vshrl.u32 %v25317_v62, 16  ;;  %v25414_v4 = vadd.f32 %v25038_v57, %v8597_v26  ;;  %19233 = vmatprep.subr.bf16.mxu1 %v21627_v45  ;;  %v12299_v19 = vsel %vm12268_vm13, %v25272_v61, %v25376_v11  ;;  %v18745_v57 = vpop.f32.mrb[112].mxu1  ;;  %v18877_v49 = vpop.f32.mrb[84].mxu0 }
 0x399   : > { %11452 = vmatprep.mubr.bf16.mxu1 %v11291_v1  ;;  %v27378_v10 = vshrl.u32 %v25070_v52, 16  ;;  %v27379_v15 = vshll.u32 %v25070_v52, 16  ;;  %v12519_v21 = vor.u32 %v12517_v23, %v25384_v25  ;;  %12475 = vmatmul.mubr.bf16.gmra.mrb[188].mxu0 %v12299_v19  ;;  %v12321_v45 = vsel %vm12268_vm13, %v25305_v29, %v12320_v27  ;;  %v18746_v48 = vpop.f32.mrb[113].mxu1  ;;  %v21634_v26 = vld [vmem:[%s27056_s3 + $0x328] sm:$0xff]  }
 0x39a   : > { %v11288_v61 = vrot.slane %v25400_v5, 5  ;;  %v25431_v37 = vadd.f32 %v25072_v42, %v8598_v34  ;;  %v25436_v24 = vsel %vm13642_vm12, %v25319_v9, %v25389_v40  ;;  %12482 = vmatprep.mubr.bf16.mxu0 %v12321_v45  ;;  %19432 = vmatpush3.bf16.msra.mxu0 %v21630_v51  ;;  %v11467_v52 = vrot.slane %v24908_v63, 4  ;;  %v18748_v8 = vpop.f32.mrb[114].mxu1  ;;  %v21632_v9 = vld [vmem:[%s27056_s3 + $0x30] sm:$0xff]   ;;  %v21635_v51 = vld [vmem:[%s27056_s3 + $0x78] sm:$0xff]   ;;  %v21644_v63 = vld [vmem:[%s27056_s3 + $0x188] sm:$0xff]  }
 0x39b   : > { %v12309_v39 = vrot.slane %v27378_v10, 4  ;;  %v12310_v30 = vrot.slane %v27379_v15, 5  ;;  %v25444_v29 = vsel %vm7518_vm1, %v12519_v21, %v25036_v6  ;;  %v12784_v42 = vor.u32 %v12783_v44, %v12779_v36  ;;  %19234 = vmatpush3.bf16.msra.mxu1 %v21628_v58  ;;  %19433 = vmatprep.subr.bf16.mxu0 %v21633_v50  ;;  %v18749_v18 = vpop.f32.mrb[115].mxu1  ;;  %v21637_v44 = vld [vmem:[%s27056_s3 + $0x370] sm:$0xff]   ;;  %v18878_v50 = vpop.f32.mrb[85].mxu0  ;;  %v27380_v36 = vld [vmem:[#allocation34_spill] sm:$0xff] }
 0x39c   : > { %v18747_v27 = vadd.f32 %v18746_v48, %v18745_v57  ;;  %19235 = vmatprep.subr.bf16.mxu1 %v21631_v56  ;;  %v11466_v1 = vrot.slane %v11159_v35, 4  ;;  %v18750_v58 = vadd.f32 %v18749_v18, %v18748_v8  ;;  %v11289_v19 = vsel %vm8029_vm6, %v27380_v36, %v11288_v61  ;;  %v18880_v10 = vpop.f32.mrb[86].mxu0  ;;  %v25469_v15 = vld [vmem:[#allocation3 + $0x40] sm:$0xff]  ;;  %v21636_v45 = vld [vmem:[%s27056_s3 + $0x38] sm:$0xff]   ;;  %v25476_v48 = vld [vmem:[#allocation3 + $0x28] sm:$0xff] }
 0x39d   : > { %v12311_v23 = vor.u32 %v12310_v30, %v12309_v39  ;;  %v12785_v34 = vsel %vm7518_vm1, %v12784_v42, %v25384_v25  ;;  %v12833_v35 = vrot.slane %v25444_v29, 3  ;;  %v25461_v56 = vadd.f32 %v18878_v50, %v18877_v49  ;;  %v18881_v57 = vpop.f32.mrb[87].mxu0  ;;  %v21641_v42 = vld [vmem:[%s27056_s3 + $0x378] sm:$0xff]  }
 0x39e   : > { %v8599_v60 = vadd.f32 %v18747_v27, %v25030_v47  ;;  %11453 = vmatmul.mubr.bf16.gmra.mrb[220].mxu1 %v11289_v19  ;;  %v11468_v39 = vsel %vm10409_vm11, %v11466_v1, %v11467_v52  ;;  %19434 = vmatpush3.bf16.msra.mxu0 %v21634_v26  ;;  %v21638_v47 = vld [vmem:[%s27056_s3 + $0x330] sm:$0xff]   ;;  %v12525_v30 = vshrl.u32 %v25469_v15, 16  ;;  %v8600_v21 = vadd.f32 %v18750_v58, %v25058_v31  ;;  %v18751_v1 = vpop.f32.mrb[116].mxu1 }
 0x39f   : > { %19236 = vmatpush3.bf16.msra.mxu1 %v21632_v9  ;;  %11617 = vmatprep.mubr.bf16.mxu1 %v11468_v39  ;;  %v12832_v61 = vrot.slane %v12785_v34, 3  ;;  %v11464_v26 = vrot.slane %v25476_v48, 4  ;;  %v25485_v31 = vadd.f32 %v18881_v57, %v18880_v10  ;;  %v12312_v8 = vsel %vm12268_vm13, %v25376_v11, %v12311_v23  ;;  %v21639_v9 = vld [vmem:[%s27056_s3 + $0x1c0] sm:$0xff]   ;;  %v18752_v23 = vpop.f32.mrb[117].mxu1  ;;  %v21642_v34 = vld [vmem:[%s27056_s3 + $0x338] sm:$0xff]  }
 0x3a0   : > { %v25483_v27 = vadd.f32 %v25138_v12, %v8599_v60  ;;  %19237 = vmatprep.subr.bf16.mxu1 %v21635_v51  ;;  %19435 = vmatprep.subr.bf16.mxu0 %v21637_v44  ;;  %v12527_v18 = vor.u32 %v12525_v30, %v25036_v6  ;;  %v11180_v49 = vshll.u32 %v25400_v5, 16  ;;  %v25497_v51 = vld [vmem:[#allocation3 + $0x50] sm:$0xf]  ;;  %v25500_v11 = vadd.f32 %v25162_v55, %v8600_v21  ;;  %v18754_v36 = vpop.f32.mrb[118].mxu1  ;;  %v18883_v10 = vpop.f32.mrb[88].mxu0  ;;  %v21645_v30 = vld [vmem:[%s27056_s3 + $0x440] sm:$0xff]  }
 0x3a1   : > { %12483 = vmatmul.mubr.bf16.gmra.mrb[192].mxu0 %v12312_v8  ;;  %v12834_v12 = vsel %vm12828_vm14, %v12832_v61, %v12833_v35  ;;  %v11463_v44 = vrot.slane %v25055_v16, 4  ;;  %v11471_v6 = vrot.slane %v24973_v46, 4  ;;  %v27381_v58 = vshll.u32 %v24888_v2, 16  ;;  %v21640_v16 = vld [vmem:[%s27056_s3 + $0x180] sm:$0xff]   ;;  %v18755_v19 = vpop.f32.mrb[119].mxu1  ;;  %v18884_v61 = vpop.f32.mrb[89].mxu0 }
 0x3a2   : > { %19436 = vmatpush3.bf16.msra.mxu0 %v21638_v47  ;;  %12983 = vmatprep.mubr.bf16.mxu0 %v12834_v12  ;;  %v25509_v60 = vsel %vm7518_vm1, %v12527_v18, %v24543_v53  ;;  %v18753_v55 = vadd.f32 %v18752_v23, %v18751_v1  ;;  %v21643_v53 = vld [vmem:[%s27056_s3 + $0x1c8] sm:$0xff]   ;;  %v12830_v47 = vrot.slane %v25277_v38, 3  ;;  %v12787_v21 = vshll.u32 %v25497_v51, 16  ;;  %v18886_v18 = vpop.f32.mrb[90].mxu0 }
 0x3a3   : > { %v11906_v50 = vrot.slane %v27381_v58, 1  ;;  %19238 = vmatpush3.bf16.msra.mxu1 %v21636_v45  ;;  %19437 = vmatprep.subr.bf16.mxu0 %v21641_v42  ;;  %v11465_v39 = vsel %vm10409_vm11, %v11463_v44, %v11464_v26  ;;  %v18756_v45 = vadd.f32 %v18755_v19, %v18754_v36  ;;  %v12837_v42 = vrot.slane %v25509_v60, 3  ;;  %v18887_v58 = vpop.f32.mrb[91].mxu0  ;;  %v27383_v36 = vld [vmem:[#allocation29_spill] sm:$0xff] }
 0x3a4   : > { %19303 = vmatprep.subr.bf16.mxu1 %v21639_v9  ;;  %v8601_v57 = vadd.f32 %v18753_v55, %v25132_v54  ;;  %v11182_v8 = vrot.slane %v11180_v49, 1  ;;  %v25529_v9 = vadd.f32 %v18884_v61, %v18883_v10  ;;  %v11472_v1 = vsel %vm10409_vm11, %v11467_v52, %v11471_v6  ;;  %v21646_v54 = vld [vmem:[%s27056_s3 + $0x400] sm:$0xff]  }
 0x3a5   : > { %v12829_v12 = vrot.slane %v25317_v62, 3  ;;  %v27382_v23 = vshrl.u32 %v24888_v2, 16  ;;  %v8602_v44 = vadd.f32 %v18756_v45, %v25154_v17  ;;  %v21649_v62 = vld [vmem:[%s27056_s3 + $0x448] sm:$0xff]   ;;  %v12789_v55 = vrot.slane %v12787_v21, 1 }
 0x3a6   : > { %11618 = vmatmul.mubr.bf16.vlgmr.msra.gmra.mrb[224].mxu1 %v11465_v39  ;;  %19438 = vmatpush3.bf16.msra.mxu0 %v21642_v34  ;;  %v25551_v52 = vsel %vm7518_vm1, %v25068_v32, %v11182_v8  ;;  %v25554_v2 = vadd.f32 %v25226_v22, %v8601_v57  ;;  %v25556_v34 = vadd.f32 %v18887_v58, %v18886_v18  ;;  %v11184_v58 = vshrl.u32 %v25400_v5, 16  ;;  %v21654_v5 = vld [vmem:[%s27056_s3 + $0x410] sm:$0xff]  }
 0x3a7   : > { %v11907_v49 = vor.u32 %v11906_v50, %v27382_v23  ;;  %19304 = vmatpush3.bf16.msra.mxu1 %v21640_v16  ;;  %11625 = vmatprep.mubr.bf16.mxu1 %v11472_v1  ;;  %v12831_v17 = vsel %vm12828_vm14, %v12829_v12, %v12830_v47  ;;  %v21647_v50 = vld [vmem:[%s27056_s3 + $0x1d0] sm:$0xff]   ;;  %v18757_v16 = vpop.f32.mrb[120].mxu1  ;;  %v12838_v22 = vsel %vm12828_vm14, %v12833_v35, %v12837_v42  ;;  %v11475_v39 = vrot.slane %v25551_v52, 4  ;;  %v21651_v23 = vld [vmem:[%s27056_s3 + $0x1d8] sm:$0xff]  }
 0x3a8   : > { %19305 = vmatprep.subr.bf16.mxu1 %v21643_v53  ;;  %19503 = vmatprep.subr.bf16.mxu0 %v21645_v30  ;;  %v25574_v19 = vadd.f32 %v25255_v59, %v8602_v44  ;;  %v18758_v10 = vpop.f32.mrb[121].mxu1  ;;  %v21650_v53 = vld [vmem:[%s27056_s3 + $0x408] sm:$0xff]   ;;  %v21648_v59 = vld [vmem:[%s27056_s3 + $0x190] sm:$0xff]  }
 0x3a9   : > { %v25566_v32 = vsel %vm7518_vm1, %v11907_v49, %v27383_v36  ;;  %12984 = vmatmul.mubr.bf16.vlgmr.msra.gmra.mrb[196].mxu0 %v12831_v17  ;;  %v27384_v30 = vld [vmem:[#allocation39_spill] sm:$0xff]  ;;  %v18759_v57 = vadd.f32 %v18758_v10, %v18757_v16  ;;  %v18760_v45 = vpop.f32.mrb[122].mxu1  ;;  %v12835_v49 = vrot.slane %v25469_v15, 3  ;;  %v27388_v36 = vld [vmem:[#allocation12_spill] sm:$0xff] }
 0x3aa   : > { %12991 = vmatprep.mubr.bf16.mxu0 %v12838_v22  ;;  %19504 = vmatpush3.bf16.msra.mxu0 %v21646_v54  ;;  %v25582_v21 = vsel %vm7518_vm1, %v27384_v30, %v12789_v55  ;;  %v11986_v35 = vshrl.u32 %v25566_v32, 16  ;;  %v18761_v61 = vpop.f32.mrb[123].mxu1  ;;  %v18889_v18 = vpop.f32.mrb[92].mxu0  ;;  %v27385_v1 = vld [vmem:[#allocation11_spill] sm:$0xff] }
 0x3ab   : > { %19306 = vmatpush3.bf16.msra.mxu1 %v21644_v63  ;;  %19505 = vmatprep.subr.bf16.mxu0 %v21649_v62  ;;  %v27386_v12 = vrot.slane %v27385_v1, 4  ;;  %v21653_v44 = vld [vmem:[%s27056_s3 + $0x450] sm:$0xff]   ;;  %v27387_v63 = vld [vmem:[#allocation38_spill] sm:$0xff]  ;;  %v18762_v17 = vadd.f32 %v18761_v61, %v18760_v45  ;;  %v12841_v48 = vrot.slane %v25582_v21, 3  ;;  %v11476_v1 = vsel %vm10409_vm11, %v11471_v6, %v11475_v39  ;;  %v21657_v6 = vld [vmem:[%s27056_s3 + $0x458] sm:$0xff]  }
 0x3ac   : > { %19307 = vmatprep.subr.bf16.mxu1 %v21647_v50  ;;  %v8603_v62 = vadd.f32 %v18759_v57, %v27387_v63  ;;  %v18890_v50 = vpop.f32.mrb[93].mxu0  ;;  %v11186_v57 = vor.u32 %v11184_v58, %v11182_v8  ;;  %v11989_v45 = vshll.u32 %v25566_v32, 16  ;;  %v21655_v32 = vld [vmem:[%s27056_s3 + $0x1e0] sm:$0xff]   ;;  %v21658_v63 = vld [vmem:[%s27056_s3 + $0x418] sm:$0xff]  }
 0x3ad   : > { %v11470_v54 = vsel %vm10409_vm11, %v11464_v26, %v27386_v12  ;;  %v27389_v26 = vshll.u32 %v27388_v36, 16  ;;  %v25605_v22 = vadd.f32 %v18890_v50, %v18889_v18  ;;  %v18892_v10 = vpop.f32.mrb[94].mxu0  ;;  %v8604_v61 = vadd.f32 %v18762_v17, %v25252_v20  ;;  %v21652_v12 = vld [vmem:[%s27056_s3 + $0x198] sm:$0xff]   ;;  %v25657_v50 = vld [vmem:[#allocation3 + $0x40] sm:$0xf] }
 0x3ae   : > { %11626 = vmatmul.mubr.bf16.gmra.mrb[228].mxu1 %v11470_v54  ;;  %19506 = vmatpush3.bf16.msra.mxu0 %v21650_v53  ;;  %v18893_v18 = vpop.f32.mrb[95].mxu0  ;;  %v12791_v53 = vshrl.u32 %v25497_v51, 16  ;;  %v25625_v54 = vadd.f32 %v25311_v7, %v8603_v62  ;;  %v12836_v20 = vsel %vm12828_vm14, %v12830_v47, %v12835_v49  ;;  %v12842_v7 = vsel %vm12828_vm14, %v12837_v42, %v12841_v48 }
 0x3af   : > { %v13280_v16 = vrot.slane %v27389_v26, 1  ;;  %19308 = vmatpush3.bf16.msra.mxu1 %v21648_v59  ;;  %11633 = vmatprep.mubr.bf16.mxu1 %v11476_v1  ;;  %v25627_v8 = vadd.f32 %v18893_v18, %v18892_v10  ;;  %v18763_v59 = vpop.f32.mrb[124].mxu1  ;;  %v25645_v38 = vadd.f32 %v25339_v14, %v8604_v61  ;;  %v25650_v62 = vrot.slane %v11986_v35, 3  ;;  %v21656_v14 = vld [vmem:[%s27056_s3 + $0x1a0] sm:$0xff]   ;;  %v25668_v61 = vld [vmem:[#allocation3 + $0x48] sm:$0xff] }
 0x3b0   : > { %19309 = vmatprep.subr.bf16.mxu1 %v21651_v23  ;;  %19507 = vmatprep.subr.bf16.mxu0 %v21653_v44  ;;  %v12793_v51 = vor.u32 %v12791_v53, %v12789_v55  ;;  %v27390_v23 = vshrl.u32 %v27388_v36, 16  ;;  %v18764_v47 = vpop.f32.mrb[125].mxu1  ;;  %v11479_v44 = vrot.slane %v11186_v57, 4  ;;  %v25652_v17 = vrot.slane %v11989_v45, 4  ;;  %v27393_v35 = vld [vmem:[#allocation25_spill] sm:$0xff]  ;;  %v21659_v45 = vld [vmem:[%s27056_s3 + $0x1e8] sm:$0xff]  }
 0x3b1   : > { %12992 = vmatmul.mubr.bf16.gmra.mrb[200].mxu0 %v12836_v20  ;;  %v18765_v42 = vadd.f32 %v18764_v47, %v18763_v59  ;;  %v18766_v55 = vpop.f32.mrb[126].mxu1  ;;  %v27391_v36 = vshrl.u32 %v24973_v46, 16  ;;  %v12839_v18 = vrot.slane %v25668_v61, 3  ;;  %v25675_v20 = vld [vmem:[#allocation3 + $0x38] sm:$0xfe]  ;;  %v11477_v52 = vrot.slane %v25657_v50, 4 }
 0x3b2   : > { %v13281_v58 = vor.u32 %v13280_v16, %v27390_v23  ;;  %12999 = vmatprep.mubr.bf16.mxu0 %v12842_v7  ;;  %19508 = vmatpush3.bf16.msra.mxu0 %v21654_v5  ;;  %v27392_v16 = vshll.u32 %v24973_v46, 16  ;;  %v18767_v5 = vpop.f32.mrb[127].mxu1  ;;  %v18895_v57 = vpop.f32.mrb[96].mxu0  ;;  %v12845_v53 = vrot.slane %v12793_v51, 3  ;;  %v11480_v23 = vsel %vm10409_vm11, %v11475_v39, %v11479_v44  ;;  %v21660_v55 = vld [vmem:[%s27056_s3 + $0x1a8] sm:$0xff]  }
 0x3b3   : > { %19310 = vmatpush3.bf16.msra.mxu1 %v21652_v12  ;;  %19509 = vmatprep.subr.bf16.mxu0 %v21657_v6  ;;  %v11996_v26 = vrot.slane %v27391_v36, 3  ;;  %v21661_v12 = vld [vmem:[%s27056_s3 + $0x460] sm:$0xff]   ;;  %v8605_v46 = vadd.f32 %v18765_v42, %v25308_v13  ;;  %v18896_v6 = vpop.f32.mrb[97].mxu0  ;;  %v25686_v42 = vld [vmem:[#allocation3 + $0x48] sm:$0xf]  ;;  %v11992_v44 = vor.u32 %v25652_v17, %v25650_v62  ;;  %v12840_v50 = vsel %vm12828_vm14, %v12835_v49, %v12839_v18  ;;  %v21663_v62 = vld [vmem:[%s27056_s3 + $0x1f0] sm:$0xff]  }
 0x3b4   : > { %v11999_v10 = vrot.slane %v27392_v16, 4  ;;  %v13286_v1 = vsel %vm7518_vm1, %v13281_v58, %v27393_v35  ;;  %19311 = vmatprep.subr.bf16.mxu1 %v21655_v32  ;;  %v25677_v59 = vadd.f32 %v18896_v6, %v18895_v57  ;;  %v27394_v32 = vld [vmem:[#allocation10_spill] sm:$0xff]  ;;  %v18898_v7 = vpop.f32.mrb[98].mxu0  ;;  %v25699_v36 = vld [vmem:[#allocation3 + $0x50] sm:$0x7]  ;;  %v12846_v15 = vsel %vm12828_vm14, %v12841_v48, %v12845_v53 }
 0x3b5   : > { %v21662_v58 = vld [vmem:[%s27056_s3 + $0x420] sm:$0xff]   ;;  %v13360_v47 = vshrl.u32 %v13286_v1, 16  ;;  %v13363_v13 = vshll.u32 %v13286_v1, 16  ;;  %v18899_v51 = vpop.f32.mrb[99].mxu0  ;;  %v21665_v39 = vld [vmem:[%s27056_s3 + $0x468] sm:$0xff]   ;;  %v27395_v17 = vld [vmem:[#allocation20_spill] sm:$0xff] }
 0x3b6   : > { %11634 = vmatmul.mubr.bf16.gmra.mrb[232].mxu1 %v27394_v32  ;;  %19510 = vmatpush3.bf16.msra.mxu0 %v21658_v63  ;;  %v25697_v63 = vor.u32 %v11999_v10, %v11996_v26  ;;  %v25704_v16 = vadd.f32 %v18899_v51, %v18898_v7  ;;  %v27396_v26 = vshrl.u32 %v27395_v17, 16  ;;  %v25718_v1 = vld [vmem:[#allocation3 + $0x58] sm:$0x3]  ;;  %v18831_v5 = vpop.f32.mrb[128].mxu1  ;;  %v27398_v49 = vld [vmem:[#allocation18_spill] sm:$0xff]  ;;  %v27161_v6 = vshll.u32 %v25686_v42, 16 }
 0x3b7   : > { %19312 = vmatpush3.bf16.msra.mxu1 %v21656_v14  ;;  %11641 = vmatprep.mubr.bf16.mxu1 %v11480_v23  ;;  %v25702_v14 = vadd.f32 %v25391_v41, %v8605_v46  ;;  %v27397_v41 = vshll.u32 %v27395_v17, 16  ;;  %v27399_v57 = vshrl.u32 %v27398_v49, 16  ;;  %v18832_v32 = vpop.f32.mrb[129].mxu1  ;;  %v21666_v7 = vld [vmem:[%s27056_s3 + $0x428] sm:$0xff]   ;;  %v12843_v23 = vrot.slane %v25699_v36, 3  ;;  %v21664_v17 = vld [vmem:[%s27056_s3 + $0x1b0] sm:$0xff]  }
 0x3b8   : > { %19313 = vmatprep.subr.bf16.mxu1 %v21659_v45  ;;  %19511 = vmatprep.subr.bf16.mxu0 %v21661_v12  ;;  %v13370_v10 = vrot.slane %v27396_v26, 1  ;;  %v27400_v12 = vshll.u32 %v27398_v49, 16  ;;  %v13362_v21 = vrot.slane %v13360_v47, 1  ;;  %v13365_v51 = vrot.slane %v13363_v13, 2 }
 0x3b9   : > { %v13373_v35 = vrot.slane %v27397_v41, 2  ;;  %13000 = vmatmul.mubr.bf16.gmra.mrb[204].mxu0 %v12840_v50  ;;  %v12009_v45 = vrot.slane %v27399_v57, 3  ;;  %v13348_v48 = vshrl.u32 %v25675_v20, 16  ;;  %v18833_v53 = vadd.f32 %v18832_v32, %v18831_v5  ;;  %v18834_v50 = vpop.f32.mrb[130].mxu1 }
 0x3ba   : > { %v12012_v46 = vrot.slane %v27400_v12, 4  ;;  %13007 = vmatprep.mubr.bf16.mxu0 %v12846_v15  ;;  %19512 = vmatpush3.bf16.msra.mxu0 %v21662_v58  ;;  %v27160_v58 = vshll.u32 %v25718_v1, 16  ;;  %v18835_v26 = vpop.f32.mrb[131].mxu1  ;;  %v18901_v41 = vpop.f32.mrb[100].mxu0  ;;  %v27401_v15 = vld [vmem:[#allocation13_spill] sm:$0xff]  ;;  %v12001_v13 = vsel %vm11972_vm8, %v11992_v44, %v25697_v63  ;;  %v13351_v57 = vshll.u32 %v25675_v20, 16 }
 0x3bb   : > { %19314 = vmatpush3.bf16.msra.mxu1 %v21660_v55  ;;  %19513 = vmatprep.subr.bf16.mxu0 %v21665_v39  ;;  %v27402_v49 = vrot.slane %v27401_v15, 4  ;;  %v21667_v55 = vld [vmem:[%s27056_s3 + $0x1f8] sm:$0xff]   ;;  %v21669_v39 = vld [vmem:[%s27056_s3 + $0x470] sm:$0xff]   ;;  %v25748_v5 = vor.u32 %v13373_v35, %v13370_v10  ;;  %v18836_v12 = vadd.f32 %v18835_v26, %v18834_v50  ;;  %v18902_v32 = vpop.f32.mrb[101].mxu0  ;;  %v11935_v44 = vrot.slane %v27161_v6, 1 }
 0x3bc   : > { %19315 = vmatprep.subr.bf16.mxu1 %v21663_v62  ;;  %v9167_v62 = vadd.f32 %v18833_v53, %v25414_v4  ;;  %v25756_v15 = vadd.f32 %v18902_v32, %v18901_v41  ;;  %v12844_v10 = vsel %vm12828_vm14, %v12839_v18, %v12843_v23  ;;  %v21670_v4 = vld [vmem:[%s27056_s3 + $0x430] sm:$0xff]   ;;  %v13366_v35 = vor.u32 %v13365_v51, %v13362_v21  ;;  %v21673_v18 = vld [vmem:[%s27056_s3 + $0x478] sm:$0xff]  }
 0x3bd   : > { %v11478_v47 = vsel %vm10409_vm11, %v27402_v49, %v11477_v52  ;;  %v25752_v52 = vor.u32 %v12012_v46, %v12009_v45  ;;  %v18904_v49 = vpop.f32.mrb[102].mxu0  ;;  %v25764_v53 = vrot.slane %v13348_v48, 1  ;;  %v9168_v45 = vadd.f32 %v18836_v12, %v25431_v37  ;;  %v27403_v23 = vld [vmem:[#allocation35_spill] sm:$0xff]  ;;  %v21671_v48 = vld [vmem:[%s27056_s3 + $0x2c0] sm:$0xff]  }
 0x3be   : > { %11642 = vmatmul.mubr.bf16.gmra.mrb[236].mxu1 %v11478_v47  ;;  %19514 = vmatpush3.bf16.msra.mxu0 %v21666_v7  ;;  %v18905_v46 = vpop.f32.mrb[103].mxu0  ;;  %v21668_v7 = vld [vmem:[%s27056_s3 + $0x1b8] sm:$0xff]   ;;  %v11936_v50 = vsel %vm7518_vm1, %v27403_v23, %v11935_v44  ;;  %v25777_v21 = vrot.slane %v27160_v58, 1  ;;  %v25780_v37 = vadd.f32 %v25461_v56, %v9167_v62  ;;  %v13375_v51 = vsel %vm13346_vm15, %v13366_v35, %v25748_v5  ;;  %v27404_v26 = vld [vmem:[#allocation23_spill] sm:$0xff]  ;;  %v27405_v47 = vld [vmem:[#allocation14_spill] sm:$0xff]  ;;  %v18837_v12 = vpop.f32.mrb[132].mxu1 }
 0x3bf   : > { %19316 = vmatpush3.bf16.msra.mxu1 %v21664_v17  ;;  %12177 = vmatprep.mubr.bf16.mxu1 %v12001_v13  ;;  %v13353_v17 = vrot.slane %v13351_v57, 2  ;;  %v13355_v41 = vrot.slane %v27404_v26, 1  ;;  %v13356_v13 = vrot.slane %v27405_v47, 2  ;;  %v27406_v32 = vshrl.u32 %v25195_v43, 16  ;;  %v18838_v57 = vpop.f32.mrb[133].mxu1  ;;  %v21672_v47 = vld [vmem:[%s27056_s3 + $0x280] sm:$0xff]  }
 0x3c0   : > { %19317 = vmatprep.subr.bf16.mxu1 %v21667_v55  ;;  %19515 = vmatprep.subr.bf16.mxu0 %v21669_v39  ;;  %v27407_v55 = vshll.u32 %v25195_v43, 16  ;;  %v13310_v62 = vsel %vm7518_vm1, %v25302_v33, %v25777_v21  ;;  %v25797_v49 = vadd.f32 %v25485_v31, %v9168_v45  ;;  %v12020_v35 = vshrl.u32 %v11936_v50, 16  ;;  %v18840_v26 = vpop.f32.mrb[134].mxu1 }
 0x3c1   : > { %13008 = vmatmul.mubr.bf16.gmra.mrb[208].mxu0 %v12844_v10  ;;  %v13383_v56 = vrot.slane %v27406_v32, 1  ;;  %v21674_v10 = vld [vmem:[%s27056_s3 + $0x438] sm:$0xff]   ;;  %v12023_v46 = vshll.u32 %v11936_v50, 16  ;;  %v27162_v23 = vshrl.u32 %v25686_v42, 16  ;;  %v18839_v43 = vadd.f32 %v18838_v57, %v18837_v12  ;;  %v21675_v50 = vld [vmem:[%s27056_s3 + $0x2c8] sm:$0xff]   ;;  %v21677_v12 = vld [vmem:[%s27056_s3 + $0x540] sm:$0xff]  }
 0x3c2   : > { %v13386_v39 = vrot.slane %v27407_v55, 2  ;;  %19516 = vmatpush3.bf16.msra.mxu0 %v21670_v4  ;;  %13551 = vmatprep.mubr.bf16.mxu0 %v13375_v51  ;;  %v12014_v31 = vsel %vm11972_vm8, %v25697_v63, %v25752_v52  ;;  %v18841_v4 = vpop.f32.mrb[135].mxu1  ;;  %v18969_v45 = vpop.f32.mrb[104].mxu0  ;;  %v13354_v51 = vor.u32 %v13353_v17, %v25764_v53  ;;  %v13397_v58 = vshll.u32 %v13310_v62, 16  ;;  %v27408_v53 = vld [vmem:[#allocation43_spill] sm:$0xff] }
 0x3c3   : > { %19318 = vmatpush3.bf16.msra.mxu1 %v21668_v7  ;;  %19517 = vmatprep.subr.bf16.mxu0 %v21673_v18  ;;  %v25813_v7 = vor.u32 %v13356_v13, %v13355_v41  ;;  %v13394_v18 = vshrl.u32 %v13310_v62, 16  ;;  %v25820_v32 = vor.u32 %v27162_v23, %v11935_v44  ;;  %v9169_v63 = vadd.f32 %v18839_v43, %v25483_v27  ;;  %v18970_v55 = vpop.f32.mrb[105].mxu0  ;;  %v21678_v41 = vld [vmem:[%s27056_s3 + $0x500] sm:$0xff]   ;;  %v21681_v62 = vld [vmem:[%s27056_s3 + $0x548] sm:$0xff]  }
 0x3c4   : > { %19383 = vmatprep.subr.bf16.mxu1 %v21671_v48  ;;  %v18842_v48 = vadd.f32 %v18841_v4, %v18840_v26  ;;  %v25823_v57 = vor.u32 %v13386_v39, %v13383_v56  ;;  %v25825_v6 = vadd.f32 %v18970_v55, %v18969_v45  ;;  %v18972_v17 = vpop.f32.mrb[106].mxu0  ;;  %v12022_v13 = vrot.slane %v12020_v35, 3  ;;  %v21676_v39 = vld [vmem:[%s27056_s3 + $0x288] sm:$0xff]   ;;  %v21679_v26 = vld [vmem:[%s27056_s3 + $0x2d0] sm:$0xff]  }
 0x3c5   : > { %v12025_v44 = vrot.slane %v12023_v46, 4  ;;  %v13311_v23 = vshrl.u32 %v25718_v1, 16  ;;  %v18973_v56 = vpop.f32.mrb[107].mxu0  ;;  %v25841_v35 = vadd.f32 %v25529_v9, %v9169_v63  ;;  %v25854_v45 = vld [vmem:[#allocation3 + $0x30] sm:$0xfc] }
 0x3c6   : > { %12178 = vmatmul.mubr.bf16.vlgmr.msra.gmra.mrb[240].mxu1 %v27408_v53  ;;  %19518 = vmatpush3.bf16.msra.mxu0 %v21674_v10  ;;  %v9170_v27 = vadd.f32 %v18842_v48, %v25500_v11  ;;  %v27409_v10 = vld [vmem:[#allocation42_spill] sm:$0xff]  ;;  %v25843_v46 = vadd.f32 %v18973_v56, %v18972_v17  ;;  %v13358_v11 = vsel %vm13346_vm15, %v13354_v51, %v25813_v7  ;;  %v18843_v9 = vpop.f32.mrb[136].mxu1  ;;  %v13396_v51 = vrot.slane %v13394_v18, 1 }
 0x3c7   : > { %19384 = vmatpush3.bf16.msra.mxu1 %v21672_v47  ;;  %12185 = vmatprep.mubr.bf16.mxu1 %v12014_v31  ;;  %v13376_v43 = vrot.slane %v27409_v10, 1  ;;  %v27410_v47 = vld [vmem:[#allocation24_spill] sm:$0xff]  ;;  %v13313_v4 = vor.u32 %v13311_v23, %v25777_v21  ;;  %v18844_v48 = vpop.f32.mrb[137].mxu1  ;;  %v25862_v55 = vor.u32 %v12025_v44, %v12022_v13  ;;  %v21682_v21 = vld [vmem:[%s27056_s3 + $0x508] sm:$0xff]   ;;  %v12033_v53 = vshrl.u32 %v25820_v32, 16 }
 0x3c8   : > { %19385 = vmatprep.subr.bf16.mxu1 %v21675_v50  ;;  %19583 = vmatprep.subr.bf16.mxu0 %v21677_v12  ;;  %v13377_v31 = vrot.slane %v27410_v47, 2  ;;  %v13388_v50 = vsel %vm13346_vm15, %v25748_v5, %v25823_v57  ;;  %v13399_v12 = vrot.slane %v13397_v58, 2  ;;  %v25860_v63 = vadd.f32 %v25556_v34, %v9170_v27  ;;  %v18846_v5 = vpop.f32.mrb[138].mxu1  ;;  %v21680_v34 = vld [vmem:[%s27056_s3 + $0x290] sm:$0xff]   ;;  %v21683_v13 = vld [vmem:[%s27056_s3 + $0x2d8] sm:$0xff]  }
 0x3c9   : > { %13552 = vmatmul.mubr.bf16.vlgmr.msra.gmra.mrb[212].mxu0 %v13358_v11  ;;  %v12036_v17 = vshll.u32 %v25820_v32, 16  ;;  %v18845_v56 = vadd.f32 %v18844_v48, %v18843_v9  ;;  %v12508_v58 = vshll.u32 %v25854_v45, 16  ;;  %v18847_v18 = vpop.f32.mrb[139].mxu1  ;;  %v21685_v32 = vld [vmem:[%s27056_s3 + $0x550] sm:$0xff]   ;;  %v13407_v27 = vshrl.u32 %v13313_v4, 16 }
 0x3ca   : > { %13559 = vmatprep.mubr.bf16.mxu0 %v13388_v50  ;;  %19584 = vmatpush3.bf16.msra.mxu0 %v21678_v41  ;;  %v18975_v41 = vpop.f32.mrb[108].mxu0  ;;  %v25876_v44 = vor.u32 %v13377_v31, %v13376_v43  ;;  %v18848_v10 = vadd.f32 %v18847_v18, %v18846_v5  ;;  %v25882_v11 = vor.u32 %v13399_v12, %v13396_v51  ;;  %v13410_v47 = vshll.u32 %v13313_v4, 16  ;;  %v21686_v31 = vld [vmem:[%s27056_s3 + $0x510] sm:$0xff]   ;;  %v21684_v12 = vld [vmem:[%s27056_s3 + $0x298] sm:$0xff]  }
 0x3cb   : > { %19386 = vmatpush3.bf16.msra.mxu1 %v21676_v39  ;;  %19585 = vmatprep.subr.bf16.mxu0 %v21681_v62  ;;  %v9171_v39 = vadd.f32 %v18845_v56, %v25554_v2  ;;  %v18976_v62 = vpop.f32.mrb[109].mxu0  ;;  %v12027_v43 = vsel %vm11972_vm8, %v25752_v52, %v25862_v55  ;;  %v12035_v2 = vrot.slane %v12033_v53, 3  ;;  %v12038_v48 = vrot.slane %v12036_v17, 4  ;;  %v21689_v52 = vld [vmem:[%s27056_s3 + $0x558] sm:$0xff]   ;;  %v21687_v53 = vld [vmem:[%s27056_s3 + $0x2e0] sm:$0xff]  }
 0x3cc   : > { %19387 = vmatprep.subr.bf16.mxu1 %v21679_v26  ;;  %v25884_v9 = vadd.f32 %v18976_v62, %v18975_v41  ;;  %v27411_v26 = vld [vmem:[#allocation31_spill] sm:$0xff]  ;;  %v18978_v50 = vpop.f32.mrb[110].mxu0  ;;  %v9172_v51 = vadd.f32 %v18848_v10, %v25574_v19  ;;  %v13379_v19 = vsel %vm13346_vm15, %v25813_v7, %v25876_v44  ;;  %v13389_v17 = vrot.slane %v25265_v3, 1  ;;  %v21690_v3 = vld [vmem:[%s27056_s3 + $0x518] sm:$0xff]  }
 0x3cd   : > { %v18979_v4 = vpop.f32.mrb[111].mxu0  ;;  %v25901_v56 = vadd.f32 %v25605_v22, %v9171_v39  ;;  %v13401_v22 = vsel %vm13346_vm15, %v25823_v57, %v25882_v11  ;;  %v13409_v18 = vrot.slane %v13407_v27, 1  ;;  %v13412_v41 = vrot.slane %v13410_v47, 2  ;;  %v21688_v57 = vld [vmem:[%s27056_s3 + $0x2a0] sm:$0xff]   ;;  %v21691_v62 = vld [vmem:[%s27056_s3 + $0x2e8] sm:$0xff]  }
 0x3ce   : > { %12186 = vmatmul.mubr.bf16.gmra.mrb[244].mxu1 %v27411_v26  ;;  %19586 = vmatpush3.bf16.msra.mxu0 %v21682_v21  ;;  %v12510_v21 = vrot.slane %v12508_v58, 1  ;;  %v25903_v5 = vadd.f32 %v18979_v4, %v18978_v50  ;;  %v18849_v58 = vpop.f32.mrb[140].mxu1  ;;  %v21693_v26 = vld [vmem:[%s27056_s3 + $0x560] sm:$0xff]   ;;  %v27412_v50 = vshll.u32 %v25686_v42, 16 }
 0x3cf   : > { %19388 = vmatpush3.bf16.msra.mxu1 %v21680_v34  ;;  %12193 = vmatprep.mubr.bf16.mxu1 %v12027_v43  ;;  %v13390_v34 = vrot.slane %v25136_v28, 2  ;;  %v18850_v7 = vpop.f32.mrb[141].mxu1  ;;  %v12506_v28 = vshrl.u32 %v25854_v45, 16  ;;  %v13413_v4 = vor.u32 %v13412_v41, %v13409_v18 }
 0x3d0   : > { %19389 = vmatprep.subr.bf16.mxu1 %v21683_v13  ;;  %19587 = vmatprep.subr.bf16.mxu0 %v21685_v32  ;;  %v25917_v13 = vadd.f32 %v25627_v8, %v9172_v51  ;;  %v12039_v32 = vor.u32 %v12038_v48, %v12035_v2  ;;  %v18851_v39 = vadd.f32 %v18850_v7, %v18849_v58  ;;  %v18852_v10 = vpop.f32.mrb[142].mxu1  ;;  %v12029_v43 = vrot.slane %v27412_v50, 4 }
 0x3d1   : > { %13560 = vmatmul.mubr.bf16.gmra.mrb[216].mxu0 %v13379_v19  ;;  %v18853_v8 = vpop.f32.mrb[143].mxu1  ;;  %v25929_v47 = vor.u32 %v13390_v34, %v13389_v17 }
 0x3d2   : > { %13567 = vmatprep.mubr.bf16.mxu0 %v13401_v22  ;;  %19588 = vmatpush3.bf16.msra.mxu0 %v21686_v31  ;;  %v18981_v27 = vpop.f32.mrb[112].mxu0  ;;  %v12511_v31 = vor.u32 %v12510_v21, %v12506_v28  ;;  %v9173_v2 = vadd.f32 %v18851_v39, %v25625_v54  ;;  %v18854_v48 = vadd.f32 %v18853_v8, %v18852_v10  ;;  %v21694_v21 = vld [vmem:[%s27056_s3 + $0x520] sm:$0xff]   ;;  %v25947_v54 = vld [vmem:[#allocation3 + $0x48] sm:$0xff] }
 0x3d3   : > { %19390 = vmatpush3.bf16.msra.mxu1 %v21684_v12  ;;  %19589 = vmatprep.subr.bf16.mxu0 %v21689_v52  ;;  %v18982_v51 = vpop.f32.mrb[113].mxu0  ;;  %v27413_v12 = vshrl.u32 %v25686_v42, 16  ;;  %v12040_v34 = vsel %vm11972_vm8, %v25862_v55, %v12039_v32  ;;  %v21692_v22 = vld [vmem:[%s27056_s3 + $0x2a8] sm:$0xff]   ;;  %v21695_v32 = vld [vmem:[%s27056_s3 + $0x2f0] sm:$0xff]   ;;  %v13414_v39 = vsel %vm13346_vm15, %v25882_v11, %v13413_v4 }
 0x3d4   : > { %19391 = vmatprep.subr.bf16.mxu1 %v21687_v53  ;;  %v25939_v19 = vadd.f32 %v18982_v51, %v18981_v27  ;;  %v27414_v53 = vld [vmem:[#allocation21_spill] sm:$0xff]  ;;  %v18984_v17 = vpop.f32.mrb[114].mxu0  ;;  %v9174_v58 = vadd.f32 %v18854_v48, %v25645_v38  ;;  %v21697_v55 = vld [vmem:[%s27056_s3 + $0x568] sm:$0xff]   ;;  %v12516_v18 = vsel %vm7518_vm1, %v12511_v31, %v25384_v25  ;;  %v25959_v41 = vadd.f32 %v25677_v59, %v9173_v2  ;;  %v21696_v11 = vld [vmem:[%s27056_s3 + $0x2b0] sm:$0xff]  }
 0x3d5   : > { %v12028_v52 = vrot.slane %v27413_v12, 3  ;;  %v18985_v42 = vpop.f32.mrb[115].mxu0  ;;  %v13392_v38 = vsel %vm13346_vm15, %v25876_v44, %v25929_v47  ;;  %v27415_v25 = vshll.u32 %v25718_v1, 16  ;;  %v12585_v27 = vrot.slane %v25444_v29, 2  ;;  %v21698_v1 = vld [vmem:[%s27056_s3 + $0x528] sm:$0xff]   ;;  %v21701_v2 = vld [vmem:[%s27056_s3 + $0x570] sm:$0xff]  }
 0x3d6   : > { %12194 = vmatmul.mubr.bf16.gmra.mrb[248].mxu1 %v27414_v53  ;;  %19590 = vmatpush3.bf16.msra.mxu0 %v21690_v3  ;;  %v25961_v7 = vadd.f32 %v18985_v42, %v18984_v17  ;;  %v13402_v3 = vrot.slane %v13311_v23, 1  ;;  %v18855_v59 = vpop.f32.mrb[144].mxu1  ;;  %v25977_v44 = vadd.f32 %v25704_v16, %v9174_v58  ;;  %v12584_v50 = vrot.slane %v12516_v18, 2  ;;  %v27416_v4 = vld [vmem:[#allocation19_spill] sm:$0xff]  ;;  %v21700_v58 = vld [vmem:[%s27056_s3 + $0x2b8] sm:$0xff]  }
 0x3d7   : > { %19392 = vmatpush3.bf16.msra.mxu1 %v21688_v57  ;;  %12201 = vmatprep.mubr.bf16.mxu1 %v12040_v34  ;;  %v13403_v28 = vrot.slane %v27415_v25, 2  ;;  %v12030_v10 = vor.u32 %v12029_v43, %v12028_v52  ;;  %v13886_v57 = vshll.u32 %v25947_v54, 16  ;;  %v18856_v8 = vpop.f32.mrb[145].mxu1  ;;  %v21699_v43 = vld [vmem:[%s27056_s3 + $0x2f8] sm:$0xff]   ;;  %v21708_v29 = vld [vmem:[%s27056_s3 + $0x388] sm:$0xff]  }
 0x3d8   : > { %19393 = vmatprep.subr.bf16.mxu1 %v21691_v62  ;;  %19591 = vmatprep.subr.bf16.mxu0 %v21693_v26  ;;  %v18857_v23 = vadd.f32 %v18856_v8, %v18855_v59  ;;  %v18858_v62 = vpop.f32.mrb[146].mxu1  ;;  %v12586_v34 = vsel %vm8076_vm7, %v12584_v50, %v12585_v27  ;;  %v21705_v42 = vld [vmem:[%s27056_s3 + $0x578] sm:$0xff]   ;;  %v12589_v59 = vrot.slane %v25509_v60, 2  ;;  %v21704_v8 = vld [vmem:[%s27056_s3 + $0x380] sm:$0xff]  }
 0x3d9   : > { %13568 = vmatmul.mubr.bf16.gmra.mrb[220].mxu0 %v13392_v38  ;;  %v18859_v26 = vpop.f32.mrb[147].mxu1  ;;  %v13404_v31 = vor.u32 %v13403_v28, %v13402_v3  ;;  %v12031_v12 = vsel %vm11972_vm8, %v27416_v4, %v12030_v10  ;;  %v25995_v52 = vrot.slane %v13886_v57, 1  ;;  %v21703_v38 = vld [vmem:[%s27056_s3 + $0x3c0] sm:$0xff]   ;;  %v21707_v62 = vld [vmem:[%s27056_s3 + $0x3c8] sm:$0xff]   ;;  %v21721_v60 = vld [vmem:[%s27056_s3 + $0x658] sm:$0xff]  }
 0x3da   : > { %13575 = vmatprep.mubr.bf16.mxu0 %v13414_v39  ;;  %19592 = vmatpush3.bf16.msra.mxu0 %v21694_v21  ;;  %v18987_v16 = vpop.f32.mrb[116].mxu0  ;;  %v9175_v48 = vadd.f32 %v18857_v23, %v25702_v14  ;;  %v21702_v21 = vld [vmem:[%s27056_s3 + $0x530] sm:$0xff]   ;;  %v27417_v25 = vld [vmem:[#allocation17_spill] sm:$0xff]  ;;  %v12581_v39 = vrot.slane %v25854_v45, 2  ;;  %v13890_v45 = vshrl.u32 %v25947_v54, 16 }
 0x3db   : > { %19394 = vmatpush3.bf16.msra.mxu1 %v21692_v22  ;;  %19593 = vmatprep.subr.bf16.mxu0 %v21697_v55  ;;  %v18988_v51 = vpop.f32.mrb[117].mxu0  ;;  %v13405_v18 = vsel %vm13346_vm15, %v25929_v47, %v13404_v31  ;;  %v21706_v47 = vld [vmem:[%s27056_s3 + $0x538] sm:$0xff]  }
 0x3dc   : > { %19395 = vmatprep.subr.bf16.mxu1 %v21695_v32  ;;  %v25997_v53 = vadd.f32 %v18988_v51, %v18987_v16  ;;  %v18990_v17 = vpop.f32.mrb[118].mxu0  ;;  %v26012_v22 = vadd.f32 %v25756_v15, %v9175_v48  ;;  %v12537_v32 = vshll.u32 %v25699_v36, 16  ;;  %v13889_v15 = vsel %vm7518_vm1, %v27417_v25, %v25995_v52 }
 0x3dd   : > { %v18991_v14 = vpop.f32.mrb[119].mxu0  ;;  %v21907_v51 = vmov 0.0  }
 0x3de   : > { %12202 = vmatmul.mubr.bf16.gmra.mrb[252].mxu1 %v12031_v12  ;;  %19594 = vmatpush3.bf16.msra.mxu0 %v21698_v1  ;;  %v26014_v55 = vadd.f32 %v18991_v14, %v18990_v17  ;;  %v18923_v3 = vpop.f32.mrb[148].mxu1  ;;  %v12539_v48 = vrot.slane %v12537_v32, 1  ;;  %387 = vst [vmem:[#allocation4 + $0x88] sm:$0xff] %v21907_v51  ;;  %v13892_v17 = vor.u32 %v13890_v45, %v25995_v52  ;;  %v26075_v32 = vld [vmem:[#allocation3 + $0x40] sm:$0xff] }
 0x3df   : > { %19396 = vmatpush3.bf16.msra.mxu1 %v21696_v11  ;;  %12735 = vmatprep.mubr.bf16.mxu1 %v12586_v34  ;;  %v18924_v28 = vpop.f32.mrb[149].mxu1  ;;  %v21709_v11 = vld [vmem:[%s27056_s3 + $0x640] sm:$0xff]  }
 0x3e0   : > { %19397 = vmatprep.subr.bf16.mxu1 %v21699_v43  ;;  %19595 = vmatprep.subr.bf16.mxu0 %v21701_v2  ;;  %v18925_v10 = vadd.f32 %v18924_v28, %v18923_v3  ;;  %v18926_v57 = vpop.f32.mrb[150].mxu1  ;;  %v27418_v43 = vld [vmem:[#allocation16_spill] sm:$0xff]  ;;  %v21710_v34 = vld [vmem:[%s27056_s3 + $0x600] sm:$0xff]   ;;  %v26080_v3 = vsel %vm7518_vm1, %v13892_v17, %v25160_v0  ;;  %v21714_v28 = vld [vmem:[%s27056_s3 + $0x608] sm:$0xff]  }
 0x3e1   : > { %13576 = vmatmul.mubr.bf16.gmra.mrb[224].mxu0 %v13405_v18  ;;  %v18927_v1 = vpop.f32.mrb[151].mxu1  ;;  %v27419_v31 = vrot.slane %v27418_v43, 2  ;;  %v21712_v0 = vld [vmem:[%s27056_s3 + $0x390] sm:$0xff]  }
 0x3e2   : > { %19596 = vmatpush3.bf16.msra.mxu0 %v21702_v21  ;;  %14078 = vmatprep.mubr.bf16.mxu0 %v13889_v15  ;;  %v18993_v23 = vpop.f32.mrb[120].mxu0  ;;  %v9664_v26 = vadd.f32 %v18925_v10, %v25780_v37  ;;  %v18928_v16 = vadd.f32 %v18927_v1, %v18926_v57  ;;  %v12590_v37 = vsel %vm8076_vm7, %v12585_v27, %v12589_v59  ;;  %v26056_v21 = vld [vmem:[#allocation3 + $0x58] sm:$0xff]  ;;  %v21713_v27 = vld [vmem:[%s27056_s3 + $0x648] sm:$0xff]   ;;  %v12541_v1 = vshrl.u32 %v25699_v36, 16  ;;  %v21718_v36 = vld [vmem:[%s27056_s3 + $0x610] sm:$0xff]  }
 0x3e3   : > { %19398 = vmatpush3.bf16.msra.mxu1 %v21700_v58  ;;  %19597 = vmatprep.subr.bf16.mxu0 %v21705_v42  ;;  %v18994_v50 = vpop.f32.mrb[121].mxu0  ;;  %v12583_v2 = vsel %vm8076_vm7, %v12581_v39, %v27419_v31  ;;  %v26067_v42 = vsel %vm7518_vm1, %v27384_v30, %v12539_v48  ;;  %v13902_v30 = vshll.u32 %v26056_v21, 16  ;;  %v21715_v57 = vld [vmem:[%s27056_s3 + $0x3d8] sm:$0xff]  }
 0x3e4   : > { %19463 = vmatprep.subr.bf16.mxu1 %v21703_v38  ;;  %v26045_v4 = vadd.f32 %v18994_v50, %v18993_v23  ;;  %v18996_v12 = vpop.f32.mrb[122].mxu0  ;;  %v9665_v14 = vadd.f32 %v18928_v16, %v25797_v49  ;;  %v26070_v18 = vadd.f32 %v25825_v6, %v9664_v26  ;;  %v21711_v49 = vld [vmem:[%s27056_s3 + $0x3d0] sm:$0xff]   ;;  %v12593_v15 = vrot.slane %v26067_v42, 2  ;;  %v27420_v16 = vld [vmem:[#allocation26_spill] sm:$0xff] }
 0x3e5   : > { %v18997_v58 = vpop.f32.mrb[123].mxu0  ;;  %v13904_v45 = vrot.slane %v13902_v30, 1  ;;  %v21729_v42 = vld [vmem:[%s27056_s3 + $0x668] sm:$0xff]  }
 0x3e6   : > { %12736 = vmatmul.mubr.bf16.vlgmr.msra.gmra.mrb[0].mxu1 %v12583_v2  ;;  %19598 = vmatpush3.bf16.msra.mxu0 %v21706_v47  ;;  %v18929_v38 = vpop.f32.mrb[152].mxu1  ;;  %v26084_v6 = vadd.f32 %v25843_v46, %v9665_v14  ;;  %v12594_v31 = vsel %vm8076_vm7, %v12589_v59, %v12593_v15 }
 0x3e7   : > { %19464 = vmatpush3.bf16.msra.mxu1 %v21704_v8  ;;  %12743 = vmatprep.mubr.bf16.mxu1 %v12590_v37  ;;  %v18930_v25 = vpop.f32.mrb[153].mxu1  ;;  %v21717_v8 = vld [vmem:[%s27056_s3 + $0x650] sm:$0xff]   ;;  %v21716_v37 = vld [vmem:[%s27056_s3 + $0x398] sm:$0xff]   ;;  %v26134_v58 = vsel %vm7518_vm1, %v25302_v33, %v13904_v45  ;;  %v21720_v33 = vld [vmem:[%s27056_s3 + $0x3a0] sm:$0xff]  }
 0x3e8   : > { %19465 = vmatprep.subr.bf16.mxu1 %v21707_v62  ;;  %19663 = vmatprep.subr.bf16.mxu0 %v21709_v11  ;;  %v18931_v47 = vadd.f32 %v18930_v25, %v18929_v38  ;;  %v18932_v39 = vpop.f32.mrb[154].mxu1 }
 0x3e9   : > { %14079 = vmatmul.mubr.bf16.vlgmr.msra.gmra.mrb[228].mxu0 %v26075_v32  ;;  %v18933_v46 = vpop.f32.mrb[155].mxu1 }
 0x3ea   : > { %14086 = vmatprep.mubr.bf16.mxu0 %v26080_v3  ;;  %19664 = vmatpush3.bf16.msra.mxu0 %v21710_v34  ;;  %v19061_v10 = vpop.f32.mrb[124].mxu0  ;;  %v9666_v23 = vadd.f32 %v18931_v47, %v25841_v35  ;;  %v18934_v62 = vadd.f32 %v18933_v46, %v18932_v39  ;;  %v12543_v35 = vor.u32 %v12541_v1, %v12539_v48  ;;  %v12591_v48 = vrot.slane %v25668_v61, 2  ;;  %v26129_v34 = vld [vmem:[#allocation3 + $0x60] sm:$0x1] }
 0x3eb   : > { %19466 = vmatpush3.bf16.msra.mxu1 %v21708_v29  ;;  %19665 = vmatprep.subr.bf16.mxu0 %v21713_v27  ;;  %v19062_v11 = vpop.f32.mrb[125].mxu0  ;;  %v13910_v25 = vshll.u32 %v26129_v34, 16 }
 0x3ec   : > { %19467 = vmatprep.subr.bf16.mxu1 %v21711_v49  ;;  %v26102_v26 = vadd.f32 %v19062_v11, %v19061_v10  ;;  %v19064_v50 = vpop.f32.mrb[126].mxu0  ;;  %v9667_v2 = vadd.f32 %v18934_v62, %v25860_v63  ;;  %v26121_v59 = vadd.f32 %v25884_v9, %v9666_v23  ;;  %v21719_v63 = vld [vmem:[%s27056_s3 + $0x3e0] sm:$0xff]   ;;  %v12597_v27 = vrot.slane %v12543_v35, 2  ;;  %v21722_v49 = vld [vmem:[%s27056_s3 + $0x618] sm:$0xff]  }
 0x3ed   : > { %v19065_v12 = vpop.f32.mrb[127].mxu0  ;;  %v21726_v35 = vld [vmem:[%s27056_s3 + $0x620] sm:$0xff]  }
 0x3ee   : > { %12744 = vmatmul.mubr.bf16.gmra.mrb[4].mxu1 %v27420_v16  ;;  %19666 = vmatpush3.bf16.msra.mxu0 %v21714_v28  ;;  %v26123_v17 = vadd.f32 %v19065_v12, %v19064_v50  ;;  %v18935_v14 = vpop.f32.mrb[156].mxu1  ;;  %v26137_v9 = vadd.f32 %v25903_v5, %v9667_v2  ;;  %v13906_v5 = vshrl.u32 %v26056_v21, 16  ;;  %v13036_v28 = vrot.slane %v26075_v32, 5 }
 0x3ef   : > { %19468 = vmatpush3.bf16.msra.mxu1 %v21712_v0  ;;  %12751 = vmatprep.mubr.bf16.mxu1 %v12594_v31  ;;  %v18936_v29 = vpop.f32.mrb[157].mxu1  ;;  %v27421_v0 = vld [vmem:[#allocation22_spill] sm:$0xff]  ;;  %v13035_v16 = vrot.slane %v25675_v20, 5  ;;  %v13912_v12 = vrot.slane %v13910_v25, 1  ;;  %v21728_v25 = vld [vmem:[%s27056_s3 + $0x3b0] sm:$0xff]  }
 0x3f0   : > { %19469 = vmatprep.subr.bf16.mxu1 %v21715_v57  ;;  %19667 = vmatprep.subr.bf16.mxu0 %v21717_v8  ;;  %v18937_v38 = vadd.f32 %v18936_v29, %v18935_v14  ;;  %v18938_v30 = vpop.f32.mrb[158].mxu1  ;;  %v27422_v46 = vrot.slane %v27421_v0, 2  ;;  %v21723_v57 = vld [vmem:[%s27056_s3 + $0x3e8] sm:$0xff]   ;;  %v21725_v8 = vld [vmem:[%s27056_s3 + $0x660] sm:$0xff]   ;;  %v26161_v11 = vor.u32 %v13906_v5, %v13904_v45  ;;  %v26192_v14 = vld [vmem:[#allocation3 + $0x50] sm:$0xff] }
 0x3f1   : > { %14087 = vmatmul.mubr.bf16.gmra.mrb[232].mxu0 %v25668_v61  ;;  %v18939_v47 = vpop.f32.mrb[159].mxu1  ;;  %v21724_v20 = vld [vmem:[%s27056_s3 + $0x3a8] sm:$0xff]  }
 0x3f2   : > { %14094 = vmatprep.mubr.bf16.mxu0 %v26134_v58  ;;  %19668 = vmatpush3.bf16.msra.mxu0 %v21718_v36  ;;  %v19067_v39 = vpop.f32.mrb[128].mxu0  ;;  %v12592_v10 = vsel %vm8076_vm7, %v27422_v46, %v12591_v48  ;;  %v9668_v1 = vadd.f32 %v18937_v38, %v25901_v56  ;;  %v18940_v23 = vadd.f32 %v18939_v47, %v18938_v30  ;;  %v12503_v56 = vld [vmem:[#allocation3 + $0x50] sm:$0x3]  ;;  %v21730_v30 = vld [vmem:[%s27056_s3 + $0x628] sm:$0xff]   ;;  %v14369_v47 = vld [vmem:[#allocation3 + $0x40] sm:$0xfc] }
 0x3f3   : > { %19470 = vmatpush3.bf16.msra.mxu1 %v21716_v37  ;;  %19669 = vmatprep.subr.bf16.mxu0 %v21721_v60  ;;  %v19068_v62 = vpop.f32.mrb[129].mxu0  ;;  %v12598_v36 = vsel %vm8076_vm7, %v12593_v15, %v12597_v27  ;;  %v26182_v15 = vsel %vm8029_vm6, %v13035_v16, %v13036_v28  ;;  %v21727_v60 = vld [vmem:[%s27056_s3 + $0x3f0] sm:$0xff]   ;;  %v13913_v29 = vsel %vm7518_vm1, %v26161_v11, %v13912_v12  ;;  %v12595_v27 = vrot.slane %v12503_v56, 2  ;;  %v21737_v12 = vld [vmem:[%s27056_s3 + $0x678] sm:$0xff]  }
 0x3f4   : > { %19471 = vmatprep.subr.bf16.mxu1 %v21719_v63  ;;  %v26164_v50 = vadd.f32 %v19068_v62, %v19067_v39  ;;  %v19070_v31 = vpop.f32.mrb[130].mxu0  ;;  %v9669_v2 = vadd.f32 %v18940_v23, %v25917_v13  ;;  %v26185_v37 = vadd.f32 %v25939_v19, %v9668_v1  ;;  %v13082_v38 = vrot.slane %v26182_v15, 4 }
 0x3f5   : > { %v19071_v45 = vpop.f32.mrb[131].mxu0 }
 0x3f6   : > { %12752 = vmatmul.mubr.bf16.gmra.mrb[8].mxu1 %v12592_v10  ;;  %19670 = vmatpush3.bf16.msra.mxu0 %v21722_v49  ;;  %v26187_v13 = vadd.f32 %v19071_v45, %v19070_v31  ;;  %v18941_v63 = vpop.f32.mrb[160].mxu1  ;;  %v26198_v19 = vadd.f32 %v25961_v7, %v9669_v2  ;;  %v13038_v7 = vrot.slane %v25668_v61, 5  ;;  %v13081_v10 = vrot.slane %v13035_v16, 4  ;;  %v21732_v45 = vld [vmem:[%s27056_s3 + $0x3b8] sm:$0xff]  }
 0x3f7   : > { %19472 = vmatpush3.bf16.msra.mxu1 %v21720_v33  ;;  %12759 = vmatprep.mubr.bf16.mxu1 %v12598_v36  ;;  %v18942_v49 = vpop.f32.mrb[161].mxu1  ;;  %v12596_v31 = vsel %vm8076_vm7, %v12591_v48, %v12595_v27  ;;  %v14405_v36 = vrot.slane %v25947_v54, 2  ;;  %v21743_v54 = vld [vmem:[%s27056_s3 + $0x4d8] sm:$0xff]  }
 0x3f8   : > { %19473 = vmatprep.subr.bf16.mxu1 %v21723_v57  ;;  %19671 = vmatprep.subr.bf16.mxu0 %v21725_v8  ;;  %v18943_v33 = vadd.f32 %v18942_v49, %v18941_v63  ;;  %v18944_v5 = vpop.f32.mrb[162].mxu1  ;;  %v21731_v57 = vld [vmem:[%s27056_s3 + $0x3f8] sm:$0xff]   ;;  %v21733_v8 = vld [vmem:[%s27056_s3 + $0x670] sm:$0xff]   ;;  %v13083_v56 = vsel %vm10409_vm11, %v13081_v10, %v13082_v38  ;;  %v21735_v63 = vld [vmem:[%s27056_s3 + $0x4c0] sm:$0xff]  }
 0x3f9   : > { %14095 = vmatmul.mubr.bf16.gmra.mrb[236].mxu0 %v26192_v14  ;;  %v18945_v39 = vpop.f32.mrb[163].mxu1  ;;  %v21739_v10 = vld [vmem:[%s27056_s3 + $0x4c8] sm:$0xff]  }
 0x3fa   : > { %14102 = vmatprep.mubr.bf16.mxu0 %v13913_v29  ;;  %19672 = vmatpush3.bf16.msra.mxu0 %v21726_v35  ;;  %v19073_v46 = vpop.f32.mrb[132].mxu0  ;;  %v9670_v1 = vadd.f32 %v18943_v33, %v25959_v41  ;;  %v18946_v23 = vadd.f32 %v18945_v39, %v18944_v5  ;;  %v21734_v41 = vld [vmem:[%s27056_s3 + $0x630] sm:$0xff]  }
 0x3fb   : > { %19474 = vmatpush3.bf16.msra.mxu1 %v21724_v20  ;;  %19673 = vmatprep.subr.bf16.mxu0 %v21729_v42  ;;  %v19074_v62 = vpop.f32.mrb[133].mxu0  ;;  %v14404_v20 = vrot.slane %v14369_v47, 2  ;;  %v26239_v42 = vsel %vm8029_vm6, %v13036_v28, %v13038_v7  ;;  %v13024_v29 = vld [vmem:[#allocation3 + $0x30] sm:$0xf0]  ;;  %v21736_v47 = vld [vmem:[%s27056_s3 + $0x480] sm:$0xff]  }
 0x3fc   : > { %19475 = vmatprep.subr.bf16.mxu1 %v21727_v60  ;;  %v26219_v35 = vadd.f32 %v19074_v62, %v19073_v46  ;;  %v19076_v16 = vpop.f32.mrb[134].mxu0  ;;  %v9671_v2 = vadd.f32 %v18946_v23, %v25977_v44  ;;  %v26242_v44 = vadd.f32 %v25997_v53, %v9670_v1  ;;  %v13086_v49 = vrot.slane %v26239_v42, 4 }
 0x3fd   : > { %v19077_v48 = vpop.f32.mrb[135].mxu0  ;;  %v14406_v32 = vsel %vm8076_vm7, %v14404_v20, %v14405_v36  ;;  %v27423_v1 = vrot.slane %v27418_v43, 4  ;;  %v14407_v62 = vrot.slane %v26192_v14, 2 }
 0x3fe   : > { %12760 = vmatmul.mubr.bf16.gmra.mrb[12].mxu1 %v12596_v31  ;;  %19674 = vmatpush3.bf16.msra.mxu0 %v21730_v30  ;;  %v26244_v60 = vadd.f32 %v19077_v48, %v19076_v16  ;;  %v18947_v27 = vpop.f32.mrb[164].mxu1  ;;  %v26254_v28 = vadd.f32 %v26014_v55, %v9671_v2  ;;  %v21738_v30 = vld [vmem:[%s27056_s3 + $0x638] sm:$0xff]   ;;  %v13040_v55 = vrot.slane %v26192_v14, 5  ;;  %v21741_v48 = vld [vmem:[%s27056_s3 + $0x4d0] sm:$0xff]  }
 0x3ff   : > { %19476 = vmatpush3.bf16.msra.mxu1 %v21728_v25  ;;  %13232 = vmatprep.mubr.bf16.mxu1 %v13083_v56  ;;  %v18948_v53 = vpop.f32.mrb[165].mxu1  ;;  %v13078_v25 = vrot.slane %v13024_v29, 4  ;;  %v13087_v56 = vsel %vm10409_vm11, %v13082_v38, %v13086_v49  ;;  %v14408_v61 = vsel %vm8076_vm7, %v14405_v36, %v14407_v62 }
 0x400   : > { %19477 = vmatprep.subr.bf16.mxu1 %v21731_v57  ;;  %19675 = vmatprep.subr.bf16.mxu0 %v21733_v8  ;;  %v18949_v33 = vadd.f32 %v18948_v53, %v18947_v27  ;;  %v18950_v5 = vpop.f32.mrb[166].mxu1  ;;  %v26286_v2 = vsel %vm8029_vm6, %v13038_v7, %v13040_v55 }
 0x401   : > { %14103 = vmatmul.mubr.bf16.gmra.mrb[240].mxu0 %v26056_v21  ;;  %v18951_v39 = vpop.f32.mrb[167].mxu1  ;;  %v13080_v23 = vsel %vm10409_vm11, %v13078_v25, %v27423_v1  ;;  %v27424_v25 = vld [vmem:[#allocation27_spill] sm:$0xff]  ;;  %v21745_v1 = vld [vmem:[%s27056_s3 + $0x4e0] sm:$0xff]  }
 0x402   : > { %19676 = vmatpush3.bf16.msra.mxu0 %v21734_v41  ;;  %14545 = vmatprep.mubr.bf16.mxu0 %v14406_v32  ;;  %v19079_v46 = vpop.f32.mrb[136].mxu0  ;;  %v9672_v57 = vadd.f32 %v18949_v33, %v26012_v22  ;;  %v21769_v22 = vld [vmem:[%s27058_s5] sm:$0xff]   ;;  %v21740_v41 = vld [vmem:[%s27056_s3 + $0x488] sm:$0xff]   ;;  %v14409_v33 = vrot.slane %v26056_v21, 2 }
 0x403   : > { %19478 = vmatpush3.bf16.msra.mxu1 %v21732_v45  ;;  %19677 = vmatprep.subr.bf16.mxu0 %v21737_v12  ;;  %v19080_v8 = vpop.f32.mrb[137].mxu0  ;;  %v13029_v45 = vld [vmem:[#allocation3 + $0x58] sm:$0x1] }
 0x404   : > { %19543 = vmatprep.subr.bf16.mxu1 %v21735_v63  ;;  %v26272_v31 = vadd.f32 %v19080_v8, %v19079_v46  ;;  %v19082_v16 = vpop.f32.mrb[138].mxu0  ;;  %v26289_v15 = vadd.f32 %v26045_v4, %v9672_v57  ;;  %v13090_v4 = vrot.slane %v26286_v2, 4  ;;  %v21742_v63 = vld [vmem:[%s27056_s3 + $0x490] sm:$0xff]   ;;  %v13042_v29 = vrot.slane %v13029_v45, 5  ;;  %v21746_v2 = vld [vmem:[%s27056_s3 + $0x4a0] sm:$0xff]  }
 0x405   : > { %v19083_v43 = vpop.f32.mrb[139].mxu0 }
 0x406   : > { %13233 = vmatmul.mubr.bf16.vlgmr.msra.gmra.mrb[16].mxu1 %v13080_v23  ;;  %19678 = vmatpush3.bf16.msra.mxu0 %v21738_v30  ;;  %v26291_v38 = vadd.f32 %v19083_v43, %v19082_v16  ;;  %v19015_v20 = vpop.f32.mrb[168].mxu1  ;;  %v13091_v39 = vsel %vm10409_vm11, %v13086_v49, %v13090_v4  ;;  %v13043_v57 = vsel %vm8029_vm6, %v13040_v55, %v13042_v29  ;;  %v21836_v23 = vld [vmem:[#allocation3 + $0x48] sm:$0xff]  ;;  %v26329_v43 = vld [vmem:[#allocation3 + $0x60] sm:$0x3] }
 0x407   : > { %19544 = vmatpush3.bf16.msra.mxu1 %v21736_v47  ;;  %13240 = vmatprep.mubr.bf16.mxu1 %v13087_v56  ;;  %v19016_v7 = vpop.f32.mrb[169].mxu1  ;;  %v13088_v16 = vrot.slane %v21836_v23, 4  ;;  %v13094_v55 = vrot.slane %v13043_v57, 4 }
 0x408   : > { %19545 = vmatprep.subr.bf16.mxu1 %v21739_v10  ;;  %20407 = vmatprep.subr.bf16.mxu0 %v21907_v51  ;;  %v19017_v12 = vadd.f32 %v19016_v7, %v19015_v20  ;;  %v19018_v42 = vpop.f32.mrb[170].mxu1  ;;  %v27425_v7 = vrot.slane %v27421_v0, 4 }
 0x409   : > { %14546 = vmatmul.mubr.bf16.vlgmr.msra.gmra.mrb[244].mxu0 %v14406_v32  ;;  %v19019_v27 = vpop.f32.mrb[171].mxu1 }
 0x40a   : > { %14553 = vmatprep.mubr.bf16.mxu0 %v14408_v61  ;;  %20408 = vmatpush3.bf16.msra.mxu0 %v21769_v22  ;;  %v19085_v32 = vpop.f32.mrb[140].mxu0  ;;  %v10315_v36 = vadd.f32 %v19017_v12, %v26070_v18  ;;  %v19020_v53 = vadd.f32 %v19019_v27, %v19018_v42  ;;  %v21744_v18 = vld [vmem:[%s27056_s3 + $0x498] sm:$0xff]   ;;  %v13089_v12 = vsel %vm10409_vm11, %v27425_v7, %v13088_v16  ;;  %v14411_v42 = vrot.slane %v26329_v43, 2 }
 0x40b   : > { %19546 = vmatpush3.bf16.msra.mxu1 %v21740_v41  ;;  %20419 = vmatprep.subr.bf16.mxu0 %v21907_v51  ;;  %v19086_v30 = vpop.f32.mrb[141].mxu0  ;;  %v13095_v27 = vsel %vm10409_vm11, %v13090_v4, %v13094_v55  ;;  %v21837_v4 = vld [vmem:[#allocation3 + $0x50] sm:$0xf] }
 0x40c   : > { %19547 = vmatprep.subr.bf16.mxu1 %v21741_v48  ;;  %v26310_v5 = vadd.f32 %v19086_v30, %v19085_v32  ;;  %v19088_v47 = vpop.f32.mrb[142].mxu0  ;;  %v10316_v46 = vadd.f32 %v19020_v53, %v26084_v6  ;;  %v26320_v8 = vadd.f32 %v26102_v26, %v10315_v36  ;;  %v14410_v6 = vsel %vm8076_vm7, %v14407_v62, %v14409_v33  ;;  %v21749_v53 = vld [vmem:[%s27056_s3 + $0x4f0] sm:$0xff]  }
 0x40d   : > { %v19089_v10 = vpop.f32.mrb[143].mxu0  ;;  %v13092_v30 = vrot.slane %v21837_v4, 4  ;;  %v27428_v4 = vld [vmem:[#allocation36_spill] sm:$0xff] }
 0x40e   : > { %13241 = vmatmul.mubr.bf16.gmra.mrb[20].mxu1 %v27424_v25  ;;  %v19021_v49 = vpop.f32.mrb[172].mxu1  ;;  %v26327_v56 = vadd.f32 %v26123_v17, %v10316_v46  ;;  %v21747_v17 = vld [vmem:[%s27056_s3 + $0x4e8] sm:$0xff]   ;;  %v14412_v25 = vsel %vm8076_vm7, %v14409_v33, %v14411_v42  ;;  %v21750_v10 = vld [vmem:[%s27056_s3 + $0x4b0] sm:$0xff]  }
 0x40f   : > { %19548 = vmatpush3.bf16.msra.mxu1 %v21742_v63  ;;  %13248 = vmatprep.mubr.bf16.mxu1 %v13091_v39  ;;  %v19022_v22 = vpop.f32.mrb[173].mxu1 }
 0x410   : > { %19549 = vmatprep.subr.bf16.mxu1 %v21743_v54  ;;  %v19023_v26 = vadd.f32 %v19022_v22, %v19021_v49  ;;  %v19024_v41 = vpop.f32.mrb[174].mxu1 }
 0x411   : > { %14554 = vmatmul.mubr.bf16.gmra.mrb[248].mxu0 %v14408_v61  ;;  %v19025_v48 = vpop.f32.mrb[175].mxu1 }
 0x412   : > { %14561 = vmatprep.mubr.bf16.mxu0 %v14410_v6  ;;  %v19153_v45 = vpop.f32.mrb[144].mxu0  ;;  %v10317_v62 = vadd.f32 %v19023_v26, %v26121_v59  ;;  %v19026_v20 = vadd.f32 %v19025_v48, %v19024_v41  ;;  %v21748_v59 = vld [vmem:[%s27056_s3 + $0x4a8] sm:$0xff]   ;;  %v27426_v26 = vld [vmem:[#allocation33_spill] sm:$0xff] }
 0x413   : > { %19550 = vmatpush3.bf16.msra.mxu1 %v21744_v18  ;;  %v19154_v61 = vpop.f32.mrb[145].mxu0 }
 0x414   : > { %19551 = vmatprep.subr.bf16.mxu1 %v21745_v1  ;;  %v26342_v63 = vadd.f32 %v19154_v61, %v19153_v45  ;;  %v19156_v29 = vpop.f32.mrb[146].mxu0  ;;  %v10318_v32 = vadd.f32 %v19026_v20, %v26137_v9  ;;  %v26350_v0 = vadd.f32 %v26164_v50, %v10317_v62  ;;  %v21751_v1 = vld [vmem:[%s27056_s3 + $0x4f8] sm:$0xff]   ;;  %v21754_v20 = vld [vmem:[%s27056_s3 + $0x580] sm:$0xff]  }
 0x415   : > { %v19157_v54 = vpop.f32.mrb[147].mxu0 }
 0x416   : > { %13249 = vmatmul.mubr.bf16.gmra.mrb[24].mxu1 %v13089_v12  ;;  %v26352_v36 = vadd.f32 %v19157_v54, %v19156_v29  ;;  %v19027_v9 = vpop.f32.mrb[176].mxu1  ;;  %v26359_v47 = vadd.f32 %v26187_v13, %v10318_v32  ;;  %v26395_v12 = vld [vmem:[#allocation3 + $0x58] sm:$0x7] }
 0x417   : > { %19552 = vmatpush3.bf16.msra.mxu1 %v21746_v2  ;;  %13256 = vmatprep.mubr.bf16.mxu1 %v13095_v27  ;;  %v19028_v39 = vpop.f32.mrb[177].mxu1  ;;  %v21752_v2 = vld [vmem:[%s27056_s3 + $0x4b8] sm:$0xff]   ;;  %v13607_v42 = vshrl.u32 %v26395_v12, 16 }
 0x418   : > { %19553 = vmatprep.subr.bf16.mxu1 %v21747_v17  ;;  %v19029_v50 = vadd.f32 %v19028_v39, %v19027_v9  ;;  %v19030_v46 = vpop.f32.mrb[178].mxu1 }
 0x419   : > { %14562 = vmatmul.mubr.bf16.gmra.mrb[252].mxu0 %v14410_v6  ;;  %v19031_v18 = vpop.f32.mrb[179].mxu1  ;;  %v13093_v6 = vsel %vm10409_vm11, %v13088_v16, %v13092_v30  ;;  %v21753_v16 = vld [vmem:[%s27056_s3 + $0x5c0] sm:$0xff]   ;;  %v13609_v30 = vor.u32 %v13607_v42, %v27428_v4 }
 0x41a   : > { %14569 = vmatprep.mubr.bf16.mxu0 %v14412_v25  ;;  %v19159_v57 = vpop.f32.mrb[148].mxu0  ;;  %v10319_v33 = vadd.f32 %v19029_v50, %v26185_v37  ;;  %v19032_v13 = vadd.f32 %v19031_v18, %v19030_v46  ;;  %v21756_v50 = vld [vmem:[%s27056_s3 + $0x588] sm:$0xff]  }
 0x41b   : > { %19554 = vmatpush3.bf16.msra.mxu1 %v21748_v59  ;;  %v19160_v49 = vpop.f32.mrb[149].mxu0  ;;  %v27427_v59 = vld [vmem:[#allocation28_spill] sm:$0xff] }
 0x41c   : > { %19555 = vmatprep.subr.bf16.mxu1 %v21749_v53  ;;  %v26369_v23 = vadd.f32 %v19160_v49, %v19159_v57  ;;  %v19162_v22 = vpop.f32.mrb[150].mxu0  ;;  %v10320_v55 = vadd.f32 %v19032_v13, %v26198_v19  ;;  %v26377_v37 = vadd.f32 %v26219_v35, %v10319_v33  ;;  %v13691_v33 = vshll.u32 %v13609_v30, 16 }
 0x41d   : > { %v19163_v41 = vpop.f32.mrb[151].mxu0 }
 0x41e   : > { %13257 = vmatmul.mubr.bf16.gmra.mrb[28].mxu1 %v13093_v6  ;;  %v26379_v48 = vadd.f32 %v19163_v41, %v19162_v22  ;;  %v19033_v45 = vpop.f32.mrb[180].mxu1  ;;  %v26385_v19 = vadd.f32 %v26244_v60, %v10320_v55  ;;  %v21755_v60 = vld [vmem:[%s27056_s3 + $0x5c8] sm:$0xff]   ;;  %v21759_v55 = vld [vmem:[%s27056_s3 + $0x5d8] sm:$0xff]  }
 0x41f   : > { %19556 = vmatpush3.bf16.msra.mxu1 %v21750_v10  ;;  %13832 = vmatprep.mubr.bf16.mxu1 %v27426_v26  ;;  %v19034_v17 = vpop.f32.mrb[181].mxu1  ;;  %v21757_v10 = vld [vmem:[%s27056_s3 + $0x5d0] sm:$0xff]   ;;  %v26425_v26 = vld [vmem:[#allocation3 + $0x40] sm:$0xfe] }
 0x420   : > { %19557 = vmatprep.subr.bf16.mxu1 %v21751_v1  ;;  %v19035_v62 = vadd.f32 %v19034_v17, %v19033_v45  ;;  %v19036_v35 = vpop.f32.mrb[182].mxu1  ;;  %v13688_v1 = vshrl.u32 %v13609_v30, 16  ;;  %v21763_v30 = vld [vmem:[%s27056_s3 + $0x5e8] sm:$0xff]  }
 0x421   : > { %14570 = vmatmul.mubr.bf16.gmra.mrb[0].mxu0 %v14412_v25  ;;  %v19037_v61 = vpop.f32.mrb[183].mxu1  ;;  %v27429_v25 = vld [vmem:[#allocation37_spill] sm:$0xff] }
 0x422   : > { %20409 = vmatprep.mubr.msk.bf16.mxu0 %vm21908_vm3, %v21907_v51  ;;  %v19165_v7 = vpop.f32.mrb[152].mxu0  ;;  %v10321_v29 = vadd.f32 %v19035_v62, %v26242_v44  ;;  %v19038_v27 = vadd.f32 %v19037_v61, %v19036_v35  ;;  %v13690_v17 = vrot.slane %v13688_v1, 2  ;;  %v13693_v62 = vrot.slane %v13691_v33, 3  ;;  %v26457_v33 = vld [vmem:[%s27057_s4] ss:$0 sm:$0xff] }
 0x423   : > { %19558 = vmatpush3.bf16.msra.mxu1 %v21752_v2  ;;  %v19166_v32 = vpop.f32.mrb[153].mxu0  ;;  %v14124_v61 = vshll.u32 %v26425_v26, 16 }
 0x424   : > { %19623 = vmatprep.subr.bf16.mxu1 %v21753_v16  ;;  %v26399_v54 = vadd.f32 %v19166_v32, %v19165_v7  ;;  %v19168_v53 = vpop.f32.mrb[154].mxu0  ;;  %v10322_v9 = vadd.f32 %v19038_v27, %v26254_v28  ;;  %v26409_v44 = vadd.f32 %v26272_v31, %v10321_v29  ;;  %v21758_v31 = vld [vmem:[%s27056_s3 + $0x590] sm:$0xff]  }
 0x425   : > { %v19169_v39 = vpop.f32.mrb[155].mxu0  ;;  %v27430_v16 = vld [vmem:[#allocation32_spill] sm:$0xff] }
 0x426   : > { %13833 = vmatmul.mubr.bf16.vlgmr.msra.gmra.mrb[32].mxu1 %v27427_v59  ;;  %v26411_v46 = vadd.f32 %v19169_v39, %v19168_v53  ;;  %v19039_v18 = vpop.f32.mrb[184].mxu1  ;;  %v26417_v28 = vadd.f32 %v26291_v38, %v10322_v9  ;;  %v21762_v59 = vld [vmem:[%s27056_s3 + $0x5a0] sm:$0xff]   ;;  %v14126_v53 = vrot.slane %v14124_v61, 1  ;;  %v14122_v9 = vshrl.u32 %v26425_v26, 16 }
 0x427   : > { %19624 = vmatpush3.bf16.msra.mxu1 %v21754_v20  ;;  %13840 = vmatprep.mubr.bf16.mxu1 %v27429_v25  ;;  %v19040_v57 = vpop.f32.mrb[185].mxu1  ;;  %v21760_v20 = vld [vmem:[%s27056_s3 + $0x598] sm:$0xff]  }
 0x428   : > { %19625 = vmatprep.subr.bf16.mxu1 %v21755_v60  ;;  %v19041_v13 = vadd.f32 %v19040_v57, %v19039_v18  ;;  %v19042_v49 = vpop.f32.mrb[186].mxu1  ;;  %v21761_v60 = vld [vmem:[%s27056_s3 + $0x5e0] sm:$0xff]  }
 0x429   : > { %v19043_v6 = vpop.f32.mrb[187].mxu1  ;;  %v27431_v18 = vld [vmem:[#allocation41_spill] sm:$0xff]  ;;  %v27433_v49 = vld [vmem:[#allocation30_spill] sm:$0xff] }
 0x42a   : > { %v19171_v22 = vpop.f32.mrb[156].mxu0  ;;  %v10323_v38 = vadd.f32 %v19041_v13, %v26289_v15  ;;  %v27432_v57 = vshll.u32 %v27431_v18, 16 }
 0x42b   : > { %19626 = vmatpush3.bf16.msra.mxu1 %v21756_v50  ;;  %v19172_v41 = vpop.f32.mrb[157].mxu0 }
 0x42c   : > { %19627 = vmatprep.subr.bf16.mxu1 %v21757_v10  ;;  %v26428_v2 = vadd.f32 %v19172_v41, %v19171_v22  ;;  %v19174_v45 = vpop.f32.mrb[158].mxu0  ;;  %v26437_v15 = vadd.f32 %v26310_v5, %v10323_v38  ;;  %v13683_v10 = vrot.slane %v13607_v42, 2  ;;  %v13684_v1 = vrot.slane %v27432_v57, 3  ;;  %v21765_v41 = vld [vmem:[%s27056_s3 + $0x5f0] sm:$0xff]  }
 0x42d   : > { %v19175_v35 = vpop.f32.mrb[159].mxu0  ;;  %v14127_v38 = vor.u32 %v14126_v53, %v14122_v9  ;;  %v27434_v53 = vld [vmem:[#allocation40_spill] sm:$0xff] }
 0x42e   : > { %13841 = vmatmul.mubr.bf16.gmra.mrb[36].mxu1 %v27430_v16  ;;  %v26439_v7 = vadd.f32 %v19175_v35, %v19174_v45  ;;  %v19107_v12 = vpop.f32.mrb[188].mxu1 }
 0x42f   : > { %19628 = vmatpush3.bf16.msra.mxu1 %v21758_v31  ;;  %13848 = vmatprep.mubr.bf16.mxu1 %v25436_v24  ;;  %v19108_v29 = vpop.f32.mrb[189].mxu1  ;;  %v13694_v24 = vor.u32 %v13693_v62, %v13690_v17  ;;  %v14128_v45 = vsel %vm7518_vm1, %v14127_v38, %v25995_v52  ;;  %v14178_v17 = vrot.slane %v26080_v3, 1  ;;  %v21767_v52 = vld [vmem:[%s27056_s3 + $0x5f8] sm:$0xff]  }
 0x430   : > { %19629 = vmatprep.subr.bf16.mxu1 %v21759_v55  ;;  %v19109_v27 = vadd.f32 %v19108_v29, %v19107_v12  ;;  %v19110_v32 = vpop.f32.mrb[190].mxu1  ;;  %v21764_v55 = vld [vmem:[%s27056_s3 + $0x5a8] sm:$0xff]   ;;  %v21766_v12 = vld [vmem:[%s27056_s3 + $0x5b0] sm:$0xff]  }
 0x431   : > { %v19111_v5 = vpop.f32.mrb[191].mxu1  ;;  %v13695_v6 = vsel %vm13642_vm12, %v25389_v40, %v13694_v24  ;;  %v14177_v24 = vrot.slane %v14128_v45, 1 }
 0x432   : > { %v19177_v4 = vpop.f32.mrb[160].mxu0  ;;  %v10871_v25 = vadd.f32 %v19109_v27, %v26320_v8  ;;  %v19112_v39 = vadd.f32 %v19111_v5, %v19110_v32 }
 0x433   : > { %19630 = vmatpush3.bf16.msra.mxu1 %v21760_v20  ;;  %v19178_v50 = vpop.f32.mrb[161].mxu0  ;;  %v14179_v9 = vsel %vm7651_vm2, %v14177_v24, %v14178_v17 }
 0x434   : > { %19631 = vmatprep.subr.bf16.mxu1 %v21761_v60  ;;  %v26459_v13 = vadd.f32 %v19178_v50, %v19177_v4  ;;  %v19180_v31 = vpop.f32.mrb[162].mxu0  ;;  %v11100_v8 = vadd.f32 %v26342_v63, %v10871_v25  ;;  %v10872_v42 = vadd.f32 %v19112_v39, %v26327_v56  ;;  %v13685_v56 = vor.u32 %v13684_v1, %v13683_v10  ;;  %v21839_v10 = vld [vmem:[#allocation3 + $0x48] sm:$0xff] }
 0x435   : > { %v19181_v22 = vpop.f32.mrb[163].mxu0  ;;  %v14175_v18 = vrot.slane %v21839_v10, 1  ;;  %v14130_v1 = vshll.u32 %v26329_v43, 16 }
 0x436   : > { %13849 = vmatmul.mubr.bf16.gmra.mrb[40].mxu1 %v27433_v49  ;;  %v26473_v16 = vadd.f32 %v26457_v33, %v11100_v8  ;;  %v11101_v40 = vadd.f32 %v26352_v36, %v10872_v42  ;;  %v19113_v63 = vpop.f32.mrb[192].mxu1  ;;  %v13686_v5 = vsel %vm13642_vm12, %v27434_v53, %v13685_v56 }
 0x437   : > { %19632 = vmatpush3.bf16.msra.mxu1 %v21762_v59  ;;  %13856 = vmatprep.mubr.bf16.mxu1 %v13695_v6  ;;  %v19114_v62 = vpop.f32.mrb[193].mxu1  ;;  %v14174_v6 = vrot.slane %v26425_v26, 1 }
 0x438   : > { %19633 = vmatprep.subr.bf16.mxu1 %v21763_v30  ;;  %v11124_v35 = vmax.f32 %v26473_v16, 0.0  ;;  %v11116_v20 = vadd.f32 %v26457_v33, %v11101_v40  ;;  %v19115_v61 = vadd.f32 %v19114_v62, %v19113_v63  ;;  %v19116_v60 = vpop.f32.mrb[194].mxu1  ;;  %v14132_v62 = vrot.slane %v14130_v1, 1 }
 0x439   : > { %v19117_v36 = vpop.f32.mrb[195].mxu1 }
 0x43a   : > { %v19279_v29 = vpop.f32.mrb[164].mxu0  ;;  %v11125_v3 = vmax.f32 %v11116_v20, 0.0  ;;  %v10873_v27 = vadd.f32 %v19115_v61, %v26350_v0  ;;  %v19118_v32 = vadd.f32 %v19117_v36, %v19116_v60  ;;  %v21768_v0 = vld [vmem:[%s27056_s3 + $0x5b8] sm:$0xff]   ;;  %v26519_v24 = vsel %vm7518_vm1, %v26161_v11, %v14132_v62 }
 0x43b   : > { %19634 = vmatpush3.bf16.msra.mxu1 %v21764_v55  ;;  %v19280_v59 = vpop.f32.mrb[165].mxu0 }
 0x43c   : > { %19635 = vmatprep.subr.bf16.mxu1 %v21765_v41  ;;  %v26490_v4 = vadd.f32 %v19280_v59, %v19279_v29  ;;  %v19282_v30 = vpop.f32.mrb[166].mxu0  ;;  %11134 = vst [vmem:[#allocation4 + $0x8] sm:$0xff] %v11125_v3  ;;  %v11102_v25 = vadd.f32 %v26369_v23, %v10873_v27  ;;  %v10874_v39 = vadd.f32 %v19118_v32, %v26359_v47  ;;  %v14182_v47 = vrot.slane %v26134_v58, 1  ;;  %v21770_v41 = vld [vmem:[%s27058_s5 + $0x8] sm:$0xff]  }
 0x43d   : > { %v19283_v50 = vpop.f32.mrb[167].mxu0 }
 0x43e   : > { %13857 = vmatmul.mubr.bf16.gmra.mrb[44].mxu1 %v13686_v5  ;;  %v26498_v57 = vadd.f32 %v19283_v50, %v19282_v30  ;;  %v11117_v49 = vadd.f32 %v26457_v33, %v11102_v25  ;;  %v11103_v23 = vadd.f32 %v26379_v48, %v10874_v39  ;;  %v19119_v31 = vpop.f32.mrb[196].mxu1  ;;  %v14176_v48 = vsel %vm7651_vm2, %v14174_v6, %v14175_v18 }
 0x43f   : > { %19636 = vmatpush3.bf16.msra.mxu1 %v21766_v12  ;;  %14328 = vmatprep.mubr.bf16.mxu1 %v14179_v9  ;;  %v19120_v8 = vpop.f32.mrb[197].mxu1  ;;  %v14183_v60 = vsel %vm7651_vm2, %v14178_v17, %v14182_v47 }
 0x440   : > { %19637 = vmatprep.subr.bf16.mxu1 %v21767_v52  ;;  %v11126_v42 = vmax.f32 %v11117_v49, 0.0  ;;  %v11118_v22 = vadd.f32 %v26457_v33, %v11103_v23  ;;  %v19121_v55 = vadd.f32 %v19120_v8, %v19119_v31  ;;  %v19122_v38 = vpop.f32.mrb[198].mxu1 }
 0x441   : > { %v19123_v40 = vpop.f32.mrb[199].mxu1 }
 0x442   : > { %v19285_v63 = vpop.f32.mrb[168].mxu0  ;;  %11135 = vst [vmem:[#allocation4 + $0x10] sm:$0xff] %v11126_v42  ;;  %v11127_v58 = vmax.f32 %v11118_v22, 0.0  ;;  %v10875_v26 = vadd.f32 %v19121_v55, %v26377_v37  ;;  %v19124_v56 = vadd.f32 %v19123_v40, %v19122_v38  ;;  %v14180_v37 = vrot.slane %v26192_v14, 1 }
 0x443   : > { %19638 = vmatpush3.bf16.msra.mxu1 %v21768_v0  ;;  %v19286_v45 = vpop.f32.mrb[169].mxu0  ;;  %v14611_v10 = vld [vmem:[#allocation4 + $0x8] sm:$0x3f] }
 0x444   : > { %20401 = vmatprep.subr.bf16.mxu1 %v21907_v51  ;;  %v26512_v20 = vadd.f32 %v19286_v45, %v19285_v63  ;;  %v19288_v61 = vpop.f32.mrb[170].mxu0  ;;  %11136 = vst [vmem:[#allocation4 + $0x18] sm:$0xff] %v11127_v58  ;;  %v11104_v12 = vadd.f32 %v26399_v54, %v10875_v26  ;;  %v10876_v36 = vadd.f32 %v19124_v56, %v26385_v19  ;;  %v14186_v19 = vrot.slane %v26519_v24, 1 }
 0x445   : > { %v19289_v29 = vpop.f32.mrb[171].mxu0  ;;  %v14181_v9 = vsel %vm7651_vm2, %v14175_v18, %v14180_v37  ;;  %v14188_v24 = vrot.slane %v26129_v34, 1 }
 0x446   : > { %14329 = vmatmul.mubr.bf16.vlgmr.msra.gmra.mrb[48].mxu1 %v14176_v48  ;;  %v26522_v52 = vadd.f32 %v19289_v29, %v19288_v61  ;;  %v11119_v17 = vadd.f32 %v26457_v33, %v11104_v12  ;;  %v11105_v3 = vadd.f32 %v26411_v46, %v10876_v36  ;;  %v19125_v54 = vpop.f32.mrb[200].mxu1  ;;  %v14187_v31 = vsel %vm7651_vm2, %v14182_v47, %v14186_v19 }
 0x447   : > { %14336 = vmatprep.mubr.bf16.mxu1 %v14183_v60  ;;  %20402 = vmatpush3.bf16.msra.mxu1 %v21770_v41  ;;  %v19126_v27 = vpop.f32.mrb[201].mxu1  ;;  %v14184_v47 = vrot.slane %v26056_v21, 1 }
 0x448   : > { %20413 = vmatprep.subr.bf16.mxu1 %v21907_v51  ;;  %v11128_v32 = vmax.f32 %v11119_v17, 0.0  ;;  %v11120_v59 = vadd.f32 %v26457_v33, %v11105_v3  ;;  %v19127_v11 = vadd.f32 %v19126_v27, %v19125_v54  ;;  %v19128_v53 = vpop.f32.mrb[202].mxu1  ;;  %v14134_v51 = vshrl.u32 %v26329_v43, 16 }
 0x449   : > { %v14612_v5 = vld [vmem:[#allocation4 + $0xe] sm:$0xff]  ;;  %v19129_v30 = vpop.f32.mrb[203].mxu1 }
 0x44a   : > { %v14614_v25 = vmax.f32 %v11124_v35, %v14612_v5  ;;  %11137 = vst [vmem:[#allocation4 + $0x20] sm:$0xff] %v11128_v32  ;;  %v11129_v46 = vmax.f32 %v11120_v59, 0.0  ;;  %v10877_v39 = vadd.f32 %v19127_v11, %v26409_v44  ;;  %v19130_v50 = vadd.f32 %v19129_v30, %v19128_v53 }
 0x44b   : > { %v14613_v1 = vld [vmem:[#allocation4 + $0x16] sm:$0x3f]  ;;  %v14136_v18 = vor.u32 %v14134_v51, %v14132_v62 }
 0x44c   : > { %v19291_v14 = vpop.f32.mrb[172].mxu0  ;;  %14616 = vst [vmem:[#allocation6] sm:$0xff] %v14614_v25  ;;  %v14615_v43 = vmax.f32 %v14611_v10, %v14613_v1  ;;  %11138 = vst [vmem:[#allocation4 + $0x28] sm:$0xff] %v11129_v46  ;;  %v11106_v16 = vadd.f32 %v26428_v2, %v10877_v39  ;;  %v10878_v35 = vadd.f32 %v19130_v50, %v26417_v28  ;;  %v26565_v39 = vld [vmem:[#allocation4 + $0x88] sm:$0xff] }
 0x44d   : > { %v19292_v0 = vpop.f32.mrb[173].mxu0  ;;  %v14190_v38 = vrot.slane %v14136_v18, 1 }
 0x44e   : > { %v26534_v49 = vadd.f32 %v19292_v0, %v19291_v14  ;;  %14337 = vmatmul.mubr.bf16.gmra.mrb[52].mxu1 %v14181_v9  ;;  %v19294_v23 = vpop.f32.mrb[174].mxu0  ;;  %14617 = vst [vmem:[#allocation6 + $0x8] sm:$0x3f] %v14615_v43  ;;  %v11121_v8 = vadd.f32 %v26457_v33, %v11106_v16  ;;  %v11107_v42 = vadd.f32 %v26439_v7, %v10878_v35  ;;  %v19131_v22 = vpop.f32.mrb[204].mxu1  ;;  %v21772_v35 = vld [vmem:[%s27058_s5 + $0x10] sm:$0xff]  }
 0x44f   : > { %14344 = vmatprep.mubr.bf16.mxu1 %v14187_v31  ;;  %v19295_v44 = vpop.f32.mrb[175].mxu0  ;;  %v19132_v55 = vpop.f32.mrb[205].mxu1  ;;  %v14185_v7 = vsel %vm7651_vm2, %v14180_v37, %v14184_v47  ;;  %v14191_v62 = vsel %vm7651_vm2, %v14186_v19, %v14190_v38  ;;  %v14189_v9 = vsel %vm7651_vm2, %v14184_v47, %v14188_v24 }
 0x450   : > { %v26539_v6 = vadd.f32 %v19295_v44, %v19294_v23  ;;  %v11130_v41 = vmax.f32 %v11121_v8, 0.0  ;;  %v26545_v40 = vadd.f32 %v26457_v33, %v11107_v42  ;;  %v19133_v2 = vadd.f32 %v19132_v55, %v19131_v22  ;;  %v19134_v28 = vpop.f32.mrb[206].mxu1  ;;  %v21771_v23 = vld [vmem:[%s27058_s5 + $0x18] sm:$0xff]  }
 0x451   : > { %v19135_v63 = vpop.f32.mrb[207].mxu1 }
 0x452   : > { %11139 = vst [vmem:[#allocation4 + $0x30] sm:$0xff] %v11130_v41  ;;  %v11131_v58 = vmax.f32 %v26545_v40, 0.0  ;;  %v10879_v26 = vadd.f32 %v19133_v2, %v26437_v15 }
 0x453   : > { %v14623_v54 = vld [vmem:[#allocation4 + $0x24] sm:$0x3f] }
 0x454   : > { %v19297_v48 = vpop.f32.mrb[176].mxu0  ;;  %v11108_v61 = vadd.f32 %v26459_v13, %v10879_v26  ;;  %v14622_v13 = vld [vmem:[#allocation4 + $0x1c] sm:$0xff] }
 0x455   : > { %v19298_v56 = vpop.f32.mrb[177].mxu0  ;;  %v14618_v36 = vld [vmem:[#allocation6] ss:$2 sm:$0x1f] }
 0x456   : > { %v26550_v45 = vadd.f32 %v19298_v56, %v19297_v48  ;;  %14345 = vmatmul.mubr.bf16.gmra.mrb[56].mxu1 %v14185_v7  ;;  %v19300_v21 = vpop.f32.mrb[178].mxu0  ;;  %v14619_v29 = vld [vmem:[#allocation6 + $0x1] ss:$2 sm:$0x1f]  ;;  %v11123_v15 = vadd.f32 %v26457_v33, %v11108_v61 }
 0x457   : > { %14352 = vmatprep.mubr.bf16.mxu1 %v14191_v62  ;;  %v19301_v60 = vpop.f32.mrb[179].mxu0  ;;  %v14620_v37 = vmax.f32 %v14618_v36, %v14619_v29  ;;  %v21773_v62 = vld [vmem:[%s27058_s5 + $0x28] sm:$0xff]   ;;  %v21774_v29 = vld [vmem:[%s27058_s5 + $0x20] sm:$0xff]  }
 0x458   : > { %v26554_v12 = vadd.f32 %v19301_v60, %v19300_v21  ;;  %v11132_v27 = vmax.f32 %v11123_v15, 0.0 }
 0x459   : > { %v19199_v17 = vpop.f32.mrb[208].mxu1  ;;  %14621 = vst [vmem:[#allocation5] sm:$0x1f] %v14620_v37  ;;  %v14624_v59 = vld [vmem:[#allocation4 + $0x2a] sm:$0xff]  ;;  %v14625_v11 = vld [vmem:[#allocation4 + $0x32] sm:$0x3f] }
 0x45a   : > { %v19200_v3 = vpop.f32.mrb[209].mxu1  ;;  %v14626_v30 = vmax.f32 %v14622_v13, %v14624_v59  ;;  %v14627_v14 = vmax.f32 %v14623_v54, %v14625_v11  ;;  %11141 = vst [vmem:[#allocation4 + $0x40] sm:$0xff] %v11132_v27 }
 0x45b   : > { %v26558_v32 = vadd.f32 %v19200_v3, %v19199_v17  ;;  %v19202_v19 = vpop.f32.mrb[210].mxu1 }
 0x45c   : > { %v19203_v53 = vpop.f32.mrb[211].mxu1  ;;  %v19359_v5 = vpop.f32.mrb[180].mxu0  ;;  %14628 = vst [vmem:[#allocation6] sm:$0xff] %v14626_v30  ;;  %14629 = vst [vmem:[#allocation6 + $0x8] sm:$0x3f] %v14627_v14  ;;  %v21775_v30 = vld [vmem:[%s27058_s5 + $0x38] sm:$0xff]  }
 0x45d   : > { %v26560_v34 = vadd.f32 %v19203_v53, %v19202_v19  ;;  %v19360_v33 = vpop.f32.mrb[181].mxu0 }
 0x45e   : > { %v26563_v51 = vadd.f32 %v19360_v33, %v19359_v5  ;;  %14353 = vmatmul.mubr.bf16.gmra.mrb[60].mxu1 %v14189_v9  ;;  %v19362_v25 = vpop.f32.mrb[182].mxu0 }
 0x45f   : > { %v19363_v46 = vpop.f32.mrb[183].mxu0  ;;  %20403 = vmatprep.mubr.msk.bf16.mxu1 %vm21908_vm3, %v26565_v39 }
 0x460   : > { %v26569_v50 = vadd.f32 %v19363_v46, %v19362_v25  ;;  %v14670_v1 = vld [vmem:[#allocation5] ss:$32 sm:$0x1]  ;;  %v14675_v16 = vld [vmem:[#allocation5 + $0x1] ss:$32 sm:$0x1] }
 0x461   : > { %v19205_v0 = vpop.f32.mrb[212].mxu1  ;;  %v14671_v43 = vpack.c.bf16 %v14670_v1, %v14670_v1  ;;  %v14676_v42 = vpack.c.bf16 %v14675_v16, %v14675_v16  ;;  %v14835_v63 = vld [vmem:[#allocation5 + $0x3] ss:$32 sm:$0x1]  ;;  %v21776_v25 = vld [vmem:[%s27058_s5 + $0x30] sm:$0xff]  }
 0x462   : > { %v19206_v10 = vpop.f32.mrb[213].mxu1  ;;  %v14779_v56 = vld [vmem:[#allocation5 + $0x2] ss:$32 sm:$0x1]  ;;  %v14836_v36 = vpack.c.bf16 %v14835_v63, %v14835_v63 }
 0x463   : > { %v26574_v31 = vadd.f32 %v19206_v10, %v19205_v0  ;;  %v19208_v18 = vpop.f32.mrb[214].mxu1  ;;  %20410 = vmatmul.mubr.msk.bf16.vlgmr.msra.gmra.mrb[4].mxu0 %vm459_vm0, %v14671_v43  ;;  %v14630_v2 = vld [vmem:[#allocation6] ss:$2 sm:$0x1f]  ;;  %v14780_v17 = vpack.c.bf16 %v14779_v56, %v14779_v56 }
 0x464   : > { %v19209_v44 = vpop.f32.mrb[215].mxu1  ;;  %v19365_v8 = vpop.f32.mrb[184].mxu0  ;;  %20420 = vmatpush3.bf16.msra.mxu0 %v21771_v23  ;;  %20421 = vmatprep.mubr.msk.bf16.mxu0 %vm21908_vm3, %v26565_v39  ;;  %v14631_v48 = vld [vmem:[#allocation6 + $0x1] ss:$2 sm:$0x1f] }
 0x465   : > { %v26579_v22 = vadd.f32 %v19209_v44, %v19208_v18  ;;  %v19366_v47 = vpop.f32.mrb[185].mxu0  ;;  %20431 = vmatprep.subr.bf16.mxu0 %v26565_v39  ;;  %v14632_v7 = vmax.f32 %v14630_v2, %v14631_v48  ;;  %v14891_v11 = vld [vmem:[#allocation5 + $0x4] ss:$32 sm:$0x1] }
 0x466   : > { %v26582_v55 = vadd.f32 %v19366_v47, %v19365_v8  ;;  %20404 = vmatmul.mubr.msk.bf16.vlgmr.msra.gmra.mrb[64].mxu1 %vm459_vm0, %v14676_v42  ;;  %v19368_v38 = vpop.f32.mrb[186].mxu0  ;;  %v14892_v10 = vpack.c.bf16 %v14891_v11, %v14891_v11  ;;  %v21778_v48 = vld [vmem:[%s27058_s5 + $0x40] sm:$0xff]  }
 0x467   : > { %v19369_v41 = vpop.f32.mrb[187].mxu0  ;;  %20414 = vmatpush3.bf16.msra.mxu1 %v21772_v35  ;;  %20415 = vmatprep.mubr.msk.bf16.mxu1 %vm21908_vm3, %v26565_v39  ;;  %14633 = vst [vmem:[#allocation5 + $0x5] sm:$0x1f] %v14632_v7 }
 0x468   : > { %v26587_v28 = vadd.f32 %v19369_v41, %v19368_v38  ;;  %20425 = vmatprep.subr.bf16.mxu1 %v26565_v39  ;;  %v21777_v38 = vld [vmem:[%s27058_s5 + $0x48] sm:$0xff]  }
 0x469   : > { %v19211_v26 = vpop.f32.mrb[216].mxu1 }
 0x46a   : > { %v19212_v21 = vpop.f32.mrb[217].mxu1 }
 0x46b   : > { %v26596_v61 = vadd.f32 %v19212_v21, %v19211_v26  ;;  %v19214_v60 = vpop.f32.mrb[218].mxu1  ;;  %20422 = vmatmul.mubr.msk.bf16.vlgmr.msra.gmra.mrb[8].mxu0 %vm459_vm0, %v14836_v36 }
 0x46c   : > { %v19215_v24 = vpop.f32.mrb[219].mxu1  ;;  %v19371_v15 = vpop.f32.mrb[188].mxu0  ;;  %20432 = vmatpush3.bf16.msra.mxu0 %v21773_v62  ;;  %20433 = vmatprep.mubr.msk.bf16.mxu0 %vm21908_vm3, %v26565_v39 }
 0x46d   : > { %v26601_v37 = vadd.f32 %v19215_v24, %v19214_v60  ;;  %v19372_v3 = vpop.f32.mrb[189].mxu0  ;;  %20443 = vmatprep.subr.bf16.mxu0 %v26565_v39 }
 0x46e   : > { %v26604_v54 = vadd.f32 %v19372_v3, %v19371_v15  ;;  %20416 = vmatmul.mubr.msk.bf16.vlgmr.msra.gmra.mrb[68].mxu1 %vm459_vm0, %v14780_v17  ;;  %v19374_v27 = vpop.f32.mrb[190].mxu0  ;;  %v14947_v5 = vld [vmem:[#allocation5 + $0x5] ss:$32 sm:$0x1] }
 0x46f   : > { %v19375_v19 = vpop.f32.mrb[191].mxu0  ;;  %20426 = vmatpush3.bf16.msra.mxu1 %v21774_v29  ;;  %20427 = vmatprep.mubr.msk.bf16.mxu1 %vm21908_vm3, %v26565_v39  ;;  %v14948_v9 = vpack.c.bf16 %v14947_v5, %v14947_v5  ;;  %v15059_v44 = vld [vmem:[#allocation5 + $0x7] ss:$32 sm:$0x1] }
 0x470   : > { %v26609_v13 = vadd.f32 %v19375_v19, %v19374_v27  ;;  %20437 = vmatprep.subr.bf16.mxu1 %v26565_v39  ;;  %v15003_v42 = vld [vmem:[#allocation5 + $0x6] ss:$32 sm:$0x1]  ;;  %v15060_v63 = vpack.c.bf16 %v15059_v44, %v15059_v44  ;;  %v15171_v3 = vld [vmem:[#allocation5 + $0x9] ss:$32 sm:$0x1] }
 0x471   : > { %v19217_v59 = vpop.f32.mrb[220].mxu1  ;;  %v15004_v7 = vpack.c.bf16 %v15003_v42, %v15003_v42  ;;  %v15115_v19 = vld [vmem:[#allocation5 + $0x8] ss:$32 sm:$0x1] }
 0x472   : > { %v19218_v53 = vpop.f32.mrb[221].mxu1 }
 0x473   : > { %v26618_v14 = vadd.f32 %v19218_v53, %v19217_v59  ;;  %v19220_v33 = vpop.f32.mrb[222].mxu1  ;;  %20434 = vmatmul.mubr.msk.bf16.vlgmr.msra.gmra.mrb[12].mxu0 %vm459_vm0, %v14948_v9 }
 0x474   : > { %v19221_v46 = vpop.f32.mrb[223].mxu1  ;;  %v19377_v0 = vpop.f32.mrb[192].mxu0  ;;  %20444 = vmatpush3.bf16.msra.mxu0 %v21775_v30  ;;  %20445 = vmatprep.mubr.msk.bf16.mxu0 %vm21908_vm3, %v26565_v39 }
 0x475   : > { %v26623_v1 = vadd.f32 %v19221_v46, %v19220_v33  ;;  %v19378_v23 = vpop.f32.mrb[193].mxu0  ;;  %20455 = vmatprep.subr.bf16.mxu0 %v26565_v39  ;;  %v15116_v33 = vpack.c.bf16 %v15115_v19, %v15115_v19 }
 0x476   : > { %v26626_v18 = vadd.f32 %v19378_v23, %v19377_v0  ;;  %20428 = vmatmul.mubr.msk.bf16.vlgmr.msra.gmra.mrb[72].mxu1 %vm459_vm0, %v14892_v10  ;;  %v19380_v43 = vpop.f32.mrb[194].mxu0 }
 0x477   : > { %v19381_v16 = vpop.f32.mrb[195].mxu0  ;;  %20438 = vmatpush3.bf16.msra.mxu1 %v21776_v25  ;;  %20439 = vmatprep.mubr.msk.bf16.mxu1 %vm21908_vm3, %v26565_v39 }
 0x478   : > { %v26631_v35 = vadd.f32 %v19381_v16, %v19380_v43  ;;  %20449 = vmatprep.subr.bf16.mxu1 %v26565_v39 }
 0x479   : > { %v19239_v8 = vpop.f32.mrb[224].mxu1 }
 0x47a   : > { %v19240_v47 = vpop.f32.mrb[225].mxu1 }
 0x47b   : > { %v19241_v41 = vadd.f32 %v19240_v47, %v19239_v8  ;;  %v19242_v2 = vpop.f32.mrb[226].mxu1  ;;  %20446 = vmatmul.mubr.msk.bf16.vlgmr.msra.gmra.mrb[16].mxu0 %vm459_vm0, %v15060_v63 }
 0x47c   : > { %v19243_v26 = vpop.f32.mrb[227].mxu1  ;;  %v19439_v56 = vpop.f32.mrb[196].mxu0  ;;  %20456 = vmatpush3.bf16.msra.mxu0 %v21777_v38  ;;  %20457 = vmatprep.mubr.msk.bf16.mxu0 %vm21908_vm3, %v26565_v39 }
 0x47d   : > { %v11620_v21 = vadd.f32 %v19241_v41, %v26558_v32  ;;  %v19244_v62 = vadd.f32 %v19243_v26, %v19242_v2  ;;  %v19440_v60 = vpop.f32.mrb[197].mxu0  ;;  %20467 = vmatprep.subr.bf16.mxu0 %v26565_v39 }
 0x47e   : > { %v26645_v36 = vadd.f32 %v19440_v60, %v19439_v56  ;;  %20440 = vmatmul.mubr.msk.bf16.vlgmr.msra.gmra.mrb[76].mxu1 %vm459_vm0, %v15004_v7  ;;  %v19442_v29 = vpop.f32.mrb[198].mxu0 }
 0x47f   : > { %v11623_v24 = vadd.f32 %v19244_v62, %v26560_v34  ;;  %v19443_v15 = vpop.f32.mrb[199].mxu0  ;;  %20450 = vmatpush3.bf16.msra.mxu1 %v21778_v48  ;;  %v26652_v17 = vadd.f32 %v26490_v4, %v11620_v21  ;;  %20451 = vmatprep.mubr.msk.bf16.mxu1 %vm21908_vm3, %v26565_v39  ;;  %v15172_v4 = vpack.c.bf16 %v15171_v3, %v15171_v3 }
 0x480   : > { %v26654_v32 = vadd.f32 %v19443_v15, %v19442_v29  ;;  %20461 = vmatprep.subr.bf16.mxu1 %v26565_v39 }
 0x481   : > { %v19245_v27 = vpop.f32.mrb[228].mxu1  ;;  %v26660_v34 = vadd.f32 %v26498_v57, %v11623_v24 }
 0x482   : > { %v19246_v59 = vpop.f32.mrb[229].mxu1 }
 0x483   : > { %v19247_v11 = vadd.f32 %v19246_v59, %v19245_v27  ;;  %v19248_v53 = vpop.f32.mrb[230].mxu1  ;;  %20458 = vmatmul.mubr.msk.bf16.vlgmr.msra.gmra.mrb[20].mxu0 %vm459_vm0, %v15172_v4 }
 0x484   : > { %v19249_v5 = vpop.f32.mrb[231].mxu1  ;;  %v19445_v30 = vpop.f32.mrb[200].mxu0  ;;  %20469 = vmatprep.mubr.msk.bf16.mxu0 %vm21908_vm3, %v26565_v39 }
 0x485   : > { %v11628_v9 = vadd.f32 %v19247_v11, %v26574_v31  ;;  %v19250_v25 = vadd.f32 %v19249_v5, %v19248_v53  ;;  %v19446_v46 = vpop.f32.mrb[201].mxu0 }
 0x486   : > { %v26665_v0 = vadd.f32 %v19446_v46, %v19445_v30  ;;  %20452 = vmatmul.mubr.msk.bf16.vlgmr.msra.gmra.mrb[80].mxu1 %vm459_vm0, %v15116_v33  ;;  %v19448_v57 = vpop.f32.mrb[202].mxu0 }
 0x487   : > { %v11631_v10 = vadd.f32 %v19250_v25, %v26579_v22  ;;  %v19449_v23 = vpop.f32.mrb[203].mxu0  ;;  %v11893_v43 = vadd.f32 %v26512_v20, %v11628_v9  ;;  %20463 = vmatprep.mubr.msk.bf16.mxu1 %vm21908_vm3, %v26565_v39 }
 0x488   : > { %v26674_v31 = vadd.f32 %v19449_v23, %v19448_v57 }
 0x489   : > { %v19251_v16 = vpop.f32.mrb[232].mxu1  ;;  %v11894_v44 = vadd.f32 %v26522_v52, %v11631_v10 }
 0x48a   : > { %v19252_v8 = vpop.f32.mrb[233].mxu1 }
 0x48b   : > { %v19253_v42 = vadd.f32 %v19252_v8, %v19251_v16  ;;  %v19254_v47 = vpop.f32.mrb[234].mxu1 }
 0x48c   : > { %v19255_v38 = vpop.f32.mrb[235].mxu1  ;;  %v19451_v41 = vpop.f32.mrb[204].mxu0 }
 0x48d   : > { %v11636_v2 = vadd.f32 %v19253_v42, %v26596_v61  ;;  %v19256_v63 = vadd.f32 %v19255_v38, %v19254_v47  ;;  %v19452_v22 = vpop.f32.mrb[205].mxu0 }
 0x48e   : > { %v26678_v48 = vadd.f32 %v19452_v22, %v19451_v41  ;;  %v19454_v20 = vpop.f32.mrb[206].mxu0 }
 0x48f   : > { %v11639_v26 = vadd.f32 %v19256_v63, %v26601_v37  ;;  %v19455_v56 = vpop.f32.mrb[207].mxu0  ;;  %v11895_v7 = vadd.f32 %v26534_v49, %v11636_v2 }
 0x490   : > { %v26682_v21 = vadd.f32 %v19455_v56, %v19454_v20 }
 0x491   : > { %v19257_v52 = vpop.f32.mrb[236].mxu1  ;;  %v11896_v62 = vadd.f32 %v26539_v6, %v11639_v26 }
 0x492   : > { %v19258_v60 = vpop.f32.mrb[237].mxu1 }
 0x493   : > { %v19259_v29 = vadd.f32 %v19258_v60, %v19257_v52  ;;  %v19260_v24 = vpop.f32.mrb[238].mxu1 }
 0x494   : > { %v19261_v15 = vpop.f32.mrb[239].mxu1  ;;  %v19457_v61 = vpop.f32.mrb[208].mxu0 }
 0x495   : > { %v11644_v3 = vadd.f32 %v19259_v29, %v26618_v14  ;;  %v19262_v27 = vadd.f32 %v19261_v15, %v19260_v24  ;;  %v19458_v19 = vpop.f32.mrb[209].mxu0 }
 0x496   : > { %v26686_v59 = vadd.f32 %v19458_v19, %v19457_v61  ;;  %v19460_v37 = vpop.f32.mrb[210].mxu0 }
 0x497   : > { %v11647_v11 = vadd.f32 %v19262_v27, %v26623_v1  ;;  %v19461_v49 = vpop.f32.mrb[211].mxu0  ;;  %v11897_v53 = vadd.f32 %v26550_v45, %v11644_v3 }
 0x498   : > { %v26690_v4 = vadd.f32 %v19461_v49, %v19460_v37 }
 0x499   : > { %v19319_v6 = vpop.f32.mrb[240].mxu1  ;;  %v11898_v5 = vadd.f32 %v26554_v12, %v11647_v11 }
 0x49a   : > { %v19320_v30 = vpop.f32.mrb[241].mxu1 }
 0x49b   : > { %v19321_v33 = vadd.f32 %v19320_v30, %v19319_v6  ;;  %v19322_v9 = vpop.f32.mrb[242].mxu1 }
 0x49c   : > { %v19323_v25 = vpop.f32.mrb[243].mxu1  ;;  %v19519_v14 = vpop.f32.mrb[212].mxu0 }
 0x49d   : > { %v12210_v46 = vadd.f32 %v19321_v33, %v26652_v17  ;;  %v19324_v57 = vadd.f32 %v19323_v25, %v19322_v9  ;;  %v19520_v10 = vpop.f32.mrb[213].mxu0 }
 0x49e   : > { %v26694_v23 = vadd.f32 %v19520_v10, %v19519_v14  ;;  %v19522_v1 = vpop.f32.mrb[214].mxu0 }
 0x49f   : > { %v12211_v16 = vadd.f32 %v19324_v57, %v26660_v34  ;;  %v19523_v45 = vpop.f32.mrb[215].mxu0  ;;  %v12491_v8 = vadd.f32 %v26563_v51, %v12210_v46 }
 0x4a0   : > { %v26698_v42 = vadd.f32 %v19523_v45, %v19522_v1 }
 0x4a1   : > { %v19325_v12 = vpop.f32.mrb[244].mxu1  ;;  %v12492_v47 = vadd.f32 %v26569_v50, %v12211_v16 }
 0x4a2   : > { %v19326_v38 = vpop.f32.mrb[245].mxu1 }
 0x4a3   : > { %v19327_v41 = vadd.f32 %v19326_v38, %v19325_v12  ;;  %v19328_v2 = vpop.f32.mrb[246].mxu1 }
 0x4a4   : > { %v19329_v63 = vpop.f32.mrb[247].mxu1  ;;  %v19525_v17 = vpop.f32.mrb[216].mxu0 }
 0x4a5   : > { %v12212_v22 = vadd.f32 %v19327_v41, %v11893_v43  ;;  %v19330_v20 = vadd.f32 %v19329_v63, %v19328_v2  ;;  %v19526_v26 = vpop.f32.mrb[217].mxu0 }
 0x4a6   : > { %v26701_v56 = vadd.f32 %v19526_v26, %v19525_v17  ;;  %v19528_v52 = vpop.f32.mrb[218].mxu0 }
 0x4a7   : > { %v12213_v34 = vadd.f32 %v19330_v20, %v11894_v44  ;;  %v19529_v60 = vpop.f32.mrb[219].mxu0  ;;  %v12493_v51 = vadd.f32 %v26582_v55, %v12212_v22 }
 0x4a8   : > { %v26704_v29 = vadd.f32 %v19529_v60, %v19528_v52 }
 0x4a9   : > { %v19331_v24 = vpop.f32.mrb[248].mxu1  ;;  %v12494_v50 = vadd.f32 %v26587_v28, %v12213_v34 }
 0x4aa   : > { %v19332_v15 = vpop.f32.mrb[249].mxu1 }
 0x4ab   : > { %v19333_v61 = vadd.f32 %v19332_v15, %v19331_v24  ;;  %v19334_v3 = vpop.f32.mrb[250].mxu1 }
 0x4ac   : > { %v19335_v27 = vpop.f32.mrb[251].mxu1  ;;  %v19531_v19 = vpop.f32.mrb[220].mxu0 }
 0x4ad   : > { %v12214_v43 = vadd.f32 %v19333_v61, %v11895_v7  ;;  %v19336_v37 = vadd.f32 %v19335_v27, %v19334_v3  ;;  %v19532_v11 = vpop.f32.mrb[221].mxu0 }
 0x4ae   : > { %v26707_v49 = vadd.f32 %v19532_v11, %v19531_v19  ;;  %v19534_v6 = vpop.f32.mrb[222].mxu0 }
 0x4af   : > { %v12215_v44 = vadd.f32 %v19336_v37, %v11896_v62  ;;  %v19535_v30 = vpop.f32.mrb[223].mxu0  ;;  %v26710_v55 = vadd.f32 %v26604_v54, %v12214_v43 }
 0x4b0   : > { %v26712_v33 = vadd.f32 %v19535_v30, %v19534_v6 }
 0x4b1   : > { %v19337_v9 = vpop.f32.mrb[252].mxu1  ;;  %v26715_v28 = vadd.f32 %v26609_v13, %v12215_v44 }
 0x4b2   : > { %v19338_v25 = vpop.f32.mrb[253].mxu1 }
 0x4b3   : > { %v19339_v14 = vadd.f32 %v19338_v25, %v19337_v9  ;;  %v19340_v46 = vpop.f32.mrb[254].mxu1 }
 0x4b4   : > { %v19341_v7 = vpop.f32.mrb[255].mxu1  ;;  %v19537_v57 = vpop.f32.mrb[224].mxu0 }
 0x4b5   : > { %v12216_v10 = vadd.f32 %v19339_v14, %v11897_v53  ;;  %v19342_v1 = vadd.f32 %v19341_v7, %v19340_v46  ;;  %v19538_v16 = vpop.f32.mrb[225].mxu0  ;;  %v21780_v14 = vld [vmem:[%s27058_s5 + $0x58] sm:$0xff]  }
 0x4b6   : > { %v26717_v45 = vadd.f32 %v19538_v16, %v19537_v57  ;;  %v19540_v62 = vpop.f32.mrb[226].mxu0  ;;  %20468 = vmatpush3.bf16.msra.mxu0 %v21780_v14 }
 0x4b7   : > { %v12217_v12 = vadd.f32 %v19342_v1, %v11898_v5  ;;  %v19541_v54 = vpop.f32.mrb[227].mxu0  ;;  %v26720_v38 = vadd.f32 %v26626_v18, %v12216_v10  ;;  %20479 = vmatprep.subr.bf16.mxu0 %v26565_v39 }
 0x4b8   : > { %v26722_v41 = vadd.f32 %v19541_v54, %v19540_v62 }
 0x4b9   : > { %v19399_v13 = vpop.f32.mrb[0].mxu1  ;;  %v26725_v2 = vadd.f32 %v26631_v35, %v12217_v12 }
 0x4ba   : > { %v19400_v63 = vpop.f32.mrb[1].mxu1 }
 0x4bb   : > { %v19401_v17 = vadd.f32 %v19400_v63, %v19399_v13  ;;  %v19402_v22 = vpop.f32.mrb[2].mxu1 }
 0x4bc   : > { %v19403_v53 = vpop.f32.mrb[3].mxu1  ;;  %v19599_v20 = vpop.f32.mrb[228].mxu0 }
 0x4bd   : > { %v12768_v26 = vadd.f32 %v19401_v17, %v12491_v8  ;;  %v19404_v52 = vadd.f32 %v19403_v53, %v19402_v22  ;;  %v19600_v34 = vpop.f32.mrb[229].mxu0 }
 0x4be   : > { %v26727_v60 = vadd.f32 %v19600_v34, %v19599_v20  ;;  %v19602_v5 = vpop.f32.mrb[230].mxu0 }
 0x4bf   : > { %v12769_v24 = vadd.f32 %v19404_v52, %v12492_v47  ;;  %v19603_v18 = vpop.f32.mrb[231].mxu0  ;;  %v26730_v15 = vadd.f32 %v26645_v36, %v12768_v26 }
 0x4c0   : > { %v26732_v61 = vadd.f32 %v19603_v18, %v19602_v5 }
 0x4c1   : > { %v19405_v35 = vpop.f32.mrb[4].mxu1  ;;  %v26735_v3 = vadd.f32 %v26654_v32, %v12769_v24  ;;  %v21779_v32 = vld [vmem:[%s27058_s5 + $0x50] sm:$0xff]  }
 0x4c2   : > { %v19406_v27 = vpop.f32.mrb[5].mxu1  ;;  %20462 = vmatpush3.bf16.msra.mxu1 %v21779_v32 }
 0x4c3   : > { %v19407_v19 = vadd.f32 %v19406_v27, %v19405_v35  ;;  %v19408_v43 = vpop.f32.mrb[6].mxu1  ;;  %20473 = vmatprep.subr.bf16.mxu1 %v26565_v39 }
 0x4c4   : > { %v19409_v8 = vpop.f32.mrb[7].mxu1  ;;  %v19605_v37 = vpop.f32.mrb[232].mxu0 }
 0x4c5   : > { %v12770_v11 = vadd.f32 %v19407_v19, %v12493_v51  ;;  %v19410_v6 = vadd.f32 %v19409_v8, %v19408_v43  ;;  %v19606_v44 = vpop.f32.mrb[233].mxu0 }
 0x4c6   : > { %v26737_v30 = vadd.f32 %v19606_v44, %v19605_v37  ;;  %v19608_v47 = vpop.f32.mrb[234].mxu0 }
 0x4c7   : > { %v12771_v9 = vadd.f32 %v19410_v6, %v12494_v50  ;;  %v19609_v36 = vpop.f32.mrb[235].mxu0  ;;  %v26740_v25 = vadd.f32 %v26665_v0, %v12770_v11 }
 0x4c8   : > { %v26748_v46 = vadd.f32 %v19609_v36, %v19608_v47 }
 0x4c9   : > { %v19411_v51 = vpop.f32.mrb[8].mxu1  ;;  %v26751_v7 = vadd.f32 %v26674_v31, %v12771_v9 }
 0x4ca   : > { %v19412_v50 = vpop.f32.mrb[9].mxu1 }
 0x4cb   : > { %v19413_v0 = vadd.f32 %v19412_v50, %v19411_v51  ;;  %v19414_v57 = vpop.f32.mrb[10].mxu1 }
 0x4cc   : > { %v19415_v10 = vpop.f32.mrb[11].mxu1  ;;  %v19611_v1 = vpop.f32.mrb[236].mxu0 }
 0x4cd   : > { %v12772_v16 = vadd.f32 %v19413_v0, %v26710_v55  ;;  %v19416_v62 = vadd.f32 %v19415_v10, %v19414_v57  ;;  %v19612_v12 = vpop.f32.mrb[237].mxu0 }
 0x4ce   : > { %v26756_v54 = vadd.f32 %v19612_v12, %v19611_v1  ;;  %v19614_v13 = vpop.f32.mrb[238].mxu0 }
 0x4cf   : > { %v12773_v31 = vadd.f32 %v19416_v62, %v26715_v28  ;;  %v19615_v63 = vpop.f32.mrb[239].mxu0  ;;  %v13020_v17 = vadd.f32 %v26678_v48, %v12772_v16 }
 0x4d0   : > { %v26760_v22 = vadd.f32 %v19615_v63, %v19614_v13 }
 0x4d1   : > { %v19417_v53 = vpop.f32.mrb[12].mxu1  ;;  %v13021_v39 = vadd.f32 %v26682_v21, %v12773_v31 }
 0x4d2   : > { %v19418_v20 = vpop.f32.mrb[13].mxu1 }
 0x4d3   : > { %v19419_v26 = vadd.f32 %v19418_v20, %v19417_v53  ;;  %v19420_v52 = vpop.f32.mrb[14].mxu1 }
 0x4d4   : > { %v19421_v34 = vpop.f32.mrb[15].mxu1  ;;  %v19617_v55 = vpop.f32.mrb[240].mxu0 }
 0x4d5   : > { %v12774_v5 = vadd.f32 %v19419_v26, %v26720_v38  ;;  %v19422_v24 = vadd.f32 %v19421_v34, %v19420_v52  ;;  %v19618_v18 = vpop.f32.mrb[241].mxu0 }
 0x4d6   : > { %v26764_v35 = vadd.f32 %v19618_v18, %v19617_v55  ;;  %v19620_v28 = vpop.f32.mrb[242].mxu0 }
 0x4d7   : > { %v12775_v27 = vadd.f32 %v19422_v24, %v26725_v2  ;;  %v19621_v48 = vpop.f32.mrb[243].mxu0  ;;  %v13022_v19 = vadd.f32 %v26686_v59, %v12774_v5 }
 0x4d8   : > { %v26768_v43 = vadd.f32 %v19621_v48, %v19620_v28 }
 0x4d9   : > { %v19479_v21 = vpop.f32.mrb[16].mxu1  ;;  %v13023_v8 = vadd.f32 %v26690_v4, %v12775_v27 }
 0x4da   : > { %v19480_v37 = vpop.f32.mrb[17].mxu1 }
 0x4db   : > { %v19481_v11 = vadd.f32 %v19480_v37, %v19479_v21  ;;  %v19482_v6 = vpop.f32.mrb[18].mxu1 }
 0x4dc   : > { %v19483_v44 = vpop.f32.mrb[19].mxu1  ;;  %v19679_v38 = vpop.f32.mrb[244].mxu0 }
 0x4dd   : > { %v13265_v47 = vadd.f32 %v19481_v11, %v26730_v15  ;;  %v19484_v9 = vadd.f32 %v19483_v44, %v19482_v6  ;;  %v19680_v36 = vpop.f32.mrb[245].mxu0 }
 0x4de   : > { %v26772_v32 = vadd.f32 %v19680_v36, %v19679_v38  ;;  %v19682_v2 = vpop.f32.mrb[246].mxu0 }
 0x4df   : > { %v13266_v14 = vadd.f32 %v19484_v9, %v26735_v3  ;;  %v19683_v59 = vpop.f32.mrb[247].mxu0  ;;  %v13584_v51 = vadd.f32 %v26694_v23, %v13265_v47 }
 0x4e0   : > { %v26776_v50 = vadd.f32 %v19683_v59, %v19682_v2 }
 0x4e1   : > { %v19485_v4 = vpop.f32.mrb[20].mxu1  ;;  %v13585_v0 = vadd.f32 %v26698_v42, %v13266_v14 }
 0x4e2   : > { %v19486_v57 = vpop.f32.mrb[21].mxu1 }
 0x4e3   : > { %v19487_v10 = vadd.f32 %v19486_v57, %v19485_v4  ;;  %v19488_v1 = vpop.f32.mrb[22].mxu1 }
 0x4e4   : > { %v19489_v16 = vpop.f32.mrb[23].mxu1  ;;  %v19685_v15 = vpop.f32.mrb[248].mxu0 }
 0x4e5   : > { %v13267_v62 = vadd.f32 %v19487_v10, %v26740_v25  ;;  %v19490_v12 = vadd.f32 %v19489_v16, %v19488_v1  ;;  %v19686_v13 = vpop.f32.mrb[249].mxu0 }
 0x4e6   : > { %v26780_v31 = vadd.f32 %v19686_v13, %v19685_v15  ;;  %v19688_v3 = vpop.f32.mrb[250].mxu0 }
 0x4e7   : > { %v13268_v63 = vadd.f32 %v19490_v12, %v26751_v7  ;;  %v19689_v23 = vpop.f32.mrb[251].mxu0  ;;  %v13586_v53 = vadd.f32 %v26701_v56, %v13267_v62 }
 0x4e8   : > { %v26784_v20 = vadd.f32 %v19689_v23, %v19688_v3 }
 0x4e9   : > { %v19491_v42 = vpop.f32.mrb[24].mxu1  ;;  %v13587_v26 = vadd.f32 %v26704_v29, %v13268_v63 }
 0x4ea   : > { %v19492_v52 = vpop.f32.mrb[25].mxu1 }
 0x4eb   : > { %v19493_v34 = vadd.f32 %v19492_v52, %v19491_v42  ;;  %v19494_v55 = vpop.f32.mrb[26].mxu1 }
 0x4ec   : > { %v19495_v5 = vpop.f32.mrb[27].mxu1  ;;  %v19691_v25 = vpop.f32.mrb[252].mxu0 }
 0x4ed   : > { %v13269_v24 = vadd.f32 %v19493_v34, %v13020_v17  ;;  %v19496_v18 = vadd.f32 %v19495_v5, %v19494_v55  ;;  %v19692_v28 = vpop.f32.mrb[253].mxu0 }
 0x4ee   : > { %v26787_v27 = vadd.f32 %v19692_v28, %v19691_v25  ;;  %v19694_v48 = vpop.f32.mrb[254].mxu0 }
 0x4ef   : > { %v13270_v7 = vadd.f32 %v19496_v18, %v13021_v39  ;;  %v19695_v21 = vpop.f32.mrb[255].mxu0  ;;  %v13588_v56 = vadd.f32 %v26707_v49, %v13269_v24 }
 0x4f0   : > { %v26790_v37 = vadd.f32 %v19695_v21, %v19694_v48 }
 0x4f1   : > { %v19497_v11 = vpop.f32.mrb[28].mxu1  ;;  %v13589_v29 = vadd.f32 %v26712_v33, %v13270_v7 }
 0x4f2   : > { %v19498_v6 = vpop.f32.mrb[29].mxu1 }
 0x4f3   : > { %v19499_v44 = vadd.f32 %v19498_v6, %v19497_v11  ;;  %v19500_v38 = vpop.f32.mrb[30].mxu1 }
 0x4f4   : > { %v19501_v47 = vpop.f32.mrb[31].mxu1  ;;  %v19697_v9 = vpop.f32.mrb[0].mxu0 }
 0x4f5   : > { %v13271_v17 = vadd.f32 %v19499_v44, %v13022_v19  ;;  %v19502_v36 = vadd.f32 %v19501_v47, %v19500_v38  ;;  %v19698_v2 = vpop.f32.mrb[1].mxu0 }
 0x4f6   : > { %v26793_v14 = vadd.f32 %v19698_v2, %v19697_v9  ;;  %v19700_v59 = vpop.f32.mrb[2].mxu0 }
 0x4f7   : > { %v13272_v39 = vadd.f32 %v19502_v36, %v13023_v8  ;;  %v19701_v4 = vpop.f32.mrb[3].mxu0  ;;  %v13590_v49 = vadd.f32 %v26717_v45, %v13271_v17 }
 0x4f8   : > { %v26796_v57 = vadd.f32 %v19701_v4, %v19700_v59  ;;  %v26813_v4 = vld [vmem:[%s27057_s4] ss:$0 sm:$0xff] }
 0x4f9   : > { %v19559_v10 = vpop.f32.mrb[32].mxu1  ;;  %v13591_v33 = vadd.f32 %v26722_v41, %v13272_v39 }
 0x4fa   : > { %v19560_v1 = vpop.f32.mrb[33].mxu1 }
 0x4fb   : > { %v19561_v16 = vadd.f32 %v19560_v1, %v19559_v10  ;;  %v19562_v15 = vpop.f32.mrb[34].mxu1 }
 0x4fc   : > { %v19563_v62 = vpop.f32.mrb[35].mxu1 }
 0x4fd   : > { %v13865_v12 = vadd.f32 %v19561_v16, %v13584_v51  ;;  %v19564_v19 = vadd.f32 %v19563_v62, %v19562_v15 }
 0x4ff   : > { %v13866_v13 = vadd.f32 %v19564_v19, %v13585_v0  ;;  %v14111_v3 = vadd.f32 %v26727_v60, %v13865_v12 }
 0x501   : > { %v19565_v63 = vpop.f32.mrb[36].mxu1  ;;  %v14112_v8 = vadd.f32 %v26732_v61, %v13866_v13 }
 0x502   : > { %v19566_v23 = vpop.f32.mrb[37].mxu1 }
 0x503   : > { %v19567_v42 = vadd.f32 %v19566_v23, %v19565_v63  ;;  %v19568_v45 = vpop.f32.mrb[38].mxu1 }
 0x504   : > { %v19569_v52 = vpop.f32.mrb[39].mxu1 }
 0x505   : > { %v13867_v34 = vadd.f32 %v19567_v42, %v13586_v53  ;;  %v19570_v55 = vadd.f32 %v19569_v52, %v19568_v45 }
 0x507   : > { %v13868_v5 = vadd.f32 %v19570_v55, %v13587_v26  ;;  %v14113_v41 = vadd.f32 %v26737_v30, %v13867_v34 }
 0x509   : > { %v19571_v25 = vpop.f32.mrb[40].mxu1  ;;  %v14114_v24 = vadd.f32 %v26748_v46, %v13868_v5 }
 0x50a   : > { %v19572_v51 = vpop.f32.mrb[41].mxu1 }
 0x50b   : > { %v19573_v18 = vadd.f32 %v19572_v51, %v19571_v25  ;;  %v19574_v0 = vpop.f32.mrb[42].mxu1  ;;  %v14635_v51 = vld [vmem:[#allocation4 + $0x40] sm:$0x3f] }
 0x50c   : > { %v19575_v28 = vpop.f32.mrb[43].mxu1 }
 0x50d   : > { %v13869_v60 = vadd.f32 %v19573_v18, %v13588_v56  ;;  %v19576_v48 = vadd.f32 %v19575_v28, %v19574_v0 }
 0x50f   : > { %v13870_v7 = vadd.f32 %v19576_v48, %v13589_v29  ;;  %v14115_v61 = vadd.f32 %v26756_v54, %v13869_v60 }
 0x511   : > { %v19577_v21 = vpop.f32.mrb[44].mxu1  ;;  %v14116_v11 = vadd.f32 %v26760_v22, %v13870_v7 }
 0x512   : > { %v19578_v53 = vpop.f32.mrb[45].mxu1 }
 0x513   : > { %v19579_v6 = vadd.f32 %v19578_v53, %v19577_v21  ;;  %v19580_v26 = vpop.f32.mrb[46].mxu1 }
 0x514   : > { %v19581_v44 = vpop.f32.mrb[47].mxu1 }
 0x515   : > { %v13871_v30 = vadd.f32 %v19579_v6, %v13590_v49  ;;  %v19582_v38 = vadd.f32 %v19581_v44, %v19580_v26 }
 0x517   : > { %v13872_v47 = vadd.f32 %v19582_v38, %v13591_v33  ;;  %v14117_v46 = vadd.f32 %v26764_v35, %v13871_v30 }
 0x519   : > { %v19639_v9 = vpop.f32.mrb[48].mxu1  ;;  %v26807_v17 = vadd.f32 %v26768_v43, %v13872_v47 }
 0x51a   : > { %v19640_v56 = vpop.f32.mrb[49].mxu1 }
 0x51b   : > { %v19641_v29 = vadd.f32 %v19640_v56, %v19639_v9  ;;  %v19642_v36 = vpop.f32.mrb[50].mxu1 }
 0x51c   : > { %v19643_v54 = vpop.f32.mrb[51].mxu1 }
 0x51d   : > { %v14361_v2 = vadd.f32 %v19641_v29, %v14111_v3  ;;  %v19644_v59 = vadd.f32 %v19643_v54, %v19642_v36 }
 0x51f   : > { %v14578_v22 = vadd.f32 %v26772_v32, %v14361_v2  ;;  %v14362_v39 = vadd.f32 %v19644_v59, %v14112_v8 }
 0x521   : > { %v14586_v35 = vadd.f32 %v26813_v4, %v14578_v22  ;;  %v14579_v49 = vadd.f32 %v26776_v50, %v14362_v39  ;;  %v19645_v43 = vpop.f32.mrb[52].mxu1 }
 0x522   : > { %v19646_v10 = vpop.f32.mrb[53].mxu1 }
 0x523   : > { %v14594_v33 = vmax.f32 %v14586_v35, 0.0  ;;  %v14587_v1 = vadd.f32 %v26813_v4, %v14579_v49  ;;  %v19647_v16 = vadd.f32 %v19646_v10, %v19645_v43  ;;  %v19648_v15 = vpop.f32.mrb[54].mxu1 }
 0x524   : > { %v19649_v62 = vpop.f32.mrb[55].mxu1 }
 0x525   : > { %14602 = vst [vmem:[#allocation4 + $0x48] sm:$0xff] %v14594_v33  ;;  %v14595_v32 = vmax.f32 %v14587_v1, 0.0  ;;  %v14363_v12 = vadd.f32 %v19647_v16, %v14113_v41  ;;  %v19650_v19 = vadd.f32 %v19649_v62, %v19648_v15 }
 0x527   : > { %14603 = vst [vmem:[#allocation4 + $0x50] sm:$0xff] %v14595_v32  ;;  %v14580_v13 = vadd.f32 %v26780_v31, %v14363_v12  ;;  %v14364_v3 = vadd.f32 %v19650_v19, %v14114_v24 }
 0x529   : > { %v14588_v63 = vadd.f32 %v26813_v4, %v14580_v13  ;;  %v14581_v50 = vadd.f32 %v26784_v20, %v14364_v3  ;;  %v19651_v8 = vpop.f32.mrb[56].mxu1 }
 0x52a   : > { %v19652_v23 = vpop.f32.mrb[57].mxu1 }
 0x52b   : > { %v14596_v42 = vmax.f32 %v14588_v63, 0.0  ;;  %v14589_v45 = vadd.f32 %v26813_v4, %v14581_v50  ;;  %v19653_v52 = vadd.f32 %v19652_v23, %v19651_v8  ;;  %v19654_v34 = vpop.f32.mrb[58].mxu1  ;;  %v21781_v50 = vld [vmem:[%s27058_s5 + $0x60] sm:$0xff]  }
 0x52c   : > { %v14636_v55 = vld [vmem:[#allocation4 + $0x46] sm:$0xff]  ;;  %v19655_v5 = vpop.f32.mrb[59].mxu1 }
 0x52d   : > { %v14638_v41 = vmax.f32 %v11131_v58, %v14636_v55  ;;  %14604 = vst [vmem:[#allocation4 + $0x58] sm:$0xff] %v14596_v42  ;;  %v14597_v25 = vmax.f32 %v14589_v45, 0.0  ;;  %v14365_v31 = vadd.f32 %v19653_v52, %v14115_v61  ;;  %v19656_v24 = vadd.f32 %v19655_v5, %v19654_v34  ;;  %v21782_v52 = vld [vmem:[%s27058_s5 + $0x68] sm:$0xff]  }
 0x52e   : > { %v14637_v18 = vld [vmem:[#allocation4 + $0x4e] sm:$0x3f] }
 0x52f   : > { %14640 = vst [vmem:[#allocation6] sm:$0xff] %v14638_v41  ;;  %v14639_v20 = vmax.f32 %v14635_v51, %v14637_v18  ;;  %14605 = vst [vmem:[#allocation4 + $0x60] sm:$0xff] %v14597_v25  ;;  %v14582_v0 = vadd.f32 %v26787_v27, %v14365_v31  ;;  %v14366_v28 = vadd.f32 %v19656_v24, %v14116_v11 }
 0x531   : > { %14641 = vst [vmem:[#allocation6 + $0x8] sm:$0x3f] %v14639_v20  ;;  %v14590_v60 = vadd.f32 %v26813_v4, %v14582_v0  ;;  %v14583_v48 = vadd.f32 %v26790_v37, %v14366_v28  ;;  %v19657_v7 = vpop.f32.mrb[60].mxu1  ;;  %v26841_v20 = vld [vmem:[#allocation4 + $0x88] sm:$0xff] }
 0x532   : > { %v19658_v40 = vpop.f32.mrb[61].mxu1 }
 0x533   : > { %v14598_v58 = vmax.f32 %v14590_v60, 0.0  ;;  %v14591_v21 = vadd.f32 %v26813_v4, %v14583_v48  ;;  %v19659_v61 = vadd.f32 %v19658_v40, %v19657_v7  ;;  %v19660_v53 = vpop.f32.mrb[62].mxu1 }
 0x534   : > { %v19661_v6 = vpop.f32.mrb[63].mxu1  ;;  %v14646_v39 = vld [vmem:[#allocation4 + $0x54] sm:$0xff] }
 0x535   : > { %14606 = vst [vmem:[#allocation4 + $0x68] sm:$0xff] %v14598_v58  ;;  %v14599_v26 = vmax.f32 %v14591_v21, 0.0  ;;  %v14367_v44 = vadd.f32 %v19659_v61, %v14117_v46  ;;  %v19662_v30 = vadd.f32 %v19661_v6, %v19660_v53  ;;  %v21783_v6 = vld [vmem:[%s27058_s5 + $0x70] sm:$0xff]  }
 0x536   : > { %v14772_v38 = vpop.f32.mrb[4].mxu0 }
 0x537   : > { %v14584_v27 = vadd.f32 %v26793_v14, %v14367_v44  ;;  %v14368_v11 = vadd.f32 %v19662_v30, %v26807_v17  ;;  %v20411_v29 = vpop.f32.mrb[5].mxu0  ;;  %v14647_v17 = vld [vmem:[#allocation4 + $0x5c] sm:$0x3f] }
 0x538   : > { %v14642_v47 = vld [vmem:[#allocation6] ss:$2 sm:$0x1f]  ;;  %v14643_v36 = vld [vmem:[#allocation6 + $0x1] ss:$2 sm:$0x1f] }
 0x539   : > { %v14592_v37 = vadd.f32 %v26813_v4, %v14584_v27  ;;  %v14585_v9 = vadd.f32 %v26796_v57, %v14368_v11  ;;  %v14723_v56 = vpop.f32.mrb[64].mxu1  ;;  %v14775_v59 = vpop.f32.mrb[6].mxu0  ;;  %v14644_v22 = vmax.f32 %v14642_v47, %v14643_v36  ;;  %v21784_v27 = vld [vmem:[%s27058_s5 + $0x78] sm:$0xff]  }
 0x53a   : > { %v14773_v54 = vadd.f32 %v14772_v38, %v14723_v56  ;;  %v20405_v2 = vpop.f32.mrb[65].mxu1  ;;  %v20412_v49 = vpop.f32.mrb[7].mxu0 }
 0x53b   : > { %v14600_v46 = vmax.f32 %v14592_v37, 0.0  ;;  %v14593_v35 = vadd.f32 %v26813_v4, %v14585_v9  ;;  %v14726_v14 = vpop.f32.mrb[66].mxu1  ;;  %14645 = vst [vmem:[#allocation5 + $0xa] sm:$0x1f] %v14644_v22  ;;  %v21785_v22 = vld [vmem:[%s27058_s5 + $0x80] sm:$0xff]   ;;  %v21786_v49 = vld [vmem:[%s27058_s5 + $0x88] sm:$0xff]  }
 0x53c   : > { %v14648_v43 = vld [vmem:[#allocation4 + $0x62] sm:$0xff]  ;;  %v14649_v10 = vld [vmem:[#allocation4 + $0x6a] sm:$0x3f]  ;;  %v20406_v33 = vpop.f32.mrb[67].mxu1 }
 0x53d   : > { %v14650_v1 = vmax.f32 %v14646_v39, %v14648_v43  ;;  %v14651_v57 = vmax.f32 %v14647_v17, %v14649_v10  ;;  %14608 = vst [vmem:[#allocation4 + $0x78] sm:$0xff] %v14600_v46  ;;  %v14601_v16 = vmax.f32 %v14593_v35, 0.0 }
 0x53e   : > { %v14883_v15 = vpop.f32.mrb[8].mxu0 }
 0x53f   : > { %14609 = vst [vmem:[#allocation4 + $0x80] sm:$0xff] %v14601_v16  ;;  %14652 = vst [vmem:[#allocation6] sm:$0xff] %v14650_v1  ;;  %v20423_v32 = vpop.f32.mrb[9].mxu0 }
 0x540   : > { %14653 = vst [vmem:[#allocation6 + $0x8] sm:$0x3f] %v14651_v57  ;;  %v14886_v4 = vpop.f32.mrb[10].mxu0 }
 0x541   : > { %v14827_v62 = vpop.f32.mrb[68].mxu1  ;;  %v20424_v3 = vpop.f32.mrb[11].mxu0 }
 0x542   : > { %v14833_v12 = vadd.f32 %v14827_v62, %v14773_v54  ;;  %v20417_v19 = vpop.f32.mrb[69].mxu1  ;;  %v15227_v63 = vld [vmem:[#allocation5 + $0xa] ss:$32 sm:$0x1] }
 0x543   : > { %v14830_v13 = vpop.f32.mrb[70].mxu1  ;;  %v15228_v23 = vpack.c.bf16 %v15227_v63, %v15227_v63  ;;  %v15283_v42 = vld [vmem:[#allocation5 + $0xb] ss:$32 sm:$0x1] }
 0x544   : > { %v20418_v8 = vpop.f32.mrb[71].mxu1  ;;  %v14889_v45 = vadd.f32 %v14883_v15, %v14833_v12  ;;  %v15284_v34 = vpack.c.bf16 %v15283_v42, %v15283_v42  ;;  %v14659_v55 = vld [vmem:[#allocation4 + $0x78] sm:$0x3f]  ;;  %v15451_v9 = vld [vmem:[#allocation5 + $0xe] ss:$32 sm:$0x1] }
 0x545   : > { %20464 = vmatmul.mubr.msk.bf16.vlgmr.msra.gmra.mrb[84].mxu1 %vm459_vm0, %v15228_v23  ;;  %v15339_v48 = vld [vmem:[#allocation5 + $0xc] ss:$32 sm:$0x1]  ;;  %v15395_v21 = vld [vmem:[#allocation5 + $0xd] ss:$32 sm:$0x1]  ;;  %v15452_v35 = vpack.c.bf16 %v15451_v9, %v15451_v9 }
 0x546   : > { %v14660_v5 = vld [vmem:[#allocation4 + $0x7e] sm:$0xff]  ;;  %v14661_v41 = vld [vmem:[#allocation4 + $0x86] sm:$0x3f]  ;;  %20470 = vmatmul.mubr.msk.bf16.vlgmr.msra.gmra.mrb[24].mxu0 %vm459_vm0, %v15284_v34  ;;  %20474 = vmatpush3.bf16.msra.mxu1 %v21781_v50  ;;  %v14995_v18 = vpop.f32.mrb[12].mxu0  ;;  %v15340_v44 = vpack.c.bf16 %v15339_v48, %v15339_v48  ;;  %v15396_v11 = vpack.c.bf16 %v15395_v21, %v15395_v21  ;;  %v21794_v21 = vld [vmem:[%s27060_s7] sm:$0xff]  }
 0x547   : > { %v14662_v25 = vmax.f32 %v14599_v26, %v14660_v5  ;;  %v14663_v31 = vmax.f32 %v14659_v55, %v14661_v41  ;;  %v14654_v24 = vld [vmem:[#allocation6] ss:$2 sm:$0x1f]  ;;  %v14655_v51 = vld [vmem:[#allocation6 + $0x1] ss:$2 sm:$0x1f]  ;;  %20480 = vmatpush3.bf16.msra.mxu0 %v21782_v52  ;;  %20475 = vmatprep.mubr.msk.bf16.mxu1 %vm21908_vm3, %v26841_v20 }
 0x548   : > { %v14656_v0 = vmax.f32 %v14654_v24, %v14655_v51  ;;  %v20435_v60 = vpop.f32.mrb[13].mxu0  ;;  %20481 = vmatprep.mubr.msk.bf16.mxu0 %vm21908_vm3, %v26841_v20  ;;  %20485 = vmatprep.subr.bf16.mxu1 %v26841_v20  ;;  %v21787_v13 = vld [vmem:[%s27058_s5 + $0x90] sm:$0xff]   ;;  %v21788_v50 = vld [vmem:[%s27058_s5 + $0x98] sm:$0xff]   ;;  %v21789_v52 = vld [vmem:[%s27058_s5 + $0xa0] sm:$0xff]  }
 0x549   : > { %v14939_v28 = vpop.f32.mrb[72].mxu1  ;;  %14664 = vst [vmem:[#allocation6] sm:$0xff] %v14662_v25  ;;  %14665 = vst [vmem:[#allocation6 + $0x8] sm:$0x3f] %v14663_v31  ;;  %v14998_v58 = vpop.f32.mrb[14].mxu0  ;;  %20491 = vmatprep.subr.bf16.mxu0 %v26841_v20  ;;  %v21790_v55 = vld [vmem:[%s27058_s5 + $0xa8] sm:$0xff]  }
 0x54a   : > { %v14945_v7 = vadd.f32 %v14939_v28, %v14889_v45  ;;  %v20429_v40 = vpop.f32.mrb[73].mxu1  ;;  %14657 = vst [vmem:[#allocation5 + $0xf] sm:$0x1f] %v14656_v0  ;;  %v20436_v53 = vpop.f32.mrb[15].mxu0  ;;  %v21791_v31 = vld [vmem:[%s27058_s5 + $0xb0] sm:$0xff]   ;;  %v21792_v51 = vld [vmem:[%s27058_s5 + $0xb8] sm:$0xff]  }
 0x54b   : > { %v14942_v61 = vpop.f32.mrb[74].mxu1  ;;  %v21793_v60 = vld [vmem:[%s27058_s5 + $0xc0] sm:$0xff]   ;;  %v21796_v53 = vld [vmem:[%s27060_s7 + $0x10] sm:$0xff]  }
 0x54c   : > { %v20430_v26 = vpop.f32.mrb[75].mxu1  ;;  %v15001_v30 = vadd.f32 %v14995_v18, %v14945_v7  ;;  %v21795_v61 = vld [vmem:[%s27060_s7 + $0x8] sm:$0xff]   ;;  %v21806_v9 = vld [vmem:[%s27062_s9 + $0x20] sm:$0xff]  }
 0x54d   : > { %20476 = vmatmul.mubr.msk.bf16.vlgmr.msra.gmra.mrb[88].mxu1 %vm459_vm0, %v15340_v44  ;;  %v21798_v26 = vld [vmem:[%s27060_s7 + $0x20] sm:$0xff]   ;;  %v21799_v44 = vld [vmem:[%s27060_s7 + $0x28] sm:$0xff]  }
 0x54e   : > { %20482 = vmatmul.mubr.msk.bf16.vlgmr.msra.gmra.mrb[28].mxu0 %vm459_vm0, %v15396_v11  ;;  %20486 = vmatpush3.bf16.msra.mxu1 %v21783_v6  ;;  %v15107_v38 = vpop.f32.mrb[16].mxu0  ;;  %v21797_v6 = vld [vmem:[%s27060_s7 + $0x18] sm:$0xff]   ;;  %v21802_v11 = vld [vmem:[%s27062_s9] sm:$0xff]  }
 0x54f   : > { %20492 = vmatpush3.bf16.msra.mxu0 %v21784_v27  ;;  %20487 = vmatprep.mubr.msk.bf16.mxu1 %vm21908_vm3, %v26841_v20  ;;  %v20447_v37 = vpop.f32.mrb[17].mxu0  ;;  %v21801_v27 = vld [vmem:[%s27060_s7 + $0x38] sm:$0xff]  }
 0x550   : > { %20493 = vmatprep.mubr.msk.bf16.mxu0 %vm21908_vm3, %v26841_v20  ;;  %20497 = vmatprep.subr.bf16.mxu1 %v26841_v20  ;;  %v15110_v36 = vpop.f32.mrb[18].mxu0  ;;  %v14666_v39 = vld [vmem:[#allocation6] ss:$2 sm:$0x1f]  ;;  %v21805_v37 = vld [vmem:[%s27062_s9 + $0x18] sm:$0xff]  }
 0x551   : > { %v15051_v47 = vpop.f32.mrb[76].mxu1  ;;  %v15507_v54 = vld [vmem:[#allocation5 + $0xf] ss:$32 sm:$0x1]  ;;  %20503 = vmatprep.subr.bf16.mxu0 %v26841_v20  ;;  %v20448_v59 = vpop.f32.mrb[19].mxu0 }
 0x552   : > { %v15057_v56 = vadd.f32 %v15051_v47, %v15001_v30  ;;  %v20441_v29 = vpop.f32.mrb[77].mxu1  ;;  %v15508_v17 = vpack.c.bf16 %v15507_v54, %v15507_v54  ;;  %v14667_v43 = vld [vmem:[#allocation6 + $0x1] ss:$2 sm:$0x1f]  ;;  %v21800_v30 = vld [vmem:[%s27060_s7 + $0x30] sm:$0xff]  }
 0x553   : > { %v15054_v2 = vpop.f32.mrb[78].mxu1  ;;  %v14668_v10 = vmax.f32 %v14666_v39, %v14667_v43  ;;  %v15563_v16 = vld [vmem:[#allocation5 + $0x10] ss:$32 sm:$0x1] }
 0x554   : > { %v20442_v46 = vpop.f32.mrb[79].mxu1  ;;  %v15113_v14 = vadd.f32 %v15107_v38, %v15057_v56  ;;  %v15619_v12 = vld [vmem:[#allocation5 + $0x11] ss:$32 sm:$0x1]  ;;  %v15564_v63 = vpack.c.bf16 %v15563_v16, %v15563_v16  ;;  %v21803_v38 = vld [vmem:[%s27062_s9 + $0x8] sm:$0xff]  }
 0x555   : > { %20488 = vmatmul.mubr.msk.bf16.vlgmr.msra.gmra.mrb[92].mxu1 %vm459_vm0, %v15452_v35  ;;  %14669 = vst [vmem:[#allocation5 + $0x14] sm:$0x1f] %v14668_v10  ;;  %v15620_v23 = vpack.c.bf16 %v15619_v12, %v15619_v12  ;;  %v15675_v42 = vld [vmem:[#allocation5 + $0x12] ss:$32 sm:$0x1]  ;;  %v21807_v56 = vld [vmem:[%s27062_s9 + $0x28] sm:$0xff]  }
 0x556   : > { %20494 = vmatmul.mubr.msk.bf16.vlgmr.msra.gmra.mrb[32].mxu0 %vm459_vm0, %v15508_v17  ;;  %20498 = vmatpush3.bf16.msra.mxu1 %v21785_v22  ;;  %v15219_v33 = vpop.f32.mrb[20].mxu0  ;;  %v15731_v45 = vld [vmem:[#allocation5 + $0x13] ss:$32 sm:$0x1]  ;;  %v15676_v34 = vpack.c.bf16 %v15675_v42, %v15675_v42 }
 0x557   : > { %20504 = vmatpush3.bf16.msra.mxu0 %v21786_v49  ;;  %20499 = vmatprep.mubr.msk.bf16.mxu1 %vm21908_vm3, %v26841_v20  ;;  %v20459_v57 = vpop.f32.mrb[21].mxu0  ;;  %v15732_v5 = vpack.c.bf16 %v15731_v45, %v15731_v45  ;;  %v21804_v47 = vld [vmem:[%s27062_s9 + $0x10] sm:$0xff]  }
 0x558   : > { %20505 = vmatprep.mubr.msk.bf16.mxu0 %vm21908_vm3, %v26841_v20  ;;  %20509 = vmatprep.subr.bf16.mxu1 %v26841_v20  ;;  %v15222_v32 = vpop.f32.mrb[22].mxu0 }
 0x559   : > { %v15163_v1 = vpop.f32.mrb[80].mxu1  ;;  %20515 = vmatprep.subr.bf16.mxu0 %v26841_v20  ;;  %v20460_v4 = vpop.f32.mrb[23].mxu0 }
 0x55a   : > { %v15169_v15 = vadd.f32 %v15163_v1, %v15113_v14  ;;  %v20453_v62 = vpop.f32.mrb[81].mxu1 }
 0x55b   : > { %v15166_v19 = vpop.f32.mrb[82].mxu1 }
 0x55c   : > { %v20454_v3 = vpop.f32.mrb[83].mxu1  ;;  %v26883_v8 = vadd.f32 %v15219_v33, %v15169_v15  ;;  %v15787_v41 = vld [vmem:[#allocation5 + $0x14] ss:$32 sm:$0x1] }
 0x55d   : > { %20500 = vmatmul.mubr.msk.bf16.vlgmr.msra.gmra.mrb[96].mxu1 %vm459_vm0, %v15564_v63  ;;  %v15843_v25 = vld [vmem:[#allocation5 + $0x15] ss:$32 sm:$0x1]  ;;  %v15788_v24 = vpack.c.bf16 %v15787_v41, %v15787_v41  ;;  %v15899_v0 = vld [vmem:[#allocation5 + $0x16] ss:$32 sm:$0x1] }
 0x55e   : > { %20506 = vmatmul.mubr.msk.bf16.vlgmr.msra.gmra.mrb[36].mxu0 %vm459_vm0, %v15620_v23  ;;  %20510 = vmatpush3.bf16.msra.mxu1 %v21787_v13  ;;  %v15844_v18 = vpack.c.bf16 %v15843_v25, %v15843_v25  ;;  %v15955_v28 = vld [vmem:[#allocation5 + $0x17] ss:$32 sm:$0x1]  ;;  %v15900_v48 = vpack.c.bf16 %v15899_v0, %v15899_v0  ;;  %v16011_v40 = vld [vmem:[#allocation5 + $0x18] ss:$32 sm:$0x1] }
 0x55f   : > { %20516 = vmatpush3.bf16.msra.mxu0 %v21788_v50  ;;  %20511 = vmatprep.mubr.msk.bf16.mxu1 %vm21908_vm3, %v26841_v20  ;;  %v15956_v7 = vpack.c.bf16 %v15955_v28, %v15955_v28  ;;  %v16012_v58 = vpack.c.bf16 %v16011_v40, %v16011_v40 }
 0x560   : > { %20517 = vmatprep.mubr.msk.bf16.mxu0 %vm21908_vm3, %v26841_v20  ;;  %20521 = vmatprep.subr.bf16.mxu1 %v26841_v20 }
 0x561   : > { %20527 = vmatprep.subr.bf16.mxu0 %v26841_v20 }
 0x565   : > { %20512 = vmatmul.mubr.msk.bf16.vlgmr.msra.gmra.mrb[100].mxu1 %vm459_vm0, %v15676_v34 }
 0x566   : > { %20518 = vmatmul.mubr.msk.bf16.vlgmr.msra.gmra.mrb[40].mxu0 %vm459_vm0, %v15732_v5  ;;  %20522 = vmatpush3.bf16.msra.mxu1 %v21789_v52 }
 0x567   : > { %20528 = vmatpush3.bf16.msra.mxu0 %v21790_v55  ;;  %20523 = vmatprep.mubr.msk.bf16.mxu1 %vm21908_vm3, %v26841_v20 }
 0x568   : > { %20529 = vmatprep.mubr.msk.bf16.mxu0 %vm21908_vm3, %v26841_v20  ;;  %20533 = vmatprep.subr.bf16.mxu1 %v26841_v20 }
 0x569   : > { %20539 = vmatprep.subr.bf16.mxu0 %v26841_v20 }
 0x56d   : > { %20524 = vmatmul.mubr.msk.bf16.vlgmr.msra.gmra.mrb[104].mxu1 %vm459_vm0, %v15788_v24 }
 0x56e   : > { %20530 = vmatmul.mubr.msk.bf16.vlgmr.msra.gmra.mrb[44].mxu0 %vm459_vm0, %v15844_v18  ;;  %20534 = vmatpush3.bf16.msra.mxu1 %v21791_v31 }
 0x56f   : > { %20540 = vmatpush3.bf16.msra.mxu0 %v21792_v51  ;;  %20535 = vmatprep.mubr.msk.bf16.mxu1 %vm21908_vm3, %v26841_v20 }
 0x570   : > { %20541 = vmatprep.mubr.msk.bf16.mxu0 %vm21908_vm3, %v26841_v20  ;;  %20545 = vmatprep.subr.bf16.mxu1 %v26841_v20 }
 0x571   : > { %20551 = vmatprep.subr.bf16.mxu0 %v26841_v20 }
 0x575   : > { %20536 = vmatmul.mubr.msk.bf16.vlgmr.msra.gmra.mrb[108].mxu1 %vm459_vm0, %v15900_v48 }
 0x576   : > { %20542 = vmatmul.mubr.msk.bf16.vlgmr.msra.gmra.mrb[48].mxu0 %vm459_vm0, %v15956_v7  ;;  %20546 = vmatpush3.bf16.msra.mxu1 %v21793_v60 }
 0x577   : > { %20547 = vmatprep.mubr.msk.bf16.mxu1 %vm21908_vm3, %v26841_v20  ;;  %20567 = vmatprep.mubr.msk.bf16.mxu0 %vm21908_vm3, %v26841_v20 }
 0x578   : > { %20571 = vmatprep.subr.bf16.mxu1 %v26841_v20  ;;  %20552 = vmatpush3.bf16.msra.mxu0 %v21794_v21 }
 0x579   : > { %20553 = vmatprep.subr.bf16.mxu0 %v26841_v20 }
 0x57c   : > { %20554 = vmatpush3.bf16.msra.mxu0 %v21795_v61 }
 0x57d   : > { %20548 = vmatmul.mubr.msk.bf16.vlgmr.msra.gmra.mrb[112].mxu1 %vm459_vm0, %v16012_v58  ;;  %20555 = vmatprep.subr.bf16.mxu0 %v26841_v20 }
 0x57e   : > { %20587 = vmatprep.mubr.msk.bf16.mxu1 %vm21908_vm3, %v26841_v20  ;;  %20572 = vmatpush3.bf16.msra.mxu1 %v21802_v11 }
 0x57f   : > { %20573 = vmatprep.subr.bf16.mxu1 %v26841_v20 }
 0x580   : > { %20556 = vmatpush3.bf16.msra.mxu0 %v21796_v53 }
 0x581   : > { %20557 = vmatprep.subr.bf16.mxu0 %v26841_v20 }
 0x582   : > { %20574 = vmatpush3.bf16.msra.mxu1 %v21803_v38 }
 0x583   : > { %20575 = vmatprep.subr.bf16.mxu1 %v26841_v20 }
 0x584   : > { %20558 = vmatpush3.bf16.msra.mxu0 %v21797_v6 }
 0x585   : > { %20559 = vmatprep.subr.bf16.mxu0 %v26841_v20 }
 0x586   : > { %20576 = vmatpush3.bf16.msra.mxu1 %v21804_v47 }
 0x587   : > { %20577 = vmatprep.subr.bf16.mxu1 %v26841_v20 }
 0x588   : > { %20560 = vmatpush3.bf16.msra.mxu0 %v21798_v26 }
 0x589   : > { %20561 = vmatprep.subr.bf16.mxu0 %v26841_v20 }
 0x58a   : > { %20578 = vmatpush3.bf16.msra.mxu1 %v21805_v37 }
 0x58b   : > { %20579 = vmatprep.subr.bf16.mxu1 %v26841_v20 }
 0x58c   : > { %20562 = vmatpush3.bf16.msra.mxu0 %v21799_v44 }
 0x58d   : > { %20563 = vmatprep.subr.bf16.mxu0 %v26841_v20 }
 0x58e   : > { %20580 = vmatpush3.bf16.msra.mxu1 %v21806_v9 }
 0x58f   : > { %20581 = vmatprep.subr.bf16.mxu1 %v26841_v20 }
 0x590   : > { %20564 = vmatpush3.bf16.msra.mxu0 %v21800_v30 }
 0x591   : > { %20565 = vmatprep.subr.bf16.mxu0 %v26841_v20 }
 0x592   : > { %20582 = vmatpush3.bf16.msra.mxu1 %v21807_v56 }
 0x593   : > { %20583 = vmatprep.subr.bf16.mxu1 %v26841_v20 }
 0x594   : > { %20566 = vmatpush3.bf16.msra.mxu0 %v21801_v27 }
 0x618   : > { %v15275_v29 = vpop.f32.mrb[84].mxu1 }
 0x619   : > { %v15281_v36 = vadd.f32 %v15275_v29, %v26883_v8  ;;  %v15331_v54 = vpop.f32.mrb[24].mxu0  ;;  %v20465_v2 = vpop.f32.mrb[85].mxu1 }
 0x61a   : > { %v20471_v59 = vpop.f32.mrb[25].mxu0  ;;  %v15278_v22 = vpop.f32.mrb[86].mxu1 }
 0x61b   : > { %v15337_v39 = vadd.f32 %v15331_v54, %v15281_v36  ;;  %v15334_v46 = vpop.f32.mrb[26].mxu0  ;;  %v20466_v35 = vpop.f32.mrb[87].mxu1 }
 0x61c   : > { %v20472_v14 = vpop.f32.mrb[27].mxu0  ;;  %v16066_v35 = vld [vmem:[%s27059_s6] sm:$0x1] }
 0x620   : > { %v15387_v49 = vpop.f32.mrb[88].mxu1 }
 0x621   : > { %v15393_v17 = vadd.f32 %v15387_v49, %v15337_v39  ;;  %v15443_v43 = vpop.f32.mrb[28].mxu0  ;;  %v20477_v10 = vpop.f32.mrb[89].mxu1 }
 0x622   : > { %v20483_v33 = vpop.f32.mrb[29].mxu0  ;;  %v15390_v1 = vpop.f32.mrb[90].mxu1 }
 0x623   : > { %v15449_v57 = vadd.f32 %v15443_v43, %v15393_v17  ;;  %v15446_v16 = vpop.f32.mrb[30].mxu0  ;;  %v20478_v15 = vpop.f32.mrb[91].mxu1 }
 0x624   : > { %v20484_v62 = vpop.f32.mrb[31].mxu0  ;;  %v21809_v16 = vld [vmem:[%s27062_s9 + $0x38] sm:$0xff]   ;;  %v16086_v15 = vld [vmem:[%s27061_s8] sm:$0x1] }
 0x628   : > { %v15499_v32 = vpop.f32.mrb[92].mxu1 }
 0x629   : > { %v15505_v12 = vadd.f32 %v15499_v32, %v15449_v57  ;;  %v15555_v19 = vpop.f32.mrb[32].mxu0  ;;  %v20489_v4 = vpop.f32.mrb[93].mxu1  ;;  %v21808_v57 = vld [vmem:[%s27062_s9 + $0x30] sm:$0xff]  }
 0x62a   : > { %v20495_v13 = vpop.f32.mrb[33].mxu0  ;;  %v15502_v3 = vpop.f32.mrb[94].mxu1  ;;  %20584 = vmatpush3.bf16.msra.mxu1 %v21808_v57 }
 0x62b   : > { %v15561_v63 = vadd.f32 %v15555_v19, %v15505_v12  ;;  %v15558_v50 = vpop.f32.mrb[34].mxu0  ;;  %v20490_v8 = vpop.f32.mrb[95].mxu1  ;;  %20585 = vmatprep.subr.bf16.mxu1 %v26841_v20 }
 0x62c   : > { %v20496_v23 = vpop.f32.mrb[35].mxu0 }
 0x62e   : > { %20586 = vmatpush3.bf16.msra.mxu1 %v21809_v16 }
 0x630   : > { %v15611_v42 = vpop.f32.mrb[96].mxu1 }
 0x631   : > { %v15617_v45 = vadd.f32 %v15611_v42, %v15561_v63  ;;  %v15667_v52 = vpop.f32.mrb[36].mxu0  ;;  %v20501_v34 = vpop.f32.mrb[97].mxu1  ;;  %v16193_v63 = vld [vmem:[%s27063_s10] sm:$0x1] }
 0x632   : > { %v20507_v55 = vpop.f32.mrb[37].mxu0  ;;  %v15614_v5 = vpop.f32.mrb[98].mxu1 }
 0x633   : > { %v15673_v41 = vadd.f32 %v15667_v52, %v15617_v45  ;;  %v15670_v25 = vpop.f32.mrb[38].mxu0  ;;  %v20502_v31 = vpop.f32.mrb[99].mxu1 }
 0x634   : > { %v20508_v24 = vpop.f32.mrb[39].mxu0 }
 0x638   : > { %v15723_v51 = vpop.f32.mrb[100].mxu1 }
 0x639   : > { %v15729_v18 = vadd.f32 %v15723_v51, %v15673_v41  ;;  %v15779_v0 = vpop.f32.mrb[40].mxu0  ;;  %v20513_v28 = vpop.f32.mrb[101].mxu1 }
 0x63a   : > { %v20519_v60 = vpop.f32.mrb[41].mxu0  ;;  %v15726_v48 = vpop.f32.mrb[102].mxu1 }
 0x63b   : > { %v15785_v7 = vadd.f32 %v15779_v0, %v15729_v18  ;;  %v15782_v40 = vpop.f32.mrb[42].mxu0  ;;  %v20514_v58 = vpop.f32.mrb[103].mxu1 }
 0x63c   : > { %v20520_v21 = vpop.f32.mrb[43].mxu0 }
 0x640   : > { %v15835_v61 = vpop.f32.mrb[104].mxu1 }
 0x641   : > { %v15841_v53 = vadd.f32 %v15835_v61, %v15785_v7  ;;  %v15891_v6 = vpop.f32.mrb[44].mxu0  ;;  %v20525_v26 = vpop.f32.mrb[105].mxu1 }
 0x642   : > { %v20531_v44 = vpop.f32.mrb[45].mxu0  ;;  %v15838_v30 = vpop.f32.mrb[106].mxu1 }
 0x643   : > { %v15897_v27 = vadd.f32 %v15891_v6, %v15841_v53  ;;  %v15894_v11 = vpop.f32.mrb[46].mxu0  ;;  %v20526_v38 = vpop.f32.mrb[107].mxu1 }
 0x644   : > { %v20532_v47 = vpop.f32.mrb[47].mxu0 }
 0x648   : > { %v15947_v37 = vpop.f32.mrb[108].mxu1 }
 0x649   : > { %v15953_v9 = vadd.f32 %v15947_v37, %v15897_v27  ;;  %v16003_v56 = vpop.f32.mrb[48].mxu0  ;;  %v20537_v29 = vpop.f32.mrb[109].mxu1 }
 0x64a   : > { %v20543_v36 = vpop.f32.mrb[49].mxu0  ;;  %v15950_v54 = vpop.f32.mrb[110].mxu1 }
 0x64b   : > { %v16009_v2 = vadd.f32 %v16003_v56, %v15953_v9  ;;  %v16006_v59 = vpop.f32.mrb[50].mxu0  ;;  %v20538_v22 = vpop.f32.mrb[111].mxu1 }
 0x64c   : > { %v20544_v39 = vpop.f32.mrb[51].mxu0 }
 0x650   : > { %v16059_v46 = vpop.f32.mrb[112].mxu1 }
 0x651   : > { %v16065_v14 = vadd.f32 %v16059_v46, %v16009_v2  ;;  %v20549_v49 = vpop.f32.mrb[113].mxu1 }
 0x652   : > { %v16062_v17 = vpop.f32.mrb[114].mxu1 }
 0x653   : > { %v16067_v43 = vadd.f32 %v16066_v35, %v16065_v14  ;;  %v20550_v10 = vpop.f32.mrb[115].mxu1 }
 0x655   : > { %v16068_v33 = vmax.f32 %v16067_v43, 0.0 }
 0x657   : > { %v16069_v1 = vpack.c.bf16 %v16068_v33, %v16068_v33 }
 0x659   : > { %20568 = vmatmul.mubr.bf16.vlgmr.msra.gmra.mrb[52].mxu0 %v16069_v1 }
 0x72c   : > { %v16169_v62 = vpop.f32.mrb[52].mxu0 }
 0x72d   : > { %v16170_v32 = vadd.f32 %v16169_v62, %v16086_v15  ;;  %v20569_v12 = vpop.f32.mrb[53].mxu0 }
 0x72e   : > { %v16172_v19 = vpop.f32.mrb[54].mxu0 }
 0x72f   : > { %v16175_v4 = vmax.f32 %v16170_v32, 0.0  ;;  %v20570_v13 = vpop.f32.mrb[55].mxu0 }
 0x731   : > { %v16176_v3 = vpack.c.bf16 %v16175_v4, %v16175_v4 }
 0x733   : > { %20588 = vmatmul.mubr.bf16.vlgmr.msra.gmra.mrb[116].mxu1 %v16176_v3 }
 0x806   : > { %v16276_v20 = vpop.f32.mrb[116].mxu1 }
 0x807   : > { %v16277_v50 = vadd.f32 %v16276_v20, %v16193_v63  ;;  %v20589_v8 = vpop.f32.mrb[117].mxu1 }
 0x808   : > { %v16279_v23 = vpop.f32.mrb[118].mxu1 }
 0x809   : > { %16282 = vst [vmem:[%s378_s29] sm:$0x1] %v16277_v50  ;;  %v20590_v42 = vpop.f32.mrb[119].mxu1 }
 0x80a   : > { %21856 = shalt.err (!%p21853_p3)
}
 0x80b   : > { %s21857_s16 = scalar_lea.hbm %s27011_s15, 16  ;;  %s21861_s13 = scalar_lea.hbm %s27064_s11, 32 }
 0x80c   : > { %p21858_p4 = scmp.ne.s32.totalorder %s27011_s15, %s21857_s16  ;;  %p21862_p9 = scmp.lt.u32.totalorder %s27011_s15, %s27064_s11 }
 0x80d   : > { %p21863_p10 = scmp.lt.u32.totalorder %s21861_s13, %s21857_s16  ;;  %p21865_p12 = scmp.lt.u32.totalorder %s21857_s16, %s27011_s15 }
 0x80e   : > { %p21859_p7 = pnand %p21858_p4, %p22008_p5 }
 0x80f   : > { %p21864_p11 = por %p21863_p10, %p21862_p9 }
 0x810   : > { %p21860_p8 = pneg %p21859_p7 }
 0x811   : > { %p21866_p13 = por %p21865_p12, %p21864_p11 }
 0x813   : > { %p21867_p0 = pnand %p21866_p13, %p21860_p8 }
 0x815   : > { %21870 = shalt.err (!%p21867_p0)
}
 0x816   : > { %21039 = dma.vmem_to_hbm [thread:$0]  (%p22008_p5), %s27013_s30, 16, %s27011_s15, %s16284_s14  }
 0x817 PF: > { %p21045_p1 = scmp.ge.s32.totalorder %s21905_s20, 2  ;;  %s16308_s21 = sand.u32 1, %s21893_s17  }
 0x818   : > { %s16309_s12 = scalar_lea.sflag [#allocation8], %s16308_s21 }
 0x819   : > { %p21042_p2 = pnand %p21045_p1, %p22012_p6 }
 0x81b   : > { %21888 = dma.done.wait (!%p21042_p2), %s16309_s12, 16  }
 0x81c   : > { %21890 = vsyncadd (!%p21042_p2), %s16309_s12, 4294967280  ;;  %p21_p3 = scmp.ge.s32.totalorder %s21995_s23, 4   ;;  %s27435_s17 = smov %s21897_s18 }
 0x81d   : > { %s27436_s18 = smov %s21901_s19  ;;  %s27437_s19 = smov %s22006_s26 }
 0x81e   : > { %s27438_s20 = smov %s21995_s23  ;;  %23 = sbr.rel (!%p21_p3) target bundleno = 3 (0x3), region = 166 }
 0x825   :  { %16313 = vsyncpa [#allocation8], 1 }
 0x826   :  { %16315 = vsyncpa [#allocation8 + $0x1], 1 }

</bundles_post_ra>
